<compile_context>
chip_gen: v6e
topology: v6e:2x2x1
jax: 0.10.0
libtpu: 0.0.40
codegen_flags: <defaults>
</compile_context>

<pallas_src>
import jax
import jax.numpy as jnp
from jax import lax
from jax.experimental import pallas as pl
from jax.experimental.pallas import tpu as pltpu

_LANE = 128


def _round_up(x, m):
    return (x + m - 1) // m * m


def _double_conv_kernel(x_ref, w1_ref, s1_ref, b1_ref, w2_ref, s2_ref, b2_ref,
                        o_ref, xp_ref, mp_ref):
    """One block of `nb` images per grid step (channels already lane-padded).

    x_ref  : (nb, H, W, Cin_p)           bf16 input (no spatial padding)
    w1_ref : (9*Cin_p, Cmid_p)           bf16 conv1 weights, row = tap*Cin_p + c  (tap = dy*3+dx)
    s1/b1  : (1, Cmid_p)                 f32 folded BN1 scale / bias
    w2_ref : (9*Cmid_p, Cout_p)          bf16 conv2 weights
    s2/b2  : (1, Cout_p)                 f32 folded BN2 scale / bias
    o_ref  : (nb, H, W, Cout_p)          f32 output
    xp_ref : VMEM (nb, H+2, W+2, Cin_p)  bf16 scratch (spatially padded input)
    mp_ref : VMEM (nb, H+2, W+2, Cmid_p) bf16 scratch (spatially padded intermediate)
    """
    nb, H, W, _ = x_ref.shape
    cmid = w1_ref.shape[1]
    cout = w2_ref.shape[1]

    def zero_halo(ref):
        # Only the 1-pixel halo ring needs zeros; the interior is fully rewritten each step.
        n, hp, wp, c = ref.shape
        zrow = jnp.zeros((n, 1, wp, c), ref.dtype)
        ref[:, 0:1, :, :] = zrow
        ref[:, hp - 1:hp, :, :] = zrow
        zcol = jnp.zeros((n, hp, 1, c), ref.dtype)
        ref[:, :, 0:1, :] = zcol
        ref[:, :, wp - 1:wp, :] = zcol

    def conv3x3(pad_ref, w_ref):
        # Fold the 9 taps into the contraction dim: one (nb*H*W, 9*C) @ (9*C, Cn) MXU matmul.
        c = pad_ref.shape[-1]
        taps = [pad_ref[:, dy:dy + H, dx:dx + W, :].reshape(nb * H * W, c)
                for dy in range(3) for dx in range(3)]          # tap index = dy*3 + dx
        patches = jnp.concatenate(taps, axis=-1)                # (nb*H*W, 9*C), lane-dense
        return jnp.dot(patches, w_ref[...],
                       preferred_element_type=jnp.float32)      # f32 accumulation on the MXU

    # ---- conv1 (3x3, pad=1, no bias) + BN1 + ReLU ----
    zero_halo(xp_ref)
    xp_ref[:, 1:H + 1, 1:W + 1, :] = x_ref[...]
    acc1 = conv3x3(xp_ref, w1_ref)                              # (nb*H*W, Cmid_p) f32
    y = jnp.maximum(acc1 * s1_ref[...] + b1_ref[...], 0.0)

    # ---- conv2 (3x3, pad=1, no bias) + BN2 + ReLU ----
    zero_halo(mp_ref)
    mp_ref[:, 1:H + 1, 1:W + 1, :] = y.astype(mp_ref.dtype).reshape(nb, H, W, cmid)
    acc2 = conv3x3(mp_ref, w2_ref)                              # (nb*H*W, Cout_p) f32
    z = jnp.maximum(acc2 * s2_ref[...] + b2_ref[...], 0.0)

    o_ref[...] = z.reshape(nb, H, W, cout).astype(o_ref.dtype)  # lane-dense (Cout_p) store


def double_conv_pallas(x_nchw, w1_oihw, bn1, w2_oihw, bn2, eps=1e-5, images_per_step=1):
    """x_nchw: (N, Cin, H, W). Weights in PyTorch OIHW layout. bn = (gamma, beta, mean, var)."""
    N, Cin, H, W = x_nchw.shape
    Cmid = w1_oihw.shape[0]
    Cout = w2_oihw.shape[0]
    nb = images_per_step
    assert N % nb == 0, "images_per_step must divide N"

    cin_p = _round_up(Cin, _LANE)
    cmid_p = _round_up(Cmid, _LANE)
    cout_p = _round_up(Cout, _LANE)

    # --- glue: layout conversion + parameter folding / lane padding (plain JAX, one-time) ---
    # NCHW -> NHWC, bf16, channels zero-padded to the 128-lane width. No spatial padding here.
    x = jnp.transpose(x_nchw, (0, 2, 3, 1)).astype(jnp.bfloat16)
    x = jnp.pad(x, ((0, 0), (0, 0), (0, 0), (0, cin_p - Cin)))

    def fold_bn(gamma, beta, mean, var, cpad):
        scale = (gamma / jnp.sqrt(var + eps)).astype(jnp.float32)
        bias = (beta - mean * scale).astype(jnp.float32)
        scale = jnp.pad(scale, (0, cpad - scale.shape[0])).reshape(1, cpad)
        bias = jnp.pad(bias, (0, cpad - bias.shape[0])).reshape(1, cpad)
        return scale, bias

    s1, b1 = fold_bn(*bn1, cmid_p)
    s2, b2 = fold_bn(*bn2, cout_p)

    def prep_w(w_oihw, ci_p, co_p):
        co, ci, _, _ = w_oihw.shape
        w = jnp.transpose(w_oihw, (2, 3, 1, 0))                       # (3, 3, ci, co)
        w = jnp.pad(w, ((0, 0), (0, 0), (0, ci_p - ci), (0, co_p - co)))
        return w.reshape(9 * ci_p, co_p).astype(jnp.bfloat16)         # row = tap*ci_p + c

    w1 = prep_w(w1_oihw, cin_p, cmid_p)
    w2 = prep_w(w2_oihw, cmid_p, cout_p)

    flops = 2 * N * H * W * 9 * (cin_p * cmid_p + cmid_p * cout_p)
    bytes_accessed = (int(x.size) * 2 + int(w1.size + w2.size) * 2
                      + int(s1.size + b1.size + s2.size + b2.size) * 4
                      + N * H * W * cout_p * 4)
    cost = pl.CostEstimate(flops=flops, transcendentals=0, bytes_accessed=bytes_accessed)

    out_nhwc = pl.pallas_call(
        _double_conv_kernel,
        out_shape=jax.ShapeDtypeStruct((N, H, W, cout_p), jnp.float32),
        grid_spec=pltpu.PrefetchScalarGridSpec(
            num_scalar_prefetch=0,
            grid=(N // nb,),
            in_specs=[
                pl.BlockSpec((nb, H, W, cin_p), lambda n: (n, 0, 0, 0)),
                # weights / BN params: constant block index -> stay resident, no re-DMA per step
                pl.BlockSpec((9 * cin_p, cmid_p), lambda n: (0, 0)),
                pl.BlockSpec((1, cmid_p), lambda n: (0, 0)),
                pl.BlockSpec((1, cmid_p), lambda n: (0, 0)),
                pl.BlockSpec((9 * cmid_p, cout_p), lambda n: (0, 0)),
                pl.BlockSpec((1, cout_p), lambda n: (0, 0)),
                pl.BlockSpec((1, cout_p), lambda n: (0, 0)),
            ],
            out_specs=pl.BlockSpec((nb, H, W, cout_p), lambda n: (n, 0, 0, 0)),
            scratch_shapes=[
                pltpu.VMEM((nb, H + 2, W + 2, cin_p), jnp.bfloat16),
                pltpu.VMEM((nb, H + 2, W + 2, cmid_p), jnp.bfloat16),
            ],
        ),
        compiler_params=pltpu.CompilerParams(dimension_semantics=("parallel",)),
        cost_estimate=cost,
    )(x, w1, s1, b1, w2, s2, b2)

    out_nhwc = out_nhwc[..., :Cout]                       # drop lane-padding channels
    return jnp.transpose(out_nhwc, (0, 3, 1, 2))          # back to NCHW, f32


def double_conv_reference(x_nchw, w1_oihw, bn1, w2_oihw, bn2, eps=1e-5, quantize=False):
    """Pure-JAX reference (inference-mode BN), NCHW throughout.

    quantize=True mirrors the kernel's bf16 rounding of conv inputs/weights (f32 accumulation),
    for a tight-tolerance comparison.
    """
    def maybe_q(a):
        return a.astype(jnp.bfloat16).astype(jnp.float32) if quantize else a

    def block(x, w, gamma, beta, mean, var):
        y = lax.conv_general_dilated(maybe_q(x), maybe_q(w), (1, 1), "SAME",
                                     dimension_numbers=("NCHW", "OIHW", "NCHW"))
        scale = gamma / jnp.sqrt(var + eps)
        bias = beta - mean * scale
        return jnp.maximum(y * scale[None, :, None, None] + bias[None, :, None, None], 0.0)

    y = block(x_nchw, w1_oihw, *bn1)
    return block(y, w2_oihw, *bn2)


if __name__ == "__main__":
    N, Cin, H, W = 2, 4, 16, 16
    Cout = 8

    key = jax.random.PRNGKey(0)
    kx, kw1, kw2, kg1, kb1, kg2, kb2 = jax.random.split(key, 7)

    x = jax.random.normal(kx, (N, Cin, H, W), dtype=jnp.float32)

    # Deterministic synthetic parameters (PyTorch shapes: OIHW weights, per-channel BN params).
    w1 = 0.1 * jax.random.normal(kw1, (Cout, Cin, 3, 3), dtype=jnp.float32)
    w2 = 0.1 * jax.random.normal(kw2, (Cout, Cout, 3, 3), dtype=jnp.float32)
    bn1 = (1.0 + 0.1 * jax.random.normal(kg1, (Cout,), dtype=jnp.float32),   # gamma
           0.1 * jax.random.normal(kb1, (Cout,), dtype=jnp.float32),         # beta
           jnp.zeros((Cout,), jnp.float32),                                  # running_mean
           jnp.ones((Cout,), jnp.float32))                                   # running_var
    bn2 = (1.0 + 0.1 * jax.random.normal(kg2, (Cout,), dtype=jnp.float32),
           0.1 * jax.random.normal(kb2, (Cout,), dtype=jnp.float32),
           jnp.zeros((Cout,), jnp.float32),
           jnp.ones((Cout,), jnp.float32))

    out = double_conv_pallas(x, w1, bn1, w2, bn2)
    out = jax.block_until_ready(out)
    assert out.shape == (N, Cout, H, W), out.shape

    # Tight check against a bf16-rounding-matched reference.
    ref_bf = double_conv_reference(x, w1, bn1, w2, bn2, quantize=True)
    err_bf = float(jnp.abs(out - ref_bf).max())
    assert jnp.allclose(out, ref_bf, rtol=5e-3, atol=5e-3), err_bf

    # Looser check against the pure-f32 reference (bf16 activation/weight quantization error).
    ref_f32 = double_conv_reference(x, w1, bn1, w2, bn2, quantize=False)
    err_f32 = float(jnp.abs(out - ref_f32).max())
    assert jnp.allclose(out, ref_f32, rtol=5e-2, atol=5e-2), err_f32

    print("KERNEL_OK")
</pallas_src>

<mosaic_0001>
module attributes {stable_mosaic.version = 11 : i64} {
  func.func @_double_conv_kernel(%arg0: i32, %arg1: memref<1x16x16x128xbf16, #tpu.memory_space<vmem>>, %arg2: memref<1152x128xbf16, #tpu.memory_space<vmem>>, %arg3: memref<1x128xf32, #tpu.memory_space<vmem>>, %arg4: memref<1x128xf32, #tpu.memory_space<vmem>>, %arg5: memref<1152x128xbf16, #tpu.memory_space<vmem>>, %arg6: memref<1x128xf32, #tpu.memory_space<vmem>>, %arg7: memref<1x128xf32, #tpu.memory_space<vmem>>, %arg8: memref<1x16x16x128xf32, #tpu.memory_space<vmem>>, %arg9: memref<1x18x18x128xbf16, #tpu.memory_space<vmem>>, %arg10: memref<1x18x18x128xbf16, #tpu.memory_space<vmem>>) attributes {dimension_semantics = [#tpu.dimension_semantics<parallel>], iteration_bounds = array<i64: 2>, scalar_prefetch = 0 : i64, scratch_operands = 2 : i64, tpu.core_type = #tpu.core_type<tc>, window_params = [{transform_indices = @transform_0, window_bounds = array<i64: 1, 16, 16, 128>}, {pipeline_mode = #tpu.pipeline_mode<synchronous>, transform_indices = @transform_1, window_bounds = array<i64: 1152, 128>}, {pipeline_mode = #tpu.pipeline_mode<synchronous>, transform_indices = @transform_2, window_bounds = array<i64: 1, 128>}, {pipeline_mode = #tpu.pipeline_mode<synchronous>, transform_indices = @transform_3, window_bounds = array<i64: 1, 128>}, {pipeline_mode = #tpu.pipeline_mode<synchronous>, transform_indices = @transform_4, window_bounds = array<i64: 1152, 128>}, {pipeline_mode = #tpu.pipeline_mode<synchronous>, transform_indices = @transform_5, window_bounds = array<i64: 1, 128>}, {pipeline_mode = #tpu.pipeline_mode<synchronous>, transform_indices = @transform_6, window_bounds = array<i64: 1, 128>}, {transform_indices = @transform_7, window_bounds = array<i64: 1, 16, 16, 128>}]} {
    %cst = arith.constant 0.000000e+00 : bf16
    %0 = vector.broadcast %cst : bf16 to vector<1x1x18x128xbf16>
    %c0 = arith.constant 0 : index
    %c0_0 = arith.constant 0 : index
    %c0_1 = arith.constant 0 : index
    %c0_2 = arith.constant 0 : index
    %1 = vector.load %arg9[%c0, %c0_0, %c0_1, %c0_2] : memref<1x18x18x128xbf16, #tpu.memory_space<vmem>>, vector<1x1x18x128xbf16>
    tpu.vector_store %arg9[%c0, %c0_0, %c0_1, %c0_2], %0 {strides = array<i32>} : memref<1x18x18x128xbf16, #tpu.memory_space<vmem>>, vector<1x1x18x128xbf16>,
    %c0_3 = arith.constant 0 : index
    %c17 = arith.constant 17 : index
    %c0_4 = arith.constant 0 : index
    %c0_5 = arith.constant 0 : index
    %2 = vector.load %arg9[%c0_3, %c17, %c0_4, %c0_5] : memref<1x18x18x128xbf16, #tpu.memory_space<vmem>>, vector<1x1x18x128xbf16>
    tpu.vector_store %arg9[%c0_3, %c17, %c0_4, %c0_5], %0 {strides = array<i32>} : memref<1x18x18x128xbf16, #tpu.memory_space<vmem>>, vector<1x1x18x128xbf16>,
    %cst_6 = arith.constant 0.000000e+00 : bf16
    %3 = vector.broadcast %cst_6 : bf16 to vector<1x18x1x128xbf16>
    %c0_7 = arith.constant 0 : index
    %c0_8 = arith.constant 0 : index
    %c0_9 = arith.constant 0 : index
    %c0_10 = arith.constant 0 : index
    %4 = vector.load %arg9[%c0_7, %c0_8, %c0_9, %c0_10] : memref<1x18x18x128xbf16, #tpu.memory_space<vmem>>, vector<1x18x1x128xbf16>
    tpu.vector_store %arg9[%c0_7, %c0_8, %c0_9, %c0_10], %3 {strides = array<i32>} : memref<1x18x18x128xbf16, #tpu.memory_space<vmem>>, vector<1x18x1x128xbf16>,
    %c0_11 = arith.constant 0 : index
    %c0_12 = arith.constant 0 : index
    %c17_13 = arith.constant 17 : index
    %c0_14 = arith.constant 0 : index
    %5 = vector.load %arg9[%c0_11, %c0_12, %c17_13, %c0_14] : memref<1x18x18x128xbf16, #tpu.memory_space<vmem>>, vector<1x18x1x128xbf16>
    tpu.vector_store %arg9[%c0_11, %c0_12, %c17_13, %c0_14], %3 {strides = array<i32>} : memref<1x18x18x128xbf16, #tpu.memory_space<vmem>>, vector<1x18x1x128xbf16>,
    %c0_15 = arith.constant 0 : index
    %c0_16 = arith.constant 0 : index
    %c0_17 = arith.constant 0 : index
    %c0_18 = arith.constant 0 : index
    %6 = vector.load %arg1[%c0_15, %c0_16, %c0_17, %c0_18] : memref<1x16x16x128xbf16, #tpu.memory_space<vmem>>, vector<1x16x16x128xbf16>
    %c0_19 = arith.constant 0 : index
    %c1 = arith.constant 1 : index
    %c1_20 = arith.constant 1 : index
    %c0_21 = arith.constant 0 : index
    %7 = vector.load %arg9[%c0_19, %c1, %c1_20, %c0_21] : memref<1x18x18x128xbf16, #tpu.memory_space<vmem>>, vector<1x16x16x128xbf16>
    tpu.vector_store %arg9[%c0_19, %c1, %c1_20, %c0_21], %6 {strides = array<i32>} : memref<1x18x18x128xbf16, #tpu.memory_space<vmem>>, vector<1x16x16x128xbf16>,
    %c0_22 = arith.constant 0 : index
    %c0_23 = arith.constant 0 : index
    %c0_24 = arith.constant 0 : index
    %c0_25 = arith.constant 0 : index
    %8 = vector.load %arg9[%c0_22, %c0_23, %c0_24, %c0_25] : memref<1x18x18x128xbf16, #tpu.memory_space<vmem>>, vector<1x16x16x128xbf16>
    %9 = vector.shape_cast %8 : vector<1x16x16x128xbf16> to vector<256x128xbf16>
    %c0_26 = arith.constant 0 : index
    %c0_27 = arith.constant 0 : index
    %c1_28 = arith.constant 1 : index
    %c0_29 = arith.constant 0 : index
    %10 = vector.load %arg9[%c0_26, %c0_27, %c1_28, %c0_29] : memref<1x18x18x128xbf16, #tpu.memory_space<vmem>>, vector<1x16x16x128xbf16>
    %11 = vector.shape_cast %10 : vector<1x16x16x128xbf16> to vector<256x128xbf16>
    %c0_30 = arith.constant 0 : index
    %c0_31 = arith.constant 0 : index
    %c2 = arith.constant 2 : index
    %c0_32 = arith.constant 0 : index
    %12 = vector.load %arg9[%c0_30, %c0_31, %c2, %c0_32] : memref<1x18x18x128xbf16, #tpu.memory_space<vmem>>, vector<1x16x16x128xbf16>
    %13 = vector.shape_cast %12 : vector<1x16x16x128xbf16> to vector<256x128xbf16>
    %c0_33 = arith.constant 0 : index
    %c1_34 = arith.constant 1 : index
    %c0_35 = arith.constant 0 : index
    %c0_36 = arith.constant 0 : index
    %14 = vector.load %arg9[%c0_33, %c1_34, %c0_35, %c0_36] : memref<1x18x18x128xbf16, #tpu.memory_space<vmem>>, vector<1x16x16x128xbf16>
    %15 = vector.shape_cast %14 : vector<1x16x16x128xbf16> to vector<256x128xbf16>
    %c0_37 = arith.constant 0 : index
    %c1_38 = arith.constant 1 : index
    %c1_39 = arith.constant 1 : index
    %c0_40 = arith.constant 0 : index
    %16 = vector.load %arg9[%c0_37, %c1_38, %c1_39, %c0_40] : memref<1x18x18x128xbf16, #tpu.memory_space<vmem>>, vector<1x16x16x128xbf16>
    %17 = vector.shape_cast %16 : vector<1x16x16x128xbf16> to vector<256x128xbf16>
    %c0_41 = arith.constant 0 : index
    %c1_42 = arith.constant 1 : index
    %c2_43 = arith.constant 2 : index
    %c0_44 = arith.constant 0 : index
    %18 = vector.load %arg9[%c0_41, %c1_42, %c2_43, %c0_44] : memref<1x18x18x128xbf16, #tpu.memory_space<vmem>>, vector<1x16x16x128xbf16>
    %19 = vector.shape_cast %18 : vector<1x16x16x128xbf16> to vector<256x128xbf16>
    %c0_45 = arith.constant 0 : index
    %c2_46 = arith.constant 2 : index
    %c0_47 = arith.constant 0 : index
    %c0_48 = arith.constant 0 : index
    %20 = vector.load %arg9[%c0_45, %c2_46, %c0_47, %c0_48] : memref<1x18x18x128xbf16, #tpu.memory_space<vmem>>, vector<1x16x16x128xbf16>
    %21 = vector.shape_cast %20 : vector<1x16x16x128xbf16> to vector<256x128xbf16>
    %c0_49 = arith.constant 0 : index
    %c2_50 = arith.constant 2 : index
    %c1_51 = arith.constant 1 : index
    %c0_52 = arith.constant 0 : index
    %22 = vector.load %arg9[%c0_49, %c2_50, %c1_51, %c0_52] : memref<1x18x18x128xbf16, #tpu.memory_space<vmem>>, vector<1x16x16x128xbf16>
    %23 = vector.shape_cast %22 : vector<1x16x16x128xbf16> to vector<256x128xbf16>
    %c0_53 = arith.constant 0 : index
    %c2_54 = arith.constant 2 : index
    %c2_55 = arith.constant 2 : index
    %c0_56 = arith.constant 0 : index
    %24 = vector.load %arg9[%c0_53, %c2_54, %c2_55, %c0_56] : memref<1x18x18x128xbf16, #tpu.memory_space<vmem>>, vector<1x16x16x128xbf16>
    %25 = vector.shape_cast %24 : vector<1x16x16x128xbf16> to vector<256x128xbf16>
    %26 = tpu.concatenate %9, %11, %13, %15, %17, %19, %21, %23, %25 in 1 : vector<256x128xbf16>, vector<256x128xbf16>, vector<256x128xbf16>, vector<256x128xbf16>, vector<256x128xbf16>, vector<256x128xbf16>, vector<256x128xbf16>, vector<256x128xbf16>, vector<256x128xbf16> -> vector<256x1152xbf16>
    %c0_57 = arith.constant 0 : index
    %c0_58 = arith.constant 0 : index
    %27 = vector.load %arg2[%c0_57, %c0_58] : memref<1152x128xbf16, #tpu.memory_space<vmem>>, vector<1152x128xbf16>
    %cst_59 = arith.constant dense<0.000000e+00> : vector<256x128xf32>
    %28 = tpu.matmul %26, %27, %cst_59 {dimension_numbers = #tpu.dot_dimension_numbers<[1], [0], [0], [1], [0, 0, 1, 1], [], []>} : vector<256x1152xbf16>, vector<1152x128xbf16>, vector<256x128xf32> -> vector<256x128xf32>
    %c0_60 = arith.constant 0 : index
    %c0_61 = arith.constant 0 : index
    %29 = vector.load %arg3[%c0_60, %c0_61] : memref<1x128xf32, #tpu.memory_space<vmem>>, vector<1x128xf32>
    %30 = vector.broadcast %29 : vector<1x128xf32> to vector<256x128xf32>
    %31 = arith.mulf %28, %30 : vector<256x128xf32>
    %c0_62 = arith.constant 0 : index
    %c0_63 = arith.constant 0 : index
    %32 = vector.load %arg4[%c0_62, %c0_63] : memref<1x128xf32, #tpu.memory_space<vmem>>, vector<1x128xf32>
    %33 = vector.broadcast %32 : vector<1x128xf32> to vector<256x128xf32>
    %34 = arith.addf %31, %33 : vector<256x128xf32>
    %cst_64 = arith.constant 0.000000e+00 : f32
    %35 = vector.broadcast %cst_64 : f32 to vector<256x128xf32>
    %36 = arith.maximumf %34, %35 : vector<256x128xf32>
    %cst_65 = arith.constant 0.000000e+00 : bf16
    %37 = vector.broadcast %cst_65 : bf16 to vector<1x1x18x128xbf16>
    %c0_66 = arith.constant 0 : index
    %c0_67 = arith.constant 0 : index
    %c0_68 = arith.constant 0 : index
    %c0_69 = arith.constant 0 : index
    %38 = vector.load %arg10[%c0_66, %c0_67, %c0_68, %c0_69] : memref<1x18x18x128xbf16, #tpu.memory_space<vmem>>, vector<1x1x18x128xbf16>
    tpu.vector_store %arg10[%c0_66, %c0_67, %c0_68, %c0_69], %37 {strides = array<i32>} : memref<1x18x18x128xbf16, #tpu.memory_space<vmem>>, vector<1x1x18x128xbf16>,
    %c0_70 = arith.constant 0 : index
    %c17_71 = arith.constant 17 : index
    %c0_72 = arith.constant 0 : index
    %c0_73 = arith.constant 0 : index
    %39 = vector.load %arg10[%c0_70, %c17_71, %c0_72, %c0_73] : memref<1x18x18x128xbf16, #tpu.memory_space<vmem>>, vector<1x1x18x128xbf16>
    tpu.vector_store %arg10[%c0_70, %c17_71, %c0_72, %c0_73], %37 {strides = array<i32>} : memref<1x18x18x128xbf16, #tpu.memory_space<vmem>>, vector<1x1x18x128xbf16>,
    %cst_74 = arith.constant 0.000000e+00 : bf16
    %40 = vector.broadcast %cst_74 : bf16 to vector<1x18x1x128xbf16>
    %c0_75 = arith.constant 0 : index
    %c0_76 = arith.constant 0 : index
    %c0_77 = arith.constant 0 : index
    %c0_78 = arith.constant 0 : index
    %41 = vector.load %arg10[%c0_75, %c0_76, %c0_77, %c0_78] : memref<1x18x18x128xbf16, #tpu.memory_space<vmem>>, vector<1x18x1x128xbf16>
    tpu.vector_store %arg10[%c0_75, %c0_76, %c0_77, %c0_78], %40 {strides = array<i32>} : memref<1x18x18x128xbf16, #tpu.memory_space<vmem>>, vector<1x18x1x128xbf16>,
    %c0_79 = arith.constant 0 : index
    %c0_80 = arith.constant 0 : index
    %c17_81 = arith.constant 17 : index
    %c0_82 = arith.constant 0 : index
    %42 = vector.load %arg10[%c0_79, %c0_80, %c17_81, %c0_82] : memref<1x18x18x128xbf16, #tpu.memory_space<vmem>>, vector<1x18x1x128xbf16>
    tpu.vector_store %arg10[%c0_79, %c0_80, %c17_81, %c0_82], %40 {strides = array<i32>} : memref<1x18x18x128xbf16, #tpu.memory_space<vmem>>, vector<1x18x1x128xbf16>,
    %43 = arith.truncf %36 : vector<256x128xf32> to vector<256x128xbf16>
    %44 = vector.shape_cast %43 : vector<256x128xbf16> to vector<1x16x16x128xbf16>
    %c0_83 = arith.constant 0 : index
    %c1_84 = arith.constant 1 : index
    %c1_85 = arith.constant 1 : index
    %c0_86 = arith.constant 0 : index
    %45 = vector.load %arg10[%c0_83, %c1_84, %c1_85, %c0_86] : memref<1x18x18x128xbf16, #tpu.memory_space<vmem>>, vector<1x16x16x128xbf16>
    tpu.vector_store %arg10[%c0_83, %c1_84, %c1_85, %c0_86], %44 {strides = array<i32>} : memref<1x18x18x128xbf16, #tpu.memory_space<vmem>>, vector<1x16x16x128xbf16>,
    %c0_87 = arith.constant 0 : index
    %c0_88 = arith.constant 0 : index
    %c0_89 = arith.constant 0 : index
    %c0_90 = arith.constant 0 : index
    %46 = vector.load %arg10[%c0_87, %c0_88, %c0_89, %c0_90] : memref<1x18x18x128xbf16, #tpu.memory_space<vmem>>, vector<1x16x16x128xbf16>
    %47 = vector.shape_cast %46 : vector<1x16x16x128xbf16> to vector<256x128xbf16>
    %c0_91 = arith.constant 0 : index
    %c0_92 = arith.constant 0 : index
    %c1_93 = arith.constant 1 : index
    %c0_94 = arith.constant 0 : index
    %48 = vector.load %arg10[%c0_91, %c0_92, %c1_93, %c0_94] : memref<1x18x18x128xbf16, #tpu.memory_space<vmem>>, vector<1x16x16x128xbf16>
    %49 = vector.shape_cast %48 : vector<1x16x16x128xbf16> to vector<256x128xbf16>
    %c0_95 = arith.constant 0 : index
    %c0_96 = arith.constant 0 : index
    %c2_97 = arith.constant 2 : index
    %c0_98 = arith.constant 0 : index
    %50 = vector.load %arg10[%c0_95, %c0_96, %c2_97, %c0_98] : memref<1x18x18x128xbf16, #tpu.memory_space<vmem>>, vector<1x16x16x128xbf16>
    %51 = vector.shape_cast %50 : vector<1x16x16x128xbf16> to vector<256x128xbf16>
    %c0_99 = arith.constant 0 : index
    %c1_100 = arith.constant 1 : index
    %c0_101 = arith.constant 0 : index
    %c0_102 = arith.constant 0 : index
    %52 = vector.load %arg10[%c0_99, %c1_100, %c0_101, %c0_102] : memref<1x18x18x128xbf16, #tpu.memory_space<vmem>>, vector<1x16x16x128xbf16>
    %53 = vector.shape_cast %52 : vector<1x16x16x128xbf16> to vector<256x128xbf16>
    %c0_103 = arith.constant 0 : index
    %c1_104 = arith.constant 1 : index
    %c1_105 = arith.constant 1 : index
    %c0_106 = arith.constant 0 : index
    %54 = vector.load %arg10[%c0_103, %c1_104, %c1_105, %c0_106] : memref<1x18x18x128xbf16, #tpu.memory_space<vmem>>, vector<1x16x16x128xbf16>
    %55 = vector.shape_cast %54 : vector<1x16x16x128xbf16> to vector<256x128xbf16>
    %c0_107 = arith.constant 0 : index
    %c1_108 = arith.constant 1 : index
    %c2_109 = arith.constant 2 : index
    %c0_110 = arith.constant 0 : index
    %56 = vector.load %arg10[%c0_107, %c1_108, %c2_109, %c0_110] : memref<1x18x18x128xbf16, #tpu.memory_space<vmem>>, vector<1x16x16x128xbf16>
    %57 = vector.shape_cast %56 : vector<1x16x16x128xbf16> to vector<256x128xbf16>
    %c0_111 = arith.constant 0 : index
    %c2_112 = arith.constant 2 : index
    %c0_113 = arith.constant 0 : index
    %c0_114 = arith.constant 0 : index
    %58 = vector.load %arg10[%c0_111, %c2_112, %c0_113, %c0_114] : memref<1x18x18x128xbf16, #tpu.memory_space<vmem>>, vector<1x16x16x128xbf16>
    %59 = vector.shape_cast %58 : vector<1x16x16x128xbf16> to vector<256x128xbf16>
    %c0_115 = arith.constant 0 : index
    %c2_116 = arith.constant 2 : index
    %c1_117 = arith.constant 1 : index
    %c0_118 = arith.constant 0 : index
    %60 = vector.load %arg10[%c0_115, %c2_116, %c1_117, %c0_118] : memref<1x18x18x128xbf16, #tpu.memory_space<vmem>>, vector<1x16x16x128xbf16>
    %61 = vector.shape_cast %60 : vector<1x16x16x128xbf16> to vector<256x128xbf16>
    %c0_119 = arith.constant 0 : index
    %c2_120 = arith.constant 2 : index
    %c2_121 = arith.constant 2 : index
    %c0_122 = arith.constant 0 : index
    %62 = vector.load %arg10[%c0_119, %c2_120, %c2_121, %c0_122] : memref<1x18x18x128xbf16, #tpu.memory_space<vmem>>, vector<1x16x16x128xbf16>
    %63 = vector.shape_cast %62 : vector<1x16x16x128xbf16> to vector<256x128xbf16>
    %64 = tpu.concatenate %47, %49, %51, %53, %55, %57, %59, %61, %63 in 1 : vector<256x128xbf16>, vector<256x128xbf16>, vector<256x128xbf16>, vector<256x128xbf16>, vector<256x128xbf16>, vector<256x128xbf16>, vector<256x128xbf16>, vector<256x128xbf16>, vector<256x128xbf16> -> vector<256x1152xbf16>
    %c0_123 = arith.constant 0 : index
    %c0_124 = arith.constant 0 : index
    %65 = vector.load %arg5[%c0_123, %c0_124] : memref<1152x128xbf16, #tpu.memory_space<vmem>>, vector<1152x128xbf16>
    %cst_125 = arith.constant dense<0.000000e+00> : vector<256x128xf32>
    %66 = tpu.matmul %64, %65, %cst_125 {dimension_numbers = #tpu.dot_dimension_numbers<[1], [0], [0], [1], [0, 0, 1, 1], [], []>} : vector<256x1152xbf16>, vector<1152x128xbf16>, vector<256x128xf32> -> vector<256x128xf32>
    %c0_126 = arith.constant 0 : index
    %c0_127 = arith.constant 0 : index
    %67 = vector.load %arg6[%c0_126, %c0_127] : memref<1x128xf32, #tpu.memory_space<vmem>>, vector<1x128xf32>
    %68 = vector.broadcast %67 : vector<1x128xf32> to vector<256x128xf32>
    %69 = arith.mulf %66, %68 : vector<256x128xf32>
    %c0_128 = arith.constant 0 : index
    %c0_129 = arith.constant 0 : index
    %70 = vector.load %arg7[%c0_128, %c0_129] : memref<1x128xf32, #tpu.memory_space<vmem>>, vector<1x128xf32>
    %71 = vector.broadcast %70 : vector<1x128xf32> to vector<256x128xf32>
    %72 = arith.addf %69, %71 : vector<256x128xf32>
    %cst_130 = arith.constant 0.000000e+00 : f32
    %73 = vector.broadcast %cst_130 : f32 to vector<256x128xf32>
    %74 = arith.maximumf %72, %73 : vector<256x128xf32>
    %75 = vector.shape_cast %74 : vector<256x128xf32> to vector<1x16x16x128xf32>
    %c0_131 = arith.constant 0 : index
    %c0_132 = arith.constant 0 : index
    %c0_133 = arith.constant 0 : index
    %c0_134 = arith.constant 0 : index
    %76 = vector.load %arg8[%c0_131, %c0_132, %c0_133, %c0_134] : memref<1x16x16x128xf32, #tpu.memory_space<vmem>>, vector<1x16x16x128xf32>
    tpu.vector_store %arg8[%c0_131, %c0_132, %c0_133, %c0_134], %75 {strides = array<i32>} : memref<1x16x16x128xf32, #tpu.memory_space<vmem>>, vector<1x16x16x128xf32>,
    return
  }
  func.func @transform_0(%arg0: i32) -> (i32, i32, i32, i32) {
    %c0_i32 = arith.constant 0 : i32
    %c0_i32_0 = arith.constant 0 : i32
    %c0_i32_1 = arith.constant 0 : i32
    %c0_i32_2 = arith.constant 0 : i32
    return %arg0, %c0_i32, %c0_i32_0, %c0_i32_1 : i32, i32, i32, i32
  }
  func.func @transform_1(%arg0: i32) -> (i32, i32) {
    %c0_i32 = arith.constant 0 : i32
    %c0_i32_0 = arith.constant 0 : i32
    %c0_i32_1 = arith.constant 0 : i32
    return %c0_i32, %c0_i32_0 : i32, i32
  }
  func.func @transform_2(%arg0: i32) -> (i32, i32) {
    %c0_i32 = arith.constant 0 : i32
    %c0_i32_0 = arith.constant 0 : i32
    %c0_i32_1 = arith.constant 0 : i32
    return %c0_i32, %c0_i32_0 : i32, i32
  }
  func.func @transform_3(%arg0: i32) -> (i32, i32) {
    %c0_i32 = arith.constant 0 : i32
    %c0_i32_0 = arith.constant 0 : i32
    %c0_i32_1 = arith.constant 0 : i32
    return %c0_i32, %c0_i32_0 : i32, i32
  }
  func.func @transform_4(%arg0: i32) -> (i32, i32) {
    %c0_i32 = arith.constant 0 : i32
    %c0_i32_0 = arith.constant 0 : i32
    %c0_i32_1 = arith.constant 0 : i32
    return %c0_i32, %c0_i32_0 : i32, i32
  }
  func.func @transform_5(%arg0: i32) -> (i32, i32) {
    %c0_i32 = arith.constant 0 : i32
    %c0_i32_0 = arith.constant 0 : i32
    %c0_i32_1 = arith.constant 0 : i32
    return %c0_i32, %c0_i32_0 : i32, i32
  }
  func.func @transform_6(%arg0: i32) -> (i32, i32) {
    %c0_i32 = arith.constant 0 : i32
    %c0_i32_0 = arith.constant 0 : i32
    %c0_i32_1 = arith.constant 0 : i32
    return %c0_i32, %c0_i32_0 : i32, i32
  }
  func.func @transform_7(%arg0: i32) -> (i32, i32, i32, i32) {
    %c0_i32 = arith.constant 0 : i32
    %c0_i32_0 = arith.constant 0 : i32
    %c0_i32_1 = arith.constant 0 : i32
    %c0_i32_2 = arith.constant 0 : i32
    return %arg0, %c0_i32, %c0_i32_0, %c0_i32_1 : i32, i32, i32, i32
  }
}

</mosaic_0001>

<bundles_post_ra>
// kernel: tpu_custom_call.1
= control target key start
LH: loop header
LB: loop body
LE: loop exit
PB: predicated region body
PF: predicated region fallthrough
CT: control target
= control target key end

     0   :  { %s16408_s0 = inlined_call_operand.hbm [shape: bf16[2,16,16,128], index: 0, kind: input, shape index: {}]   ;;  %s16409_s1 = inlined_call_operand.hbm [shape: bf16[1152,128], index: 1, kind: input, shape index: {}]   ;;  %s16410_s2 = inlined_call_operand.vmem [shape: f32[1,128], index: 2, kind: input, shape index: {}]   ;;  %s16411_s3 = inlined_call_operand.vmem [shape: f32[1,128], index: 3, kind: input, shape index: {}]   ;;  %s16412_s4 = inlined_call_operand.hbm [shape: bf16[1152,128], index: 4, kind: input, shape index: {}]   ;;  %s16413_s5 = inlined_call_operand.vmem [shape: f32[1,128], index: 5, kind: input, shape index: {}]   ;;  %s16414_s6 = inlined_call_operand.vmem [shape: f32[1,128], index: 6, kind: input, shape index: {}]   ;;  %s16415_s7 = inlined_call_operand.hbm [shape: f32[2,16,16,128], index: 7, kind: output, shape index: {}]  }
   0x1   :  { %16471 = sst [smem:[#allocation57_spill]] %s16409_s1 }
   0x2   :  { %12 = vsyncpa [#allocation5], 0 }
   0x3   :  { %14 = vsyncpa [#allocation5 + $0x1], 0 }
   0x4   :  { %15 = vsyncpa [#allocation8], 0 }
   0x5   :  { %16 = vsyncpa [#allocation6], 0 }
   0x6   :  { %18 = vsyncpa [#allocation6 + $0x1], 0  ;;  %s11827_s24 = smov 0   ;;  %s11829_s25 = smov 0  }
   0x7   :  { %s11831_s26 = smov 0   ;;  %s11833_s27 = smov 0  }
   0x8 LB: > { %s11848_s28 = sadd.s32 4294967295, %s11776_s27   ;;  %s9584_s29 = sadd.s32 4294967294, %s11776_s27   ;;  %s11776_s27 = sphi %s11833_s27, %s16869_s27   ;;  %s11772_s26 = sphi %s11831_s26, %s16868_s26   ;;  %s11768_s25 = sphi %s11829_s25, %s16867_s25   ;;  %s11764_s24 = sphi %s11827_s24, %s16866_s24  }
   0x9   : > { %p44_p0 = scmp.ne.s32.totalorder %s11768_s25, %s11764_s24  ;;  %p16417_p1 = scmp.eq.s32.totalorder %s11848_s28, 0 }
   0xa   : > { %p194_p2 = scmp.eq.s32.totalorder %s11848_s28, 1  ;;  %p200_p3 = scmp.eq.s32.totalorder %s9584_s29, 1 }
   0xb   : > { %p11857_p4 = por %p16417_p1, %p44_p0  ;;  %p9585_p5 = scmp.ge.s32.totalorder %s11776_s27, 1 }
   0xc   : > { %p11862_p6 = por %p200_p3, %p44_p0  ;;  %p207_p7 = scmp.lt.s32.totalorder %s11776_s27, 3 }
   0xd   : > { %s16472_s30 = scalar_select %p11857_p4, 1, 0 }
   0xe   : > { %s16473_s8 = scalar_select %p11862_p6, 1, 0 }
   0xf   : > { %p11867_p8 = pnand %p9585_p5, %p207_p7  ;;  %s11778_s10 = smov [#allocation7]  }
  0x10   : > { %s219_s11 = sshll.u32 %s11778_s10, 4  ;;  %s11779_s13 = smov [#allocation9]   ;;  %s220_s11 = int_to_ptr.vmem [resolvable:$true] %s219_s11 }
  0x11   : > { %s16474_s9 = scalar_select %p11867_p8, 1, 0 }
  0x12   : > { %p11252_p9 = pneg %p11867_p8  ;;  %s238_s14 = sshll.u32 %s11779_s13, 4  ;;  %s239_s14 = int_to_ptr.vmem [resolvable:$true] %s238_s14 }
  0x13   : > { %s11639_s15 = scalar_lea.vmem %s220_s11, 9216  ;;  %p11647_p5 = scmp.lt.s32.totalorder %s220_s11, %s220_s11 }
  0x14   : > { %p11876_p11 = pnand %p11252_p9, %p16417_p1  ;;  %p11640_p13 = scmp.ne.s32.totalorder %s220_s11, %s11639_s15 }
  0x15   : > { %p11648_p7 = scmp.lt.s32.totalorder %s11639_s15, %s11639_s15 }
  0x16   : > { %p11630_p12 = pneg %p11876_p11 }
  0x17   : > { %p11649_p10 = por %p11648_p7, %p11647_p5 }
  0x18   : > { %p11642_p0 = pnand %p11640_p13, %p11630_p12 }
  0x1a   : > { %p11643_p3 = pneg %p11642_p0 }
  0x1c   : > { %p11650_p9 = pnand %p11649_p10, %p11643_p3 }
  0x1e   : > { %11653 = shalt.err (!%p11650_p9)
}
  0x1f   : > { %s16416_s16 = smov 64   ;;  %s16418_s17 = smov 4  }
  0x20   : > { %s16476_s1 = sld [smem:[#allocation57_spill]]  ;;  %s11665_s20 = scalar_lea.vmem %s239_s14, 9216 }
  0x21   : > { %p11666_p13 = scmp.ne.s32.totalorder %s239_s14, %s11665_s20  ;;  %p11673_p10 = scmp.lt.s32.totalorder %s239_s14, %s239_s14 }
  0x22   : > { %p11674_p3 = scmp.lt.s32.totalorder %s11665_s20, %s11665_s20 }
  0x23   : > { %p11668_p0 = pnand %p11666_p13, %p11630_p12 }
  0x24   : > { %p11675_p7 = por %p11674_p3, %p11673_p10 }
  0x25   : > { %p11669_p5 = pneg %p11668_p0 }
  0x26   : > { %11255 = dma.hbm_to_vmem [thread:$0]  (!%p11876_p11), %s16476_s1, 9216, %s220_s11, [#allocation8], %s16416_s16, %s16416_s16, %s16418_s17  }
  0x27   : > { %p11676_p9 = pnand %p11675_p7, %p11669_p5 }
  0x29   : > { %11679 = shalt.err (!%p11676_p9)
}
  0x2a   : > { %11258 = dma.hbm_to_vmem [thread:$0]  (!%p11876_p11), %s16412_s4, 9216, %s239_s14, [#allocation8], %s16416_s16, %s16416_s16, %s16418_s17  }
  0x2b   : > { %s11905_s23 = sadd.s32 1, %s11776_s27   ;;  %s31_s29 = sadd.s32 1, %s11772_s26 }
  0x2c   : > { %s28_s10 = ssub.s32 %s11776_s27, %s11905_s23  ;;  %p38_p12 = scmp.ne.s32.totalorder %s11772_s26, %s11768_s25 }
  0x2d   : > { %p29_p13 = scmp.eq.s32.totalorder %s28_s10, 0  ;;  %p39_p0 = scmp.eq.s32.totalorder %s11776_s27, 0 }
  0x2e   : > { %p11915_p5 = por %p194_p2, %p38_p12  ;;  %p11269_p10 = scmp.lt.s32.totalorder %s11776_s27, 2 }
  0x2f   : > { %s11921_s12 = scalar_select %p29_p13, %s11772_s26, %s31_s29  }
  0x30   : > { %s16477_s11 = scalar_select %p11915_p5, 1, 0 }
  0x31   : > { %p40_p3 = por %p39_p0, %p38_p12  ;;  %s258_s13 = sand.u32 1, %s11772_s26  }
  0x32   : > { %s9589_s15 = sshll.u32 %s258_s13, 7  ;;  %s10166_s14 = sshll.u32 %s11776_s27, 11 }
  0x33   : > { %s11928_s20 = scalar_lea.hbm %s16408_s0, %s10166_s14  ;;  %s262_s21 = scalar_lea.vmem [#allocation4], %s9589_s15 }
  0x34   : > { %s269_s22 = sshll.u32 %s262_s21, 4  ;;  %p11932_p2 = pnand %p11269_p10, %p40_p3  ;;  %s11930_s22 = int_to_ptr.vmem [resolvable:$true] %s269_s22 }
  0x35   : > { %s11936_s29 = scalar_lea.sflag [#allocation5], %s258_s13  ;;  %s11680_s16 = scalar_lea.hbm %s11928_s20, 2048 }
  0x36   : > { %p11681_p11 = scmp.ne.s32.totalorder %s11928_s20, %s11680_s16  ;;  %p11682_p7 = pneg %p11932_p2 }
  0x37   : > { %s11685_s15 = scalar_lea.hbm %s16408_s0, 4096  ;;  %p11686_p13 = scmp.lt.s32.totalorder %s11928_s20, %s16408_s0 }
  0x38   : > { %p11683_p9 = pnand %p11682_p7, %p11681_p11  ;;  %p11687_p0 = scmp.lt.s32.totalorder %s11685_s15, %s11680_s16 }
  0x3a   : > { %p11684_p12 = pneg %p11683_p9  ;;  %p11688_p10 = por %p11687_p0, %p11686_p13 }
  0x3c   : > { %p11689_p3 = pnand %p11688_p10, %p11684_p12 }
  0x3e   : > { %11692 = shalt.err (!%p11689_p3)
}
  0x3f   : > { %s11693_s13 = scalar_lea.vmem %s11930_s22, 2048  ;;  %s11782_s17 = smov [#allocation4]  }
  0x40   : > { %p11694_p1 = scmp.ne.s32.totalorder %s11930_s22, %s11693_s13  ;;  %s11698_s1 = sshll.u32 %s11782_s17, 4  ;;  %s11699_s1 = int_to_ptr.vmem [resolvable:$false] %s11698_s1 }
  0x41   : > { %s11700_s14 = scalar_lea.vmem %s11699_s1, 4096  ;;  %p11701_p9 = scmp.lt.s32.totalorder %s11930_s22, %s11699_s1 }
  0x42   : > { %p11696_p6 = pnand %p11694_p1, %p11682_p7  ;;  %p11702_p5 = scmp.lt.s32.totalorder %s11700_s14, %s11693_s13 }
  0x44   : > { %p11697_p11 = pneg %p11696_p6  ;;  %p11703_p4 = por %p11702_p5, %p11701_p9 }
  0x46   : > { %p11704_p8 = pnand %p11703_p4, %p11697_p11 }
  0x48   : > { %11707 = shalt.err (!%p11704_p8)
}
  0x49   : > { %s16479_s16 = smov 4   ;;  %s16480_s18 = smov 64  }
  0x4a   : > { %11262 = dma.hbm_to_vmem [thread:$0]  (!%p11932_p2), %s11928_s20, 2048, %s11930_s22, %s11936_s29, %s16480_s18, %s16480_s18, %s16479_s16  }
  0x4b   : > { %p16481_p1 = scmp.ne.s32.totalorder %s16474_s9, 0 }
  0x4d   : > { %281 = sbr.rel (%p16481_p1) target bundleno = 1341 (0x53d), region = 48 }
  0x52   : > { %s11963_s17 = sand.u32 1, %s11768_s25   ;;  %p16482_p4 = scmp.ne.s32.totalorder %s16472_s30, 0 }
  0x53   : > { %s9593_s1 = sshll.u32 %s11963_s17, 7  ;;  %s284_s15 = scalar_lea.sflag [#allocation5], %s11963_s17 }
  0x54   : > { %s11967_s19 = scalar_lea.vmem [#allocation4], %s9593_s1 }
  0x55   : > { %11751 = dma.done.wait (%p16482_p4), %s284_s15, 2048  }
  0x56   : > { %11753 = vsyncadd (%p16482_p4), %s284_s15, 4294965248  ;;  %p16483_p6 = scmp.eq.s32.totalorder %s11848_s28, 0 }
  0x58   : > { %11755 = dma.done.wait (%p16483_p6), [#allocation8], 18432   ;;  %p16484_p8 = pmov %p16483_p6 }
  0x59   : > { %v11783_v0 = vmov 0   ;;  %v11312_v1 = vld [vmem:[#allocation7 + $0x78] sm:$0xff]   ;;  %v11316_v5 = vld [vmem:[#allocation7 + $0x70] sm:$0xff]   ;;  %v11320_v9 = vld [vmem:[#allocation7 + $0x68] sm:$0xff]   ;;  %vm335_vm0 = vsmask.f32 256 }
  0x5a   : > { %11757 = vsyncadd (%p16484_p8), [#allocation8], 4294948864  ;;  %327 = vst [vmem:[#allocation2] sm:$0xf] %v11783_v0  ;;  %v11313_v2 = vld [vmem:[#allocation7 + $0xf8] sm:$0xff]   ;;  %10200 = vmatprep.subr.bf16.mxu0 %v11312_v1  ;;  %v11317_v6 = vld [vmem:[#allocation7 + $0xf0] sm:$0xff]  }
  0x5b   : > { %328 = vst [vmem:[#allocation2 + $0x4] sm:$0xf] %v11783_v0  ;;  %329 = vst [vmem:[#allocation2 + $0x8] sm:$0x1] %v11783_v0  ;;  %v11314_v3 = vld [vmem:[#allocation7 + $0x38] sm:$0xff]   ;;  %10312 = vmatprep.subr.bf16.mxu1 %v11313_v2  ;;  %v11318_v7 = vld [vmem:[#allocation7 + $0x30] sm:$0xff]  }
  0x5c   : > { %331 = vst [vmem:[#allocation2 + $0xcc] sm:$0xf] %v11783_v0  ;;  %332 = vst [vmem:[#allocation2 + $0xd0] sm:$0xf] %v11783_v0  ;;  %v11315_v4 = vld [vmem:[#allocation7 + $0xb8] sm:$0xff]   ;;  %10201 = vmatpush3.bf16.msra.mxu0 %v11314_v3  ;;  %v11319_v8 = vld [vmem:[#allocation7 + $0xb0] sm:$0xff]  }
  0x5d   : > { %333 = vst [vmem:[#allocation2 + $0xd4] sm:$0x1] %v11783_v0  ;;  %4862 = vst [vmem:[#allocation3] sm:$0xf] %v11783_v0  ;;  %10313 = vmatpush3.bf16.msra.mxu1 %v11315_v4  ;;  %10202 = vmatprep.subr.bf16.mxu0 %v11316_v5  ;;  %v11321_v10 = vld [vmem:[#allocation7 + $0xe8] sm:$0xff]   ;;  %v11324_v13 = vld [vmem:[#allocation7 + $0x60] sm:$0xff]  }
  0x5e   : > { %4863 = vst [vmem:[#allocation3 + $0x4] sm:$0xf] %v11783_v0  ;;  %4864 = vst [vmem:[#allocation3 + $0x8] sm:$0x1] %v11783_v0  ;;  %10314 = vmatprep.subr.bf16.mxu1 %v11317_v6  ;;  %v11322_v11 = vld [vmem:[#allocation7 + $0x28] sm:$0xff]   ;;  %v11325_v14 = vld [vmem:[#allocation7 + $0xe0] sm:$0xff]  }
  0x5f   : > { %4866 = vst [vmem:[#allocation3 + $0xcc] sm:$0xf] %v11783_v0  ;;  %4867 = vst [vmem:[#allocation3 + $0xd0] sm:$0xf] %v11783_v0  ;;  %v11323_v12 = vld [vmem:[#allocation7 + $0xa8] sm:$0xff]   ;;  %v11326_v15 = vld [vmem:[#allocation7 + $0x20] sm:$0xff]  }
  0x60   : > { %4868 = vst [vmem:[#allocation3 + $0xd4] sm:$0x1] %v11783_v0  ;;  %10203 = vmatpush3.bf16.msra.mxu0 %v11318_v7  ;;  %vm391_vm1 = vsmask.f32 7938  ;;  %v11327_v16 = vld [vmem:[#allocation7 + $0xa0] sm:$0xff]   ;;  %v11328_v17 = vld [vmem:[#allocation7 + $0x58] sm:$0xff]  }
  0x61   : > { %10315 = vmatpush3.bf16.msra.mxu1 %v11319_v8  ;;  %10204 = vmatprep.subr.bf16.mxu0 %v11320_v9  ;;  %v11329_v18 = vld [vmem:[#allocation7 + $0xd8] sm:$0xff]   ;;  %vm334_vm2 = vcmask 1040384   ;;  %v11332_v21 = vld [vmem:[#allocation7 + $0x50] sm:$0xff]   ;;  %v16485_v24 = vmov 0  ;;  %v16488_v25 = vmov 0  ;;  %v11336_v27 = vld [vmem:[#allocation7 + $0x48] sm:$0xff]  }
  0x62   : > { %10316 = vmatprep.subr.bf16.mxu1 %v11321_v10  ;;  %v11330_v19 = vld [vmem:[#allocation7 + $0x18] sm:$0xff]   ;;  %v11333_v22 = vld [vmem:[#allocation7 + $0xd0] sm:$0xff]   ;;  %vm11978_vm3 = vmand %vm334_vm2, %vm335_vm0  ;;  %vm479_vm5 = vsmask.f32 4368  ;;  %vm802_vm6 = vcmask 1043456   ;;  %vm1415_vm7 = vcmask 1042432  }
  0x63   : > { %v11331_v20 = vld [vmem:[#allocation7 + $0x98] sm:$0xff]   ;;  %v11334_v23 = vld [vmem:[#allocation7 + $0x10] sm:$0xff]   ;;  %v16486_v24 = vsel %vm11978_vm3, 4294967295, %v16485_v24  ;;  %vm11983_vm4 = vmand %vm334_vm2, %vm391_vm1  ;;  %vm964_vm8 = vsmask.f32 3328  ;;  %vm1416_vm10 = vcmask 1046532  }
  0x64   : > { %10205 = vmatpush3.bf16.msra.mxu0 %v11322_v11  ;;  %16487 = vst [vmem:[#allocation14_spill] sm:$0xff] %v16486_v24  ;;  %v16489_v25 = vsel %vm11983_vm4, 4294967295, %v16488_v25  ;;  %v11335_v26 = vld [vmem:[#allocation7 + $0x90] sm:$0xff]   ;;  %v11337_v28 = vld [vmem:[#allocation7 + $0xc8] sm:$0xff]   ;;  %v11340_v31 = vld [vmem:[#allocation7 + $0x40] sm:$0xff]   ;;  %v16491_v59 = vmov 0 }
  0x65   : > { %10317 = vmatpush3.bf16.msra.mxu1 %v11323_v12  ;;  %10206 = vmatprep.subr.bf16.mxu0 %v11324_v13  ;;  %16490 = vst [vmem:[#allocation15_spill] sm:$0xff] %v16489_v25  ;;  %v11338_v29 = vld [vmem:[#allocation7 + $0x8] sm:$0xff]   ;;  %v11341_v32 = vld [vmem:[#allocation7 + $0xc0] sm:$0xff]   ;;  %v337_v35 = vld [vmem:[#allocation2] sm:$0x1]  ;;  %v16494_v2 = vmov 0 }
  0x66   : > { %10318 = vmatprep.subr.bf16.mxu1 %v11325_v14  ;;  %v11339_v30 = vld [vmem:[#allocation7 + $0x88] sm:$0xff]   ;;  %v11342_v33 = vld [vmem:[#allocation7] sm:$0xff]   ;;  %v393_v36 = vld [vmem:[#allocation2 + $0x8] sm:$0x1]  ;;  %v338_v38 = vsel %vm11978_vm3, 0, %v337_v35  ;;  %s9596_s15 = sshll.u32 %s11963_s17, 8 }
  0x67   : > { %v11343_v34 = vld [vmem:[#allocation7 + $0x80] sm:$0xff]   ;;  %v11987_v37 = vld [vmem:[#allocation2 + $0x4] sm:$0xf]  ;;  %v394_v39 = vsel %vm11983_vm4, 0, %v393_v36  ;;  %v340_v42 = vld [vmem:[#allocation2 + $0xc] sm:$0x1] }
  0x68   : > { %10207 = vmatpush3.bf16.msra.mxu0 %v11326_v15  ;;  %v977_v40 = vshll.u32 %v11987_v37, 16  ;;  %v981_v41 = vshrl.u32 %v11987_v37, 16  ;;  %339 = vst [vmem:[#allocation2] sm:$0x1] %v338_v38  ;;  %395 = vst [vmem:[#allocation2 + $0x8] sm:$0x1] %v394_v39 }
  0x69   : > { %10319 = vmatpush3.bf16.msra.mxu1 %v11327_v16  ;;  %10208 = vmatprep.subr.bf16.mxu0 %v11328_v17  ;;  %vm965_vm9 = vsmask.f32 7440  ;;  %v341_v43 = vsel %vm11978_vm3, 0, %v340_v42  ;;  %v447_v44 = vld [vmem:[%s11967_s19] sm:$0xf]  ;;  %v1420_v46 = vrot.slane %v11987_v37, 5  ;;  %vm12005_vm11 = vmor %vm335_vm0, %vm479_vm5 }
  0x6a   : > { %10320 = vmatprep.subr.bf16.mxu1 %v11329_v18  ;;  %v448_v45 = vld [vmem:[%s11967_s19 + $0x4] sm:$0xf]  ;;  %v12000_v47 = vrot.slane %v977_v40, 5  ;;  %v983_v48 = vrot.slane %v981_v41, 4  ;;  %342 = vst [vmem:[#allocation2 + $0xc] sm:$0x1] %v341_v43  ;;  %vm12013_vm12 = vmand %vm802_vm6, %vm391_vm1 }
  0x6b   : > { %v482_v49 = vshrl.u32 %v447_v44, 16  ;;  %v485_v50 = vshll.u32 %v447_v44, 16  ;;  %v490_v51 = vshrl.u32 %v448_v45, 16  ;;  %v493_v52 = vshll.u32 %v448_v45, 16  ;;  %v1351_v53 = vld [vmem:[#allocation2] sm:$0xe]  ;;  %vm12031_vm13 = vmor %vm1415_vm7, %vm1416_vm10 }
  0x6c   : > { %10209 = vmatpush3.bf16.msra.mxu0 %v11330_v19  ;;  %v11346_v55 = vld [vmem:[#allocation7 + $0x178] sm:$0xff]   ;;  %v984_v56 = vor.u32 %v983_v48, %v12000_v47  ;;  %v396_v58 = vld [vmem:[#allocation2 + $0x14] sm:$0x1]  ;;  %v16492_v59 = vsel %vm12005_vm11, 4294967295, %v16491_v59  ;;  %v9597_v62 = vrot.slane %v1351_v53, 9  ;;  %v16495_v2 = vsel %vm12013_vm12, 4294967295, %v16494_v2  ;;  %vm12037_vm14 = vmor %vm964_vm8, %vm965_vm9 }
  0x6d   : > { %10321 = vmatpush3.bf16.msra.mxu1 %v11331_v20  ;;  %10210 = vmatprep.subr.bf16.mxu0 %v11332_v21  ;;  %v484_v54 = vrot.slane %v482_v49, 7  ;;  %v492_v57 = vrot.slane %v490_v51, 7  ;;  %16493 = vst [vmem:[#allocation16_spill] sm:$0xff] %v16492_v59  ;;  %v397_v63 = vsel %vm11983_vm4, 0, %v396_v58  ;;  %v343_v0 = vld [vmem:[#allocation2 + $0x18] sm:$0x1] }
  0x6e   : > { %10322 = vmatprep.subr.bf16.mxu1 %v11333_v22  ;;  %16496 = vst [vmem:[#allocation17_spill] sm:$0xff] %v16495_v2  ;;  %v1422_v3 = vrot.slane %v1420_v46, 4  ;;  %398 = vst [vmem:[#allocation2 + $0x14] sm:$0x1] %v397_v63  ;;  %v344_v4 = vsel %vm11978_vm3, 0, %v343_v0  ;;  %v985_v13 = vrot.slane %v984_v56, 4  ;;  %v1421_v38 = vsel %vm12031_vm13, %v9597_v62, %v1420_v46 }
  0x6f   : > { %v487_v60 = vor.u32 %v485_v50, %v484_v54  ;;  %v488_v61 = vrot.slane %v484_v54, 4  ;;  %v495_v1 = vor.u32 %v493_v52, %v492_v57  ;;  %v449_v5 = vld [vmem:[%s11967_s19 + $0x8] sm:$0xf]  ;;  %v450_v6 = vld [vmem:[%s11967_s19 + $0xc] sm:$0xf]  ;;  %v497_v17 = vrot.slane %v492_v57, 4 }
  0x70   : > { %10211 = vmatpush3.bf16.msra.mxu0 %v11334_v23  ;;  %v12021_v7 = vld [vmem:[#allocation2] sm:$0xf]  ;;  %v948_v8 = vld [vmem:[#allocation2 + $0x8] sm:$0x1]  ;;  %345 = vst [vmem:[#allocation2 + $0x18] sm:$0x1] %v344_v4 }
  0x71   : > { %10323 = vmatpush3.bf16.msra.mxu1 %v11335_v26  ;;  %10212 = vmatprep.subr.bf16.mxu0 %v11336_v27  ;;  %v499_v9 = vshrl.u32 %v449_v5, 16  ;;  %v502_v10 = vshll.u32 %v449_v5, 16  ;;  %v968_v11 = vshrl.u32 %v12021_v7, 16  ;;  %v971_v12 = vshll.u32 %v12021_v7, 16  ;;  %v804_v15 = vld [vmem:[#allocation2 + $0xc] sm:$0xf] }
  0x72   : > { %10324 = vmatprep.subr.bf16.mxu1 %v11337_v28  ;;  %v987_v14 = vshll.u32 %v948_v8, 16  ;;  %v496_v16 = vsel %vm12005_vm11, %v488_v61, %v495_v1  ;;  %v805_v18 = vsel %vm12013_vm12, %v487_v60, %v804_v15  ;;  %v399_v20 = vld [vmem:[#allocation2 + $0x20] sm:$0x1]  ;;  %v1423_v26 = vrot.slane %v948_v8, 5  ;;  %v346_v28 = vld [vmem:[#allocation2 + $0x24] sm:$0x1] }
  0x73   : > { %v501_v19 = vrot.slane %v499_v9, 7  ;;  %v970_v21 = vrot.slane %v968_v11, 4  ;;  %v973_v22 = vrot.slane %v971_v12, 5  ;;  %806 = vst [vmem:[#allocation2 + $0xc] sm:$0xf] %v805_v18  ;;  %v16497_v27 = vmov 0 }
  0x74   : > { %10213 = vmatpush3.bf16.msra.mxu0 %v11338_v29  ;;  %v989_v23 = vrot.slane %v987_v14, 5  ;;  %807 = vst [vmem:[#allocation2 + $0x10] sm:$0xf] %v496_v16  ;;  %v16498_v27 = vsel %vm12031_vm13, 4294967295, %v16497_v27  ;;  %v16500_v29 = vmov 0  ;;  %v510_v35 = vshll.u32 %v450_v6, 16 }
  0x75   : > { %10325 = vmatpush3.bf16.msra.mxu1 %v11339_v30  ;;  %10214 = vmatprep.subr.bf16.mxu0 %v11340_v31  ;;  %16499 = vst [vmem:[#allocation18_spill] sm:$0xff] %v16498_v27  ;;  %v16501_v29 = vsel %vm12037_vm14, 4294967295, %v16500_v29  ;;  %v504_v30 = vor.u32 %v502_v10, %v501_v19  ;;  %v505_v31 = vrot.slane %v501_v19, 4  ;;  %v400_v36 = vsel %vm11983_vm4, 0, %v399_v20  ;;  %v808_v39 = vld [vmem:[#allocation2 + $0x14] sm:$0x1] }
  0x76   : > { %10326 = vmatprep.subr.bf16.mxu1 %v11341_v32  ;;  %16502 = vst [vmem:[#allocation19_spill] sm:$0xff] %v16501_v29  ;;  %v507_v32 = vshrl.u32 %v450_v6, 16  ;;  %401 = vst [vmem:[#allocation2 + $0x20] sm:$0x1] %v400_v36  ;;  %v347_v41 = vsel %vm11978_vm3, 0, %v346_v28  ;;  %v990_v44 = vsel %vm12037_vm14, %v985_v13, %v989_v23  ;;  %v1424_v45 = vsel %vm12031_vm13, %v1422_v3, %v1423_v26  ;;  %v11353_v20 = vld [vmem:[#allocation7 + $0x130] sm:$0xff]  }
  0x77   : > { %v12053_v42 = vld [vmem:[%s11967_s19 + $0x14] sm:$0xf]  ;;  %v809_v48 = vsel %vm11978_vm3, %v497_v17, %v808_v39  ;;  %v811_v46 = vld [vmem:[#allocation2 + $0x18] sm:$0xf]  ;;  %348 = vst [vmem:[#allocation2 + $0x24] sm:$0x1] %v347_v41  ;;  %v9645_v49 = vcombine.low %v12021_v7, %v11987_v37  ;;  %v9677_v63 = vcombine.low %v1421_v38, %v1424_v45 }
  0x78   : > { %10215 = vmatpush3.bf16.msra.mxu0 %v11342_v33  ;;  %v12042_v33 = vld [vmem:[%s11967_s19 + $0x10] sm:$0xf]  ;;  %v12048_v40 = vrot.slane %v507_v32, 7  ;;  %810 = vst [vmem:[#allocation2 + $0x14] sm:$0x1] %v809_v48  ;;  %v812_v51 = vsel %vm12013_vm12, %v504_v30, %v811_v46  ;;  %v524_v57 = vshrl.u32 %v12053_v42, 16 }
  0x79   : > { %10327 = vmatpush3.bf16.msra.mxu1 %v11343_v34  ;;  %10424 = vmatprep.subr.bf16.mxu0 %v11346_v55  ;;  %v974_v34 = vor.u32 %v973_v22, %v970_v21  ;;  %v516_v52 = vshrl.u32 %v12042_v33, 16  ;;  %v402_v53 = vld [vmem:[#allocation2 + $0x2c] sm:$0x1]  ;;  %813 = vst [vmem:[#allocation2 + $0x18] sm:$0xf] %v812_v51  ;;  %v519_v56 = vshll.u32 %v12042_v33, 16 }
  0x7a   : > { %v512_v50 = vor.u32 %v510_v35, %v12048_v40  ;;  %v11347_v55 = vld [vmem:[#allocation7 + $0x138] sm:$0xff]   ;;  %v11352_v37 = vld [vmem:[#allocation7 + $0x170] sm:$0xff]   ;;  %v403_v58 = vsel %vm11983_vm4, 0, %v402_v53  ;;  %v527_v11 = vshll.u32 %v12053_v42, 16  ;;  %v514_v14 = vrot.slane %v12048_v40, 4  ;;  %v11358_v30 = vld [vmem:[#allocation7 + $0x168] sm:$0xff]  }
  0x7b   : > { %v975_v43 = vrot.slane %v974_v34, 4  ;;  %v1530_v61 = vld [vmem:[#allocation2 + $0xc] sm:$0xf]  ;;  %v12074_v62 = vld [vmem:[#allocation2 + $0x10] sm:$0xf]  ;;  %v12089_v15 = vrot.slane %v516_v52, 7 }
  0x7c   : > { %v12076_v0 = vld [vmem:[#allocation2 + $0xc] sm:$0xf]  ;;  %404 = vst [vmem:[#allocation2 + $0x2c] sm:$0x1] %v403_v58  ;;  %v1579_v1 = vshrl.u32 %v1530_v61, 16  ;;  %v1582_v3 = vshll.u32 %v1530_v61, 16  ;;  %v9693_v7 = vcombine.low %v1530_v61, %v12074_v62 }
  0x7d   : > { %v980_v54 = vsel %vm12037_vm14, %v975_v43, %v12000_v47  ;;  %v513_v47 = vsel %vm12005_vm11, %v505_v31, %v512_v50  ;;  %v1588_v4 = vshll.u32 %v12074_v62, 16  ;;  %v1592_v5 = vshrl.u32 %v12074_v62, 16  ;;  %v12082_v6 = vld [vmem:[#allocation2 + $0x10] sm:$0xf]  ;;  %v1352_v10 = vld [vmem:[#allocation2 + $0xc] sm:$0xe] }
  0x7e   : > { %v9661_v60 = vcombine.low %v980_v54, %v990_v44  ;;  %814 = vst [vmem:[#allocation2 + $0x1c] sm:$0xf] %v513_v47  ;;  %v992_v8 = vshrl.u32 %v12076_v0, 16  ;;  %v995_v9 = vshll.u32 %v12076_v0, 16  ;;  %v1581_v12 = vrot.slane %v1579_v1, 4  ;;  %4140 = vmatprep.mubr.bf16.mxu1 %v9693_v7  ;;  %v11365_v7 = vld [vmem:[#allocation7 + $0x120] sm:$0xff]  }
  0x7f   : > { %v1584_v13 = vrot.slane %v1582_v3, 5  ;;  %v1001_v18 = vshll.u32 %v12082_v6, 16  ;;  %v1005_v19 = vshrl.u32 %v12082_v6, 16  ;;  %v12093_v22 = vrot.slane %v1588_v4, 5  ;;  %4141 = vmatmul.mubr.bf16.vlgmr.msra.gmra.mxu1 %v9677_v63  ;;  %v949_v26 = vld [vmem:[#allocation2 + $0x14] sm:$0x1] }
  0x80   : > { %3979 = vmatprep.mubr.bf16.mxu0 %v9661_v60  ;;  %v994_v16 = vrot.slane %v992_v8, 4  ;;  %v997_v17 = vrot.slane %v995_v9, 5  ;;  %v12095_v23 = vrot.slane %v1592_v5, 4  ;;  %v9598_v28 = vrot.slane %v1352_v10, 9  ;;  %v815_v36 = vld [vmem:[#allocation2 + $0x20] sm:$0x1] }
  0x81   : > { %3980 = vmatmul.mubr.bf16.vlgmr.msra.gmra.mxu0 %v9645_v49  ;;  %v1585_v21 = vor.u32 %v1584_v13, %v1581_v12  ;;  %v1003_v32 = vrot.slane %v1001_v18, 5  ;;  %v1007_v34 = vrot.slane %v1005_v19, 4  ;;  %v1011_v35 = vshll.u32 %v949_v26, 16  ;;  %v12099_v39 = vld [vmem:[#allocation2 + $0x18] sm:$0xf]  ;;  %s10199_s30 = sshll.u32 %s11848_s28, 12 }
  0x82   : > { %10425 = vmatpush3.bf16.msra.mxu0 %v11347_v55  ;;  %v998_v31 = vor.u32 %v997_v17, %v994_v16  ;;  %v12101_v40 = vld [vmem:[#allocation2 + $0x18] sm:$0xf]  ;;  %v526_v41 = vrot.slane %v524_v57, 7  ;;  %v1427_v46 = vrot.slane %v12082_v6, 5  ;;  %v1595_v51 = vor.u32 %v12095_v23, %v12093_v22  ;;  %v11364_v55 = vld [vmem:[#allocation7 + $0x160] sm:$0xff]   ;;  %s16361_s10 = scalar_lea.hbm %s16415_s7, %s10199_s30  ;;  %s9479_s29 = scalar_lea.sflag [#allocation6], %s11963_s17 }
  0x83   : > { %10426 = vmatprep.subr.bf16.mxu0 %v11352_v37  ;;  %v12097_v38 = vrot.slane %v1585_v21, 4  ;;  %v1008_v44 = vor.u32 %v1007_v34, %v1003_v32  ;;  %v1013_v45 = vrot.slane %v1011_v35, 5  ;;  %v11359_v49 = vld [vmem:[#allocation7 + $0x128] sm:$0xff]   ;;  %v9646_v52 = vcombine.low %v12076_v0, %v12082_v6  ;;  %v818_v4 = vld [vmem:[#allocation2 + $0x24] sm:$0xf]  ;;  %p16863_p2 = scmp.ne.s32.totalorder %s16477_s11, 0 }
  0x84   : > { %v999_v43 = vrot.slane %v998_v31, 4  ;;  %v521_v54 = vor.u32 %v519_v56, %v12089_v15  ;;  %v1428_v60 = vsel %vm12031_vm13, %v9598_v28, %v1427_v46  ;;  %v1429_v61 = vrot.slane %v1427_v46, 4  ;;  %v349_v5 = vld [vmem:[#allocation2 + $0x30] sm:$0x1]  ;;  %v12134_v6 = vld [vmem:[%s11967_s19 + $0x18] sm:$0xf] }
  0x85   : > { %v12103_v48 = vld [vmem:[#allocation2 + $0x1c] sm:$0xf]  ;;  %v1009_v37 = vrot.slane %v1008_v44, 4  ;;  %v1430_v63 = vrot.slane %v949_v26, 5  ;;  %v816_v0 = vsel %vm11978_vm3, %v514_v14, %v815_v36  ;;  %v1016_v33 = vshrl.u32 %v12101_v40, 16  ;;  %s11784_s21 = smov [#allocation10]  }
  0x86   : > { %10427 = vmatpush3.bf16.msra.mxu0 %v11353_v20  ;;  %v12114_v53 = vld [vmem:[#allocation2 + $0x1c] sm:$0xf]  ;;  %v1004_v57 = vsel %vm12037_vm14, %v999_v43, %v1003_v32  ;;  %v9694_v58 = vcombine.low %v12099_v39, %v12103_v48  ;;  %817 = vst [vmem:[#allocation2 + $0x20] sm:$0x1] %v816_v0  ;;  %v1019_v47 = vshll.u32 %v12101_v40, 16  ;;  %v522_v12 = vrot.slane %v12089_v15, 4 }
  0x87   : > { %10428 = vmatprep.subr.bf16.mxu0 %v11358_v30  ;;  %v1014_v56 = vsel %vm12037_vm14, %v1009_v37, %v1013_v45  ;;  %v1025_v1 = vshll.u32 %v12114_v53, 16  ;;  %v1029_v3 = vshrl.u32 %v12114_v53, 16  ;;  %v1431_v9 = vsel %vm12031_vm13, %v1429_v61, %v1430_v63  ;;  %v1353_v13 = vld [vmem:[#allocation2 + $0x18] sm:$0xe]  ;;  %v822_v14 = vld [vmem:[#allocation2 + $0x2c] sm:$0x1] }
  0x88   : > { %4148 = vmatprep.mubr.bf16.mxu1 %v9694_v58  ;;  %v9662_v8 = vcombine.low %v1004_v57, %v1014_v56  ;;  %v1018_v10 = vrot.slane %v1016_v33, 4  ;;  %v9678_v16 = vcombine.low %v1428_v60, %v1431_v9  ;;  %v1021_v17 = vrot.slane %v1019_v47, 5  ;;  %v11370_v20 = vld [vmem:[#allocation7 + $0x158] sm:$0xff]   ;;  %v12164_v47 = vld [vmem:[%s11967_s19 + $0x20] sm:$0xf]  ;;  %s11712_s13 = sshll.u32 %s11784_s21, 4  ;;  %s11713_s13 = int_to_ptr.vmem [resolvable:$false] %s11712_s13 }
  0x89   : > { %v12139_v18 = vrot.slane %v1025_v1, 5  ;;  %v1031_v19 = vrot.slane %v1029_v3, 4  ;;  %v529_v23 = vor.u32 %v527_v11, %v526_v41  ;;  %v531_v26 = vrot.slane %v526_v41, 4  ;;  %v454_v34 = vld [vmem:[%s11967_s19 + $0x1c] sm:$0xf]  ;;  %v11377_v1 = vld [vmem:[#allocation7 + $0x110] sm:$0xff]  }
  0x8a   : > { %10429 = vmatpush3.bf16.msra.mxu0 %v11359_v49  ;;  %3987 = vmatprep.mubr.bf16.mxu0 %v9662_v8  ;;  %v819_v15 = vsel %vm12013_vm12, %v521_v54, %v818_v4  ;;  %v12146_v28 = vrot.slane %v1595_v51, 4  ;;  %v1022_v30 = vor.u32 %v1021_v17, %v1018_v10  ;;  %v1434_v32 = vrot.slane %v12114_v53, 5  ;;  %v405_v41 = vld [vmem:[#allocation2 + $0x38] sm:$0x1]  ;;  %v11371_v43 = vld [vmem:[#allocation7 + $0x118] sm:$0xff]   ;;  %v11376_v51 = vld [vmem:[#allocation7 + $0x150] sm:$0xff]  }
  0x8b   : > { %10430 = vmatprep.subr.bf16.mxu0 %v11364_v55  ;;  %3988 = vmatmul.mubr.bf16.gmra.mxu0 %v9646_v52  ;;  %v1032_v31 = vor.u32 %v1031_v19, %v12139_v18  ;;  %820 = vst [vmem:[#allocation2 + $0x24] sm:$0xf] %v819_v15  ;;  %v530_v35 = vsel %vm12005_vm11, %v522_v12, %v529_v23  ;;  %v350_v11 = vsel %vm11978_vm3, 0, %v349_v5  ;;  %v533_v36 = vshrl.u32 %v12134_v6, 16  ;;  %v352_v49 = vld [vmem:[#allocation2 + $0x3c] sm:$0x1] }
  0x8c   : > { %4149 = vmatmul.mubr.bf16.gmra.mxu1 %v9678_v16  ;;  %v823_v42 = vsel %vm11978_vm3, %v531_v26, %v822_v14  ;;  %v1023_v44 = vrot.slane %v1022_v30, 4  ;;  %821 = vst [vmem:[#allocation2 + $0x28] sm:$0xf] %v530_v35  ;;  %v9599_v45 = vrot.slane %v1353_v13, 9  ;;  %v1436_v46 = vrot.slane %v1434_v32, 4  ;;  %v11382_v19 = vld [vmem:[#allocation7 + $0x148] sm:$0xff]  }
  0x8d   : > { %824 = vst [vmem:[#allocation2 + $0x2c] sm:$0x1] %v823_v42  ;;  %351 = vst [vmem:[#allocation2 + $0x30] sm:$0x1] %v350_v11  ;;  %v950_v52 = vld [vmem:[#allocation2 + $0x20] sm:$0x1]  ;;  %v9647_v8 = vcombine.low %v12101_v40, %v12114_v53 }
  0x8e   : > { %10431 = vmatpush3.bf16.msra.mxu0 %v11365_v7  ;;  %v1033_v54 = vrot.slane %v1032_v31, 4  ;;  %v535_v55 = vrot.slane %v533_v36, 7  ;;  %v541_v57 = vshrl.u32 %v454_v34, 16  ;;  %v544_v37 = vshll.u32 %v454_v34, 16  ;;  %v12180_v12 = vld [vmem:[%s11967_s19 + $0x24] sm:$0xf] }
  0x8f   : > { %10432 = vmatprep.subr.bf16.mxu0 %v11370_v20  ;;  %v1035_v58 = vshll.u32 %v950_v52, 16  ;;  %v1437_v60 = vrot.slane %v950_v52, 5  ;;  %v536_v61 = vshll.u32 %v12134_v6, 16  ;;  %v406_v63 = vsel %vm11983_vm4, 0, %v405_v41  ;;  %v11383_v42 = vld [vmem:[#allocation7 + $0x108] sm:$0xff]   ;;  %s11714_s14 = scalar_lea.vmem %s11713_s13, 8192 }
  0x90   : > { %v539_v0 = vrot.slane %v535_v55, 4  ;;  %v543_v33 = vrot.slane %v541_v57, 7  ;;  %407 = vst [vmem:[#allocation2 + $0x38] sm:$0x1] %v406_v63  ;;  %v353_v56 = vsel %vm11978_vm3, 0, %v352_v49  ;;  %v1028_v3 = vsel %vm12037_vm14, %v1023_v44, %v12139_v18 }
  0x91   : > { %v1037_v4 = vrot.slane %v1035_v58, 5  ;;  %v1435_v5 = vsel %vm12031_vm13, %v9599_v45, %v1434_v32  ;;  %v1438_v6 = vsel %vm12031_vm13, %v1436_v46, %v1437_v60  ;;  %354 = vst [vmem:[#allocation2 + $0x3c] sm:$0x1] %v353_v56  ;;  %v538_v16 = vor.u32 %v536_v61, %v535_v55  ;;  %v11384_v61 = vld [vmem:[#allocation7 + $0x1f8] sm:$0xff]  }
  0x92   : > { %10433 = vmatpush3.bf16.msra.mxu0 %v11371_v43  ;;  %v12173_v7 = vld [vmem:[#allocation2 + $0x24] sm:$0xf]  ;;  %v546_v10 = vor.u32 %v544_v37, %v543_v33  ;;  %v550_v18 = vshrl.u32 %v12164_v47, 16  ;;  %v9679_v26 = vcombine.low %v1435_v5, %v1438_v6  ;;  %v548_v31 = vrot.slane %v543_v33, 4  ;;  %v11385_v56 = vld [vmem:[#allocation7 + $0x1b8] sm:$0xff]   ;;  %10536 = vmatprep.subr.bf16.mxu1 %v11384_v61 }
  0x93   : > { %10434 = vmatprep.subr.bf16.mxu0 %v11376_v51  ;;  %v12177_v9 = vld [vmem:[#allocation2 + $0x24] sm:$0xf]  ;;  %v1038_v13 = vsel %vm12037_vm14, %v1033_v54, %v1037_v4  ;;  %v12186_v23 = vld [vmem:[#allocation2 + $0x28] sm:$0xf]  ;;  %v553_v34 = vshll.u32 %v12164_v47, 16  ;;  %v558_v35 = vshrl.u32 %v12180_v12, 16  ;;  %10537 = vmatpush3.bf16.msra.mxu1 %v11385_v56 }
  0x94   : > { %v1040_v14 = vshrl.u32 %v12177_v9, 16  ;;  %v1354_v17 = vld [vmem:[#allocation2 + $0x24] sm:$0xe]  ;;  %v9663_v20 = vcombine.low %v1028_v3, %v1038_v13  ;;  %v12188_v40 = vld [vmem:[#allocation2 + $0x28] sm:$0xf]  ;;  %v547_v15 = vsel %vm12005_vm11, %v539_v0, %v546_v10  ;;  %v9695_v30 = vcombine.low %v12173_v7, %v12186_v23 }
  0x95   : > { %v951_v53 = vld [vmem:[#allocation2 + $0x2c] sm:$0x1]  ;;  %v825_v32 = vld [vmem:[#allocation2 + $0x30] sm:$0xf]  ;;  %828 = vst [vmem:[#allocation2 + $0x34] sm:$0xf] %v547_v15 }
  0x96   : > { %10435 = vmatpush3.bf16.msra.mxu0 %v11377_v1  ;;  %3995 = vmatprep.mubr.bf16.mxu0 %v9663_v20  ;;  %v1042_v11 = vrot.slane %v1040_v14, 4  ;;  %v1043_v36 = vshll.u32 %v12177_v9, 16  ;;  %v1049_v41 = vshll.u32 %v12188_v40, 16  ;;  %v1053_v43 = vshrl.u32 %v12188_v40, 16  ;;  %v11386_v5 = vld [vmem:[#allocation7 + $0x1f0] sm:$0xff]  }
  0x97   : > { %10436 = vmatprep.subr.bf16.mxu0 %v11382_v19  ;;  %4156 = vmatprep.mubr.bf16.mxu1 %v9695_v30  ;;  %v1059_v44 = vshll.u32 %v951_v53, 16  ;;  %v826_v45 = vsel %vm12013_vm12, %v538_v16, %v825_v32  ;;  %v9600_v46 = vrot.slane %v1354_v17, 9  ;;  %v829_v49 = vld [vmem:[#allocation2 + $0x38] sm:$0x1]  ;;  %v1441_v55 = vrot.slane %v12188_v40, 5  ;;  %v11388_v20 = vld [vmem:[#allocation7 + $0x1b0] sm:$0xff]  }
  0x98   : > { %3996 = vmatmul.mubr.bf16.gmra.mxu0 %v9647_v8  ;;  %4157 = vmatmul.mubr.bf16.gmra.mxu1 %v9679_v26  ;;  %v1045_v51 = vrot.slane %v1043_v36, 5  ;;  %v1051_v52 = vrot.slane %v1049_v41, 5  ;;  %v1055_v54 = vrot.slane %v1053_v43, 4  ;;  %827 = vst [vmem:[#allocation2 + $0x30] sm:$0xf] %v826_v45  ;;  %v1444_v37 = vrot.slane %v951_v53, 5 }
  0x99   : > { %v1061_v57 = vrot.slane %v1059_v44, 5  ;;  %v830_v58 = vsel %vm11978_vm3, %v548_v31, %v829_v49  ;;  %v552_v60 = vrot.slane %v550_v18, 7  ;;  %v1443_v33 = vrot.slane %v1441_v55, 4  ;;  %v832_v14 = vld [vmem:[#allocation2 + $0x3c] sm:$0xf]  ;;  %10538 = vmatprep.subr.bf16.mxu1 %v11386_v5 }
  0x9a   : > { %10437 = vmatpush3.bf16.msra.mxu0 %v11383_v42  ;;  %v1046_v63 = vor.u32 %v1045_v51, %v1042_v11  ;;  %v1056_v0 = vor.u32 %v1055_v54, %v1051_v52  ;;  %831 = vst [vmem:[#allocation2 + $0x38] sm:$0x1] %v830_v58  ;;  %v1442_v47 = vsel %vm12031_vm13, %v9600_v46, %v1441_v55  ;;  %v12206_v3 = vrot.slane %v558_v35, 7  ;;  %v11390_v31 = vld [vmem:[#allocation7 + $0x1e8] sm:$0xff]   ;;  %v408_v43 = vld [vmem:[#allocation2 + $0x44] sm:$0x1] }
  0x9b   : > { %v555_v1 = vor.u32 %v553_v34, %v552_v60  ;;  %v561_v4 = vshll.u32 %v12180_v12, 16  ;;  %v1445_v10 = vsel %vm12031_vm13, %v1443_v33, %v1444_v37  ;;  %v9648_v17 = vcombine.low %v12177_v9, %v12188_v40  ;;  %10539 = vmatpush3.bf16.msra.mxu1 %v11388_v20  ;;  %v11391_v44 = vld [vmem:[#allocation7 + $0x1a8] sm:$0xff]   ;;  %v11392_v54 = vld [vmem:[#allocation7 + $0x1e0] sm:$0xff]  }
  0x9c   : > { %v1047_v6 = vrot.slane %v1046_v63, 4  ;;  %v1057_v8 = vrot.slane %v1056_v0, 4  ;;  %v12211_v13 = vld [vmem:[#allocation2 + $0x34] sm:$0xf]  ;;  %v556_v19 = vrot.slane %v552_v60, 4  ;;  %v9680_v15 = vcombine.low %v1442_v47, %v1445_v10  ;;  %10540 = vmatprep.subr.bf16.mxu1 %v11390_v31 }
  0x9d   : > { %v12213_v16 = vld [vmem:[#allocation2 + $0x34] sm:$0xf]  ;;  %v1073_v18 = vshll.u32 %v12211_v13, 16  ;;  %v1077_v12 = vshrl.u32 %v12211_v13, 16  ;;  %v563_v30 = vor.u32 %v561_v4, %v12206_v3  ;;  %v833_v42 = vsel %vm12013_vm12, %v555_v1, %v832_v14  ;;  %v457_v60 = vld [vmem:[%s11967_s19 + $0x28] sm:$0xf] }
  0x9e   : > { %16503 = vst [vmem:[#allocation20_spill] sm:$0xff] %v12213_v16  ;;  %v1052_v26 = vsel %vm12037_vm14, %v1047_v6, %v1051_v52  ;;  %v1062_v53 = vsel %vm12037_vm14, %v1057_v8, %v1061_v57  ;;  %834 = vst [vmem:[#allocation2 + $0x3c] sm:$0xf] %v833_v42  ;;  %v355_v52 = vld [vmem:[#allocation2 + $0x48] sm:$0x1]  ;;  %v1603_v55 = vshrl.u32 %v12099_v39, 16 }
  0x9f   : > { %v9664_v32 = vcombine.low %v1052_v26, %v1062_v53  ;;  %v12224_v34 = vld [vmem:[#allocation2 + $0x30] sm:$0xf]  ;;  %v12228_v40 = vrot.slane %v1073_v18, 5  ;;  %v1079_v35 = vrot.slane %v1077_v12, 4  ;;  %v564_v51 = vsel %vm12005_vm11, %v556_v19, %v563_v30  ;;  %v458_v4 = vld [vmem:[%s11967_s19 + $0x2c] sm:$0xf]  ;;  %10541 = vmatpush3.bf16.msra.mxu1 %v11391_v44 }
  0xa0   : > { %v12226_v9 = vld [vmem:[#allocation2 + $0x30] sm:$0xf]  ;;  %v9696_v11 = vcombine.low %v12224_v34, %v12213_v16  ;;  %v1606_v57 = vshll.u32 %v12099_v39, 16  ;;  %835 = vst [vmem:[#allocation2 + $0x40] sm:$0xf] %v564_v51  ;;  %v1448_v33 = vrot.slane %v12211_v13, 5  ;;  %10542 = vmatprep.subr.bf16.mxu1 %v11392_v54 }
  0xa1   : > { %v1064_v36 = vshrl.u32 %v12226_v9, 16  ;;  %v1355_v41 = vld [vmem:[#allocation2 + $0x30] sm:$0xe]  ;;  %4003 = vmatprep.mubr.bf16.mxu0 %v9664_v32  ;;  %v952_v45 = vld [vmem:[#allocation2 + $0x38] sm:$0x1]  ;;  %v1067_v46 = vshll.u32 %v12226_v9, 16  ;;  %v1080_v49 = vor.u32 %v1079_v35, %v12228_v40 }
  0xa2   : > { %4164 = vmatprep.mubr.bf16.mxu1 %v9696_v11  ;;  %4004 = vmatmul.mubr.bf16.gmra.mxu0 %v9648_v17  ;;  %v1083_v58 = vshll.u32 %v952_v45, 16  ;;  %v9601_v0 = vrot.slane %v1355_v41, 9  ;;  %v1451_v47 = vrot.slane %v952_v45, 5  ;;  %v409_v1 = vsel %vm11983_vm4, 0, %v408_v43 }
  0xa3   : > { %v1066_v37 = vrot.slane %v1064_v36, 4  ;;  %4165 = vmatmul.mubr.bf16.gmra.mxu1 %v9680_v15  ;;  %v1069_v61 = vrot.slane %v1067_v46, 5  ;;  %v1081_v63 = vrot.slane %v1080_v49, 4  ;;  %v356_v39 = vsel %vm11978_vm3, 0, %v355_v52  ;;  %410 = vst [vmem:[#allocation2 + $0x44] sm:$0x1] %v409_v1 }
  0xa4   : > { %v1085_v56 = vrot.slane %v1083_v58, 5  ;;  %v1450_v6 = vrot.slane %v1448_v33, 4  ;;  %357 = vst [vmem:[#allocation2 + $0x48] sm:$0x1] %v356_v39  ;;  %v567_v8 = vshrl.u32 %v457_v60, 16  ;;  %v12248_v10 = vrot.slane %v1603_v55, 4 }
  0xa5   : > { %v1070_v5 = vor.u32 %v1069_v61, %v1066_v37  ;;  %v1627_v14 = vshrl.u32 %v12173_v7, 16  ;;  %v1449_v17 = vsel %vm12031_vm13, %v9601_v0, %v1448_v33  ;;  %v570_v18 = vshll.u32 %v457_v60, 16  ;;  %v12257_v26 = vld [vmem:[#allocation2 + $0x3c] sm:$0xf]  ;;  %v411_v49 = vld [vmem:[#allocation2 + $0x50] sm:$0x1] }
  0xa6   : > { %v1086_v19 = vsel %vm12037_vm14, %v1081_v63, %v1085_v56  ;;  %v1452_v20 = vsel %vm12031_vm13, %v1450_v6, %v1451_v47  ;;  %v569_v53 = vrot.slane %v567_v8, 7  ;;  %v1630_v15 = vshll.u32 %v12173_v7, 16  ;;  %v12261_v31 = vld [vmem:[#allocation2 + $0x3c] sm:$0xf]  ;;  %v12287_v56 = vld [vmem:[%s11967_s19 + $0x30] sm:$0xf] }
  0xa7   : > { %v1071_v12 = vrot.slane %v1070_v5, 4  ;;  %v565_v30 = vrot.slane %v12206_v3, 4  ;;  %v1088_v32 = vshrl.u32 %v12257_v26, 16  ;;  %v575_v35 = vshrl.u32 %v458_v4, 16  ;;  %v12267_v11 = vld [vmem:[#allocation2 + $0x40] sm:$0xf] }
  0xa8   : > { %16504 = vst [vmem:[#allocation21_spill] sm:$0xff] %v12267_v11  ;;  %v9649_v36 = vcombine.low %v12226_v9, %v12211_v13  ;;  %v12271_v41 = vld [vmem:[#allocation2 + $0x40] sm:$0xf]  ;;  %v1091_v7 = vshll.u32 %v12257_v26, 16  ;;  %v572_v43 = vor.u32 %v570_v18, %v569_v53  ;;  %v9681_v44 = vcombine.low %v1449_v17, %v1452_v20  ;;  %v358_v13 = vld [vmem:[#allocation2 + $0x54] sm:$0x1] }
  0xa9   : > { %v1076_v42 = vsel %vm12037_vm14, %v1071_v12, %v12228_v40  ;;  %v573_v45 = vrot.slane %v569_v53, 4  ;;  %v578_v46 = vshll.u32 %v458_v4, 16  ;;  %v9697_v51 = vcombine.low %v12261_v31, %v12267_v11  ;;  %v11394_v9 = vld [vmem:[#allocation7 + $0x1a0] sm:$0xff]   ;;  %v460_v47 = vld [vmem:[%s11967_s19 + $0x34] sm:$0xf] }
  0xaa   : > { %v9665_v3 = vcombine.low %v1076_v42, %v1086_v19  ;;  %v1090_v52 = vrot.slane %v1088_v32, 4  ;;  %v1093_v40 = vrot.slane %v1091_v7, 5  ;;  %v1097_v54 = vshll.u32 %v12271_v41, 16  ;;  %v836_v55 = vld [vmem:[#allocation2 + $0x44] sm:$0x1]  ;;  %v11396_v1 = vld [vmem:[#allocation7 + $0x140] sm:$0xff]   ;;  %10543 = vmatpush3.bf16.msra.mxu1 %v11394_v9 }
  0xab   : > { %v1101_v37 = vshrl.u32 %v12271_v41, 16  ;;  %v12278_v58 = vrot.slane %v575_v35, 7  ;;  %v839_v60 = vld [vmem:[#allocation2 + $0x48] sm:$0xf]  ;;  %v12280_v61 = vrot.slane %v1606_v57, 5  ;;  %4172 = vmatprep.mubr.bf16.mxu1 %v9697_v51  ;;  %v837_v63 = vsel %vm11978_vm3, %v565_v30, %v836_v55  ;;  %v11397_v8 = vld [vmem:[#allocation7 + $0x100] sm:$0xff]   ;;  %10438 = vmatprep.subr.bf16.mxu0 %v11396_v1 }
  0xac   : > { %4011 = vmatprep.mubr.bf16.mxu0 %v9665_v3  ;;  %v1094_v0 = vor.u32 %v1093_v40, %v1090_v52  ;;  %v840_v33 = vsel %vm12013_vm12, %v572_v43, %v839_v60  ;;  %4173 = vmatmul.mubr.bf16.gmra.mxu1 %v9681_v44  ;;  %838 = vst [vmem:[#allocation2 + $0x44] sm:$0x1] %v837_v63  ;;  %v12291_v4 = vrot.slane %v1097_v54, 5  ;;  %v1356_v6 = vld [vmem:[#allocation2 + $0x3c] sm:$0xe]  ;;  %v12294_v17 = vrot.slane %v1627_v14, 4 }
  0xad   : > { %4012 = vmatmul.mubr.bf16.gmra.mxu0 %v9649_v36  ;;  %v1103_v57 = vrot.slane %v1101_v37, 4  ;;  %v580_v5 = vor.u32 %v578_v46, %v12278_v58  ;;  %841 = vst [vmem:[#allocation2 + $0x48] sm:$0xf] %v840_v33  ;;  %v12296_v18 = vrot.slane %v1630_v15, 5  ;;  %v412_v12 = vsel %vm11983_vm4, 0, %v411_v49  ;;  %v11398_v60 = vld [vmem:[#allocation7 + $0x1d8] sm:$0xff]  }
  0xae   : > { %v359_v19 = vsel %vm11978_vm3, 0, %v358_v13  ;;  %v414_v20 = vld [vmem:[#allocation2 + $0x5c] sm:$0x1]  ;;  %v1455_v14 = vrot.slane %v12271_v41, 5  ;;  %413 = vst [vmem:[#allocation2 + $0x50] sm:$0x1] %v412_v12  ;;  %10439 = vmatpush3.bf16.msra.mxu0 %v11397_v8  ;;  %v9650_v9 = vcombine.low %v12257_v26, %v12271_v41  ;;  %10544 = vmatprep.subr.bf16.mxu1 %v11398_v60 }
  0xaf   : > { %v581_v30 = vsel %vm12005_vm11, %v573_v45, %v580_v5  ;;  %360 = vst [vmem:[#allocation2 + $0x54] sm:$0x1] %v359_v19  ;;  %v584_v15 = vshrl.u32 %v12287_v56, 16  ;;  %v361_v32 = vld [vmem:[#allocation2 + $0x60] sm:$0x1]  ;;  %v12308_v42 = vrot.slane %v1094_v0, 4  ;;  %v1104_v3 = vor.u32 %v1103_v57, %v12291_v4 }
  0xb0   : > { %842 = vst [vmem:[#allocation2 + $0x4c] sm:$0xf] %v581_v30  ;;  %v9602_v36 = vrot.slane %v1356_v6, 9  ;;  %v592_v7 = vshrl.u32 %v460_v47, 16  ;;  %v12311_v43 = vld [vmem:[%s11967_s19 + $0x38] sm:$0xf] }
  0xb1   : > { %v586_v44 = vrot.slane %v584_v15, 7  ;;  %v595_v45 = vshll.u32 %v460_v47, 16  ;;  %v415_v46 = vsel %vm11983_vm4, 0, %v414_v20  ;;  %v1651_v49 = vshrl.u32 %v12224_v34, 16  ;;  %v12323_v54 = vld [vmem:[%s11967_s19 + $0x3c] sm:$0xf] }
  0xb2   : > { %v587_v51 = vshll.u32 %v12287_v56, 16  ;;  %v12318_v52 = vrot.slane %v592_v7, 7  ;;  %416 = vst [vmem:[#allocation2 + $0x5c] sm:$0x1] %v415_v46  ;;  %v362_v40 = vsel %vm11978_vm3, 0, %v361_v32  ;;  %v1654_v13 = vshll.u32 %v12224_v34, 16 }
  0xb3   : > { %v1457_v55 = vrot.slane %v1455_v14, 4  ;;  %v590_v37 = vrot.slane %v586_v44, 4  ;;  %363 = vst [vmem:[#allocation2 + $0x60] sm:$0x1] %v362_v40  ;;  %v953_v63 = vld [vmem:[#allocation2 + $0x44] sm:$0x1]  ;;  %v1100_v0 = vsel %vm12037_vm14, %v12308_v42, %v12291_v4  ;;  %v1456_v56 = vsel %vm12031_vm13, %v9602_v36, %v1455_v14 }
  0xb4   : > { %v582_v33 = vrot.slane %v12278_v58, 4  ;;  %v12335_v47 = vld [vmem:[#allocation2 + $0x48] sm:$0xf]  ;;  %v597_v1 = vor.u32 %v595_v45, %v12318_v52  ;;  %v1105_v57 = vrot.slane %v1104_v3, 4  ;;  %v1107_v5 = vshll.u32 %v953_v63, 16  ;;  %v11400_v3 = vld [vmem:[#allocation7 + $0x1d0] sm:$0xff]  }
  0xb5   : > { %v12338_v6 = vld [vmem:[#allocation2 + $0x48] sm:$0xf]  ;;  %v1458_v8 = vrot.slane %v953_v63, 5  ;;  %v601_v12 = vshrl.u32 %v12311_v43, 16  ;;  %v843_v19 = vld [vmem:[#allocation2 + $0x50] sm:$0x1]  ;;  %v589_v20 = vor.u32 %v587_v51, %v586_v44 }
  0xb6   : > { %v1112_v4 = vshrl.u32 %v12335_v47, 16  ;;  %v1115_v58 = vshll.u32 %v12335_v47, 16  ;;  %v598_v30 = vsel %vm12005_vm11, %v590_v37, %v597_v1  ;;  %v11399_v14 = vld [vmem:[#allocation7 + $0x198] sm:$0xff]   ;;  %v1109_v15 = vrot.slane %v1107_v5, 5  ;;  %v846_v37 = vld [vmem:[#allocation2 + $0x54] sm:$0xf] }
  0xb7   : > { %v12345_v32 = vld [vmem:[#allocation2 + $0x4c] sm:$0xf]  ;;  %v1459_v42 = vsel %vm12031_vm13, %v1457_v55, %v1458_v8  ;;  %849 = vst [vmem:[#allocation2 + $0x58] sm:$0xf] %v598_v30  ;;  %v604_v36 = vshll.u32 %v12311_v43, 16  ;;  %v609_v7 = vshrl.u32 %v12323_v54, 16  ;;  %v844_v46 = vsel %vm11978_vm3, %v582_v33, %v843_v19  ;;  %10545 = vmatpush3.bf16.msra.mxu1 %v11399_v14 }
  0xb8   : > { %16505 = vst [vmem:[#allocation22_spill] sm:$0xff] %v12345_v32  ;;  %v9698_v45 = vcombine.low %v12338_v6, %v12345_v32  ;;  %v9682_v44 = vcombine.low %v1456_v56, %v1459_v42  ;;  %v12355_v51 = vld [vmem:[#allocation2 + $0x4c] sm:$0xf]  ;;  %v599_v40 = vrot.slane %v12318_v52, 4  ;;  %v11402_v55 = vld [vmem:[#allocation7 + $0x190] sm:$0xff]   ;;  %v1110_v43 = vsel %vm12037_vm14, %v1105_v57, %v1109_v15  ;;  %10546 = vmatprep.subr.bf16.mxu1 %v11400_v3  ;;  %v11404_v56 = vld [vmem:[#allocation7 + $0x1c8] sm:$0xff]  }
  0xb9   : > { %845 = vst [vmem:[#allocation2 + $0x50] sm:$0x1] %v844_v46  ;;  %v1114_v60 = vrot.slane %v1112_v4, 4  ;;  %v1117_v63 = vrot.slane %v1115_v58, 5  ;;  %v1121_v1 = vshll.u32 %v12355_v51, 16  ;;  %v9666_v8 = vcombine.low %v1100_v0, %v1110_v43 }
  0xba   : > { %v850_v5 = vld [vmem:[#allocation2 + $0x5c] sm:$0x1]  ;;  %4180 = vmatprep.mubr.bf16.mxu1 %v9698_v45  ;;  %v1125_v33 = vshrl.u32 %v12355_v51, 16  ;;  %v847_v52 = vsel %vm12013_vm12, %v589_v20, %v846_v37  ;;  %v1357_v19 = vld [vmem:[#allocation2 + $0x48] sm:$0xe]  ;;  %v612_v30 = vshll.u32 %v12323_v54, 16 }
  0xbb   : > { %v417_v14 = vld [vmem:[#allocation2 + $0x68] sm:$0x1]  ;;  %v12365_v57 = vrot.slane %v1651_v49, 4  ;;  %4181 = vmatmul.mubr.bf16.gmra.mxu1 %v9682_v44  ;;  %v1118_v4 = vor.u32 %v1117_v63, %v1114_v60  ;;  %v12367_v58 = vrot.slane %v1121_v1, 5  ;;  %848 = vst [vmem:[#allocation2 + $0x54] sm:$0xf] %v847_v52  ;;  %4019 = vmatprep.mubr.bf16.mxu0 %v9666_v8  ;;  %v851_v42 = vsel %vm11978_vm3, %v599_v40, %v850_v5 }
  0xbc   : > { %v1462_v15 = vrot.slane %v12355_v51, 5  ;;  %v1127_v0 = vrot.slane %v1125_v33, 4  ;;  %v603_v3 = vrot.slane %v601_v12, 7  ;;  %v12372_v20 = vrot.slane %v609_v7, 7  ;;  %10547 = vmatpush3.bf16.msra.mxu1 %v11402_v55  ;;  %v11405_v54 = vld [vmem:[#allocation7 + $0x188] sm:$0xff]   ;;  %4020 = vmatmul.mubr.bf16.gmra.mxu0 %v9650_v9  ;;  %v11406_v37 = vld [vmem:[#allocation7 + $0x1c0] sm:$0xff]  }
  0xbd   : > { %16506 = vst [vmem:[#allocation23_spill] sm:$0xff] %v12365_v57  ;;  %v1675_v49 = vshrl.u32 %v12261_v31, 16  ;;  %v9603_v45 = vrot.slane %v1357_v19, 9  ;;  %852 = vst [vmem:[#allocation2 + $0x5c] sm:$0x1] %v851_v42  ;;  %v418_v46 = vsel %vm11983_vm4, 0, %v417_v14  ;;  %10548 = vmatprep.subr.bf16.mxu1 %v11404_v56 }
  0xbe   : > { %v853_v44 = vld [vmem:[#allocation2 + $0x60] sm:$0xf]  ;;  %v1128_v12 = vor.u32 %v1127_v0, %v12367_v58  ;;  %v12381_v7 = vld [vmem:[#allocation2 + $0x58] sm:$0xf]  ;;  %v606_v40 = vor.u32 %v604_v36, %v603_v3  ;;  %v607_v55 = vrot.slane %v603_v3, 4  ;;  %v614_v43 = vor.u32 %v612_v30, %v12372_v20  ;;  %v11407_v63 = vld [vmem:[#allocation7 + $0x180] sm:$0xff]  }
  0xbf   : > { %419 = vst [vmem:[#allocation2 + $0x68] sm:$0x1] %v418_v46  ;;  %v12386_v26 = vrot.slane %v1654_v13, 5  ;;  %v1119_v41 = vrot.slane %v1118_v4, 4  ;;  %v1145_v9 = vshll.u32 %v12381_v7, 16  ;;  %v1149_v60 = vshrl.u32 %v12381_v7, 16 }
  0xc0   : > { %v954_v1 = vld [vmem:[#allocation2 + $0x50] sm:$0x1]  ;;  %v1129_v5 = vrot.slane %v1128_v12, 4  ;;  %v12390_v56 = vld [vmem:[#allocation2 + $0x58] sm:$0xf]  ;;  %v1464_v8 = vrot.slane %v1462_v15, 4  ;;  %v615_v36 = vsel %vm12005_vm11, %v607_v55, %v614_v43  ;;  %v854_v33 = vsel %vm12013_vm12, %v606_v40, %v853_v44  ;;  %10549 = vmatpush3.bf16.msra.mxu1 %v11405_v54 }
  0xc1   : > { %16507 = vst [vmem:[#allocation24_spill] sm:$0xff] %v12390_v56  ;;  %v1131_v34 = vshll.u32 %v954_v1, 16  ;;  %v1465_v13 = vrot.slane %v954_v1, 5  ;;  %v12396_v52 = vrot.slane %v1145_v9, 5  ;;  %v1151_v19 = vrot.slane %v1149_v60, 4  ;;  %10550 = vmatprep.subr.bf16.mxu1 %v11406_v37 }
  0xc2   : > { %855 = vst [vmem:[#allocation2 + $0x60] sm:$0xf] %v854_v33  ;;  %856 = vst [vmem:[#allocation2 + $0x64] sm:$0xf] %v615_v36  ;;  %v12398_v30 = vrot.slane %v1675_v49, 4  ;;  %v1678_v14 = vshll.u32 %v12261_v31, 16  ;;  %v1463_v0 = vsel %vm12031_vm13, %v9603_v45, %v1462_v15  ;;  %v1124_v3 = vsel %vm12037_vm14, %v1119_v41, %v12367_v58 }
  0xc3   : > { %v12401_v4 = vld [vmem:[#allocation2 + $0x54] sm:$0xf]  ;;  %v1133_v54 = vrot.slane %v1131_v34, 5  ;;  %v616_v49 = vrot.slane %v12372_v20, 4  ;;  %v364_v37 = vld [vmem:[#allocation2 + $0x6c] sm:$0x1]  ;;  %v1466_v12 = vsel %vm12031_vm13, %v1464_v8, %v1465_v13  ;;  %v1152_v55 = vor.u32 %v1151_v19, %v12396_v52 }
  0xc4   : > { %v12405_v42 = vld [vmem:[#allocation2 + $0x54] sm:$0xf]  ;;  %v9699_v44 = vcombine.low %v12401_v4, %v12390_v56  ;;  %v11408_v31 = vld [vmem:[#allocation7 + $0x238] sm:$0xff]   ;;  %v955_v40 = vld [vmem:[#allocation2 + $0x5c] sm:$0x1]  ;;  %10551 = vmatpush3.bf16.msra.mxu1 %v11407_v63  ;;  %v1699_v58 = vshrl.u32 %v12338_v6, 16  ;;  %v9651_v20 = vcombine.low %v12335_v47, %v12355_v51  ;;  %v9683_v41 = vcombine.low %v1463_v0, %v1466_v12 }
  0xc5   : > { %v1358_v46 = vld [vmem:[#allocation2 + $0x54] sm:$0xe]  ;;  %v1136_v15 = vshrl.u32 %v12405_v42, 16  ;;  %v1139_v45 = vshll.u32 %v12405_v42, 16  ;;  %v1134_v43 = vsel %vm12037_vm14, %v1129_v5, %v1133_v54  ;;  %11144 = vmatprep.subr.bf16.mxu0 %v11408_v31  ;;  %v1702_v60 = vshll.u32 %v12338_v6, 16 }
  0xc6   : > { %4188 = vmatprep.mubr.bf16.mxu1 %v9699_v44  ;;  %v857_v9 = vld [vmem:[#allocation2 + $0x68] sm:$0x1]  ;;  %v9667_v1 = vcombine.low %v1124_v3, %v1134_v43  ;;  %v1153_v33 = vrot.slane %v1152_v55, 4  ;;  %v1155_v63 = vshll.u32 %v955_v40, 16  ;;  %v9604_v34 = vrot.slane %v1358_v46, 9 }
  0xc7   : > { %v1138_v8 = vrot.slane %v1136_v15, 4  ;;  %v1141_v36 = vrot.slane %v1139_v45, 5  ;;  %4189 = vmatmul.mubr.bf16.gmra.mxu1 %v9683_v41  ;;  %v1469_v13 = vrot.slane %v12381_v7, 5  ;;  %v1472_v47 = vrot.slane %v955_v40, 5  ;;  %v463_v15 = vld [vmem:[%s11967_s19 + $0x40] sm:$0xf] }
  0xc8   : > { %4027 = vmatprep.mubr.bf16.mxu0 %v9667_v1  ;;  %v858_v6 = vsel %vm11978_vm3, %v616_v49, %v857_v9  ;;  %v365_v51 = vsel %vm11978_vm3, 0, %v364_v37  ;;  %v12433_v0 = vrot.slane %v1678_v14, 5  ;;  %v12436_v44 = vrot.slane %v1699_v58, 4  ;;  %v12482_v35 = vld [vmem:[%s11967_s19 + $0x54] sm:$0xf] }
  0xc9   : > { %v1142_v5 = vor.u32 %v1141_v36, %v1138_v8  ;;  %v12425_v19 = vld [vmem:[#allocation2 + $0x60] sm:$0xf]  ;;  %v12427_v54 = vld [vmem:[#allocation2 + $0x64] sm:$0xf]  ;;  %4028 = vmatmul.mubr.bf16.gmra.mxu0 %v9651_v20  ;;  %v1157_v46 = vrot.slane %v1155_v63, 5  ;;  %v1470_v37 = vsel %vm12031_vm13, %v9604_v34, %v1469_v13  ;;  %v1471_v14 = vrot.slane %v1469_v13, 4 }
  0xca   : > { %16508 = vst [vmem:[#allocation25_spill] sm:$0xff] %v12427_v54  ;;  %859 = vst [vmem:[#allocation2 + $0x68] sm:$0x1] %v858_v6  ;;  %v12438_v31 = vld [vmem:[#allocation2 + $0x60] sm:$0xf]  ;;  %v9700_v49 = vcombine.low %v12425_v19, %v12427_v54  ;;  %v12447_v45 = vrot.slane %v1702_v60, 5  ;;  %v9652_v58 = vcombine.low %v12405_v42, %v12381_v7 }
  0xcb   : > { %366 = vst [vmem:[#allocation2 + $0x6c] sm:$0x1] %v365_v51  ;;  %v1143_v12 = vrot.slane %v1142_v5, 4  ;;  %v12444_v40 = vld [vmem:[#allocation2 + $0x64] sm:$0xf]  ;;  %v1158_v55 = vsel %vm12037_vm14, %v1153_v33, %v1157_v46  ;;  %v1160_v43 = vshrl.u32 %v12438_v31, 16  ;;  %v1473_v9 = vsel %vm12031_vm13, %v1471_v14, %v1472_v47 }
  0xcc   : > { %v464_v20 = vld [vmem:[%s11967_s19 + $0x44] sm:$0xf]  ;;  %4196 = vmatprep.mubr.bf16.mxu1 %v9700_v49  ;;  %v1163_v60 = vshll.u32 %v12438_v31, 16  ;;  %v1169_v1 = vshll.u32 %v12444_v40, 16  ;;  %v9684_v36 = vcombine.low %v1470_v37, %v1473_v9  ;;  %v1173_v7 = vshrl.u32 %v12444_v40, 16 }
  0xcd   : > { %v1148_v41 = vsel %vm12037_vm14, %v1143_v12, %v12396_v52  ;;  %v1162_v33 = vrot.slane %v1160_v43, 4  ;;  %v618_v34 = vshrl.u32 %v463_v15, 16  ;;  %v621_v13 = vshll.u32 %v463_v15, 16  ;;  %v420_v14 = vld [vmem:[#allocation2 + $0x74] sm:$0x1] }
  0xce   : > { %v9668_v8 = vcombine.low %v1148_v41, %v1158_v55  ;;  %v1165_v42 = vrot.slane %v1163_v60, 5  ;;  %v1171_v63 = vrot.slane %v1169_v1, 5  ;;  %v1175_v52 = vrot.slane %v1173_v7, 4  ;;  %v367_v55 = vld [vmem:[#allocation2 + $0x78] sm:$0x1] }
  0xcf   : > { %4197 = vmatmul.mubr.bf16.gmra.mxu1 %v9684_v36  ;;  %v626_v47 = vshrl.u32 %v464_v20, 16  ;;  %v629_v6 = vshll.u32 %v464_v20, 16  ;;  %v1723_v51 = vshrl.u32 %v12401_v4, 16  ;;  %v620_v37 = vrot.slane %v618_v34, 7  ;;  %v1359_v60 = vld [vmem:[#allocation2 + $0x60] sm:$0xe] }
  0xd0   : > { %4035 = vmatprep.mubr.bf16.mxu0 %v9668_v8  ;;  %v1166_v49 = vor.u32 %v1165_v42, %v1162_v33  ;;  %v1176_v15 = vor.u32 %v1175_v52, %v1171_v63  ;;  %v465_v1 = vld [vmem:[%s11967_s19 + $0x48] sm:$0xf]  ;;  %v1476_v7 = vrot.slane %v12444_v40, 5  ;;  %v466_v46 = vld [vmem:[%s11967_s19 + $0x4c] sm:$0xf]  ;;  %v9653_v52 = vcombine.low %v12438_v31, %v12444_v40 }
  0xd1   : > { %v956_v12 = vld [vmem:[#allocation2 + $0x68] sm:$0x1]  ;;  %4036 = vmatmul.mubr.bf16.gmra.mxu0 %v9652_v58  ;;  %v12466_v41 = vrot.slane %v626_v47, 7  ;;  %v623_v8 = vor.u32 %v621_v13, %v620_v37  ;;  %v624_v36 = vrot.slane %v620_v37, 4  ;;  %v423_v33 = vld [vmem:[#allocation2 + $0x80] sm:$0x1] }
  0xd2   : > { %v1179_v43 = vshll.u32 %v956_v12, 16  ;;  %v860_v9 = vld [vmem:[#allocation2 + $0x6c] sm:$0xf]  ;;  %v1167_v20 = vrot.slane %v1166_v49, 4  ;;  %v1177_v42 = vrot.slane %v1176_v15, 4  ;;  %v9605_v37 = vrot.slane %v1359_v60, 9 }
  0xd3   : > { %v631_v58 = vor.u32 %v629_v6, %v12466_v41  ;;  %v370_v47 = vld [vmem:[#allocation2 + $0x84] sm:$0x1]  ;;  %v12475_v5 = vld [vmem:[%s11967_s19 + $0x50] sm:$0xf]  ;;  %v861_v13 = vsel %vm12013_vm12, %v623_v8, %v860_v9  ;;  %v1479_v3 = vrot.slane %v956_v12, 5  ;;  %v421_v40 = vsel %vm11983_vm4, 0, %v420_v14 }
  0xd4   : > { %v1181_v34 = vrot.slane %v1179_v43, 5  ;;  %v1172_v49 = vsel %vm12037_vm14, %v1167_v20, %v1171_v63  ;;  %v426_v15 = vld [vmem:[#allocation2 + $0x8c] sm:$0x1]  ;;  %862 = vst [vmem:[#allocation2 + $0x6c] sm:$0xf] %v861_v13  ;;  %v368_v63 = vsel %vm11978_vm3, 0, %v367_v55 }
  0xd5   : > { %v632_v31 = vsel %vm12005_vm11, %v624_v36, %v631_v58  ;;  %v373_v43 = vld [vmem:[#allocation2 + $0x90] sm:$0x1]  ;;  %v1478_v12 = vrot.slane %v1476_v7, 4  ;;  %422 = vst [vmem:[#allocation2 + $0x74] sm:$0x1] %v421_v40  ;;  %v635_v60 = vshrl.u32 %v465_v1, 16 }
  0xd6   : > { %v1182_v6 = vsel %vm12037_vm14, %v1177_v42, %v1181_v34  ;;  %863 = vst [vmem:[#allocation2 + $0x70] sm:$0xf] %v632_v31  ;;  %369 = vst [vmem:[#allocation2 + $0x78] sm:$0x1] %v368_v63  ;;  %v1726_v20 = vshll.u32 %v12401_v4, 16  ;;  %v643_v8 = vshrl.u32 %v466_v46, 16 }
  0xd7   : > { %v9669_v9 = vcombine.low %v1172_v49, %v1182_v6  ;;  %v646_v42 = vshll.u32 %v466_v46, 16  ;;  %v424_v36 = vsel %vm11983_vm4, 0, %v423_v33  ;;  %v637_v34 = vrot.slane %v635_v60, 7  ;;  %v376_v56 = vld [vmem:[#allocation2 + $0x9c] sm:$0x1] }
  0xd8   : > { %v638_v14 = vshll.u32 %v465_v1, 16  ;;  %425 = vst [vmem:[#allocation2 + $0x80] sm:$0x1] %v424_v36  ;;  %v371_v55 = vsel %vm11978_vm3, 0, %v370_v47  ;;  %v652_v58 = vshrl.u32 %v12475_v5, 16  ;;  %v633_v49 = vrot.slane %v12466_v41, 4 }
  0xd9   : > { %4043 = vmatprep.mubr.bf16.mxu0 %v9669_v9  ;;  %v645_v13 = vrot.slane %v643_v8, 7  ;;  %372 = vst [vmem:[#allocation2 + $0x84] sm:$0x1] %v371_v55  ;;  %v660_v6 = vshrl.u32 %v12482_v35, 16  ;;  %v427_v46 = vsel %vm11983_vm4, 0, %v426_v15  ;;  %v1477_v33 = vsel %vm12031_vm13, %v9605_v37, %v1476_v7 }
  0xda   : > { %4044 = vmatmul.mubr.bf16.gmra.mxu0 %v9653_v52  ;;  %v1480_v1 = vsel %vm12031_vm13, %v1478_v12, %v1479_v3  ;;  %v641_v31 = vrot.slane %v637_v34, 4  ;;  %428 = vst [vmem:[#allocation2 + $0x8c] sm:$0x1] %v427_v46  ;;  %v374_v47 = vsel %vm11978_vm3, 0, %v373_v43  ;;  %v12510_v41 = vrot.slane %v1723_v51, 4 }
  0xdb   : > { %v648_v52 = vor.u32 %v646_v42, %v645_v13  ;;  %v654_v40 = vrot.slane %v652_v58, 7  ;;  %v655_v63 = vshll.u32 %v12475_v5, 16  ;;  %375 = vst [vmem:[#allocation2 + $0x90] sm:$0x1] %v374_v47  ;;  %v12513_v15 = vld [vmem:[#allocation2 + $0x6c] sm:$0xf]  ;;  %v640_v37 = vor.u32 %v638_v14, %v637_v34 }
  0xdc   : > { %v12515_v7 = vld [vmem:[#allocation2 + $0x6c] sm:$0xf]  ;;  %v662_v3 = vrot.slane %v660_v6, 7  ;;  %v663_v9 = vshll.u32 %v12482_v35, 16  ;;  %v12520_v12 = vrot.slane %v1726_v20, 5  ;;  %v1747_v4 = vshrl.u32 %v12425_v19, 16 }
  0xdd   : > { %v12523_v51 = vld [vmem:[#allocation2 + $0x70] sm:$0xf]  ;;  %v9685_v60 = vcombine.low %v1477_v33, %v1480_v1  ;;  %v864_v5 = vld [vmem:[#allocation2 + $0x74] sm:$0x1]  ;;  %v649_v8 = vsel %vm12005_vm11, %v641_v31, %v648_v52  ;;  %v1184_v20 = vshrl.u32 %v12515_v7, 16  ;;  %v650_v34 = vrot.slane %v645_v13, 4 }
  0xde   : > { %16509 = vst [vmem:[#allocation26_spill] sm:$0xff] %v12523_v51  ;;  %v9701_v42 = vcombine.low %v12513_v15, %v12523_v51  ;;  %v865_v35 = vsel %vm11978_vm3, %v633_v49, %v864_v5  ;;  %v12531_v36 = vld [vmem:[#allocation2 + $0x70] sm:$0xf]  ;;  %v867_v14 = vld [vmem:[#allocation2 + $0x78] sm:$0xf]  ;;  %v1750_v55 = vshll.u32 %v12425_v19, 16  ;;  %v657_v33 = vor.u32 %v655_v63, %v654_v40 }
  0xdf   : > { %870 = vst [vmem:[#allocation2 + $0x7c] sm:$0xf] %v649_v8  ;;  %866 = vst [vmem:[#allocation2 + $0x74] sm:$0x1] %v865_v35  ;;  %v1187_v58 = vshll.u32 %v12515_v7, 16  ;;  %v1193_v6 = vshll.u32 %v12531_v36, 16  ;;  %v868_v31 = vsel %vm12013_vm12, %v640_v37, %v867_v14  ;;  %v665_v47 = vor.u32 %v663_v9, %v662_v3 }
  0xe0   : > { %v871_v46 = vld [vmem:[#allocation2 + $0x80] sm:$0x1]  ;;  %4204 = vmatprep.mubr.bf16.mxu1 %v9701_v42  ;;  %v1186_v1 = vrot.slane %v1184_v20, 4  ;;  %v1197_v49 = vshrl.u32 %v12531_v36, 16  ;;  %v1360_v13 = vld [vmem:[#allocation2 + $0x6c] sm:$0xe] }
  0xe1   : > { %v874_v52 = vld [vmem:[#allocation2 + $0x84] sm:$0xf]  ;;  %4205 = vmatmul.mubr.bf16.gmra.mxu1 %v9685_v60  ;;  %v1189_v5 = vrot.slane %v1187_v58, 5  ;;  %v1195_v8 = vrot.slane %v1193_v6, 5  ;;  %869 = vst [vmem:[#allocation2 + $0x78] sm:$0xf] %v868_v31  ;;  %v872_v20 = vsel %vm11978_vm3, %v650_v34, %v871_v46 }
  0xe2   : > { %v1483_v35 = vrot.slane %v12531_v36, 5  ;;  %v878_v63 = vld [vmem:[#allocation2 + $0x8c] sm:$0x1]  ;;  %v1199_v42 = vrot.slane %v1197_v49, 4  ;;  %v658_v53 = vrot.slane %v654_v40, 4  ;;  %v667_v39 = vrot.slane %v662_v3, 4 }
  0xe3   : > { %v12545_v43 = vld [vmem:[%s11967_s19 + $0x58] sm:$0xf]  ;;  %v12547_v37 = vrot.slane %v1747_v4, 4  ;;  %v12549_v9 = vrot.slane %v1750_v55, 5  ;;  %v1190_v14 = vor.u32 %v1189_v5, %v1186_v1  ;;  %873 = vst [vmem:[#allocation2 + $0x80] sm:$0x1] %v872_v20  ;;  %v875_v60 = vsel %vm12013_vm12, %v657_v33, %v874_v52 }
  0xe4   : > { %v1200_v58 = vor.u32 %v1199_v42, %v1195_v8  ;;  %v9606_v6 = vrot.slane %v1360_v13, 9  ;;  %v666_v49 = vsel %vm12005_vm11, %v658_v53, %v665_v47  ;;  %876 = vst [vmem:[#allocation2 + $0x84] sm:$0xf] %v875_v60  ;;  %v879_v40 = vsel %vm11978_vm3, %v667_v39, %v878_v63 }
  0xe5   : > { %v1771_v3 = vshrl.u32 %v12513_v15, 16  ;;  %v1191_v4 = vrot.slane %v1190_v14, 4  ;;  %v1485_v34 = vrot.slane %v1483_v35, 4  ;;  %877 = vst [vmem:[#allocation2 + $0x88] sm:$0xf] %v666_v49  ;;  %v669_v46 = vshrl.u32 %v12545_v43, 16 }
  0xe6   : > { %v12558_v55 = vld [vmem:[#allocation2 + $0x7c] sm:$0xf]  ;;  %880 = vst [vmem:[#allocation2 + $0x8c] sm:$0x1] %v879_v40  ;;  %v957_v33 = vld [vmem:[#allocation2 + $0x74] sm:$0x1]  ;;  %v9654_v20 = vcombine.low %v12515_v7, %v12531_v36  ;;  %v1484_v14 = vsel %vm12031_vm13, %v9606_v6, %v1483_v35 }
  0xe7   : > { %v12561_v1 = vld [vmem:[#allocation2 + $0x7c] sm:$0xf]  ;;  %v1217_v31 = vshll.u32 %v12558_v55, 16  ;;  %v1221_v53 = vshrl.u32 %v12558_v55, 16  ;;  %v1774_v47 = vshll.u32 %v12513_v15, 16  ;;  %v1201_v52 = vrot.slane %v1200_v58, 4 }
  0xe8   : > { %16510 = vst [vmem:[#allocation27_spill] sm:$0xff] %v12561_v1  ;;  %v1203_v5 = vshll.u32 %v957_v33, 16  ;;  %v1486_v63 = vrot.slane %v957_v33, 5  ;;  %v12570_v42 = vld [vmem:[#allocation2 + $0x78] sm:$0xf]  ;;  %v1196_v19 = vsel %vm12037_vm14, %v1191_v4, %v1195_v8  ;;  %v12582_v58 = vrot.slane %v669_v46, 7 }
  0xe9   : > { %v12576_v60 = vld [vmem:[#allocation2 + $0x78] sm:$0xf]  ;;  %v1219_v49 = vrot.slane %v1217_v31, 5  ;;  %v1223_v40 = vrot.slane %v1221_v53, 4  ;;  %v9702_v15 = vcombine.low %v12570_v42, %v12561_v1  ;;  %v1490_v46 = vrot.slane %v12558_v55, 5 }
  0xea   : > { %v1205_v13 = vrot.slane %v1203_v5, 5  ;;  %v1487_v33 = vsel %vm12031_vm13, %v1485_v34, %v1486_v63  ;;  %v958_v7 = vld [vmem:[#allocation2 + $0x80] sm:$0x1]  ;;  %v1208_v36 = vshrl.u32 %v12576_v60, 16  ;;  %v1211_v35 = vshll.u32 %v12576_v60, 16 }
  0xeb   : > { %v1224_v6 = vor.u32 %v1223_v40, %v1219_v49  ;;  %4212 = vmatprep.mubr.bf16.mxu1 %v9702_v15  ;;  %v9686_v8 = vcombine.low %v1484_v14, %v1487_v33  ;;  %v12590_v4 = vld [vmem:[#allocation2 + $0x84] sm:$0xf]  ;;  %v1361_v53 = vld [vmem:[#allocation2 + $0x78] sm:$0xe]  ;;  %v672_v5 = vshll.u32 %v12545_v43, 16  ;;  %v12597_v40 = vrot.slane %v1771_v3, 4 }
  0xec   : > { %v1206_v31 = vsel %vm12037_vm14, %v1201_v52, %v1205_v13  ;;  %v1210_v39 = vrot.slane %v1208_v36, 4  ;;  %v1213_v50 = vrot.slane %v1211_v35, 5  ;;  %v12595_v21 = vld [vmem:[#allocation2 + $0x88] sm:$0xf]  ;;  %v12599_v54 = vrot.slane %v1774_v47, 5 }
  0xed   : > { %v9670_v63 = vcombine.low %v1196_v19, %v1206_v31  ;;  %16511 = vst [vmem:[#allocation28_spill] sm:$0xff] %v12595_v21  ;;  %4213 = vmatmul.mubr.bf16.gmra.mxu1 %v9686_v8  ;;  %v1225_v13 = vrot.slane %v1224_v6, 4  ;;  %v1227_v52 = vshll.u32 %v958_v7, 16  ;;  %v12601_v14 = vld [vmem:[#allocation2 + $0x84] sm:$0xf]  ;;  %v1795_v43 = vshrl.u32 %v12570_v42, 16 }
  0xee   : > { %v1214_v15 = vor.u32 %v1213_v50, %v1210_v39  ;;  %v9703_v19 = vcombine.low %v12590_v4, %v12595_v21  ;;  %v9607_v33 = vrot.slane %v1361_v53, 9  ;;  %v12606_v36 = vld [vmem:[#allocation2 + $0x88] sm:$0xf]  ;;  %v9655_v47 = vcombine.low %v12576_v60, %v12558_v55  ;;  %v12610_v6 = vld [vmem:[#allocation2 + $0x8c] sm:$0x1] }
  0xef   : > { %4051 = vmatprep.mubr.bf16.mxu0 %v9670_v63  ;;  %v1229_v3 = vrot.slane %v1227_v52, 5  ;;  %v1492_v35 = vrot.slane %v1490_v46, 4  ;;  %v470_v31 = vld [vmem:[%s11967_s19 + $0x5c] sm:$0xf]  ;;  %v674_v8 = vor.u32 %v672_v5, %v12582_v58  ;;  %v1493_v39 = vrot.slane %v958_v7, 5 }
  0xf0   : > { %4052 = vmatmul.mubr.bf16.gmra.mxu0 %v9654_v20  ;;  %v1215_v63 = vrot.slane %v1214_v15, 4  ;;  %4220 = vmatprep.mubr.bf16.mxu1 %v9703_v19  ;;  %v1491_v50 = vsel %vm12031_vm13, %v9607_v33, %v1490_v46  ;;  %v1232_v53 = vshrl.u32 %v12601_v14, 16  ;;  %v881_v34 = vld [vmem:[#allocation2 + $0x90] sm:$0xf]  ;;  %v1235_v55 = vshll.u32 %v12601_v14, 16 }
  0xf1   : > { %v1230_v20 = vsel %vm12037_vm14, %v1225_v13, %v1229_v3  ;;  %v1241_v60 = vshll.u32 %v12606_v36, 16  ;;  %v1245_v52 = vshrl.u32 %v12606_v36, 16  ;;  %v1494_v46 = vsel %vm12031_vm13, %v1492_v35, %v1493_v39  ;;  %v429_v19 = vld [vmem:[#allocation2 + $0x98] sm:$0x1] }
  0xf2   : > { %v1220_v5 = vsel %vm12037_vm14, %v1215_v63, %v1219_v49  ;;  %v1234_v7 = vrot.slane %v1232_v53, 4  ;;  %v1251_v15 = vshll.u32 %v12610_v6, 16  ;;  %v9687_v51 = vcombine.low %v1491_v50, %v1494_v46  ;;  %v471_v49 = vld [vmem:[%s11967_s19 + $0x60] sm:$0xf]  ;;  %v1362_v50 = vld [vmem:[#allocation2 + $0x84] sm:$0xe] }
  0xf3   : > { %v9671_v33 = vcombine.low %v1220_v5, %v1230_v20  ;;  %v1237_v13 = vrot.slane %v1235_v55, 5  ;;  %v1243_v3 = vrot.slane %v1241_v60, 5  ;;  %v1798_v32 = vshll.u32 %v12570_v42, 16  ;;  %v472_v20 = vld [vmem:[%s11967_s19 + $0x64] sm:$0xf] }
  0xf4   : > { %v1247_v16 = vrot.slane %v1245_v52, 4  ;;  %v677_v57 = vshrl.u32 %v470_v31, 16  ;;  %v1253_v63 = vrot.slane %v1251_v15, 5  ;;  %v680_v39 = vshll.u32 %v470_v31, 16  ;;  %v432_v52 = vld [vmem:[#allocation2 + $0xa4] sm:$0x1] }
  0xf5   : > { %4059 = vmatprep.mubr.bf16.mxu0 %v9671_v33  ;;  %4221 = vmatmul.mubr.bf16.gmra.mxu1 %v9687_v51  ;;  %v1238_v35 = vor.u32 %v1237_v13, %v1234_v7  ;;  %v882_v53 = vsel %vm12013_vm12, %v674_v8, %v881_v34  ;;  %v675_v60 = vrot.slane %v12582_v58, 4  ;;  %v1497_v42 = vrot.slane %v12606_v36, 5  ;;  %v379_v8 = vld [vmem:[#allocation2 + $0xa8] sm:$0x1]  ;;  %v12644_v15 = vld [vmem:[%s11967_s19 + $0x68] sm:$0xf] }
  0xf6   : > { %v1248_v55 = vor.u32 %v1247_v16, %v1243_v3  ;;  %v679_v5 = vrot.slane %v677_v57, 7  ;;  %883 = vst [vmem:[#allocation2 + $0x90] sm:$0xf] %v882_v53  ;;  %v12635_v46 = vrot.slane %v1795_v43, 4  ;;  %v430_v31 = vsel %vm11983_vm4, 0, %v429_v19 }
  0xf7   : > { %v1239_v51 = vrot.slane %v1238_v35, 4  ;;  %v377_v34 = vsel %vm11978_vm3, 0, %v376_v56  ;;  %v9656_v57 = vcombine.low %v12601_v14, %v12606_v36  ;;  %v9608_v58 = vrot.slane %v1362_v50, 9  ;;  %431 = vst [vmem:[#allocation2 + $0x98] sm:$0x1] %v430_v31 }
  0xf8   : > { %4060 = vmatmul.mubr.bf16.gmra.mxu0 %v9655_v47  ;;  %v1249_v16 = vrot.slane %v1248_v55, 4  ;;  %v682_v7 = vor.u32 %v680_v39, %v679_v5  ;;  %378 = vst [vmem:[#allocation2 + $0x9c] sm:$0x1] %v377_v34  ;;  %v1500_v47 = vrot.slane %v12610_v6, 5  ;;  %v686_v19 = vshrl.u32 %v471_v49, 16 }
  0xf9   : > { %v1244_v43 = vsel %vm12037_vm14, %v1239_v51, %v1243_v3  ;;  %v689_v33 = vshll.u32 %v471_v49, 16  ;;  %v1499_v35 = vrot.slane %v1497_v42, 4  ;;  %v694_v14 = vshrl.u32 %v472_v20, 16 }
  0xfa   : > { %v1254_v56 = vsel %vm12037_vm14, %v1249_v16, %v1253_v63  ;;  %v683_v13 = vsel %vm12005_vm11, %v675_v60, %v682_v7  ;;  %v688_v39 = vrot.slane %v686_v19, 7  ;;  %v697_v53 = vshll.u32 %v472_v20, 16  ;;  %v12663_v20 = vld [vmem:[%s11967_s19 + $0x6c] sm:$0xf] }
  0xfb   : > { %v9672_v36 = vcombine.low %v1244_v43, %v1254_v56  ;;  %884 = vst [vmem:[#allocation2 + $0x94] sm:$0xf] %v683_v13  ;;  %v433_v3 = vsel %vm11983_vm4, 0, %v432_v52  ;;  %v12655_v50 = vrot.slane %v1798_v32, 5  ;;  %v684_v6 = vrot.slane %v679_v5, 4 }
  0xfc   : > { %v696_v49 = vrot.slane %v694_v14, 7  ;;  %434 = vst [vmem:[#allocation2 + $0xa4] sm:$0x1] %v433_v3  ;;  %v380_v63 = vsel %vm11978_vm3, 0, %v379_v8  ;;  %v1819_v55 = vshrl.u32 %v12590_v4, 16  ;;  %v691_v51 = vor.u32 %v689_v33, %v688_v39 }
  0xfd   : > { %4067 = vmatprep.mubr.bf16.mxu0 %v9672_v36  ;;  %v12660_v60 = vld [vmem:[#allocation2 + $0x90] sm:$0xf]  ;;  %v692_v31 = vrot.slane %v688_v39, 4  ;;  %381 = vst [vmem:[#allocation2 + $0xa8] sm:$0x1] %v380_v63  ;;  %v703_v52 = vshrl.u32 %v12644_v15, 16  ;;  %v1498_v7 = vsel %vm12031_vm13, %v9608_v58, %v1497_v42  ;;  %v1501_v43 = vsel %vm12031_vm13, %v1499_v35, %v1500_v47 }
  0xfe   : > { %v1822_v32 = vshll.u32 %v12590_v4, 16  ;;  %v1552_v34 = vld [vmem:[#allocation2 + $0x90] sm:$0xf]  ;;  %v1256_v16 = vshrl.u32 %v12660_v60, 16  ;;  %v1259_v8 = vshll.u32 %v12660_v60, 16  ;;  %v699_v33 = vor.u32 %v697_v53, %v696_v49 }
  0xff   : > { %v885_v19 = vld [vmem:[#allocation2 + $0x98] sm:$0x1]  ;;  %v888_v56 = vld [vmem:[#allocation2 + $0x9c] sm:$0xf]  ;;  %v706_v13 = vshll.u32 %v12644_v15, 16  ;;  %v701_v36 = vrot.slane %v696_v49, 4  ;;  %v9688_v53 = vcombine.low %v1498_v7, %v1501_v43 }
 0x100   : > { %4068 = vmatmul.mubr.bf16.gmra.mxu0 %v9656_v57  ;;  %v886_v4 = vsel %vm11978_vm3, %v684_v6, %v885_v19  ;;  %v1258_v14 = vrot.slane %v1256_v16, 4  ;;  %v1363_v39 = vld [vmem:[#allocation2 + $0x90] sm:$0xe]  ;;  %v1261_v3 = vrot.slane %v1259_v8, 5  ;;  %v700_v42 = vsel %vm12005_vm11, %v692_v31, %v699_v33  ;;  %v435_v63 = vld [vmem:[#allocation2 + $0xb0] sm:$0x1] }
 0x101   : > { %887 = vst [vmem:[#allocation2 + $0x98] sm:$0x1] %v886_v4  ;;  %v889_v58 = vsel %vm12013_vm12, %v691_v51, %v888_v56  ;;  %v12683_v47 = vrot.slane %v703_v52, 7  ;;  %v12685_v15 = vrot.slane %v1819_v55, 4  ;;  %891 = vst [vmem:[#allocation2 + $0xa0] sm:$0xf] %v700_v42 }
 0x102   : > { %v12687_v35 = vld [vmem:[#allocation2 + $0x94] sm:$0xf]  ;;  %890 = vst [vmem:[#allocation2 + $0x9c] sm:$0xf] %v889_v58  ;;  %v711_v49 = vshrl.u32 %v12663_v20, 16  ;;  %v1843_v8 = vshrl.u32 %v1552_v34, 16  ;;  %v1262_v52 = vor.u32 %v1261_v3, %v1258_v14 }
 0x103   : > { %16512 = vst [vmem:[#allocation29_spill] sm:$0xff] %v12685_v15  ;;  %16513 = vst [vmem:[#allocation30_spill] sm:$0xff] %v12687_v35  ;;  %v12689_v6 = vld [vmem:[#allocation2 + $0x94] sm:$0xf]  ;;  %v9704_v51 = vcombine.low %v1552_v34, %v12687_v35  ;;  %v892_v19 = vld [vmem:[#allocation2 + $0xa4] sm:$0x1]  ;;  %v708_v14 = vor.u32 %v706_v13, %v12683_v47 }
 0x104   : > { %v382_v16 = vld [vmem:[#allocation2 + $0xb4] sm:$0x1]  ;;  %v1265_v55 = vshll.u32 %v12689_v6, 16  ;;  %v1846_v33 = vshll.u32 %v1552_v34, 16  ;;  %v1269_v7 = vshrl.u32 %v12689_v6, 16  ;;  %v1504_v43 = vrot.slane %v12689_v6, 5 }
 0x105   : > { %v893_v56 = vsel %vm11978_vm3, %v701_v36, %v892_v19  ;;  %v895_v4 = vld [vmem:[#allocation2 + $0xa8] sm:$0xf]  ;;  %v12700_v42 = vrot.slane %v1822_v32, 5  ;;  %4228 = vmatprep.mubr.bf16.mxu1 %v9704_v51  ;;  %v9609_v5 = vrot.slane %v1363_v39, 9  ;;  %v1263_v3 = vrot.slane %v1262_v52, 4 }
 0x106   : > { %v1267_v58 = vrot.slane %v1265_v55, 5  ;;  %894 = vst [vmem:[#allocation2 + $0xa4] sm:$0x1] %v893_v56  ;;  %4229 = vmatmul.mubr.bf16.gmra.mxu1 %v9688_v53  ;;  %v1271_v34 = vrot.slane %v1269_v7, 4  ;;  %v12703_v11 = vrot.slane %v711_v49, 7  ;;  %v714_v31 = vshll.u32 %v12663_v20, 16 }
 0x107   : > { %16514 = vst [vmem:[#allocation31_spill] sm:$0xff] %v12700_v42  ;;  %v1506_v57 = vrot.slane %v1504_v43, 4  ;;  %v896_v36 = vsel %vm12013_vm12, %v708_v14, %v895_v4  ;;  %v436_v32 = vsel %vm11983_vm4, 0, %v435_v63  ;;  %v383_v39 = vsel %vm11978_vm3, 0, %v382_v16  ;;  %v12717_v20 = vld [vmem:[%s11967_s19 + $0x70] sm:$0xf] }
 0x108   : > { %v12712_v51 = vrot.slane %v1843_v8, 4  ;;  %v12714_v13 = vrot.slane %v1846_v33, 5  ;;  %v960_v53 = vld [vmem:[#allocation2 + $0x98] sm:$0x1]  ;;  %v1272_v52 = vor.u32 %v1271_v34, %v1267_v58  ;;  %897 = vst [vmem:[#allocation2 + $0xa8] sm:$0xf] %v896_v36  ;;  %v9657_v16 = vcombine.low %v12660_v60, %v12689_v6 }
 0x109   : > { %437 = vst [vmem:[#allocation2 + $0xb0] sm:$0x1] %v436_v32  ;;  %384 = vst [vmem:[#allocation2 + $0xb4] sm:$0x1] %v383_v39  ;;  %v1275_v55 = vshll.u32 %v960_v53, 16  ;;  %v1505_v8 = vsel %vm12031_vm13, %v9609_v5, %v1504_v43  ;;  %v1507_v33 = vrot.slane %v960_v53, 5  ;;  %v1268_v7 = vsel %vm12037_vm14, %v1263_v3, %v1267_v58 }
 0x10a   : > { %16515 = vst [vmem:[#allocation32_spill] sm:$0xff] %v12712_v51  ;;  %16516 = vst [vmem:[#allocation33_spill] sm:$0xff] %v12714_v13  ;;  %v1554_v19 = vld [vmem:[#allocation2 + $0x9c] sm:$0xf]  ;;  %v12721_v63 = vld [vmem:[#allocation2 + $0xa0] sm:$0xf]  ;;  %v716_v34 = vor.u32 %v714_v31, %v12703_v11 }
 0x10b   : > { %v1273_v56 = vrot.slane %v1272_v52, 4  ;;  %v12729_v4 = vld [vmem:[#allocation2 + $0x9c] sm:$0xf]  ;;  %v709_v14 = vrot.slane %v12683_v47, 4  ;;  %v1277_v36 = vrot.slane %v1275_v55, 5  ;;  %v9705_v32 = vcombine.low %v1554_v19, %v12721_v63 }
 0x10c   : > { %v1508_v60 = vsel %vm12031_vm13, %v1506_v57, %v1507_v33  ;;  %v12736_v6 = vld [vmem:[#allocation2 + $0xa0] sm:$0xf]  ;;  %v718_v5 = vrot.slane %v12703_v11, 4  ;;  %v1867_v43 = vshrl.u32 %v1554_v19, 16  ;;  %v1870_v39 = vshll.u32 %v1554_v19, 16 }
 0x10d   : > { %v9689_v58 = vcombine.low %v1505_v8, %v1508_v60  ;;  %v961_v3 = vld [vmem:[#allocation2 + $0xa4] sm:$0x1]  ;;  %v720_v53 = vshrl.u32 %v12717_v20, 16  ;;  %v1278_v47 = vsel %vm12037_vm14, %v1273_v56, %v1277_v36  ;;  %4236 = vmatprep.mubr.bf16.mxu1 %v9705_v32  ;;  %v1280_v52 = vshrl.u32 %v12729_v4, 16  ;;  %v1364_v36 = vld [vmem:[#allocation2 + $0x9c] sm:$0xe] }
 0x10e   : > { %v1283_v57 = vshll.u32 %v12729_v4, 16  ;;  %v9673_v55 = vcombine.low %v1268_v7, %v1278_v47  ;;  %v1880_v33 = vshrl.u32 %v12721_v63, 16  ;;  %v1289_v11 = vshll.u32 %v12736_v6, 16 }
 0x10f   : > { %4237 = vmatmul.mubr.bf16.gmra.mxu1 %v9689_v58  ;;  %v1293_v19 = vshrl.u32 %v12736_v6, 16  ;;  %v1282_v8 = vrot.slane %v1280_v52, 4  ;;  %v1299_v49 = vshll.u32 %v961_v3, 16  ;;  %v717_v56 = vsel %vm12005_vm11, %v709_v14, %v716_v34  ;;  %v1556_v13 = vld [vmem:[#allocation2 + $0xa8] sm:$0xf] }
 0x110   : > { %v1285_v60 = vrot.slane %v1283_v57, 5  ;;  %4075 = vmatprep.mubr.bf16.mxu0 %v9673_v55  ;;  %v1291_v32 = vrot.slane %v1289_v11, 5  ;;  %898 = vst [vmem:[#allocation2 + $0xac] sm:$0xf] %v717_v56  ;;  %v899_v7 = vld [vmem:[#allocation2 + $0xb0] sm:$0x1] }
 0x111   : > { %v1295_v31 = vrot.slane %v1293_v19, 4  ;;  %v12754_v51 = vrot.slane %v1867_v43, 4  ;;  %v12756_v52 = vrot.slane %v1870_v39, 5  ;;  %4076 = vmatmul.mubr.bf16.gmra.mxu0 %v9657_v16  ;;  %v1891_v14 = vshrl.u32 %v1556_v13, 16  ;;  %v12758_v34 = vld [vmem:[#allocation2 + $0xa8] sm:$0xf] }
 0x112   : > { %v1286_v57 = vor.u32 %v1285_v60, %v1282_v8  ;;  %v1301_v11 = vrot.slane %v1299_v49, 5  ;;  %v9610_v19 = vrot.slane %v1364_v36, 9  ;;  %v1511_v56 = vrot.slane %v12736_v6, 5 }
 0x113   : > { %v1296_v55 = vor.u32 %v1295_v31, %v1291_v32  ;;  %v1894_v58 = vshll.u32 %v1556_v13, 16  ;;  %v1514_v42 = vrot.slane %v961_v3, 5  ;;  %v900_v43 = vsel %vm11978_vm3, %v718_v5, %v899_v7 }
 0x114   : > { %v1287_v21 = vrot.slane %v1286_v57, 4  ;;  %v1512_v16 = vsel %vm12031_vm13, %v9610_v19, %v1511_v56  ;;  %v1513_v39 = vrot.slane %v1511_v56, 4  ;;  %901 = vst [vmem:[#allocation2 + $0xb0] sm:$0x1] %v900_v43  ;;  %v1304_v8 = vshrl.u32 %v12758_v34, 16 }
 0x115   : > { %v1297_v47 = vrot.slane %v1296_v55, 4  ;;  %v9658_v31 = vcombine.low %v12729_v4, %v12736_v6  ;;  %v1307_v60 = vshll.u32 %v12758_v34, 16  ;;  %v722_v3 = vrot.slane %v720_v53, 7  ;;  %v476_v57 = vld [vmem:[%s11967_s19 + $0x74] sm:$0xf] }
 0x116   : > { %v1292_v49 = vsel %vm12037_vm14, %v1287_v21, %v1291_v32  ;;  %v1515_v36 = vsel %vm12031_vm13, %v1513_v39, %v1514_v42  ;;  %v1306_v7 = vrot.slane %v1304_v8, 4  ;;  %v723_v55 = vshll.u32 %v12717_v20, 16  ;;  %v902_v42 = vld [vmem:[#allocation2 + $0xb4] sm:$0xf]  ;;  %v385_v19 = vld [vmem:[#allocation2 + $0xc0] sm:$0x1] }
 0x117   : > { %v1302_v5 = vsel %vm12037_vm14, %v1297_v47, %v1301_v11  ;;  %v12778_v21 = vld [vmem:[#allocation2 + $0xac] sm:$0xf]  ;;  %v9690_v32 = vcombine.low %v1512_v16, %v1515_v36  ;;  %v1309_v6 = vrot.slane %v1307_v60, 5  ;;  %v1893_v53 = vrot.slane %v1891_v14, 4  ;;  %v1365_v60 = vld [vmem:[#allocation2 + $0xa8] sm:$0xe] }
 0x118   : > { %v9674_v56 = vcombine.low %v1292_v49, %v1302_v5  ;;  %v12780_v4 = vld [vmem:[#allocation2 + $0xac] sm:$0xf]  ;;  %v1896_v43 = vrot.slane %v1894_v58, 5  ;;  %v9706_v47 = vcombine.low %v1556_v13, %v12778_v21  ;;  %v1873_v39 = vor.u32 %v12756_v52, %v12754_v51  ;;  %v438_v5 = vld [vmem:[#allocation2 + $0xbc] sm:$0x1] }
 0x119   : > { %v1313_v11 = vshll.u32 %v12780_v4, 16  ;;  %v1310_v20 = vor.u32 %v1309_v6, %v1306_v7  ;;  %v1317_v8 = vshrl.u32 %v12780_v4, 16  ;;  %v725_v49 = vor.u32 %v723_v55, %v722_v3 }
 0x11a   : > { %4083 = vmatprep.mubr.bf16.mxu0 %v9674_v56  ;;  %v16517_v16 = vshll.u32 %v12721_v63, 16  ;;  %v12791_v14 = vrot.slane %v1880_v33, 4  ;;  %4244 = vmatprep.mubr.bf16.mxu1 %v9706_v47  ;;  %v728_v58 = vshrl.u32 %v476_v57, 16  ;;  %v731_v55 = vshll.u32 %v476_v57, 16 }
 0x11b   : > { %4084 = vmatmul.mubr.bf16.gmra.mxu0 %v9658_v31  ;;  %v1315_v13 = vrot.slane %v1313_v11, 5  ;;  %4245 = vmatmul.mubr.bf16.gmra.mxu1 %v9690_v32  ;;  %v962_v51 = vld [vmem:[#allocation2 + $0xb0] sm:$0x1]  ;;  %v1311_v52 = vrot.slane %v1310_v20, 4  ;;  %v1319_v7 = vrot.slane %v1317_v8, 4  ;;  %v903_v63 = vsel %vm12013_vm12, %v725_v49, %v902_v42 }
 0x11c   : > { %v12789_v36 = vrot.slane %v16517_v16, 5  ;;  %16519 = vst [vmem:[#allocation35_spill] sm:$0xff] %v12791_v14  ;;  %v1897_v56 = vor.u32 %v1896_v43, %v1893_v53  ;;  %v1323_v6 = vshll.u32 %v962_v51, 16  ;;  %v726_v33 = vrot.slane %v722_v3, 4  ;;  %904 = vst [vmem:[#allocation2 + $0xb4] sm:$0xf] %v903_v63 }
 0x11d   : > { %v730_v16 = vrot.slane %v728_v58, 7  ;;  %v477_v31 = vld [vmem:[%s11967_s19 + $0x78] sm:$0xf]  ;;  %v12796_v47 = vrot.slane %v1873_v39, 4  ;;  %v1320_v11 = vor.u32 %v1319_v7, %v1315_v13  ;;  %v9611_v14 = vrot.slane %v1365_v60, 9 }
 0x11e   : > { %16518 = vst [vmem:[#allocation34_spill] sm:$0xff] %v12789_v36  ;;  %v1518_v32 = vrot.slane %v12780_v4, 5  ;;  %v478_v36 = vld [vmem:[%s11967_s19 + $0x7c] sm:$0xf]  ;;  %v1316_v20 = vsel %vm12037_vm14, %v1311_v52, %v1315_v13  ;;  %v1325_v57 = vrot.slane %v1323_v6, 5  ;;  %v439_v53 = vsel %vm11983_vm4, 0, %v438_v5 }
 0x11f   : > { %16520 = vst [vmem:[#allocation36_spill] sm:$0xff] %v12796_v47  ;;  %v733_v8 = vor.u32 %v731_v55, %v730_v16  ;;  %v1321_v43 = vrot.slane %v1320_v11, 4  ;;  %v1521_v42 = vrot.slane %v962_v51, 5  ;;  %440 = vst [vmem:[#allocation2 + $0xbc] sm:$0x1] %v439_v53  ;;  %v386_v39 = vsel %vm11978_vm3, 0, %v385_v19 }
 0x120   : > { %v1520_v3 = vrot.slane %v1518_v32, 4  ;;  %v12806_v49 = vrot.slane %v1897_v56, 4  ;;  %387 = vst [vmem:[#allocation2 + $0xc0] sm:$0x1] %v386_v39  ;;  %v737_v60 = vshrl.u32 %v477_v31, 16  ;;  %v745_v13 = vshrl.u32 %v478_v36, 16 }
 0x121   : > { %v734_v58 = vsel %vm12005_vm11, %v726_v33, %v733_v8  ;;  %v1326_v52 = vsel %vm12037_vm14, %v1321_v43, %v1325_v57  ;;  %v9659_v5 = vcombine.low %v12758_v34, %v12780_v4  ;;  %v740_v51 = vshll.u32 %v477_v31, 16  ;;  %v12817_v6 = vld [vmem:[#allocation2 + $0x14] sm:$0x1]  ;;  %s16175_s19 = scalar_lea.vmem [#allocation10], %s9596_s15 }
 0x122   : > { %16521 = vst [vmem:[#allocation37_spill] sm:$0xff] %v12806_v49  ;;  %905 = vst [vmem:[#allocation2 + $0xb8] sm:$0xf] %v734_v58  ;;  %v748_v7 = vshll.u32 %v478_v36, 16  ;;  %v1900_v55 = vshll.u32 %v12778_v21, 16  ;;  %v9675_v19 = vcombine.low %v1316_v20, %v1326_v52  ;;  %v739_v63 = vrot.slane %v737_v60, 7 }
 0x123   : > { %v12815_v56 = vrot.slane %v745_v13, 7  ;;  %v1904_v33 = vshrl.u32 %v12778_v21, 16  ;;  %v735_v11 = vrot.slane %v730_v16, 4  ;;  %v1558_v8 = vld [vmem:[#allocation2 + $0xb4] sm:$0xf]  ;;  %v1519_v57 = vsel %vm12031_vm13, %v9611_v14, %v1518_v32  ;;  %s9492_s9 = sshll.u32 %s16175_s19, 4  ;;  %s16363_s9 = int_to_ptr.vmem [resolvable:$true] %s9492_s9 }
 0x124   : > { %v1522_v34 = vsel %vm12031_vm13, %v1520_v3, %v1521_v42  ;;  %v12824_v4 = vld [vmem:[#allocation2 + $0xb4] sm:$0xf]  ;;  %4091 = vmatprep.mubr.bf16.mxu0 %v9675_v19  ;;  %v1915_v36 = vshrl.u32 %v1558_v8, 16  ;;  %v1918_v31 = vshll.u32 %v1558_v8, 16  ;;  %v742_v43 = vor.u32 %v740_v51, %v739_v63  ;;  %v12830_v14 = vld [vmem:[#allocation2 + $0x18] sm:$0xf]  ;;  %p11715_p13 = scmp.lt.s32.totalorder %s16363_s9, %s11713_s13 }
 0x125   : > { %16522 = vst [vmem:[#allocation38_spill] sm:$0xff] %v12815_v56  ;;  %v1328_v20 = vshrl.u32 %v12824_v4, 16  ;;  %v1331_v53 = vshll.u32 %v12824_v4, 16  ;;  %4092 = vmatmul.mubr.bf16.gmra.mxu0 %v9659_v5  ;;  %v743_v21 = vrot.slane %v739_v63, 4  ;;  %v750_v16 = vor.u32 %v748_v7, %v12815_v56  ;;  %v12832_v32 = vld [vmem:[#allocation2 + $0x1c] sm:$0xf] }
 0x126   : > { %v1598_v39 = vshll.u32 %v12817_v6, 16  ;;  %v12834_v3 = vld [vmem:[#allocation2 + $0x24] sm:$0xf]  ;;  %v12836_v42 = vld [vmem:[#allocation2 + $0x28] sm:$0xf]  ;;  %v1917_v58 = vrot.slane %v1915_v36, 4 }
 0x127   : > { %16523 = vst [vmem:[#allocation39_spill] sm:$0xff] %v12836_v42  ;;  %v1920_v60 = vrot.slane %v1918_v31, 5  ;;  %v906_v13 = vld [vmem:[#allocation2 + $0xbc] sm:$0x1]  ;;  %v1330_v52 = vrot.slane %v1328_v20, 4  ;;  %v1333_v19 = vrot.slane %v1331_v53, 5  ;;  %v751_v56 = vsel %vm12005_vm11, %v743_v21, %v750_v16 }
 0x128   : > { %v1962_v5 = vld [vmem:[#allocation2 + $0xc] sm:$0xe]  ;;  %v12838_v51 = vrot.slane %v1900_v55, 5  ;;  %v12840_v63 = vrot.slane %v1904_v33, 4  ;;  %v907_v7 = vsel %vm11978_vm3, %v735_v11, %v906_v13  ;;  %v909_v25 = vld [vmem:[#allocation2 + $0xc0] sm:$0xf]  ;;  %v9691_v20 = vcombine.low %v1519_v57, %v1522_v34 }
 0x129   : > { %v12846_v49 = vld [vmem:[#allocation2 + $0x30] sm:$0xf]  ;;  %v12848_v47 = vld [vmem:[#allocation2 + $0x34] sm:$0xf]  ;;  %v12850_v36 = vld [vmem:[#allocation2 + $0x3c] sm:$0xf]  ;;  %v910_v33 = vsel %vm12013_vm12, %v742_v43, %v909_v25  ;;  %v1921_v16 = vor.u32 %v1920_v60, %v1917_v58  ;;  %v1334_v2 = vor.u32 %v1333_v19, %v1330_v52 }
 0x12a   : > { %16524 = vst [vmem:[#allocation40_spill] sm:$0xff] %v12838_v51  ;;  %16525 = vst [vmem:[#allocation41_spill] sm:$0xff] %v12840_v63  ;;  %v1559_v31 = vld [vmem:[#allocation2 + $0xb8] sm:$0xf]  ;;  %v12860_v21 = vld [vmem:[#allocation2 + $0x40] sm:$0xf] }
 0x12b   : > { %908 = vst [vmem:[#allocation2 + $0xbc] sm:$0x1] %v907_v7  ;;  %v12852_v55 = vld [vmem:[#allocation2 + $0xb8] sm:$0xf]  ;;  %912 = vst [vmem:[#allocation2 + $0xc4] sm:$0xf] %v751_v56  ;;  %v9707_v13 = vcombine.low %v1558_v8, %v1559_v31 }
 0x12c   : > { %v1337_v59 = vshll.u32 %v12852_v55, 16  ;;  %911 = vst [vmem:[#allocation2 + $0xc0] sm:$0xf] %v910_v33  ;;  %v1366_v57 = vld [vmem:[#allocation2 + $0xb4] sm:$0xe]  ;;  %v1600_v34 = vrot.slane %v1598_v39, 5 }
 0x12d   : > { %v12863_v7 = vld [vmem:[#allocation2 + $0x48] sm:$0xf]  ;;  %v1341_v25 = vshrl.u32 %v12852_v55, 16  ;;  %v12870_v53 = vld [vmem:[#allocation2 + $0x4c] sm:$0xf]  ;;  %4252 = vmatprep.mubr.bf16.mxu1 %v9707_v13  ;;  %v1525_v58 = vrot.slane %v12852_v55, 5 }
 0x12e   : > { %v1339_v8 = vrot.slane %v1337_v59, 5  ;;  %v9613_v60 = vrot.slane %v1962_v5, 9  ;;  %4253 = vmatmul.mubr.bf16.gmra.mxu1 %v9691_v20  ;;  %v9612_v19 = vrot.slane %v1366_v57, 9  ;;  %v16526_v33 = vrot.slane %v12074_v62, 5  ;;  %v12917_v51 = vld [vmem:[#allocation2 + $0x58] sm:$0xf] }
 0x12f   : > { %v1343_v52 = vrot.slane %v1341_v25, 4  ;;  %v2031_v56 = vrot.slane %v12817_v6, 5  ;;  %v12878_v24 = vrot.slane %v1921_v16, 4  ;;  %v1924_v43 = vshll.u32 %v1559_v31, 16  ;;  %s11708_s28 = scalar_lea.vmem %s16363_s9, 4096 }
 0x130   : > { %v2030_v11 = vrot.slane %v16526_v33, 4  ;;  %v1928_v63 = vshrl.u32 %v1559_v31, 16  ;;  %v1601_v59 = vsel %vm12037_vm14, %v12146_v28, %v1600_v34  ;;  %v1335_v5 = vrot.slane %v1334_v2, 4  ;;  %p11709_p5 = scmp.ne.s32.totalorder %s16363_s9, %s11708_s28  ;;  %p11716_p0 = scmp.lt.s32.totalorder %s11714_s14, %s11708_s28 }
 0x131   : > { %16527 = vst [vmem:[#allocation42_spill] sm:$0xff] %v12878_v24  ;;  %v1344_v13 = vor.u32 %v1343_v52, %v1339_v8  ;;  %v16528_v20 = vsel %vm12037_vm14, %v12097_v38, %v12093_v22  ;;  %v2188_v25 = vshrl.u32 %v12830_v14, 16  ;;  %v9660_v31 = vcombine.low %v12824_v4, %v12852_v55 }
 0x132   : > { %v12888_v57 = vcombine.low %v16528_v20, %v1601_v59  ;;  %v963_v6 = vld [vmem:[#allocation2 + $0xbc] sm:$0x1]  ;;  %v12891_v16 = vld [vmem:[#allocation2 + $0xc4] sm:$0xf]  ;;  %v1527_v33 = vrot.slane %v1525_v58, 4  ;;  %v16530_v28 = vrot.slane %v12074_v62, 5  ;;  %v2032_v59 = vsel %vm12031_vm13, %v2030_v11, %v2031_v56  ;;  %p11710_p7 = pnand %p11709_p5, %p16863_p2  ;;  %p11717_p10 = por %p11716_p0, %p11715_p13 }
 0x133   : > { %16529 = vst [vmem:[#allocation43_spill] sm:$0xff] %v12891_v16  ;;  %v2191_v34 = vshll.u32 %v12830_v14, 16  ;;  %v1345_v52 = vrot.slane %v1344_v13, 4  ;;  %v1347_v22 = vshll.u32 %v963_v6, 16  ;;  %v12900_v38 = vld [vmem:[#allocation2 + $0xc0] sm:$0xf]  ;;  %v1526_v62 = vsel %vm12031_vm13, %v9612_v19, %v1525_v58 }
 0x134   : > { %v2029_v2 = vsel %vm12031_vm13, %v9613_v60, %v16530_v28  ;;  %v2197_v20 = vshll.u32 %v12832_v32, 16  ;;  %v12905_v39 = vrot.slane %v1924_v43, 5  ;;  %v9708_v4 = vcombine.low %v12900_v38, %v12891_v16  ;;  %v2171_v60 = vld [vmem:[#allocation2 + $0x20] sm:$0x1]  ;;  %v12911_v28 = vld [vmem:[#allocation2 + $0x54] sm:$0xf]  ;;  %p11711_p12 = pneg %p11710_p7 }
 0x135   : > { %v1528_v55 = vrot.slane %v963_v6, 5  ;;  %v12913_v13 = vrot.slane %v1928_v63, 4  ;;  %v1340_v24 = vsel %vm12037_vm14, %v1335_v5, %v1339_v8  ;;  %v1349_v11 = vrot.slane %v1347_v22, 5  ;;  %v1563_v58 = vld [vmem:[#allocation2 + $0x20] sm:$0x1] }
 0x136   : > { %16531 = vst [vmem:[#allocation44_spill] sm:$0xff] %v12905_v39  ;;  %v2190_v56 = vrot.slane %v2188_v25, 4  ;;  %4260 = vmatprep.mubr.bf16.mxu1 %v9708_v4  ;;  %v9725_v39 = vcombine.low %v2029_v2, %v2032_v59  ;;  %v2193_v35 = vrot.slane %v2191_v34, 5  ;;  %v1963_v19 = vld [vmem:[#allocation2 + $0x18] sm:$0xe]  ;;  %v2199_v8 = vrot.slane %v2197_v20, 5  ;;  %p11718_p3 = pnand %p11717_p10, %p11711_p12 }
 0x137   : > { %16532 = vst [vmem:[#allocation45_spill] sm:$0xff] %v12913_v13  ;;  %v1529_v43 = vsel %vm12031_vm13, %v1527_v33, %v1528_v55  ;;  %v1350_v63 = vsel %vm12037_vm14, %v1345_v52, %v1349_v11  ;;  %v2201_v5 = vshrl.u32 %v12832_v32, 16  ;;  %v2207_v15 = vshll.u32 %v2171_v60, 16  ;;  %v11552_v34 = vld [vmem:[#allocation2 + $0x1c] sm:$0xf] }
 0x138   : > { %v9692_v13 = vcombine.low %v1526_v62, %v1529_v43  ;;  %v9676_v25 = vcombine.low %v1340_v24, %v1350_v63  ;;  %v2194_v4 = vor.u32 %v2193_v35, %v2190_v56  ;;  %v9614_v2 = vrot.slane %v1963_v19, 9 }
 0x139   : > { %v2203_v33 = vrot.slane %v2201_v5, 4  ;;  %v2035_v59 = vrot.slane %v11552_v34, 5  ;;  %v2038_v55 = vrot.slane %v1563_v58, 5  ;;  %v2209_v52 = vrot.slane %v2207_v15, 5 }
 0x13a   : > { %4261 = vmatmul.mubr.bf16.gmra.mxu1 %v9692_v13  ;;  %4099 = vmatprep.mubr.bf16.mxu0 %v9676_v25  ;;  %v2195_v1 = vrot.slane %v2194_v4, 4  ;;  %v16533_v20 = vor.u32 %v12280_v61, %v12248_v10  ;;  %v1612_v13 = vshll.u32 %v11552_v34, 16  ;;  %v16534_v56 = vshrl.u32 %v12103_v48, 16 }
 0x13b   : > { %4100 = vmatmul.mubr.bf16.gmra.mxu0 %v9660_v31  ;;  %v2204_v24 = vor.u32 %v2203_v33, %v2199_v8  ;;  %v2036_v35 = vsel %vm12031_vm13, %v9614_v2, %v2035_v59  ;;  %v2037_v60 = vrot.slane %v2035_v59, 4  ;;  %v1622_v19 = vshll.u32 %v1563_v58, 16  ;;  %v2172_v31 = vld [vmem:[#allocation2 + $0x2c] sm:$0x1]  ;;  %v1964_v2 = vld [vmem:[#allocation2 + $0x24] sm:$0xe] }
 0x13c   : > { %v1610_v62 = vrot.slane %v16533_v20, 4  ;;  %4301 = vmatprep.mubr.bf16.mxu0 %v9725_v39  ;;  %v2200_v11 = vsel %vm12037_vm14, %v2195_v1, %v2199_v8  ;;  %v1618_v43 = vrot.slane %v16534_v56, 4  ;;  %v2212_v15 = vshrl.u32 %v12834_v3, 16 }
 0x13d   : > { %v2205_v63 = vrot.slane %v2204_v24, 4  ;;  %v2039_v10 = vsel %vm12031_vm13, %v2037_v60, %v2038_v55  ;;  %v1614_v61 = vrot.slane %v1612_v13, 5  ;;  %v2215_v5 = vshll.u32 %v12834_v3, 16  ;;  %v1564_v24 = vld [vmem:[#allocation2 + $0x2c] sm:$0x1] }
 0x13e   : > { %v9726_v25 = vcombine.low %v2036_v35, %v2039_v10  ;;  %v1624_v4 = vrot.slane %v1622_v19, 5  ;;  %v2214_v39 = vrot.slane %v2212_v15, 4  ;;  %v2221_v33 = vshll.u32 %v12836_v42, 16 }
 0x13f   : > { %v2210_v48 = vsel %vm12037_vm14, %v2205_v63, %v2209_v52  ;;  %v1615_v1 = vsel %vm12037_vm14, %v1610_v62, %v1614_v61  ;;  %v1619_v58 = vor.u32 %v1618_v43, %v1614_v61  ;;  %v2217_v8 = vrot.slane %v2215_v5, 5  ;;  %v11411_v52 = vld [vmem:[#allocation7 + $0x230] sm:$0xff]   ;;  %v11553_v63 = vld [vmem:[#allocation2 + $0x28] sm:$0xf] }
 0x140   : > { %v9757_v34 = vcombine.low %v2200_v11, %v2210_v48  ;;  %v2223_v59 = vrot.slane %v2221_v33, 5  ;;  %v2225_v55 = vshrl.u32 %v12836_v42, 16  ;;  %v2231_v20 = vshll.u32 %v2172_v31, 16  ;;  %v12950_v11 = vpop.f32.mrf.mxu1 }
 0x141   : > { %v12947_v35 = vpop.f32.mrf.mxu0  ;;  %v1620_v60 = vrot.slane %v1619_v58, 4  ;;  %v2218_v13 = vor.u32 %v2217_v8, %v2214_v39  ;;  %v16444_v56 = vrot.slane %v12836_v42, 5  ;;  %v2647_v19 = vrot.slane %v2172_v31, 5  ;;  %v11554_v58 = vld [vmem:[#allocation7 + $0x238] sm:$0xff]  }
 0x142   : > { %4462 = vmatprep.mubr.bf16.mxu1 %v9757_v34  ;;  %v2227_v15 = vrot.slane %v2225_v55, 4  ;;  %v2233_v62 = vrot.slane %v2231_v20, 5  ;;  %v9615_v43 = vrot.slane %v1964_v2, 9  ;;  %v2042_v10 = vrot.slane %v11553_v63, 5  ;;  %v12964_v55 = vpop.f32.mrf.mxu1 }
 0x143   : > { %v12952_v61 = vpop.f32.mrf.mxu0  ;;  %4302 = vmatmul.mubr.bf16.vlgmr.msra.gmra.mxu0 %v12888_v57  ;;  %v16535_v5 = vcombine.low %v12830_v14, %v12832_v32  ;;  %v1625_v31 = vsel %vm12037_vm14, %v1620_v60, %v1624_v4  ;;  %v2219_v39 = vrot.slane %v2218_v13, 4  ;;  %v2646_v33 = vrot.slane %v16444_v56, 4 }
 0x144   : > { %v2045_v48 = vrot.slane %v1564_v24, 5  ;;  %11145 = vmatpush3.bf16.msra.mxu0 %v11554_v58  ;;  %4309 = vmatprep.mubr.bf16.mxu0 %v9726_v25  ;;  %v9710_v8 = vcombine.low %v1615_v1, %v1625_v31  ;;  %v2228_v2 = vor.u32 %v2227_v15, %v2223_v59  ;;  %v2043_v57 = vsel %vm12031_vm13, %v9615_v43, %v2042_v10  ;;  %v11414_v1 = vld [vmem:[#allocation7 + $0x228] sm:$0xff]  }
 0x145   : > { %4463 = vmatmul.mubr.bf16.vlgmr.msra.gmra.mxu1 %v16535_v5  ;;  %v2044_v34 = vrot.slane %v2042_v10, 4  ;;  %v2224_v14 = vsel %vm12037_vm14, %v2219_v39, %v2223_v59  ;;  %v12970_v32 = vsel %vm12031_vm13, %v2646_v33, %v2647_v19  ;;  %v16537_v4 = vor.u32 %v12296_v18, %v12294_v17  ;;  %11146 = vmatprep.subr.bf16.mxu0 %v11411_v52  ;;  %v12975_v60 = vpop.f32.mrf.mxu0  ;;  %v2173_v5 = vld [vmem:[#allocation2 + $0x38] sm:$0x1]  ;;  %v12981_v19 = vpop.f32.mrf.mxu1 }
 0x146   : > { %16536 = vst [vmem:[#allocation46_spill] sm:$0xff] %v12970_v32  ;;  %v1636_v25 = vshll.u32 %v11553_v63, 16  ;;  %v2229_v13 = vrot.slane %v2228_v2, 4  ;;  %v16538_v43 = vshrl.u32 %v12186_v23, 16  ;;  %v1646_v10 = vshll.u32 %v1564_v24, 16  ;;  %v11423_v32 = vld [vmem:[#allocation7 + $0x210] sm:$0xff]  }
 0x147   : > { %v1634_v20 = vrot.slane %v16537_v4, 4  ;;  %v2046_v15 = vsel %vm12031_vm13, %v2044_v34, %v2045_v48  ;;  %v2236_v17 = vshrl.u32 %v12846_v49, 16  ;;  %v2239_v18 = vshll.u32 %v12846_v49, 16  ;;  %v1565_v63 = vld [vmem:[#allocation2 + $0x38] sm:$0x1] }
 0x148   : > { %v1642_v59 = vrot.slane %v16538_v43, 4  ;;  %v9727_v31 = vcombine.low %v2043_v57, %v2046_v15  ;;  %v1638_v39 = vrot.slane %v1636_v25, 5  ;;  %v2234_v33 = vsel %vm12037_vm14, %v2229_v13, %v2233_v62  ;;  %11147 = vmatpush3.bf16.msra.mxu0 %v11411_v52  ;;  %v1965_v24 = vld [vmem:[#allocation2 + $0x30] sm:$0xe]  ;;  %v12991_v15 = vpop.f32.mrf.mxu0  ;;  %v12993_v43 = vpop.f32.mrf.mxu1 }
 0x149   : > { %v1648_v58 = vrot.slane %v1646_v10, 5  ;;  %v2245_v48 = vshll.u32 %v12848_v47, 16  ;;  %v2249_v23 = vshrl.u32 %v12848_v47, 16  ;;  %v9758_v2 = vcombine.low %v2224_v14, %v2234_v33  ;;  %11148 = vmatprep.subr.bf16.mxu0 %v11414_v1  ;;  %v11417_v25 = vld [vmem:[#allocation7 + $0x220] sm:$0xff]  }
 0x14a   : > { %v1639_v57 = vsel %vm12037_vm14, %v1634_v20, %v1638_v39  ;;  %v1643_v34 = vor.u32 %v1642_v59, %v1638_v39  ;;  %v2238_v4 = vrot.slane %v2236_v17, 4  ;;  %v2241_v62 = vrot.slane %v2239_v18, 5  ;;  %v11555_v14 = vld [vmem:[#allocation2 + $0x34] sm:$0xf]  ;;  %v16540_v18 = vld [vmem:[#allocation23_spill] sm:$0xff] }
 0x14b   : > { %v2247_v13 = vrot.slane %v2245_v48, 5  ;;  %v2251_v10 = vrot.slane %v2249_v23, 4  ;;  %v2255_v56 = vshll.u32 %v2173_v5, 16  ;;  %4310 = vmatmul.mubr.bf16.gmra.mxu0 %v9710_v8  ;;  %4470 = vmatprep.mubr.bf16.mxu1 %v9758_v2  ;;  %v9616_v6 = vrot.slane %v1965_v24, 9 }
 0x14c   : > { %v1644_v52 = vrot.slane %v1643_v34, 4  ;;  %v2049_v33 = vrot.slane %v11555_v14, 5  ;;  %v2052_v22 = vrot.slane %v1565_v63, 5  ;;  %v16539_v20 = vcombine.low %v12834_v3, %v12836_v42  ;;  %4317 = vmatprep.mubr.bf16.mxu0 %v9727_v31  ;;  %11149 = vmatpush3.bf16.msra.mxu0 %v11414_v1  ;;  %v13005_v34 = vpop.f32.mrf.mxu0  ;;  %v13007_v3 = vpop.f32.mrf.mxu1 }
 0x14d   : > { %v2242_v59 = vor.u32 %v2241_v62, %v2238_v4  ;;  %v2252_v39 = vor.u32 %v2251_v10, %v2247_v13  ;;  %v2257_v17 = vrot.slane %v2255_v56, 5  ;;  %v16541_v48 = vor.u32 %v12386_v26, %v16540_v18  ;;  %v16542_v62 = vld [vmem:[#allocation20_spill] sm:$0xff]  ;;  %11150 = vmatprep.subr.bf16.mxu0 %v11417_v25 }
 0x14e   : > { %4471 = vmatmul.mubr.bf16.gmra.mxu1 %v16539_v20  ;;  %v1649_v8 = vsel %vm12037_vm14, %v1644_v52, %v1648_v58  ;;  %v2050_v5 = vsel %vm12031_vm13, %v9616_v6, %v2049_v33  ;;  %v2051_v24 = vrot.slane %v2049_v33, 4  ;;  %v1660_v2 = vshll.u32 %v11555_v14, 16  ;;  %v11420_v20 = vld [vmem:[#allocation7 + $0x218] sm:$0xff]   ;;  %v13014_v1 = vpop.f32.mrf.mxu0  ;;  %v13016_v33 = vpop.f32.mrf.mxu1  ;;  %v2174_v18 = vld [vmem:[#allocation2 + $0x44] sm:$0x1] }
 0x14f   : > { %v1658_v23 = vrot.slane %v16541_v48, 4  ;;  %v9711_v31 = vcombine.low %v1639_v57, %v1649_v8  ;;  %v2243_v4 = vrot.slane %v2242_v59, 4  ;;  %v2253_v56 = vrot.slane %v2252_v39, 4  ;;  %v1966_v8 = vld [vmem:[#allocation2 + $0x3c] sm:$0xe] }
 0x150   : > { %v16543_v10 = vshrl.u32 %v16542_v62, 16  ;;  %v2053_v58 = vsel %vm12031_vm13, %v2051_v24, %v2052_v22  ;;  %v1662_v52 = vrot.slane %v1660_v2, 5  ;;  %v1670_v6 = vshll.u32 %v1565_v63, 16  ;;  %v1566_v62 = vld [vmem:[#allocation2 + $0x44] sm:$0x1]  ;;  %11151 = vmatpush3.bf16.msra.mxu0 %v11417_v25 }
 0x151   : > { %v2260_v14 = vshrl.u32 %v12850_v36, 16  ;;  %v2248_v57 = vsel %vm12037_vm14, %v2243_v4, %v2247_v13  ;;  %v2258_v59 = vsel %vm12037_vm14, %v2253_v56, %v2257_v17  ;;  %v9728_v39 = vcombine.low %v2050_v5, %v2053_v58  ;;  %11152 = vmatprep.subr.bf16.mxu0 %v11420_v20  ;;  %v13028_v5 = vpop.f32.mrf.mxu1 }
 0x152   : > { %v1666_v26 = vrot.slane %v16543_v10, 4  ;;  %v2263_v48 = vshll.u32 %v12850_v36, 16  ;;  %v9759_v63 = vcombine.low %v2248_v57, %v2258_v59  ;;  %v1672_v2 = vrot.slane %v1670_v6, 5  ;;  %v13024_v10 = vpop.f32.mrf.mxu0 }
 0x153   : > { %v2262_v42 = vrot.slane %v2260_v14, 4  ;;  %v2269_v4 = vshll.u32 %v12860_v21, 16  ;;  %v2273_v17 = vshrl.u32 %v12860_v21, 16  ;;  %4318 = vmatmul.mubr.bf16.gmra.mxu0 %v9711_v31  ;;  %v1663_v56 = vsel %vm12037_vm14, %v1658_v23, %v1662_v52 }
 0x154   : > { %v1667_v24 = vor.u32 %v1666_v26, %v1662_v52  ;;  %v2265_v13 = vrot.slane %v2263_v48, 5  ;;  %4478 = vmatprep.mubr.bf16.mxu1 %v9759_v63  ;;  %v2279_v58 = vshll.u32 %v2174_v18, 16  ;;  %v9617_v25 = vrot.slane %v1966_v8, 9  ;;  %4325 = vmatprep.mubr.bf16.mxu0 %v9728_v39  ;;  %v11556_v48 = vld [vmem:[#allocation2 + $0x40] sm:$0xf]  ;;  %v13042_v18 = vpop.f32.mrf.mxu0  ;;  %v13046_v8 = vpop.f32.mrf.mxu1 }
 0x155   : > { %v16544_v6 = vcombine.low %v12846_v49, %v12848_v47  ;;  %v2271_v57 = vrot.slane %v2269_v4, 5  ;;  %v2275_v59 = vrot.slane %v2273_v17, 4  ;;  %v2056_v22 = vrot.slane %v11556_v48, 5  ;;  %11153 = vmatpush3.bf16.msra.mxu0 %v11420_v20  ;;  %v16546_v4 = vld [vmem:[#allocation21_spill] sm:$0xff] }
 0x156   : > { %v1668_v26 = vrot.slane %v1667_v24, 4  ;;  %v2266_v14 = vor.u32 %v2265_v13, %v2262_v42  ;;  %v2281_v63 = vrot.slane %v2279_v58, 5  ;;  %v2059_v16 = vrot.slane %v1566_v62, 5  ;;  %11154 = vmatprep.subr.bf16.mxu0 %v11423_v32  ;;  %v11426_v24 = vld [vmem:[#allocation7 + $0x208] sm:$0xff]  }
 0x157   : > { %4479 = vmatmul.mubr.bf16.gmra.mxu1 %v16544_v6  ;;  %v16545_v23 = vor.u32 %v12433_v0, %v12398_v30  ;;  %v2276_v42 = vor.u32 %v2275_v59, %v2271_v57  ;;  %v2057_v39 = vsel %vm12031_vm13, %v9617_v25, %v2056_v22  ;;  %v1684_v13 = vshll.u32 %v11556_v48, 16  ;;  %v13054_v25 = vld [vmem:[#allocation2 + $0x50] sm:$0x1] }
 0x158   : > { %v1673_v31 = vsel %vm12037_vm14, %v1668_v26, %v1672_v2  ;;  %v2267_v49 = vrot.slane %v2266_v14, 4  ;;  %v2058_v2 = vrot.slane %v2056_v22, 4  ;;  %v16547_v17 = vshrl.u32 %v16546_v4, 16  ;;  %v2175_v26 = vld [vmem:[#allocation2 + $0x50] sm:$0x1] }
 0x159   : > { %v13040_v52 = vrot.slane %v16545_v23, 4  ;;  %v9712_v47 = vcombine.low %v1663_v56, %v1673_v31  ;;  %v1694_v0 = vshll.u32 %v1566_v62, 16  ;;  %v2277_v56 = vrot.slane %v2276_v42, 4  ;;  %v1967_v31 = vld [vmem:[#allocation2 + $0x48] sm:$0xe]  ;;  %v13059_v62 = vpop.f32.mrf.mxu0  ;;  %11155 = vmatpush3.bf16.msra.mxu0 %v11423_v32  ;;  %v11429_v23 = vld [vmem:[#allocation7 + $0x200] sm:$0xff]  }
 0x15a   : > { %v1690_v30 = vrot.slane %v16547_v17, 4  ;;  %v2272_v20 = vsel %vm12037_vm14, %v2267_v49, %v2271_v57  ;;  %v2284_v58 = vshrl.u32 %v12863_v7, 16  ;;  %v2287_v6 = vshll.u32 %v12863_v7, 16  ;;  %16548 = vst [vmem:[#allocation23_spill] sm:$0xff] %v13059_v62  ;;  %v13063_v17 = vpop.f32.mrf.mxu1  ;;  %11156 = vmatprep.subr.bf16.mxu0 %v11426_v24 }
 0x15b   : > { %v2060_v14 = vsel %vm12031_vm13, %v2058_v2, %v2059_v16  ;;  %v1686_v22 = vrot.slane %v1684_v13, 5  ;;  %v1696_v59 = vrot.slane %v1694_v0, 5  ;;  %v2293_v48 = vshll.u32 %v12870_v53, 16  ;;  %4326 = vmatmul.mubr.bf16.gmra.mxu0 %v9712_v47  ;;  %v13068_v62 = vpop.f32.mrf.mxu0  ;;  %v11557_v47 = vld [vmem:[#allocation2 + $0x4c] sm:$0xf] }
 0x15c   : > { %v2282_v57 = vsel %vm12037_vm14, %v2277_v56, %v2281_v63  ;;  %v9729_v49 = vcombine.low %v2057_v39, %v2060_v14  ;;  %v2286_v42 = vrot.slane %v2284_v58, 4  ;;  %v2289_v4 = vrot.slane %v2287_v6, 5  ;;  %v13071_v58 = vpop.f32.mrf.mxu1 }
 0x15d   : > { %v9760_v16 = vcombine.low %v2272_v20, %v2282_v57  ;;  %v1687_v2 = vsel %vm12037_vm14, %v13040_v52, %v1686_v22  ;;  %v1691_v13 = vor.u32 %v1690_v30, %v1686_v22  ;;  %v2295_v0 = vrot.slane %v2293_v48, 5  ;;  %v13077_v22 = vpop.f32.mrf.mxu0  ;;  %11157 = vmatpush3.bf16.msra.mxu0 %v11426_v24 }
 0x15e   : > { %4333 = vmatprep.mubr.bf16.mxu0 %v9729_v49  ;;  %v2290_v32 = vor.u32 %v2289_v4, %v2286_v42  ;;  %v2297_v63 = vshrl.u32 %v12870_v53, 16  ;;  %v2303_v39 = vshll.u32 %v2175_v26, 16  ;;  %v9618_v56 = vrot.slane %v1967_v31, 9  ;;  %v13082_v42 = vpop.f32.mrf.mxu1  ;;  %11158 = vmatprep.subr.bf16.mxu0 %v11429_v23 }
 0x15f   : > { %4486 = vmatprep.mubr.bf16.mxu1 %v9760_v16  ;;  %v1692_v6 = vrot.slane %v1691_v13, 4  ;;  %v2063_v20 = vrot.slane %v11557_v47, 5  ;;  %v2066_v14 = vrot.slane %v13054_v25, 5  ;;  %v16549_v52 = vor.u32 %v12447_v45, %v12436_v44  ;;  %v16551_v16 = vld [vmem:[#allocation22_spill] sm:$0xff] }
 0x160   : > { %v16550_v48 = vcombine.low %v12850_v36, %v12860_v21  ;;  %v2291_v26 = vrot.slane %v2290_v32, 4  ;;  %v2299_v31 = vrot.slane %v2297_v63, 4  ;;  %v2305_v57 = vrot.slane %v2303_v39, 5  ;;  %v13092_v39 = vpop.f32.mrf.mxu0 }
 0x161   : > { %v1706_v30 = vrot.slane %v16549_v52, 4  ;;  %v1708_v49 = vshll.u32 %v11557_v47, 16  ;;  %v1697_v4 = vsel %vm12037_vm14, %v1692_v6, %v1696_v59  ;;  %v2064_v44 = vsel %vm12031_vm13, %v9618_v56, %v2063_v20  ;;  %v2176_v52 = vld [vmem:[#allocation2 + $0x5c] sm:$0x1]  ;;  %11159 = vmatpush3.bf16.msra.mxu0 %v11429_v23 }
 0x162   : > { %4487 = vmatmul.mubr.bf16.gmra.mxu1 %v16550_v48  ;;  %v2065_v45 = vrot.slane %v2063_v20, 4  ;;  %v16552_v24 = vshrl.u32 %v16551_v16, 16  ;;  %v9713_v36 = vcombine.low %v1687_v2, %v1697_v4  ;;  %v2296_v21 = vsel %vm12037_vm14, %v2291_v26, %v2295_v0  ;;  %v1968_v20 = vld [vmem:[#allocation2 + $0x54] sm:$0xe]  ;;  %v13099_v48 = vpop.f32.mrf.mxu1 }
 0x163   : > { %v2300_v32 = vor.u32 %v2299_v31, %v2295_v0  ;;  %v1710_v63 = vrot.slane %v1708_v49, 5  ;;  %v1718_v59 = vshll.u32 %v13054_v25, 16  ;;  %v2308_v56 = vshrl.u32 %v12911_v28, 16  ;;  %16553 = vst [vmem:[#allocation20_spill] sm:$0xff] %v13099_v48 }
 0x164   : > { %v1714_v13 = vrot.slane %v16552_v24, 4  ;;  %v2067_v47 = vsel %vm12031_vm13, %v2065_v45, %v2066_v14  ;;  %v2311_v6 = vshll.u32 %v12911_v28, 16  ;;  %4334 = vmatmul.mubr.bf16.gmra.mxu0 %v9713_v36  ;;  %v2317_v25 = vshll.u32 %v12917_v51, 16 }
 0x165   : > { %v2301_v2 = vrot.slane %v2300_v32, 4  ;;  %v9730_v4 = vcombine.low %v2064_v44, %v2067_v47  ;;  %v1711_v0 = vsel %vm12037_vm14, %v1706_v30, %v1710_v63  ;;  %v1720_v31 = vrot.slane %v1718_v59, 5  ;;  %v1568_v32 = vld [vmem:[#allocation2 + $0x5c] sm:$0x1]  ;;  %v13107_v44 = vpop.f32.mrf.mxu0  ;;  %v13110_v47 = vld [vmem:[#allocation2 + $0x60] sm:$0xf]  ;;  %v13112_v59 = vpop.f32.mrf.mxu1 }
 0x166   : > { %v1715_v26 = vor.u32 %v1714_v13, %v1710_v63  ;;  %v2310_v49 = vrot.slane %v2308_v56, 4  ;;  %v2313_v14 = vrot.slane %v2311_v6, 5  ;;  %v2321_v24 = vshrl.u32 %v12917_v51, 16  ;;  %16554 = vst [vmem:[#allocation21_spill] sm:$0xff] %v13107_v44  ;;  %16555 = vst [vmem:[#allocation22_spill] sm:$0xff] %v13112_v59 }
 0x167   : > { %v2306_v45 = vsel %vm12037_vm14, %v2301_v2, %v2305_v57  ;;  %4341 = vmatprep.mubr.bf16.mxu0 %v9730_v4  ;;  %v2327_v23 = vshll.u32 %v2176_v52, 16  ;;  %v2319_v63 = vrot.slane %v2317_v25, 5  ;;  %v9619_v2 = vrot.slane %v1968_v20, 9  ;;  %v13116_v4 = vld [vmem:[#allocation2 + $0x64] sm:$0xf]  ;;  %v13118_v52 = vpop.f32.mrf.mxu0  ;;  %v13120_v25 = vpop.f32.mrf.mxu1 }
 0x168   : > { %v1716_v16 = vrot.slane %v1715_v26, 4  ;;  %v9761_v13 = vcombine.low %v2296_v21, %v2306_v45  ;;  %v2314_v36 = vor.u32 %v2313_v14, %v2310_v49  ;;  %v2323_v56 = vrot.slane %v2321_v24, 4  ;;  %16556 = vst [vmem:[#allocation47_spill] sm:$0xff] %v13118_v52  ;;  %v11558_v21 = vld [vmem:[#allocation2 + $0x58] sm:$0xf]  ;;  %16557 = vst [vmem:[#allocation48_spill] sm:$0xff] %v13120_v25 }
 0x169   : > { %v2329_v6 = vrot.slane %v2327_v23, 5  ;;  %v2070_v49 = vrot.slane %v11558_v21, 5  ;;  %v2073_v14 = vrot.slane %v1568_v32, 5  ;;  %v16558_v45 = vcombine.low %v12863_v7, %v12870_v53  ;;  %v16560_v23 = vld [vmem:[#allocation24_spill] sm:$0xff]  ;;  %v2177_v7 = vld [vmem:[#allocation2 + $0x68] sm:$0x1] }
 0x16a   : > { %v1721_v57 = vsel %vm12037_vm14, %v1716_v16, %v1720_v31  ;;  %4494 = vmatprep.mubr.bf16.mxu1 %v9761_v13  ;;  %v2315_v30 = vrot.slane %v2314_v36, 4  ;;  %v2324_v31 = vor.u32 %v2323_v56, %v2319_v63  ;;  %v16559_v20 = vor.u32 %v12520_v12, %v12510_v41  ;;  %v13136_v56 = vpop.f32.mrf.mxu1 }
 0x16b   : > { %v9714_v26 = vcombine.low %v1711_v0, %v1721_v57  ;;  %4495 = vmatmul.mubr.bf16.gmra.mxu1 %v16558_v45  ;;  %v1732_v24 = vshll.u32 %v11558_v21, 16  ;;  %v16561_v59 = vshrl.u32 %v16560_v23, 16  ;;  %v13130_v0 = vpop.f32.mrf.mxu0  ;;  %v2071_v57 = vsel %vm12031_vm13, %v9619_v2, %v2070_v49  ;;  %16563 = vst [vmem:[#allocation49_spill] sm:$0xff] %v13136_v56  ;;  %v1969_v23 = vld [vmem:[#allocation2 + $0x60] sm:$0xe] }
 0x16c   : > { %v1730_v16 = vrot.slane %v16559_v20, 4  ;;  %16562 = vst [vmem:[#allocation24_spill] sm:$0xff] %v13130_v0  ;;  %v2320_v36 = vsel %vm12037_vm14, %v2315_v30, %v2319_v63  ;;  %v2072_v25 = vrot.slane %v2070_v49, 4  ;;  %v1742_v53 = vshll.u32 %v1568_v32, 16 }
 0x16d   : > { %v1738_v13 = vrot.slane %v16561_v59, 4  ;;  %v2325_v45 = vrot.slane %v2324_v31, 4  ;;  %v1734_v41 = vrot.slane %v1732_v24, 5  ;;  %v2332_v12 = vshrl.u32 %v13110_v47, 16  ;;  %v1569_v59 = vld [vmem:[#allocation2 + $0x68] sm:$0x1]  ;;  %4342 = vmatmul.mubr.bf16.gmra.mxu0 %v9714_v26  ;;  %v13148_v56 = vpop.f32.mrf.mxu0  ;;  %v13150_v26 = vpop.f32.mrf.mxu1 }
 0x16e   : > { %v2335_v21 = vshll.u32 %v13110_v47, 16  ;;  %v2074_v20 = vsel %vm12031_vm13, %v2072_v25, %v2073_v14  ;;  %v1744_v30 = vrot.slane %v1742_v53, 5  ;;  %v2341_v63 = vshll.u32 %v13116_v4, 16 }
 0x16f   : > { %v2345_v2 = vshrl.u32 %v13116_v4, 16  ;;  %v2330_v32 = vsel %vm12037_vm14, %v2325_v45, %v2329_v6  ;;  %v9731_v49 = vcombine.low %v2071_v57, %v2074_v20  ;;  %v1735_v31 = vsel %vm12037_vm14, %v1730_v16, %v1734_v41  ;;  %v13154_v57 = vld [vmem:[#allocation2 + $0x6c] sm:$0xf]  ;;  %v11559_v45 = vld [vmem:[#allocation2 + $0x64] sm:$0xf] }
 0x170   : > { %v1739_v24 = vor.u32 %v1738_v13, %v1734_v41  ;;  %v9762_v0 = vcombine.low %v2320_v36, %v2330_v32  ;;  %v2334_v14 = vrot.slane %v2332_v12, 4  ;;  %v2337_v25 = vrot.slane %v2335_v21, 5 }
 0x171   : > { %v2343_v53 = vrot.slane %v2341_v63, 5  ;;  %4349 = vmatprep.mubr.bf16.mxu0 %v9731_v49  ;;  %v2347_v44 = vrot.slane %v2345_v2, 4  ;;  %v2351_v48 = vshll.u32 %v2177_v7, 16  ;;  %v9747_v6 = vcombine.low %v13110_v47, %v13116_v4  ;;  %v13164_v63 = vld [vmem:[#allocation2 + $0x70] sm:$0xf]  ;;  %v13168_v2 = vpop.f32.mrf.mxu1 }
 0x172   : > { %v1740_v52 = vrot.slane %v1739_v24, 4  ;;  %4502 = vmatprep.mubr.bf16.mxu1 %v9762_v0  ;;  %v2338_v16 = vor.u32 %v2337_v25, %v2334_v14  ;;  %v9620_v13 = vrot.slane %v1969_v23, 9  ;;  %v2077_v41 = vrot.slane %v11559_v45, 5  ;;  %v13166_v0 = vpop.f32.mrf.mxu0  ;;  %16566 = vst [vmem:[#allocation50_spill] sm:$0xff] %v13168_v2  ;;  %v2178_v24 = vld [vmem:[#allocation2 + $0x74] sm:$0x1] }
 0x173   : > { %v2080_v20 = vrot.slane %v1569_v59, 5  ;;  %v16564_v36 = vcombine.low %v12911_v28, %v12917_v51  ;;  %v2348_v21 = vor.u32 %v2347_v44, %v2343_v53  ;;  %v2353_v7 = vrot.slane %v2351_v48, 5  ;;  %v16567_v48 = vld [vmem:[#allocation25_spill] sm:$0xff] }
 0x174   : > { %v1745_v12 = vsel %vm12037_vm14, %v1740_v52, %v1744_v30  ;;  %v16565_v47 = vor.u32 %v12549_v9, %v12547_v37  ;;  %v2339_v49 = vrot.slane %v2338_v16, 4  ;;  %v2078_v51 = vsel %vm12031_vm13, %v9620_v13, %v2077_v41  ;;  %v13174_v9 = vpop.f32.mrf.mxu1 }
 0x175   : > { %4503 = vmatmul.mubr.bf16.gmra.mxu1 %v16564_v36  ;;  %v9715_v32 = vcombine.low %v1735_v31, %v1745_v12  ;;  %v2079_v28 = vrot.slane %v2077_v41, 4  ;;  %v2349_v52 = vrot.slane %v2348_v21, 4  ;;  %v1756_v44 = vshll.u32 %v11559_v45, 16  ;;  %16569 = vst [vmem:[#allocation25_spill] sm:$0xff] %v13174_v9  ;;  %v13184_v12 = vpop.f32.mrf.mxu0 }
 0x176   : > { %v1754_v4 = vrot.slane %v16565_v47, 4  ;;  %v16568_v30 = vshrl.u32 %v16567_v48, 16  ;;  %v1766_v37 = vshll.u32 %v1569_v59, 16  ;;  %v2344_v14 = vsel %vm12037_vm14, %v2339_v49, %v2343_v53  ;;  %v1570_v59 = vld [vmem:[#allocation2 + $0x74] sm:$0x1] }
 0x177   : > { %4350 = vmatmul.mubr.bf16.gmra.mxu0 %v9715_v32  ;;  %v2081_v31 = vsel %vm12031_vm13, %v2079_v28, %v2080_v20  ;;  %v2356_v25 = vshrl.u32 %v13154_v57, 16  ;;  %v2359_v16 = vshll.u32 %v13154_v57, 16  ;;  %v2354_v13 = vsel %vm12037_vm14, %v2349_v52, %v2353_v7  ;;  %v1970_v49 = vld [vmem:[#allocation2 + $0x6c] sm:$0xe] }
 0x178   : > { %v1762_v23 = vrot.slane %v16568_v30, 4  ;;  %v9732_v45 = vcombine.low %v2078_v51, %v2081_v31  ;;  %v1758_v41 = vrot.slane %v1756_v44, 5  ;;  %v1768_v36 = vrot.slane %v1766_v37, 5  ;;  %v13190_v51 = vpop.f32.mrf.mxu1 }
 0x179   : > { %v9763_v21 = vcombine.low %v2344_v14, %v2354_v13  ;;  %v2358_v47 = vrot.slane %v2356_v25, 4  ;;  %v2361_v32 = vrot.slane %v2359_v16, 5  ;;  %v2365_v53 = vshll.u32 %v13164_v63, 16  ;;  %16570 = vst [vmem:[#allocation51_spill] sm:$0xff] %v13190_v51  ;;  %v13196_v14 = vld [vmem:[#allocation2 + $0x78] sm:$0xf]  ;;  %v13200_v13 = vpop.f32.mrf.mxu0 }
 0x17a   : > { %4357 = vmatprep.mubr.bf16.mxu0 %v9732_v45  ;;  %v1763_v20 = vor.u32 %v1762_v23, %v1758_v41  ;;  %v2369_v28 = vshrl.u32 %v13164_v63, 16  ;;  %v2375_v48 = vshll.u32 %v2178_v24, 16  ;;  %v1759_v52 = vsel %vm12037_vm14, %v1754_v4, %v1758_v41  ;;  %v13198_v16 = vld [vmem:[#allocation2 + $0x7c] sm:$0xf]  ;;  %16571 = vst [vmem:[#allocation52_spill] sm:$0xff] %v13200_v13 }
 0x17b   : > { %4510 = vmatprep.mubr.bf16.mxu1 %v9763_v21  ;;  %v2362_v44 = vor.u32 %v2361_v32, %v2358_v47  ;;  %v2367_v30 = vrot.slane %v2365_v53, 5  ;;  %v9748_v37 = vcombine.low %v13154_v57, %v13164_v63  ;;  %v9621_v25 = vrot.slane %v1970_v49, 9  ;;  %v11560_v21 = vld [vmem:[#allocation2 + $0x70] sm:$0xf] }
 0x17c   : > { %v1764_v23 = vrot.slane %v1763_v20, 4  ;;  %v2371_v31 = vrot.slane %v2369_v28, 4  ;;  %v2377_v24 = vrot.slane %v2375_v48, 5  ;;  %v2084_v7 = vrot.slane %v11560_v21, 5  ;;  %v16573_v32 = vld [vmem:[#allocation26_spill] sm:$0xff]  ;;  %v13209_v20 = vpop.f32.mrf.mxu1 }
 0x17d   : > { %4511 = vmatmul.mubr.bf16.gmra.mxu1 %v9747_v6  ;;  %v2363_v45 = vrot.slane %v2362_v44, 4  ;;  %v2087_v4 = vrot.slane %v1570_v59, 5  ;;  %v16572_v41 = vor.u32 %v12599_v54, %v12597_v40  ;;  %v1780_v63 = vshll.u32 %v11560_v21, 16  ;;  %16575 = vst [vmem:[#allocation26_spill] sm:$0xff] %v13209_v20  ;;  %v2179_v21 = vld [vmem:[#allocation2 + $0x80] sm:$0x1] }
 0x17e   : > { %v1769_v57 = vsel %vm12037_vm14, %v1764_v23, %v1768_v36  ;;  %v2372_v6 = vor.u32 %v2371_v31, %v2367_v30  ;;  %v16574_v53 = vshrl.u32 %v16573_v32, 16  ;;  %v2085_v44 = vsel %vm12031_vm13, %v9621_v25, %v2084_v7  ;;  %v13216_v23 = vpop.f32.mrf.mxu0 }
 0x17f   : > { %v1778_v47 = vrot.slane %v16572_v41, 4  ;;  %v9716_v28 = vcombine.low %v1759_v52, %v1769_v57  ;;  %v2368_v48 = vsel %vm12037_vm14, %v2363_v45, %v2367_v30  ;;  %v2086_v51 = vrot.slane %v2084_v7, 4  ;;  %16576 = vst [vmem:[#allocation53_spill] sm:$0xff] %v13216_v23 }
 0x180   : > { %v1786_v49 = vrot.slane %v16574_v53, 4  ;;  %v2373_v54 = vrot.slane %v2372_v6, 4  ;;  %v1782_v40 = vrot.slane %v1780_v63, 5  ;;  %v1790_v41 = vshll.u32 %v1570_v59, 16  ;;  %v13227_v6 = vpop.f32.mrf.mxu1  ;;  %v1571_v53 = vld [vmem:[#allocation2 + $0x80] sm:$0x1]  ;;  %v13229_v2 = vpop.f32.mrf.mxu0 }
 0x181   : > { %v2380_v36 = vshrl.u32 %v13196_v14, 16  ;;  %4358 = vmatmul.mubr.bf16.gmra.mxu0 %v9716_v28  ;;  %v2088_v31 = vsel %vm12031_vm13, %v2086_v51, %v2087_v4  ;;  %v2383_v52 = vshll.u32 %v13196_v14, 16  ;;  %v2389_v30 = vshll.u32 %v13198_v16, 16  ;;  %v1971_v28 = vld [vmem:[#allocation2 + $0x78] sm:$0xe] }
 0x182   : > { %v2393_v45 = vshrl.u32 %v13198_v16, 16  ;;  %v2378_v7 = vsel %vm12037_vm14, %v2373_v54, %v2377_v24  ;;  %v9733_v25 = vcombine.low %v2085_v44, %v2088_v31  ;;  %v1783_v59 = vsel %vm12037_vm14, %v1778_v47, %v1782_v40  ;;  %v13231_v24 = vpop.f32.mrf.mxu1  ;;  %v13243_v31 = vpop.f32.mrf.mxu0 }
 0x183   : > { %v1787_v57 = vor.u32 %v1786_v49, %v1782_v40  ;;  %v9764_v63 = vcombine.low %v2368_v48, %v2378_v7  ;;  %v1792_v32 = vrot.slane %v1790_v41, 5  ;;  %v2382_v51 = vrot.slane %v2380_v36, 4 }
 0x184   : > { %v2385_v4 = vrot.slane %v2383_v52, 5  ;;  %4365 = vmatprep.mubr.bf16.mxu0 %v9733_v25  ;;  %v2391_v23 = vrot.slane %v2389_v30, 5  ;;  %v2395_v13 = vrot.slane %v2393_v45, 4  ;;  %v2399_v9 = vshll.u32 %v2179_v21, 16  ;;  %v13245_v21 = vpop.f32.mrf.mxu1 }
 0x185   : > { %v1788_v20 = vrot.slane %v1787_v57, 4  ;;  %4518 = vmatprep.mubr.bf16.mxu1 %v9764_v63  ;;  %v10218_v49 = vadd.f32 %v12952_v61, %v12947_v35  ;;  %v10330_v48 = vadd.f32 %v12964_v55, %v12950_v11  ;;  %v9749_v44 = vcombine.low %v13196_v14, %v13198_v16  ;;  %v11561_v14 = vld [vmem:[#allocation2 + $0x7c] sm:$0xf] }
 0x186   : > { %v2386_v47 = vor.u32 %v2385_v4, %v2382_v51  ;;  %4519 = vmatmul.mubr.bf16.gmra.mxu1 %v9748_v37  ;;  %v2396_v40 = vor.u32 %v2395_v13, %v2391_v23  ;;  %v2401_v41 = vrot.slane %v2399_v9, 5  ;;  %v10221_v36 = vadd.f32 %v12991_v15, %v12975_v60  ;;  %v13251_v9 = vld [vmem:[#allocation2 + $0x84] sm:$0xf]  ;;  %v16580_v57 = vld [vmem:[#allocation27_spill] sm:$0xff]  ;;  %v13270_v51 = vpop.f32.mrf.mxu1 }
 0x187   : > { %v1793_v54 = vsel %vm12037_vm14, %v1788_v20, %v1792_v32  ;;  %v13247_v52 = vadd.f32 %v10330_v48, %v10218_v49  ;;  %v10333_v11 = vadd.f32 %v12993_v43, %v12981_v19  ;;  %v9622_v37 = vrot.slane %v1971_v28, 9  ;;  %v13253_v20 = vpop.f32.mrf.mxu0  ;;  %v13262_v43 = vld [vmem:[#allocation2 + $0x88] sm:$0xf] }
 0x188   : > { %v9717_v35 = vcombine.low %v1783_v59, %v1793_v54  ;;  %v2387_v61 = vrot.slane %v2386_v47, 4  ;;  %v2397_v55 = vrot.slane %v2396_v40, 4  ;;  %v2091_v16 = vrot.slane %v11561_v14, 5 }
 0x189   : > { %16577 = vst [vmem:[#allocation54_spill] sm:$0xff] %v13247_v52  ;;  %v2094_v13 = vrot.slane %v1571_v53, 5  ;;  %v13257_v15 = vadd.f32 %v10333_v11, %v10221_v36  ;;  %v16579_v30 = vor.u32 %v12655_v50, %v12635_v46  ;;  %v1804_v19 = vshll.u32 %v11561_v14, 16  ;;  %v13278_v40 = vpop.f32.mrf.mxu0  ;;  %v11432_v52 = vld [vmem:[#allocation9 + $0x78] sm:$0xff]  }
 0x18a   : > { %4366 = vmatmul.mubr.bf16.gmra.mxu0 %v9717_v35  ;;  %v2392_v60 = vsel %vm12037_vm14, %v2387_v61, %v2391_v23  ;;  %v2402_v7 = vsel %vm12037_vm14, %v2397_v55, %v2401_v41  ;;  %v2092_v25 = vsel %vm12031_vm13, %v9622_v37, %v2091_v16  ;;  %v2093_v59 = vrot.slane %v2091_v16, 4  ;;  %v2180_v23 = vld [vmem:[#allocation2 + $0x8c] sm:$0x1]  ;;  %v13284_v16 = vpop.f32.mrf.mxu1  ;;  %10672 = vmatprep.subr.bf16.mxu1 %v11432_v52 }
 0x18b   : > { %16578 = vst [vmem:[#allocation55_spill] sm:$0xff] %v13257_v15  ;;  %v1802_v45 = vrot.slane %v16579_v30, 4  ;;  %v16581_v63 = vshrl.u32 %v16580_v57, 16  ;;  %v9765_v4 = vcombine.low %v2392_v60, %v2402_v7  ;;  %v1806_v28 = vrot.slane %v1804_v19, 5  ;;  %v1572_v7 = vld [vmem:[#allocation2 + $0x8c] sm:$0x1] }
 0x18c   : > { %v1814_v46 = vshll.u32 %v1571_v53, 16  ;;  %v2404_v50 = vshrl.u32 %v13251_v9, 16  ;;  %v2095_v47 = vsel %vm12031_vm13, %v2093_v59, %v2094_v13  ;;  %v2407_v49 = vshll.u32 %v13251_v9, 16 }
 0x18d   : > { %v1810_v32 = vrot.slane %v16581_v63, 4  ;;  %v2413_v48 = vshll.u32 %v13262_v43, 16  ;;  %v2417_v54 = vshrl.u32 %v13262_v43, 16  ;;  %v16582_v41 = vshrl.u32 %v12900_v38, 16  ;;  %4526 = vmatprep.mubr.bf16.mxu1 %v9765_v4  ;;  %v1972_v63 = vld [vmem:[#allocation2 + $0x84] sm:$0xe]  ;;  %v13296_v4 = vpop.f32.mrf.mxu1 }
 0x18e   : > { %v9734_v35 = vcombine.low %v2092_v25, %v2095_v47  ;;  %v1816_v61 = vrot.slane %v1814_v46, 5  ;;  %4527 = vmatmul.mubr.bf16.gmra.mxu1 %v9749_v44  ;;  %v2406_v11 = vrot.slane %v2404_v50, 4  ;;  %v2409_v55 = vrot.slane %v2407_v49, 5  ;;  %v13308_v46 = vld [vmem:[#allocation2 + $0x94] sm:$0xf] }
 0x18f   : > { %v13282_v36 = vrot.slane %v16582_v41, 4  ;;  %v1811_v53 = vor.u32 %v1810_v32, %v1806_v28  ;;  %v2415_v37 = vrot.slane %v2413_v48, 5  ;;  %v2419_v14 = vrot.slane %v2417_v54, 4  ;;  %v13294_v32 = vpop.f32.mrf.mxu0  ;;  %v13312_v47 = vpop.f32.mrf.mxu1  ;;  %v16585_v41 = vld [vmem:[#allocation29_spill] sm:$0xff] }
 0x190   : > { %4373 = vmatprep.mubr.bf16.mxu0 %v9734_v35  ;;  %v1807_v13 = vsel %vm12037_vm14, %v1802_v45, %v1806_v28  ;;  %v2423_v30 = vshll.u32 %v2180_v23, 16  ;;  %v10224_v19 = vadd.f32 %v13014_v1, %v13005_v34  ;;  %v2410_v25 = vor.u32 %v2409_v55, %v2406_v11  ;;  %v13304_v28 = vld [vmem:[#allocation2 + $0x90] sm:$0xf]  ;;  %v16586_v35 = vld [vmem:[#allocation31_spill] sm:$0xff] }
 0x191   : > { %v1812_v60 = vrot.slane %v1811_v53, 4  ;;  %v2420_v59 = vor.u32 %v2419_v14, %v2415_v37  ;;  %v10336_v44 = vadd.f32 %v13016_v33, %v13007_v3  ;;  %v9750_v57 = vcombine.low %v13251_v9, %v13262_v43  ;;  %v13310_v50 = vpop.f32.mrf.mxu0  ;;  %v13324_v55 = vpop.f32.mrf.mxu1 }
 0x192   : > { %v2425_v23 = vrot.slane %v2423_v30, 5  ;;  %v10227_v34 = vadd.f32 %v13042_v18, %v13024_v10  ;;  %v10339_v1 = vadd.f32 %v13046_v8, %v13028_v5  ;;  %v2411_v33 = vrot.slane %v2410_v25, 4  ;;  %v11562_v10 = vld [vmem:[#allocation2 + $0x88] sm:$0xf]  ;;  %v16587_v30 = vld [vmem:[#allocation28_spill] sm:$0xff] }
 0x193   : > { %v1817_v45 = vsel %vm12037_vm14, %v1812_v60, %v1816_v61  ;;  %v2421_v9 = vrot.slane %v2420_v59, 4  ;;  %v13306_v43 = vadd.f32 %v10336_v44, %v10224_v19  ;;  %v9623_v48 = vrot.slane %v1972_v63, 9  ;;  %v13322_v11 = vpop.f32.mrf.mxu0 }
 0x194   : > { %v9718_v3 = vcombine.low %v1807_v13, %v1817_v45  ;;  %v13314_v49 = vadd.f32 %v10339_v1, %v10227_v34  ;;  %v2098_v18 = vrot.slane %v11562_v10, 5  ;;  %v2101_v54 = vrot.slane %v1572_v7, 5 }
 0x195   : > { %16583 = vst [vmem:[#allocation27_spill] sm:$0xff] %v13306_v43  ;;  %v2416_v5 = vsel %vm12037_vm14, %v2411_v33, %v2415_v37  ;;  %v2426_v8 = vsel %vm12037_vm14, %v2421_v9, %v2425_v23  ;;  %v1825_v53 = vor.u32 %v16586_v35, %v16585_v41  ;;  %v1828_v61 = vshll.u32 %v11562_v10, 16  ;;  %v2181_v37 = vld [vmem:[#allocation2 + $0x98] sm:$0x1]  ;;  %v13331_v23 = vpop.f32.mrf.mxu0 }
 0x196   : > { %16584 = vst [vmem:[#allocation56_spill] sm:$0xff] %v13314_v49  ;;  %4374 = vmatmul.mubr.bf16.gmra.mxu0 %v9718_v3  ;;  %v9766_v14 = vcombine.low %v2416_v5, %v2426_v8  ;;  %v2099_v13 = vsel %vm12031_vm13, %v9623_v48, %v2098_v18  ;;  %v2100_v60 = vrot.slane %v2098_v18, 4  ;;  %v16588_v19 = vshrl.u32 %v16587_v30, 16  ;;  %v1973_v18 = vld [vmem:[#allocation2 + $0x90] sm:$0xe]  ;;  %v13342_v8 = vpop.f32.mrf.mxu1 }
 0x197   : > { %v1826_v59 = vrot.slane %v1825_v53, 4  ;;  %v1830_v44 = vrot.slane %v1828_v61, 5  ;;  %v1838_v63 = vshll.u32 %v1572_v7, 16  ;;  %v2428_v45 = vshrl.u32 %v13304_v28, 16  ;;  %v13340_v5 = vpop.f32.mrf.mxu0  ;;  %v1573_v61 = vld [vmem:[#allocation2 + $0x98] sm:$0x1] }
 0x198   : > { %v1834_v25 = vrot.slane %v16588_v19, 4  ;;  %4534 = vmatprep.mubr.bf16.mxu1 %v9766_v14  ;;  %v2102_v34 = vsel %vm12031_vm13, %v2100_v60, %v2101_v54  ;;  %v2431_v1 = vshll.u32 %v13304_v28, 16  ;;  %v2437_v3 = vshll.u32 %v13308_v46, 16  ;;  %v1974_v49 = vld [vmem:[#allocation2 + $0x9c] sm:$0xe] }
 0x199   : > { %v2441_v33 = vshrl.u32 %v13308_v46, 16  ;;  %4535 = vmatmul.mubr.bf16.gmra.mxu1 %v9750_v57  ;;  %v9735_v9 = vcombine.low %v2099_v13, %v2102_v34  ;;  %v1831_v48 = vsel %vm12037_vm14, %v1826_v59, %v1830_v44  ;;  %v1840_v10 = vrot.slane %v1838_v63, 5  ;;  %v16589_v57 = vld [vmem:[#allocation23_spill] sm:$0xff]  ;;  %v13348_v19 = vpop.f32.mrf.mxu0 }
 0x19a   : > { %v1835_v7 = vor.u32 %v1834_v25, %v1830_v44  ;;  %v2430_v41 = vrot.slane %v2428_v45, 4  ;;  %v2433_v54 = vrot.slane %v2431_v1, 5  ;;  %v2439_v35 = vrot.slane %v2437_v3, 5 }
 0x19b   : > { %v2443_v53 = vrot.slane %v2441_v33, 4  ;;  %4381 = vmatprep.mubr.bf16.mxu0 %v9735_v9  ;;  %v2447_v60 = vshll.u32 %v2181_v37, 16  ;;  %v10230_v13 = vadd.f32 %v13068_v62, %v16589_v57  ;;  %v10342_v30 = vadd.f32 %v13071_v58, %v13063_v17  ;;  %v16591_v62 = vld [vmem:[#allocation20_spill] sm:$0xff]  ;;  %v13360_v17 = vld [vmem:[#allocation2 + $0x9c] sm:$0xf]  ;;  %v13362_v58 = vpop.f32.mrf.mxu1  ;;  %v16595_v57 = vld [vmem:[#allocation30_spill] sm:$0xff] }
 0x19c   : > { %v1836_v14 = vrot.slane %v1835_v7, 4  ;;  %v2434_v25 = vor.u32 %v2433_v54, %v2430_v41  ;;  %v9751_v44 = vcombine.low %v13304_v28, %v13308_v46  ;;  %v10233_v63 = vadd.f32 %v13092_v39, %v13077_v22  ;;  %v13364_v46 = vld [vmem:[#allocation2 + $0xa0] sm:$0xf]  ;;  %v2182_v22 = vld [vmem:[#allocation2 + $0xa4] sm:$0x1] }
 0x19d   : > { %v2444_v59 = vor.u32 %v2443_v53, %v2439_v35  ;;  %v2449_v37 = vrot.slane %v2447_v60, 5  ;;  %v13356_v34 = vadd.f32 %v10342_v30, %v10230_v13  ;;  %v10345_v1 = vadd.f32 %v16591_v62, %v13082_v42  ;;  %v11563_v7 = vld [vmem:[#allocation2 + $0x94] sm:$0xf]  ;;  %v16593_v54 = vld [vmem:[#allocation32_spill] sm:$0xff]  ;;  %v16594_v53 = vld [vmem:[#allocation33_spill] sm:$0xff]  ;;  %v13370_v42 = vpop.f32.mrf.mxu0  ;;  %v13380_v62 = vpop.f32.mrf.mxu1 }
 0x19e   : > { %v1841_v45 = vsel %vm12037_vm14, %v1836_v14, %v1840_v10  ;;  %v2435_v33 = vrot.slane %v2434_v25, 4  ;;  %v9624_v28 = vrot.slane %v1973_v18, 9  ;;  %v2105_v10 = vrot.slane %v11563_v7, 5 }
 0x19f   : > { %16590 = vst [vmem:[#allocation29_spill] sm:$0xff] %v13356_v34  ;;  %v9719_v3 = vcombine.low %v1831_v48, %v1841_v45  ;;  %v2445_v9 = vrot.slane %v2444_v59, 4  ;;  %v13366_v39 = vadd.f32 %v10345_v1, %v10233_v63  ;;  %v2108_v41 = vrot.slane %v1573_v61, 5  ;;  %v16598_v34 = vld [vmem:[#allocation21_spill] sm:$0xff] }
 0x1a0   : > { %v1849_v14 = vor.u32 %v16594_v53, %v16593_v54  ;;  %v2440_v48 = vsel %vm12037_vm14, %v2435_v33, %v2439_v35  ;;  %v1852_v60 = vshll.u32 %v11563_v7, 16  ;;  %v16596_v13 = vshrl.u32 %v16595_v57, 16 }
 0x1a1   : > { %16592 = vst [vmem:[#allocation31_spill] sm:$0xff] %v13366_v39  ;;  %4382 = vmatmul.mubr.bf16.gmra.mxu0 %v9719_v3  ;;  %v2450_v18 = vsel %vm12037_vm14, %v2445_v9, %v2449_v37  ;;  %v2106_v59 = vsel %vm12031_vm13, %v9624_v28, %v2105_v10  ;;  %v2107_v63 = vrot.slane %v2105_v10, 4  ;;  %v1862_v3 = vshll.u32 %v1573_v61, 16  ;;  %v1574_v28 = vld [vmem:[#allocation2 + $0xa4] sm:$0x1]  ;;  %v13388_v10 = vpop.f32.mrf.mxu0 }
 0x1a2   : > { %v1858_v30 = vrot.slane %v16596_v13, 4  ;;  %v9767_v25 = vcombine.low %v2440_v48, %v2450_v18  ;;  %v1850_v45 = vrot.slane %v1849_v14, 4  ;;  %v1854_v1 = vrot.slane %v1852_v60, 5 }
 0x1a3   : > { %v2452_v54 = vshrl.u32 %v13360_v17, 16  ;;  %v2455_v35 = vshll.u32 %v13360_v17, 16  ;;  %v2109_v37 = vsel %vm12031_vm13, %v2107_v63, %v2108_v41  ;;  %v2461_v33 = vshll.u32 %v13364_v46, 16 }
 0x1a4   : > { %4542 = vmatprep.mubr.bf16.mxu1 %v9767_v25  ;;  %v2465_v9 = vshrl.u32 %v13364_v46, 16  ;;  %v2471_v7 = vshll.u32 %v2182_v22, 16  ;;  %v16597_v53 = vshll.u32 %v12900_v38, 16  ;;  %v9736_v61 = vcombine.low %v2106_v59, %v2109_v37  ;;  %v13394_v25 = vpop.f32.mrf.mxu1  ;;  %v16599_v38 = vld [vmem:[#allocation47_spill] sm:$0xff]  ;;  %v13404_v37 = vpop.f32.mrf.mxu0 }
 0x1a5   : > { %4543 = vmatmul.mubr.bf16.gmra.mxu1 %v9751_v44  ;;  %v1859_v48 = vor.u32 %v1858_v30, %v1854_v1  ;;  %v1864_v18 = vrot.slane %v1862_v3, 5  ;;  %v2454_v60 = vrot.slane %v2452_v54, 4  ;;  %v2457_v57 = vrot.slane %v2455_v35, 5  ;;  %v16600_v30 = vld [vmem:[#allocation22_spill] sm:$0xff]  ;;  %v16601_v3 = vld [vmem:[#allocation48_spill] sm:$0xff] }
 0x1a6   : > { %v13392_v14 = vrot.slane %v16597_v53, 5  ;;  %v2463_v13 = vrot.slane %v2461_v33, 5  ;;  %v2467_v41 = vrot.slane %v2465_v9, 4  ;;  %4389 = vmatprep.mubr.bf16.mxu0 %v9736_v61  ;;  %v1855_v22 = vsel %vm12037_vm14, %v1850_v45, %v1854_v1  ;;  %v16602_v45 = vld [vmem:[#allocation24_spill] sm:$0xff]  ;;  %v16603_v9 = vld [vmem:[#allocation49_spill] sm:$0xff] }
 0x1a7   : > { %v1860_v63 = vrot.slane %v1859_v48, 4  ;;  %v2473_v39 = vrot.slane %v2471_v7, 5  ;;  %v10236_v53 = vadd.f32 %v16599_v38, %v16598_v34  ;;  %v2458_v44 = vor.u32 %v2457_v57, %v2454_v60  ;;  %v13412_v61 = vld [vmem:[#allocation2 + $0xa8] sm:$0xf]  ;;  %v13414_v48 = vld [vmem:[#allocation2 + $0xac] sm:$0xf]  ;;  %v13420_v38 = vpop.f32.mrf.mxu1 }
 0x1a8   : > { %v2468_v59 = vor.u32 %v2467_v41, %v2463_v13  ;;  %v10348_v54 = vadd.f32 %v16601_v3, %v16600_v30  ;;  %v9752_v35 = vcombine.low %v13360_v17, %v13364_v46  ;;  %v10239_v1 = vadd.f32 %v13148_v56, %v16602_v45  ;;  %16604 = vst [vmem:[#allocation28_spill] sm:$0xff] %v13414_v48  ;;  %v13418_v46 = vld [vmem:[#allocation2 + $0xb0] sm:$0x1]  ;;  %v11564_v30 = vld [vmem:[#allocation2 + $0xa0] sm:$0xf] }
 0x1a9   : > { %v1865_v33 = vsel %vm12037_vm14, %v1860_v63, %v1864_v18  ;;  %v10351_v34 = vadd.f32 %v13150_v26, %v16603_v9  ;;  %v1886_v7 = vshll.u32 %v1574_v28, 16  ;;  %v2459_v57 = vrot.slane %v2458_v44, 4  ;;  %16606 = vst [vmem:[#allocation20_spill] sm:$0xff] %v13418_v46  ;;  %v13434_v45 = vpop.f32.mrf.mxu1 }
 0x1aa   : > { %v9720_v60 = vcombine.low %v1855_v22, %v1865_v33  ;;  %v2469_v41 = vrot.slane %v2468_v59, 4  ;;  %v13416_v17 = vadd.f32 %v10348_v54, %v10236_v53  ;;  %v9625_v63 = vrot.slane %v1974_v49, 9  ;;  %v16608_v53 = vld [vmem:[#allocation34_spill] sm:$0xff]  ;;  %v16609_v59 = vld [vmem:[#allocation36_spill] sm:$0xff]  ;;  %v13432_v33 = vpop.f32.mrf.mxu0 }
 0x1ab   : > { %v13422_v18 = vadd.f32 %v10351_v34, %v10239_v1  ;;  %v1888_v56 = vrot.slane %v1886_v7, 5  ;;  %v2112_v26 = vrot.slane %v11564_v30, 5  ;;  %v2464_v3 = vsel %vm12037_vm14, %v2459_v57, %v2463_v13  ;;  %v16610_v13 = vld [vmem:[#allocation35_spill] sm:$0xff]  ;;  %v1575_v57 = vld [vmem:[#allocation2 + $0xb0] sm:$0x1] }
 0x1ac   : > { %16605 = vst [vmem:[#allocation23_spill] sm:$0xff] %v13416_v17  ;;  %4390 = vmatmul.mubr.bf16.gmra.mxu0 %v9720_v60  ;;  %v2474_v22 = vsel %vm12037_vm14, %v2469_v41, %v2473_v39  ;;  %v2115_v44 = vrot.slane %v1574_v28, 5  ;;  %v1879_v54 = vsel %vm12037_vm14, %v16609_v59, %v16608_v53  ;;  %v1883_v34 = vor.u32 %v16610_v13, %v16608_v53  ;;  %v13444_v41 = vpop.f32.mrf.mxu1  ;;  %v13451_v17 = vpop.f32.mrf.mxu0 }
 0x1ad   : > { %16607 = vst [vmem:[#allocation32_spill] sm:$0xff] %v13422_v18  ;;  %v9768_v49 = vcombine.low %v2464_v3, %v2474_v22  ;;  %v2113_v1 = vsel %vm12031_vm13, %v9625_v63, %v2112_v26  ;;  %v2114_v9 = vrot.slane %v2112_v26, 4  ;;  %v2476_v39 = vshrl.u32 %v13412_v61, 16  ;;  %v1975_v22 = vld [vmem:[#allocation2 + $0xa8] sm:$0xe] }
 0x1ae   : > { %v2479_v28 = vshll.u32 %v13412_v61, 16  ;;  %v2485_v7 = vshll.u32 %v13414_v48, 16  ;;  %v2489_v60 = vshrl.u32 %v13414_v48, 16  ;;  %v1884_v63 = vrot.slane %v1883_v34, 4 }
 0x1af   : > { %4550 = vmatprep.mubr.bf16.mxu1 %v9768_v49  ;;  %v2116_v30 = vsel %vm12031_vm13, %v2114_v9, %v2115_v44  ;;  %v2495_v26 = vshll.u32 %v13418_v46, 16  ;;  %v10242_v3 = vadd.f32 %v13184_v12, %v13166_v0  ;;  %v2478_v59 = vrot.slane %v2476_v39, 4  ;;  %v16611_v44 = vld [vmem:[#allocation50_spill] sm:$0xff]  ;;  %v16612_v9 = vld [vmem:[#allocation25_spill] sm:$0xff] }
 0x1b0   : > { %4551 = vmatmul.mubr.bf16.gmra.mxu1 %v9752_v35  ;;  %v9737_v53 = vcombine.low %v2113_v1, %v2116_v30  ;;  %v2481_v13 = vrot.slane %v2479_v28, 5  ;;  %v2487_v18 = vrot.slane %v2485_v7, 5  ;;  %v1889_v49 = vsel %vm12037_vm14, %v1884_v63, %v1888_v56  ;;  %v11433_v46 = vld [vmem:[#allocation9 + $0x38] sm:$0xff]   ;;  %v16613_v1 = vld [vmem:[#allocation52_spill] sm:$0xff]  ;;  %v13461_v7 = vld [vmem:[#allocation2 + $0xb4] sm:$0xf]  ;;  %v13465_v56 = vpop.f32.mrf.mxu1 }
 0x1b1   : > { %v2491_v43 = vrot.slane %v2489_v60, 4  ;;  %v2497_v15 = vrot.slane %v2495_v26, 5  ;;  %v10354_v34 = vadd.f32 %v16612_v9, %v16611_v44  ;;  %v9721_v0 = vcombine.low %v1879_v54, %v1889_v49  ;;  %v16614_v39 = vld [vmem:[#allocation53_spill] sm:$0xff]  ;;  %v13463_v30 = vld [vmem:[#allocation2 + $0xb8] sm:$0xf]  ;;  %v16618_v44 = vld [vmem:[#allocation26_spill] sm:$0xff]  ;;  %10673 = vmatpush3.bf16.msra.mxu1 %v11433_v46 }
 0x1b2   : > { %4397 = vmatprep.mubr.bf16.mxu0 %v9737_v53  ;;  %v2482_v12 = vor.u32 %v2481_v13, %v2478_v59  ;;  %v9753_v35 = vcombine.low %v13412_v61, %v13414_v48  ;;  %v10245_v28 = vadd.f32 %v16614_v39, %v16613_v1  ;;  %16615 = vst [vmem:[#allocation33_spill] sm:$0xff] %v13463_v30  ;;  %v16617_v26 = vld [vmem:[#allocation51_spill] sm:$0xff]  ;;  %v1910_v54 = vshll.u32 %v1575_v57, 16  ;;  %v11565_v13 = vld [vmem:[#allocation2 + $0xac] sm:$0xf]  ;;  %v13471_v1 = vpop.f32.mrf.mxu0 }
 0x1b3   : > { %v2492_v60 = vor.u32 %v2491_v43, %v2487_v18  ;;  %v13467_v63 = vadd.f32 %v10354_v34, %v10242_v3  ;;  %v10357_v53 = vadd.f32 %v16618_v44, %v16617_v26  ;;  %v9626_v61 = vrot.slane %v1975_v22, 9  ;;  %v16620_v3 = vld [vmem:[#allocation40_spill] sm:$0xff]  ;;  %v16621_v34 = vld [vmem:[#allocation37_spill] sm:$0xff]  ;;  %v13479_v44 = vld [vmem:[#allocation2 + $0xbc] sm:$0x1] }
 0x1b4   : > { %4398 = vmatmul.mubr.bf16.gmra.mxu0 %v9721_v0  ;;  %v2483_v59 = vrot.slane %v2482_v12, 4  ;;  %v2119_v49 = vrot.slane %v11565_v13, 5  ;;  %v2122_v9 = vrot.slane %v1575_v57, 5  ;;  %v1912_v43 = vrot.slane %v1910_v54, 5  ;;  %v16622_v46 = vld [vmem:[#allocation41_spill] sm:$0xff] }
 0x1b5   : > { %16616 = vst [vmem:[#allocation30_spill] sm:$0xff] %v13467_v63  ;;  %v2493_v39 = vrot.slane %v2492_v60, 4  ;;  %v13473_v48 = vadd.f32 %v10357_v53, %v10245_v28  ;;  %v1903_v26 = vsel %vm12037_vm14, %v16621_v34, %v16620_v3  ;;  %v1907_v0 = vor.u32 %v16622_v46, %v16620_v3  ;;  %v13487_v12 = vld [vmem:[#allocation2 + $0xbc] sm:$0x1]  ;;  %v13489_v28 = vpop.f32.mrf.mxu1  ;;  %v13499_v3 = vpop.f32.mrf.mxu0  ;;  %v13519_v63 = vld [vmem:[#allocation2 + $0xc0] sm:$0xf] }
 0x1b6   : > { %v2488_v52 = vsel %vm12037_vm14, %v2483_v59, %v2487_v18  ;;  %v2120_v57 = vsel %vm12031_vm13, %v9626_v61, %v2119_v49  ;;  %v2121_v22 = vrot.slane %v2119_v49, 4  ;;  %16623 = vst [vmem:[#allocation47_spill] sm:$0xff] %v13489_v28  ;;  %v2500_v53 = vshrl.u32 %v13461_v7, 16 }
 0x1b7   : > { %16619 = vst [vmem:[#allocation21_spill] sm:$0xff] %v13473_v48  ;;  %v2498_v60 = vsel %vm12037_vm14, %v2493_v39, %v2497_v15  ;;  %v2503_v54 = vshll.u32 %v13461_v7, 16  ;;  %v2509_v18 = vshll.u32 %v13463_v30, 16  ;;  %v1908_v13 = vrot.slane %v1907_v0, 4  ;;  %v13501_v34 = vpop.f32.mrf.mxu1  ;;  %v13508_v0 = vpop.f32.mrf.mxu0 }
 0x1b8   : > { %v9769_v59 = vcombine.low %v2488_v52, %v2498_v60  ;;  %v2123_v61 = vsel %vm12031_vm13, %v2121_v22, %v2122_v9  ;;  %v2513_v49 = vshrl.u32 %v13463_v30, 16  ;;  %v2502_v48 = vrot.slane %v2500_v53, 4  ;;  %v1976_v22 = vld [vmem:[#allocation2 + $0xb4] sm:$0xe] }
 0x1b9   : > { %v9738_v46 = vcombine.low %v2120_v57, %v2123_v61  ;;  %v2505_v15 = vrot.slane %v2503_v54, 5  ;;  %v2511_v39 = vrot.slane %v2509_v18, 5  ;;  %v1913_v52 = vsel %vm12037_vm14, %v1908_v13, %v1912_v43  ;;  %v13510_v28 = vpop.f32.mrf.mxu1 }
 0x1ba   : > { %4558 = vmatprep.mubr.bf16.mxu1 %v9769_v59  ;;  %v2515_v60 = vrot.slane %v2513_v49, 4  ;;  %v2519_v9 = vshll.u32 %v13479_v44, 16  ;;  %v9722_v57 = vcombine.low %v1903_v26, %v1913_v52  ;;  %v10248_v54 = vadd.f32 %v13243_v31, %v13229_v2  ;;  %v441_v49 = vld [vmem:[#allocation2 + $0xc8] sm:$0x1]  ;;  %v11566_v52 = vld [vmem:[#allocation2 + $0xb8] sm:$0xf] }
 0x1bb   : > { %4559 = vmatmul.mubr.bf16.gmra.mxu1 %v9753_v35  ;;  %4405 = vmatprep.mubr.bf16.mxu0 %v9738_v46  ;;  %v2506_v53 = vor.u32 %v2505_v15, %v2502_v48  ;;  %v1934_v18 = vshll.u32 %v13487_v12, 16  ;;  %v10360_v43 = vadd.f32 %v13231_v24, %v13227_v6  ;;  %v9754_v13 = vcombine.low %v13461_v7, %v13463_v30  ;;  %v13521_v35 = vpop.f32.mrf.mxu0  ;;  %v13523_v26 = vpop.f32.mrf.mxu1  ;;  %v13529_v6 = vld [vmem:[#allocation2 + $0xc4] sm:$0xf] }
 0x1bc   : > { %v2516_v59 = vor.u32 %v2515_v60, %v2511_v39  ;;  %v2521_v61 = vrot.slane %v2519_v9, 5  ;;  %4406 = vmatmul.mubr.bf16.gmra.mxu0 %v9722_v57  ;;  %v10251_v2 = vadd.f32 %v13278_v40, %v13253_v20  ;;  %v10363_v31 = vadd.f32 %v13270_v51, %v13245_v21  ;;  %v16626_v40 = vld [vmem:[#allocation44_spill] sm:$0xff]  ;;  %v16627_v21 = vld [vmem:[#allocation42_spill] sm:$0xff] }
 0x1bd   : > { %v2507_v48 = vrot.slane %v2506_v53, 4  ;;  %v1936_v46 = vrot.slane %v1934_v18, 5  ;;  %v13531_v7 = vadd.f32 %v10360_v43, %v10248_v54  ;;  %v9627_v15 = vrot.slane %v1976_v22, 9  ;;  %v13533_v9 = vpop.f32.mrf.mxu0  ;;  %v13544_v18 = vpop.f32.mrf.mxu1 }
 0x1be   : > { %v2517_v24 = vrot.slane %v2516_v59, 4  ;;  %v2126_v60 = vrot.slane %v11566_v52, 5  ;;  %v13537_v53 = vadd.f32 %v10363_v31, %v10251_v2  ;;  %v2129_v20 = vrot.slane %v13487_v12, 5  ;;  %v11436_v2 = vld [vmem:[#allocation9 + $0x68] sm:$0xff]  }
 0x1bf   : > { %16624 = vst [vmem:[#allocation22_spill] sm:$0xff] %v13531_v7  ;;  %v2512_v57 = vsel %vm12037_vm14, %v2507_v48, %v2511_v39  ;;  %v1927_v51 = vsel %vm12037_vm14, %v16627_v21, %v16626_v40  ;;  %v16628_v39 = vld [vmem:[#allocation45_spill] sm:$0xff]  ;;  %v13552_v48 = vpop.f32.mrf.mxu0  ;;  %v442_v31 = vsel %vm11983_vm4, 0, %v441_v49  ;;  %v2524_v52 = vshrl.u32 %v13519_v63, 16  ;;  %v13566_v30 = vpop.f32.mrf.mxu1 }
 0x1c0   : > { %16625 = vst [vmem:[#allocation48_spill] sm:$0xff] %v13537_v53  ;;  %v2522_v22 = vsel %vm12037_vm14, %v2517_v24, %v2521_v61  ;;  %v2127_v54 = vsel %vm12031_vm13, %v9627_v15, %v2126_v60  ;;  %v2128_v59 = vrot.slane %v2126_v60, 4  ;;  %v1931_v43 = vor.u32 %v16628_v39, %v16626_v40  ;;  %v11434_v53 = vld [vmem:[#allocation9 + $0x70] sm:$0xff]   ;;  %443 = vst [vmem:[#allocation2 + $0xc8] sm:$0x1] %v442_v31 }
 0x1c1   : > { %v9770_v12 = vcombine.low %v2512_v57, %v2522_v22  ;;  %v2527_v21 = vshll.u32 %v13519_v63, 16  ;;  %v2533_v15 = vshll.u32 %v13529_v6, 16  ;;  %v2537_v60 = vshrl.u32 %v13529_v6, 16  ;;  %v13562_v40 = vpop.f32.mrf.mxu0  ;;  %v11435_v57 = vld [vmem:[#allocation9 + $0x30] sm:$0xff]   ;;  %10674 = vmatprep.subr.bf16.mxu1 %v11434_v53  ;;  %v444_v53 = vld [vmem:[#allocation2 + $0xd4] sm:$0x1] }
 0x1c2   : > { %v2130_v61 = vsel %vm12031_vm13, %v2128_v59, %v2129_v20  ;;  %v1932_v24 = vrot.slane %v1931_v43, 4  ;;  %v2526_v49 = vrot.slane %v2524_v52, 4  ;;  %v10254_v7 = vadd.f32 %v13310_v50, %v13294_v32  ;;  %v388_v50 = vld [vmem:[#allocation2 + $0xcc] sm:$0x1]  ;;  %10675 = vmatpush3.bf16.msra.mxu1 %v11435_v57 }
 0x1c3   : > { %4566 = vmatprep.mubr.bf16.mxu1 %v9770_v12  ;;  %v9739_v22 = vcombine.low %v2127_v54, %v2130_v61  ;;  %v2529_v39 = vrot.slane %v2527_v21, 5  ;;  %v13570_v59 = vrot.slane %v2533_v15, 5  ;;  %v2539_v43 = vrot.slane %v2537_v60, 4  ;;  %v13574_v12 = vpop.f32.mrf.mxu0  ;;  %10676 = vmatprep.subr.bf16.mxu1 %v11436_v2 }
 0x1c4   : > { %4567 = vmatmul.mubr.bf16.gmra.mxu1 %v9754_v13  ;;  %v1937_v20 = vsel %vm12037_vm14, %v1932_v24, %v1936_v46  ;;  %v10366_v31 = vadd.f32 %v13296_v4, %v13284_v16  ;;  %v10257_v32 = vadd.f32 %v13331_v23, %v13322_v11  ;;  %v16630_v13 = vld [vmem:[#allocation38_spill] sm:$0xff]  ;;  %v10369_v46 = vadd.f32 %v13324_v55, %v13312_v47  ;;  %v1977_v24 = vld [vmem:[#allocation2 + $0xc0] sm:$0xe]  ;;  %v13598_v47 = vpop.f32.mrf.mxu1 }
 0x1c5   : > { %4413 = vmatprep.mubr.bf16.mxu0 %v9739_v22  ;;  %v9723_v54 = vcombine.low %v1927_v51, %v1937_v20  ;;  %v2530_v52 = vor.u32 %v2529_v39, %v2526_v49  ;;  %v752_v21 = vrot.slane %v16630_v13, 4  ;;  %v13583_v15 = vpop.f32.mrf.mxu0  ;;  %v16632_v16 = vor.u32 %v13392_v14, %v13282_v36  ;;  %v16633_v51 = vld [vmem:[#allocation43_spill] sm:$0xff]  ;;  %v13596_v22 = vld [vmem:[#allocation2 + $0xd0] sm:$0xf]  ;;  %v11567_v13 = vld [vmem:[#allocation2 + $0xc4] sm:$0xf] }
 0x1c6   : > { %v13579_v61 = vadd.f32 %v10366_v31, %v10254_v7  ;;  %v16634_v11 = vshll.u32 %v16633_v51, 16  ;;  %v16635_v60 = vshrl.u32 %v16633_v51, 16  ;;  %v2540_v55 = vor.u32 %v2539_v43, %v13570_v59  ;;  %v11437_v49 = vld [vmem:[#allocation9 + $0x28] sm:$0xff]  }
 0x1c7   : > { %v13588_v4 = vrot.slane %v16632_v16, 4  ;;  %4414 = vmatmul.mubr.bf16.gmra.mxu0 %v9723_v54  ;;  %v13601_v57 = vadd.f32 %v10369_v46, %v10257_v32  ;;  %v389_v36 = vsel %vm11978_vm3, 0, %v388_v50  ;;  %v445_v14 = vsel %vm11983_vm4, 0, %v444_v53  ;;  %v913_v39 = vld [vmem:[#allocation2 + $0xc8] sm:$0x1]  ;;  %v13617_v46 = vpop.f32.mrf.mxu0  ;;  %10677 = vmatpush3.bf16.msra.mxu1 %v11437_v49 }
 0x1c8   : > { %16631 = vst [vmem:[#allocation24_spill] sm:$0xff] %v13579_v61  ;;  %v13592_v23 = vrot.slane %v16634_v11, 5  ;;  %v1954_v7 = vrot.slane %v16635_v60, 4  ;;  %v13607_v20 = vrot.slane %v2530_v52, 4  ;;  %v9628_v54 = vrot.slane %v1977_v24, 9 }
 0x1c9   : > { %16636 = vst [vmem:[#allocation49_spill] sm:$0xff] %v13601_v57  ;;  %v2133_v16 = vrot.slane %v11567_v13, 5  ;;  %390 = vst [vmem:[#allocation2 + $0xcc] sm:$0x1] %v389_v36  ;;  %v914_v43 = vsel %vm11978_vm3, %v752_v21, %v913_v39  ;;  %v2557_v32 = vshll.u32 %v13596_v22, 16  ;;  %v2561_v50 = vshrl.u32 %v13596_v22, 16  ;;  %v13626_v36 = vpop.f32.mrf.mxu1 }
 0x1ca   : > { %446 = vst [vmem:[#allocation2 + $0xd4] sm:$0x1] %v445_v14  ;;  %v10260_v53 = vadd.f32 %v13348_v19, %v13340_v5  ;;  %v2572_v52 = vld [vmem:[#allocation2 + $0x24] sm:$0xe]  ;;  %915 = vst [vmem:[#allocation2 + $0xc8] sm:$0x1] %v914_v43  ;;  %v1955_v24 = vor.u32 %v1954_v7, %v13592_v23  ;;  %v10372_v51 = vadd.f32 %v13362_v58, %v13342_v8 }
 0x1cb   : > { %v10263_v11 = vadd.f32 %v13388_v10, %v13370_v42  ;;  %v10375_v21 = vadd.f32 %v13394_v25, %v13380_v62  ;;  %v2571_v60 = vld [vmem:[#allocation2 + $0x18] sm:$0xe]  ;;  %v13628_v14 = vrot.slane %v2540_v55, 4  ;;  %v13630_v5 = vrot.slane %v2557_v32, 5  ;;  %v11568_v39 = vld [vmem:[#allocation2 + $0x1c] sm:$0xf]  ;;  %v13640_v32 = vpop.f32.mrf.mxu0 }
 0x1cc   : > { %v2563_v19 = vrot.slane %v2561_v50, 4  ;;  %v2637_v13 = vrot.slane %v11568_v39, 5  ;;  %v13632_v7 = vadd.f32 %v10372_v51, %v10260_v53  ;;  %v9630_v8 = vrot.slane %v2572_v52, 9  ;;  %v11569_v10 = vld [vmem:[#allocation2 + $0x20] sm:$0x1]  ;;  %v16640_v53 = vld [vmem:[#allocation39_spill] sm:$0xff] }
 0x1cd   : > { %v13634_v43 = vadd.f32 %v10375_v21, %v10263_v11  ;;  %v10266_v58 = vadd.f32 %v13432_v33, %v13404_v37  ;;  %v9629_v42 = vrot.slane %v2571_v60, 9  ;;  %v2640_v25 = vrot.slane %v11569_v10, 5  ;;  %v13654_v11 = vpop.f32.mrf.mxu1  ;;  %v16643_v60 = vld [vmem:[#allocation46_spill] sm:$0xff]  ;;  %v13678_v31 = vpop.f32.mrf.mxu0 }
 0x1ce   : > { %16638 = vst [vmem:[#allocation34_spill] sm:$0xff] %v13632_v7  ;;  %v2639_v62 = vrot.slane %v2637_v13, 4  ;;  %v10378_v55 = vadd.f32 %v13434_v45, %v13420_v38  ;;  %v2134_v50 = vsel %vm12031_vm13, %v9628_v54, %v2133_v16  ;;  %v16641_v51 = vrot.slane %v16640_v53, 5 }
 0x1cf   : > { %16639 = vst [vmem:[#allocation36_spill] sm:$0xff] %v13634_v43  ;;  %v10269_v37 = vadd.f32 %v13471_v1, %v13451_v17  ;;  %v10381_v33 = vadd.f32 %v13465_v56, %v13444_v41  ;;  %v2135_v38 = vrot.slane %v2133_v16, 4  ;;  %v2564_v54 = vor.u32 %v2563_v19, %v13630_v5  ;;  %v2573_v56 = vld [vmem:[#allocation2 + $0x30] sm:$0xe]  ;;  %v13668_v16 = vpop.f32.mrf.mxu1 }
 0x1d0   : > { %v13648_v52 = vsel %vm12031_vm13, %v9630_v8, %v16641_v51  ;;  %v13656_v45 = vld [vmem:[#allocation2 + $0xcc] sm:$0xf]  ;;  %v13663_v8 = vadd.f32 %v10378_v55, %v10266_v58  ;;  %v1956_v10 = vrot.slane %v1955_v24, 4  ;;  %v2638_v19 = vsel %vm12031_vm13, %v9629_v42, %v2637_v13  ;;  %v11570_v24 = vld [vmem:[#allocation2 + $0x34] sm:$0xf] }
 0x1d1   : > { %v13658_v21 = vld [vmem:[#allocation2 + $0xd4] sm:$0x1]  ;;  %v2548_v17 = vshrl.u32 %v13656_v45, 16  ;;  %v2551_v1 = vshll.u32 %v13656_v45, 16  ;;  %v13670_v53 = vld [vmem:[#allocation2 + $0xc8] sm:$0x1]  ;;  %v2641_v58 = vsel %vm12031_vm13, %v2639_v62, %v2640_v25  ;;  %v13676_v55 = vadd.f32 %v10381_v33, %v10269_v37  ;;  %v13681_v61 = vpop.f32.mrf.mxu1 }
 0x1d2   : > { %16642 = vst [vmem:[#allocation35_spill] sm:$0xff] %v13658_v21  ;;  %16644 = vst [vmem:[#allocation50_spill] sm:$0xff] %v13663_v8  ;;  %v2567_v41 = vshll.u32 %v13658_v21, 16  ;;  %v1577_v51 = vld [vmem:[#allocation2 + $0xc8] sm:$0x1]  ;;  %v2651_v39 = vrot.slane %v11570_v24, 5  ;;  %v1951_v13 = vsel %vm12037_vm14, %v13588_v4, %v13592_v23  ;;  %v2536_v37 = vsel %vm12037_vm14, %v13607_v20, %v13570_v59  ;;  %v13695_v23 = vpop.f32.mrf.mxu0 }
 0x1d3   : > { %16645 = vst [vmem:[#allocation25_spill] sm:$0xff] %v13670_v53  ;;  %16646 = vst [vmem:[#allocation52_spill] sm:$0xff] %v13676_v55  ;;  %v2543_v8 = vshll.u32 %v13670_v53, 16  ;;  %v1958_v43 = vshll.u32 %v1577_v51, 16  ;;  %v2136_v7 = vrot.slane %v1577_v51, 5  ;;  %v2550_v57 = vrot.slane %v2548_v17, 4  ;;  %v13693_v24 = vpop.f32.mrf.mxu1 }
 0x1d4   : > { %v2553_v42 = vrot.slane %v2551_v1, 5  ;;  %v2565_v62 = vrot.slane %v2564_v54, 4  ;;  %v2569_v25 = vrot.slane %v2567_v41, 5  ;;  %v9773_v53 = vcombine.low %v2638_v19, %v2641_v58  ;;  %v16647_v1 = vld [vmem:[#allocation47_spill] sm:$0xff]  ;;  %v11572_v19 = vld [vmem:[#allocation2 + $0x40] sm:$0xf] }
 0x1d5   : > { %v2545_v33 = vrot.slane %v2543_v8, 5  ;;  %v1960_v51 = vrot.slane %v1958_v43, 5  ;;  %v2137_v17 = vsel %vm12031_vm13, %v2135_v38, %v2136_v7  ;;  %v9631_v4 = vrot.slane %v2573_v56, 9  ;;  %v11571_v43 = vld [vmem:[#allocation2 + $0x38] sm:$0x1]  ;;  %v13702_v38 = vpop.f32.mrf.mxu1 }
 0x1d6   : > { %v9740_v55 = vcombine.low %v2134_v50, %v2137_v17  ;;  %v2554_v21 = vor.u32 %v2553_v42, %v2550_v57  ;;  %v2653_v20 = vrot.slane %v2651_v39, 4  ;;  %v2654_v7 = vrot.slane %v11571_v43, 5  ;;  %v2574_v56 = vld [vmem:[#allocation2 + $0x3c] sm:$0xe] }
 0x1d7   : > { %v2546_v54 = vsel %vm12037_vm14, %v13628_v14, %v2545_v33  ;;  %v1961_v59 = vsel %vm12037_vm14, %v1956_v10, %v1960_v51  ;;  %v2570_v8 = vsel %vm12037_vm14, %v2565_v62, %v2569_v25  ;;  %v10272_v49 = vadd.f32 %v13508_v0, %v13499_v3  ;;  %v13710_v41 = vpop.f32.mrf.mxu1  ;;  %v10288_v0 = vpop.f32.mrf.mxu0 }
 0x1d8   : > { %v9771_v2 = vcombine.low %v2536_v37, %v2546_v54  ;;  %4421 = vmatprep.mubr.bf16.mxu0 %v9740_v55  ;;  %v9724_v57 = vcombine.low %v1951_v13, %v1961_v59  ;;  %v2555_v50 = vrot.slane %v2554_v21, 4  ;;  %v10384_v14 = vadd.f32 %v13501_v34, %v16647_v1  ;;  %v11574_v37 = vld [vmem:[#allocation2 + $0x44] sm:$0x1]  ;;  %v2577_v1 = vld [vmem:[#allocation2 + $0x60] sm:$0xe] }
 0x1d9   : > { %v2658_v21 = vrot.slane %v11572_v19, 5  ;;  %v10275_v58 = vadd.f32 %v13533_v9, %v13521_v35  ;;  %v10387_v3 = vadd.f32 %v13523_v26, %v13510_v28  ;;  %v16648_v34 = vcombine.low %v13519_v63, %v13529_v6  ;;  %v2575_v35 = vld [vmem:[#allocation2 + $0x48] sm:$0xe]  ;;  %v11573_v9 = vld [vmem:[#allocation2 + $0x4c] sm:$0xf]  ;;  %v10289_v26 = vpop.f32.mrf.mxu0  ;;  %v10403_v25 = vpop.f32.mrf.mxu1 }
 0x1da   : > { %4574 = vmatprep.mubr.bf16.mxu1 %v9771_v2  ;;  %4422 = vmatmul.mubr.bf16.gmra.mxu0 %v9724_v57  ;;  %v2560_v10 = vsel %vm12037_vm14, %v2555_v50, %v13630_v5  ;;  %v13722_v13 = vadd.f32 %v10384_v14, %v10272_v49  ;;  %v2652_v5 = vsel %vm12031_vm13, %v9631_v4, %v2651_v39  ;;  %v2665_v28 = vrot.slane %v11573_v9, 5  ;;  %v11575_v2 = vld [vmem:[#allocation2 + $0x50] sm:$0x1]  ;;  %v11577_v14 = vld [vmem:[#allocation2 + $0x64] sm:$0xf] }
 0x1db   : > { %4575 = vmatmul.mubr.bf16.gmra.mxu1 %v16648_v34  ;;  %v9772_v55 = vcombine.low %v2560_v10, %v2570_v8  ;;  %11160 = vmatprep.mubr.bf16.mxu0 %v9773_v53  ;;  %v2655_v42 = vsel %vm12031_vm13, %v2653_v20, %v2654_v7  ;;  %v13728_v62 = vadd.f32 %v10387_v3, %v10275_v58  ;;  %v2661_v63 = vrot.slane %v11574_v37, 5  ;;  %v10291_v54 = vpop.f32.mrf.mxu0  ;;  %v11579_v9 = vld [vmem:[#allocation2 + $0x68] sm:$0x1] }
 0x1dc   : > { %v9632_v33 = vrot.slane %v2574_v56, 9  ;;  %v10278_v53 = vadd.f32 %v13562_v40, %v13552_v48  ;;  %v2660_v51 = vrot.slane %v2658_v21, 4  ;;  %v10390_v39 = vadd.f32 %v13566_v30, %v13544_v18  ;;  %v10404_v18 = vpop.f32.mrf.mxu1 }
 0x1dd   : > { %4582 = vmatprep.mubr.bf16.mxu1 %v9772_v55  ;;  %v10281_v17 = vadd.f32 %v13583_v15, %v13574_v12  ;;  %v10393_v4 = vadd.f32 %v13626_v36, %v13598_v47  ;;  %v9756_v59 = vcombine.low %v13656_v45, %v13596_v22  ;;  %v9775_v20 = vcombine.low %v2652_v5, %v2655_v42  ;;  %v10292_v30 = vpop.f32.mrf.mxu0  ;;  %v2576_v36 = vld [vmem:[#allocation2 + $0x54] sm:$0xe]  ;;  %v11576_v45 = vld [vmem:[#allocation2 + $0x58] sm:$0xf] }
 0x1de   : > { %v9633_v43 = vrot.slane %v2575_v35, 9  ;;  %v2667_v7 = vrot.slane %v2665_v28, 4  ;;  %v2668_v57 = vrot.slane %v11575_v2, 5  ;;  %v13740_v48 = vadd.f32 %v10390_v39, %v10278_v53  ;;  %v11438_v39 = vld [vmem:[#allocation9 + $0x60] sm:$0xff]  }
 0x1df   : > { %v13742_v40 = vadd.f32 %v10393_v4, %v10281_v17  ;;  %v2659_v12 = vsel %vm12031_vm13, %v9632_v33, %v2658_v21  ;;  %v16649_v15 = vcombine.low %v13648_v52, %v16643_v60  ;;  %v2662_v47 = vsel %vm12031_vm13, %v2660_v51, %v2661_v63  ;;  %v10294_v56 = vpop.f32.mrf.mxu0  ;;  %v11439_v17 = vld [vmem:[#allocation9 + $0x20] sm:$0xff]   ;;  %10678 = vmatprep.subr.bf16.mxu1 %v11438_v39 }
 0x1e0   : > { %v2672_v50 = vrot.slane %v11576_v45, 5  ;;  %v10284_v8 = vadd.f32 %v13640_v32, %v13617_v46  ;;  %v10396_v49 = vadd.f32 %v13668_v16, %v13654_v11  ;;  %v2679_v10 = vrot.slane %v11577_v14, 5  ;;  %v10406_v11 = vpop.f32.mrf.mxu1  ;;  %v11578_v16 = vld [vmem:[#allocation2 + $0x5c] sm:$0x1]  ;;  %v11580_v4 = vld [vmem:[#allocation2 + $0x74] sm:$0x1]  ;;  %10679 = vmatpush3.bf16.msra.mxu1 %v11439_v17 }
 0x1e1   : > { %v10287_v52 = vadd.f32 %v13695_v23, %v13678_v31  ;;  %v10399_v60 = vadd.f32 %v13693_v24, %v13681_v61  ;;  %v2666_v19 = vsel %vm12031_vm13, %v9633_v43, %v2665_v28  ;;  %v2669_v46 = vsel %vm12031_vm13, %v2667_v7, %v2668_v57  ;;  %v10295_v31 = vpop.f32.mrf.mxu0  ;;  %v2583_v7 = vld [vmem:[#allocation2 + $0xa8] sm:$0xe]  ;;  %v11581_v57 = vld [vmem:[#allocation2 + $0x70] sm:$0xf] }
 0x1e2   : > { %11161 = vmatmul.mubr.bf16.vlgmr.msra.gmra.mxu0 %v16649_v15  ;;  %v13763_v32 = vadd.f32 %v10396_v49, %v10284_v8  ;;  %v2675_v21 = vrot.slane %v11578_v16, 5  ;;  %v9776_v58 = vcombine.low %v2659_v12, %v2662_v47  ;;  %v9634_v3 = vrot.slane %v2576_v36, 9  ;;  %v10407_v5 = vpop.f32.mrf.mxu1 }
 0x1e3   : > { %4583 = vmatmul.mubr.bf16.gmra.mxu1 %v9756_v59  ;;  %11164 = vmatprep.mubr.bf16.mxu0 %v9775_v20  ;;  %v13765_v34 = vadd.f32 %v10399_v60, %v10287_v52  ;;  %v2674_v23 = vrot.slane %v2672_v50, 4  ;;  %v9635_v55 = vrot.slane %v2577_v1, 9  ;;  %v10290_v61 = vadd.f32 %v10289_v26, %v10288_v0  ;;  %v10297_v63 = vpop.f32.mrf.mxu0  ;;  %v2578_v20 = vld [vmem:[#allocation2 + $0x6c] sm:$0xe] }
 0x1e4   : > { %v10402_v24 = vadd.f32 %v13710_v41, %v13702_v38  ;;  %v9777_v42 = vcombine.low %v2666_v19, %v2669_v46  ;;  %v2681_v35 = vrot.slane %v2679_v10, 4  ;;  %v2682_v28 = vrot.slane %v11579_v9, 5  ;;  %v10409_v51 = vpop.f32.mrf.mxu1  ;;  %v16650_v19 = vld [vmem:[#allocation28_spill] sm:$0xff] }
 0x1e5   : > { %v10293_v37 = vadd.f32 %v10292_v30, %v10291_v54  ;;  %v10405_v53 = vadd.f32 %v10404_v18, %v10403_v25  ;;  %v2689_v59 = vrot.slane %v11580_v4, 5  ;;  %v10298_v0 = vpop.f32.mrf.mxu0  ;;  %v2731_v26 = vrot.slane %v13479_v44, 5  ;;  %v2579_v54 = vld [vmem:[#allocation2 + $0x78] sm:$0xe]  ;;  %v11582_v18 = vld [vmem:[#allocation2 + $0x7c] sm:$0xf] }
 0x1e6   : > { %v13769_v33 = vadd.f32 %v10402_v24, %v10290_v61  ;;  %v2673_v38 = vsel %vm12031_vm13, %v9634_v3, %v2672_v50  ;;  %v2676_v41 = vsel %vm12031_vm13, %v2674_v23, %v2675_v21  ;;  %v10410_v25 = vpop.f32.mrf.mxu1  ;;  %v2680_v2 = vsel %vm12031_vm13, %v9635_v55, %v2679_v10  ;;  %v2584_v50 = vld [vmem:[#allocation2 + $0xb4] sm:$0xe]  ;;  %v11583_v55 = vld [vmem:[#allocation2 + $0x80] sm:$0x1] }
 0x1e7   : > { %v13776_v43 = vadd.f32 %v10405_v53, %v10293_v37  ;;  %v2683_v44 = vsel %vm12031_vm13, %v2681_v35, %v2682_v28  ;;  %v2686_v30 = vrot.slane %v11581_v57, 5  ;;  %v2693_v12 = vrot.slane %v11582_v18, 5  ;;  %v10300_v16 = vpop.f32.mrf.mxu0  ;;  %v11586_v57 = vld [vmem:[#allocation2 + $0x8c] sm:$0x1] }
 0x1e8   : > { %v10296_v15 = vadd.f32 %v10295_v31, %v10294_v56  ;;  %v10408_v47 = vadd.f32 %v10407_v5, %v10406_v11  ;;  %v10299_v36 = vadd.f32 %v10298_v0, %v10297_v63  ;;  %v10411_v45 = vadd.f32 %v10410_v25, %v10409_v51  ;;  %v16652_v11 = vld [vmem:[#allocation33_spill] sm:$0xff] }
 0x1e9   : > { %v9778_v8 = vcombine.low %v2673_v38, %v2676_v41  ;;  %v9636_v49 = vrot.slane %v2578_v20, 9  ;;  %v9637_v1 = vrot.slane %v2579_v54, 9  ;;  %v9641_v14 = vrot.slane %v2583_v7, 9  ;;  %v11584_v51 = vld [vmem:[#allocation2 + $0x88] sm:$0xf] }
 0x1ea   : > { %11165 = vmatmul.mubr.bf16.gmra.mxu0 %v9776_v58  ;;  %v9779_v52 = vcombine.low %v2680_v2, %v2683_v44  ;;  %v13782_v60 = vadd.f32 %v10408_v47, %v10296_v15  ;;  %v13784_v10 = vadd.f32 %v10411_v45, %v10299_v36  ;;  %v2721_v46 = vrot.slane %v16650_v19, 5  ;;  %v16651_v58 = vld [vmem:[#allocation20_spill] sm:$0xff]  ;;  %v11585_v54 = vld [vmem:[#allocation2 + $0x94] sm:$0xf]  ;;  %v2581_v7 = vld [vmem:[#allocation2 + $0x90] sm:$0xe] }
 0x1eb   : > { %11168 = vmatprep.mubr.bf16.mxu0 %v9777_v42  ;;  %v2688_v21 = vrot.slane %v2686_v30, 4  ;;  %v2724_v3 = vrot.slane %v16651_v58, 5  ;;  %v9642_v56 = vrot.slane %v2584_v50, 9  ;;  %v2728_v31 = vrot.slane %v16652_v11, 5  ;;  %v10301_v42 = vpop.f32.mrf.mxu0  ;;  %v2580_v41 = vld [vmem:[#allocation2 + $0x84] sm:$0xe] }
 0x1ec   : > { %v2695_v23 = vrot.slane %v2693_v12, 4  ;;  %v2696_v61 = vrot.slane %v11583_v55, 5  ;;  %v13791_v24 = vsel %vm12031_vm13, %v9641_v14, %v2721_v46  ;;  %v2723_v5 = vrot.slane %v2721_v46, 4  ;;  %v11587_v50 = vld [vmem:[#allocation2 + $0x98] sm:$0x1] }
 0x1ed   : > { %v13795_v35 = vsel %vm12031_vm13, %v9642_v56, %v2728_v31  ;;  %v2730_v9 = vrot.slane %v2728_v31, 4  ;;  %v10302_v28 = vadd.f32 %v10301_v42, %v10300_v16  ;;  %v2687_v37 = vsel %vm12031_vm13, %v9636_v49, %v2686_v30  ;;  %v10303_v20 = vpop.f32.mrf.mxu0  ;;  %v11588_v16 = vld [vmem:[#allocation2 + $0xa0] sm:$0xf]  ;;  %v2582_v11 = vld [vmem:[#allocation2 + $0x9c] sm:$0xe] }
 0x1ee   : > { %v13801_v63 = vsel %vm12031_vm13, %v2723_v5, %v2724_v3  ;;  %v2690_v53 = vsel %vm12031_vm13, %v2688_v21, %v2689_v59  ;;  %v2700_v39 = vrot.slane %v11584_v51, 5  ;;  %v2694_v0 = vsel %vm12031_vm13, %v9637_v1, %v2693_v12  ;;  %v10412_v2 = vpop.f32.mrf.mxu1  ;;  %v11441_v5 = vld [vmem:[#allocation9 + $0x18] sm:$0xff]   ;;  %v11589_v42 = vld [vmem:[#allocation2 + $0xa4] sm:$0x1] }
 0x1ef   : > { %v9785_v17 = vcombine.low %v13791_v24, %v13801_v63  ;;  %v13809_v4 = vsel %vm12031_vm13, %v2730_v9, %v2731_v26  ;;  %v2697_v38 = vsel %vm12031_vm13, %v2695_v23, %v2696_v61  ;;  %v2707_v25 = vrot.slane %v11585_v54, 5  ;;  %v10304_v36 = vpop.f32.mrf.mxu0  ;;  %v11440_v61 = vld [vmem:[#allocation9 + $0x58] sm:$0xff]   ;;  %v16657_v24 = vld [vmem:[#allocation35_spill] sm:$0xff] }
 0x1f0   : > { %v9786_v59 = vcombine.low %v13795_v35, %v13809_v4  ;;  %v9780_v44 = vcombine.low %v2687_v37, %v2690_v53  ;;  %v2703_v30 = vrot.slane %v11586_v57, 5  ;;  %v9781_v26 = vcombine.low %v2694_v0, %v2697_v38  ;;  %v10413_v47 = vpop.f32.mrf.mxu1  ;;  %10680 = vmatprep.subr.bf16.mxu1 %v11440_v61  ;;  %v16659_v35 = vld [vmem:[#allocation27_spill] sm:$0xff] }
 0x1f1   : > { %v9638_v18 = vrot.slane %v2580_v41, 9  ;;  %v2702_v15 = vrot.slane %v2700_v39, 4  ;;  %v9639_v12 = vrot.slane %v2581_v7, 9  ;;  %v2709_v45 = vrot.slane %v2707_v25, 4  ;;  %10681 = vmatpush3.bf16.msra.mxu1 %v11441_v5 }
 0x1f2   : > { %11169 = vmatmul.mubr.bf16.gmra.mxu0 %v9778_v8  ;;  %v2710_v8 = vrot.slane %v11587_v50, 5  ;;  %v10414_v49 = vadd.f32 %v10413_v47, %v10412_v2  ;;  %v10415_v1 = vpop.f32.mrf.mxu1  ;;  %v2714_v21 = vrot.slane %v11588_v16, 5  ;;  %v2717_v9 = vrot.slane %v11589_v42, 5 }
 0x1f3   : > { %11172 = vmatprep.mubr.bf16.mxu0 %v9779_v52  ;;  %v10305_v52 = vadd.f32 %v10304_v36, %v10303_v20  ;;  %v2701_v19 = vsel %vm12031_vm13, %v9638_v18, %v2700_v39  ;;  %v2704_v46 = vsel %vm12031_vm13, %v2702_v15, %v2703_v30  ;;  %v2708_v3 = vsel %vm12031_vm13, %v9639_v12, %v2707_v25 }
 0x1f4   : > { %v13817_v14 = vadd.f32 %v10414_v49, %v10302_v28  ;;  %v10416_v58 = vpop.f32.mrf.mxu1  ;;  %v2711_v56 = vsel %vm12031_vm13, %v2709_v45, %v2710_v8  ;;  %v9782_v23 = vcombine.low %v2701_v19, %v2704_v46  ;;  %v9640_v37 = vrot.slane %v2582_v11, 9  ;;  %v16654_v45 = vld [vmem:[#allocation25_spill] sm:$0xff] }
 0x1f5   : > { %v10417_v31 = vadd.f32 %v10416_v58, %v10415_v1  ;;  %v9783_v28 = vcombine.low %v2708_v3, %v2711_v56  ;;  %v2716_v53 = vrot.slane %v2714_v21, 4  ;;  %v2735_v7 = vrot.slane %v13529_v6, 5  ;;  %v2586_v58 = vld [vmem:[#allocation2 + $0xcc] sm:$0xe] }
 0x1f6   : > { %v2715_v38 = vsel %vm12031_vm13, %v9640_v37, %v2714_v21  ;;  %v2738_v50 = vrot.slane %v16654_v45, 5  ;;  %v2742_v6 = vrot.slane %v13596_v22, 5  ;;  %v2745_v63 = vrot.slane %v16657_v24, 5  ;;  %v16658_v37 = vld [vmem:[#allocation55_spill] sm:$0xff] }
 0x1f7   : > { %v13827_v55 = vadd.f32 %v10417_v31, %v10305_v52  ;;  %v2718_v41 = vsel %vm12031_vm13, %v2716_v53, %v2717_v9  ;;  %v2737_v12 = vrot.slane %v2735_v7, 4  ;;  %v16656_v31 = vld [vmem:[#allocation54_spill] sm:$0xff] }
 0x1f8   : > { %v2744_v61 = vrot.slane %v2742_v6, 4 }
 0x1f9   : > { %v2739_v21 = vsel %vm12031_vm13, %v2737_v12, %v2738_v50  ;;  %v16662_v50 = vld [vmem:[#allocation29_spill] sm:$0xff] }
 0x1fa   : > { %11173 = vmatmul.mubr.bf16.gmra.mxu0 %v9780_v44  ;;  %v10418_v51 = vpop.f32.mrf.mxu1  ;;  %v2585_v44 = vld [vmem:[#allocation2 + $0xc0] sm:$0xe] }
 0x1fb   : > { %11176 = vmatprep.mubr.bf16.mxu0 %v9781_v26  ;;  %v10306_v39 = vpop.f32.mrf.mxu0  ;;  %v9784_v26 = vcombine.low %v2715_v38, %v2718_v41  ;;  %v9643_v36 = vrot.slane %v2585_v44, 9 }
 0x1fc   : > { %v10419_v20 = vpop.f32.mrf.mxu1 }
 0x1fd   : > { %v10420_v0 = vadd.f32 %v10419_v20, %v10418_v51  ;;  %v10307_v54 = vpop.f32.mrf.mxu0  ;;  %v2736_v16 = vsel %vm12031_vm13, %v9643_v36, %v2735_v7  ;;  %v2746_v20 = vsel %vm12031_vm13, %v2744_v61, %v2745_v63  ;;  %v16666_v61 = vld [vmem:[#allocation23_spill] sm:$0xff] }
 0x1fe   : > { %v10421_v25 = vpop.f32.mrf.mxu1  ;;  %v10308_v2 = vadd.f32 %v10307_v54, %v10306_v39  ;;  %v9787_v22 = vcombine.low %v2736_v16, %v2739_v21 }
 0x1ff   : > { %v10309_v57 = vpop.f32.mrf.mxu0 }
 0x200   : > { %v10422_v30 = vpop.f32.mrf.mxu1  ;;  %v13834_v18 = vadd.f32 %v10420_v0, %v10308_v2 }
 0x201   : > { %v10423_v15 = vadd.f32 %v10422_v30, %v10421_v25  ;;  %v10310_v47 = vpop.f32.mrf.mxu0  ;;  %v16660_v30 = vld [vmem:[#allocation56_spill] sm:$0xff] }
 0x202   : > { %11177 = vmatmul.mubr.bf16.gmra.mxu0 %v9782_v23  ;;  %16653 = vst [vmem:[#allocation53_spill] sm:$0xff] %v13834_v18  ;;  %v10311_v8 = vadd.f32 %v10310_v47, %v10309_v57 }
 0x203   : > { %11180 = vmatprep.mubr.bf16.mxu0 %v9783_v28  ;;  %v10440_v49 = vpop.f32.mrf.mxu0 }
 0x204   : > { %v13839_v52 = vadd.f32 %v10423_v15, %v10311_v8 }
 0x205   : > { %v13837_v1 = vpop.f32.mrf.mxu1  ;;  %v10441_v19 = vpop.f32.mrf.mxu0 }
 0x206   : > { %16655 = vst [vmem:[#allocation51_spill] sm:$0xff] %v13839_v52  ;;  %v10442_v3 = vadd.f32 %v10441_v19, %v10440_v49  ;;  %v11443_v19 = vld [vmem:[#allocation9 + $0x10] sm:$0xff]   ;;  %v11447_v52 = vld [vmem:[#allocation9 + $0x8] sm:$0xff]  }
 0x207   : > { %v13845_v46 = vpop.f32.mrf.mxu1  ;;  %v10443_v56 = vpop.f32.mrf.mxu0 }
 0x208   : > { %v13854_v23 = vadd.f32 %v10442_v3, %v16656_v31 }
 0x209   : > { %v13851_v11 = vpop.f32.mrf.mxu1  ;;  %v10444_v5 = vpop.f32.mrf.mxu0 }
 0x20a   : > { %11181 = vmatmul.mubr.bf16.gmra.mxu0 %v9784_v26  ;;  %v10445_v9 = vadd.f32 %v10444_v5, %v10443_v56  ;;  %v16664_v56 = vld [vmem:[#allocation31_spill] sm:$0xff] }
 0x20b   : > { %11184 = vmatprep.mubr.bf16.mxu0 %v9785_v17  ;;  %v9644_v17 = vrot.slane %v2586_v58, 9  ;;  %v13857_v42 = vpop.f32.mrf.mxu1  ;;  %v10446_v28 = vpop.f32.mrf.mxu0 }
 0x20c   : > { %v13863_v53 = vadd.f32 %v10445_v9, %v16658_v37 }
 0x20d   : > { %v2743_v39 = vsel %vm12031_vm13, %v9644_v17, %v2742_v6  ;;  %v10447_v0 = vpop.f32.mrf.mxu0  ;;  %v11442_v6 = vld [vmem:[#allocation9 + $0x50] sm:$0xff]  }
 0x20e   : > { %v13865_v51 = vpop.f32.mrf.mxu1  ;;  %v10448_v38 = vadd.f32 %v10447_v0, %v10446_v28  ;;  %v9788_v25 = vcombine.low %v2743_v39, %v2746_v20  ;;  %10682 = vmatprep.subr.bf16.mxu1 %v11442_v6  ;;  %v16668_v0 = vld [vmem:[#allocation32_spill] sm:$0xff] }
 0x20f   : > { %v10449_v54 = vpop.f32.mrf.mxu0  ;;  %10683 = vmatpush3.bf16.msra.mxu1 %v11443_v19  ;;  %v11448_v19 = vld [vmem:[#allocation9 + $0xf0] sm:$0xff]  }
 0x210   : > { %v13871_v41 = vpop.f32.mrf.mxu1  ;;  %v13874_v4 = vadd.f32 %v10448_v38, %v16659_v35 }
 0x211   : > { %v10450_v7 = vpop.f32.mrf.mxu0 }
 0x212   : > { %11185 = vmatmul.mubr.bf16.gmra.mxu0 %v9786_v59  ;;  %v13876_v59 = vpop.f32.mrf.mxu1  ;;  %v10451_v2 = vadd.f32 %v10450_v7, %v10449_v54 }
 0x213   : > { %11188 = vmatprep.mubr.bf16.mxu0 %v9787_v22  ;;  %v10452_v57 = vpop.f32.mrf.mxu0 }
 0x214   : > { %v13878_v44 = vpop.f32.mrf.mxu1  ;;  %v13881_v26 = vadd.f32 %v10451_v2, %v16660_v30  ;;  %v11446_v30 = vld [vmem:[#allocation9 + $0xb8] sm:$0xff]  }
 0x215   : > { %v10453_v47 = vpop.f32.mrf.mxu0 }
 0x216   : > { %16661 = vst [vmem:[#allocation26_spill] sm:$0xff] %v13881_v26  ;;  %v10454_v36 = vadd.f32 %v10453_v47, %v10452_v57  ;;  %v11444_v57 = vld [vmem:[#allocation9 + $0xf8] sm:$0xff]  }
 0x217   : > { %v13883_v15 = vpop.f32.mrf.mxu1  ;;  %v10455_v45 = vpop.f32.mrf.mxu0  ;;  %10784 = vmatprep.subr.bf16.mxu0 %v11444_v57  ;;  %v4929_v57 = vld [vmem:[#allocation3 + $0x20] sm:$0x1] }
 0x218   : > { %v13888_v8 = vadd.f32 %v10454_v36, %v16662_v50  ;;  %10785 = vmatpush3.bf16.msra.mxu0 %v11446_v30 }
 0x219   : > { %v13885_v12 = vpop.f32.mrf.mxu1  ;;  %v10456_v16 = vpop.f32.mrf.mxu0  ;;  %10786 = vmatprep.subr.bf16.mxu0 %v11448_v19 }
 0x21a   : > { %11189 = vmatmul.mubr.bf16.gmra.mxu0 %v9788_v25  ;;  %16663 = vst [vmem:[#allocation40_spill] sm:$0xff] %v13888_v8  ;;  %v10457_v21 = vadd.f32 %v10456_v16, %v10455_v45  ;;  %v4875_v25 = vld [vmem:[#allocation3 + $0x18] sm:$0x1] }
 0x21b   : > { %v13890_v49 = vpop.f32.mrf.mxu1  ;;  %v10458_v3 = vpop.f32.mrf.mxu0  ;;  %v4876_v2 = vsel %vm11978_vm3, 0, %v4875_v25  ;;  %v16671_v45 = vld [vmem:[#allocation30_spill] sm:$0xff]  ;;  %v11451_v25 = vld [vmem:[#allocation9 + $0xa8] sm:$0xff]  }
 0x21c   : > { %v13895_v31 = vadd.f32 %v10457_v21, %v16664_v56  ;;  %4877 = vst [vmem:[#allocation3 + $0x18] sm:$0x1] %v4876_v2  ;;  %v11449_v21 = vld [vmem:[#allocation9 + $0xb0] sm:$0xff]  }
 0x21d   : > { %v13892_v58 = vpop.f32.mrf.mxu1  ;;  %v10459_v24 = vpop.f32.mrf.mxu0  ;;  %10787 = vmatpush3.bf16.msra.mxu0 %v11449_v21  ;;  %v4926_v21 = vld [vmem:[#allocation3 + $0x14] sm:$0x1] }
 0x21e   : > { %16665 = vst [vmem:[#allocation37_spill] sm:$0xff] %v13895_v31  ;;  %v10460_v63 = vadd.f32 %v10459_v24, %v10458_v3  ;;  %v4884_v31 = vld [vmem:[#allocation3 + $0x3c] sm:$0x1] }
 0x21f   : > { %v10461_v17 = vpop.f32.mrf.mxu0 }
 0x220   : > { %v13900_v5 = vadd.f32 %v10460_v63, %v16666_v61  ;;  %v16673_v63 = vld [vmem:[#allocation21_spill] sm:$0xff] }
 0x221   : > { %v10462_v28 = vpop.f32.mrf.mxu0 }
 0x222   : > { %v13897_v22 = vpop.f32.mrf.mxu1  ;;  %16667 = vst [vmem:[#allocation41_spill] sm:$0xff] %v13900_v5  ;;  %v10463_v37 = vadd.f32 %v10462_v28, %v10461_v17  ;;  %v4872_v28 = vld [vmem:[#allocation3 + $0xc] sm:$0x1]  ;;  %v4941_v5 = vld [vmem:[#allocation3 + $0x50] sm:$0x1] }
 0x224   : > { %v13902_v9 = vpop.f32.mrf.mxu1  ;;  %v10464_v20 = vpop.f32.mrf.mxu0  ;;  %v13907_v38 = vadd.f32 %v10463_v37, %v16668_v0  ;;  %v11450_v37 = vld [vmem:[#allocation9 + $0xe8] sm:$0xff]   ;;  %v4873_v0 = vsel %vm11978_vm3, 0, %v4872_v28  ;;  %v11453_v28 = vld [vmem:[#allocation9 + $0xa0] sm:$0xff]  }
 0x225   : > { %4874 = vst [vmem:[#allocation3 + $0xc] sm:$0x1] %v4873_v0  ;;  %10788 = vmatprep.subr.bf16.mxu0 %v11450_v37  ;;  %v11445_v0 = vld [vmem:[#allocation9 + $0x48] sm:$0xff]  }
 0x226   : > { %v13904_v39 = vpop.f32.mrf.mxu1  ;;  %16669 = vst [vmem:[#allocation44_spill] sm:$0xff] %v13907_v38  ;;  %v10465_v35 = vpop.f32.mrf.mxu0  ;;  %10789 = vmatpush3.bf16.msra.mxu0 %v11451_v25  ;;  %v16680_v25 = vld [vmem:[#allocation48_spill] sm:$0xff]  ;;  %10684 = vmatprep.subr.bf16.mxu1 %v11445_v0 }
 0x227   : > { %v10466_v47 = vadd.f32 %v10465_v35, %v10464_v20  ;;  %10685 = vmatpush3.bf16.msra.mxu1 %v11447_v52 }
 0x228   : > { %v13909_v54 = vpop.f32.mrf.mxu1  ;;  %v10467_v36 = vpop.f32.mrf.mxu0 }
 0x229   : > { %v13914_v50 = vadd.f32 %v10466_v47, %v16671_v45  ;;  %v16676_v45 = vld [vmem:[#allocation22_spill] sm:$0xff] }
 0x22a   : > { %v10468_v16 = vpop.f32.mrf.mxu0 }
 0x22b   : > { %16672 = vst [vmem:[#allocation42_spill] sm:$0xff] %v13914_v50  ;;  %v13916_v6 = vpop.f32.mrf.mxu1  ;;  %v10469_v56 = vadd.f32 %v10468_v16, %v10467_v36  ;;  %v4930_v36 = vsel %vm11983_vm4, 0, %v4929_v57  ;;  %v4881_v57 = vld [vmem:[#allocation3 + $0x30] sm:$0x1] }
 0x22c   : > { %4931 = vst [vmem:[#allocation3 + $0x20] sm:$0x1] %v4930_v36  ;;  %v4882_v36 = vsel %vm11978_vm3, 0, %v4881_v57 }
 0x22d   : > { %v13918_v3 = vpop.f32.mrf.mxu1  ;;  %v10470_v24 = vpop.f32.mrf.mxu0  ;;  %v13921_v17 = vadd.f32 %v10469_v56, %v16673_v63  ;;  %v11452_v56 = vld [vmem:[#allocation9 + $0xe0] sm:$0xff]   ;;  %4883 = vst [vmem:[#allocation3 + $0x30] sm:$0x1] %v4882_v36  ;;  %v4923_v36 = vld [vmem:[#allocation3 + $0x8] sm:$0x1] }
 0x22e   : > { %10790 = vmatprep.subr.bf16.mxu0 %v11452_v56 }
 0x22f   : > { %16674 = vst [vmem:[#allocation45_spill] sm:$0xff] %v13921_v17  ;;  %v13923_v61 = vpop.f32.mrf.mxu1  ;;  %v10471_v20 = vpop.f32.mrf.mxu0  ;;  %10791 = vmatpush3.bf16.msra.mxu0 %v11453_v28 }
 0x230   : > { %v10472_v2 = vadd.f32 %v10471_v20, %v10470_v24  ;;  %v4927_v24 = vsel %vm11983_vm4, 0, %v4926_v21  ;;  %v4878_v21 = vld [vmem:[#allocation3 + $0x24] sm:$0x1] }
 0x231   : > { %v13927_v35 = vpop.f32.mrf.mxu1  ;;  %v10473_v30 = vpop.f32.mrf.mxu0  ;;  %4928 = vst [vmem:[#allocation3 + $0x14] sm:$0x1] %v4927_v24  ;;  %v4879_v56 = vsel %vm11978_vm3, 0, %v4878_v21  ;;  %v11454_v24 = vld [vmem:[#allocation9 + $0xd8] sm:$0xff]   ;;  %v4932_v21 = vld [vmem:[#allocation3 + $0x2c] sm:$0x1] }
 0x232   : > { %v13932_v19 = vadd.f32 %v10472_v2, %v16676_v45  ;;  %v4869_v45 = vld [vmem:[#allocation3] sm:$0x1]  ;;  %4880 = vst [vmem:[#allocation3 + $0x24] sm:$0x1] %v4879_v56  ;;  %10792 = vmatprep.subr.bf16.mxu0 %v11454_v24  ;;  %v11458_v56 = vld [vmem:[#allocation9 + $0xd0] sm:$0xff]  }
 0x233   : > { %v10474_v63 = vpop.f32.mrf.mxu0 }
 0x234   : > { %16677 = vst [vmem:[#allocation38_spill] sm:$0xff] %v13932_v19  ;;  %v10475_v37 = vadd.f32 %v10474_v63, %v10473_v30  ;;  %v4870_v30 = vsel %vm11978_vm3, 0, %v4869_v45  ;;  %v16684_v45 = vld [vmem:[#allocation24_spill] sm:$0xff] }
 0x235   : > { %v13934_v16 = vpop.f32.mrf.mxu1  ;;  %4871 = vst [vmem:[#allocation3] sm:$0x1] %v4870_v30 }
 0x236   : > { %16678 = vst [vmem:[#allocation43_spill] sm:$0xff] %v13934_v16  ;;  %v13943_v17 = vadd.f32 %v10475_v37, %v16680_v25  ;;  %v4935_v25 = vld [vmem:[#allocation3 + $0x38] sm:$0x1] }
 0x237   : > { %v13938_v20 = vpop.f32.mrf.mxu1  ;;  %v10476_v2 = vpop.f32.mrf.mxu0  ;;  %v4936_v28 = vsel %vm11983_vm4, 0, %v4935_v25 }
 0x238   : > { %16679 = vst [vmem:[#allocation39_spill] sm:$0xff] %v13938_v20  ;;  %16681 = vst [vmem:[#allocation46_spill] sm:$0xff] %v13943_v17  ;;  %v11456_v17 = vld [vmem:[#allocation9 + $0x98] sm:$0xff]   ;;  %v4893_v20 = vld [vmem:[#allocation3 + $0x60] sm:$0x1] }
 0x239   : > { %v13945_v19 = vpop.f32.mrf.mxu1  ;;  %v10477_v63 = vpop.f32.mrf.mxu0  ;;  %4937 = vst [vmem:[#allocation3 + $0x38] sm:$0x1] %v4936_v28  ;;  %10793 = vmatpush3.bf16.msra.mxu0 %v11456_v17  ;;  %v11459_v28 = vld [vmem:[#allocation9 + $0x90] sm:$0xff]   ;;  %v16688_v17 = vld [vmem:[#allocation49_spill] sm:$0xff] }
 0x23a   : > { %16682 = vst [vmem:[#allocation47_spill] sm:$0xff] %v13945_v19  ;;  %v10478_v37 = vadd.f32 %v10477_v63, %v10476_v2  ;;  %v4924_v2 = vsel %vm11983_vm4, 0, %v4923_v36  ;;  %v4933_v63 = vsel %vm11983_vm4, 0, %v4932_v21  ;;  %10794 = vmatprep.subr.bf16.mxu0 %v11458_v56  ;;  %v11455_v21 = vld [vmem:[#allocation9 + $0x40] sm:$0xff]  }
 0x23b   : > { %v13951_v57 = vpop.f32.mrf.mxu1  ;;  %v10479_v0 = vpop.f32.mrf.mxu0  ;;  %4925 = vst [vmem:[#allocation3 + $0x8] sm:$0x1] %v4924_v2  ;;  %4934 = vst [vmem:[#allocation3 + $0x2c] sm:$0x1] %v4933_v63  ;;  %v13977_v63 = vld [vmem:[#allocation3 + $0x4] sm:$0xf]  ;;  %10686 = vmatprep.subr.bf16.mxu1 %v11455_v21 }
 0x23c   : > { %16683 = vst [vmem:[#allocation28_spill] sm:$0xff] %v13951_v57  ;;  %v13956_v50 = vadd.f32 %v10478_v37, %v16684_v45  ;;  %v4887_v37 = vld [vmem:[#allocation3 + $0x48] sm:$0x1]  ;;  %v13973_v38 = vld [vmem:[#allocation3] sm:$0xf] }
 0x23d   : > { %v13958_v52 = vpop.f32.mrf.mxu1  ;;  %v10480_v30 = vpop.f32.mrf.mxu0  ;;  %v4888_v45 = vsel %vm11978_vm3, 0, %v4887_v37  ;;  %10795 = vmatpush3.bf16.msra.mxu0 %v11459_v28  ;;  %v5558_v37 = vshll.u32 %v13973_v38, 16  ;;  %v4942_v28 = vsel %vm11983_vm4, 0, %v4941_v5  ;;  %v4938_v21 = vld [vmem:[#allocation3 + $0x44] sm:$0x1] }
 0x23e   : > { %16685 = vst [vmem:[#allocation20_spill] sm:$0xff] %v13956_v50  ;;  %16686 = vst [vmem:[#allocation33_spill] sm:$0xff] %v13958_v52  ;;  %v10481_v24 = vadd.f32 %v10480_v30, %v10479_v0  ;;  %v4885_v0 = vsel %vm11978_vm3, 0, %v4884_v31  ;;  %v11457_v30 = vld [vmem:[#allocation9] sm:$0xff]  }
 0x23f   : > { %v13964_v25 = vpop.f32.mrf.mxu1  ;;  %4889 = vst [vmem:[#allocation3 + $0x48] sm:$0x1] %v4888_v45  ;;  %4886 = vst [vmem:[#allocation3 + $0x3c] sm:$0x1] %v4885_v0  ;;  %v5564_v45 = vshll.u32 %v13977_v63, 16  ;;  %10687 = vmatpush3.bf16.msra.mxu1 %v11457_v30  ;;  %v5560_v18 = vrot.slane %v5558_v37, 5 }
 0x240   : > { %16687 = vst [vmem:[#allocation25_spill] sm:$0xff] %v13964_v25  ;;  %v13969_v50 = vadd.f32 %v10481_v24, %v16688_v17  ;;  %v5555_v24 = vshrl.u32 %v13973_v38, 16  ;;  %v5568_v17 = vshrl.u32 %v13977_v63, 16  ;;  %4943 = vst [vmem:[#allocation3 + $0x50] sm:$0x1] %v4942_v28  ;;  %v16692_v25 = vld [vmem:[#allocation34_spill] sm:$0xff] }
 0x241   : > { %v13971_v36 = vpop.f32.mrf.mxu1  ;;  %v10482_v2 = vpop.f32.mrf.mxu0  ;;  %v4939_v30 = vsel %vm11983_vm4, 0, %v4938_v21  ;;  %v16695_v21 = vld [vmem:[#allocation36_spill] sm:$0xff] }
 0x242   : > { %16689 = vst [vmem:[#allocation54_spill] sm:$0xff] %v13969_v50  ;;  %16690 = vst [vmem:[#allocation35_spill] sm:$0xff] %v13971_v36  ;;  %v5538_v8 = vld [vmem:[#allocation3 + $0x8] sm:$0x1]  ;;  %v5557_v26 = vrot.slane %v5555_v24, 4  ;;  %v5566_v36 = vrot.slane %v5564_v45, 5 }
 0x243   : > { %v13979_v56 = vpop.f32.mrf.mxu1  ;;  %v10483_v50 = vpop.f32.mrf.mxu0  ;;  %v5570_v19 = vrot.slane %v5568_v17, 4  ;;  %4940 = vst [vmem:[#allocation3 + $0x44] sm:$0x1] %v4939_v30  ;;  %v5574_v24 = vshll.u32 %v5538_v8, 16  ;;  %v6004_v17 = vrot.slane %v13977_v63, 5 }
 0x244   : > { %16691 = vst [vmem:[#allocation55_spill] sm:$0xff] %v13979_v56  ;;  %v10484_v31 = vadd.f32 %v10483_v50, %v10482_v2  ;;  %v11460_v56 = vld [vmem:[#allocation9 + $0xc8] sm:$0xff]   ;;  %v5561_v2 = vor.u32 %v5560_v18, %v5557_v26 }
 0x245   : > { %v10485_v0 = vpop.f32.mrf.mxu0  ;;  %v11461_v50 = vld [vmem:[#allocation9 + $0x88] sm:$0xff]   ;;  %10796 = vmatprep.subr.bf16.mxu0 %v11460_v56 }
 0x246   : > { %v13988_v52 = vadd.f32 %v10484_v31, %v16692_v25  ;;  %v13990_v57 = vpop.f32.mrf.mxu1  ;;  %10797 = vmatpush3.bf16.msra.mxu0 %v11461_v50  ;;  %v5562_v45 = vrot.slane %v5561_v2, 4  ;;  %v5571_v25 = vor.u32 %v5570_v19, %v5566_v36  ;;  %v11463_v50 = vld [vmem:[#allocation9 + $0xc0] sm:$0xff]  }
 0x247   : > { %16694 = vst [vmem:[#allocation56_spill] sm:$0xff] %v13990_v57  ;;  %v10486_v5 = vpop.f32.mrf.mxu0  ;;  %v5576_v57 = vrot.slane %v5574_v24, 5  ;;  %v6007_v24 = vrot.slane %v5538_v8, 5  ;;  %10798 = vmatprep.subr.bf16.mxu0 %v11463_v50 }
 0x248   : > { %16693 = vst [vmem:[#allocation27_spill] sm:$0xff] %v13988_v52  ;;  %v13994_v37 = vpop.f32.mrf.mxu1  ;;  %v10487_v28 = vadd.f32 %v10486_v5, %v10485_v0  ;;  %v4894_v52 = vsel %vm11978_vm3, 0, %v4893_v20  ;;  %v5567_v18 = vsel %vm12037_vm14, %v5562_v45, %v5566_v36  ;;  %v5572_v26 = vrot.slane %v5571_v25, 4  ;;  %v4890_v5 = vld [vmem:[#allocation3 + $0x54] sm:$0x1]  ;;  %v11464_v36 = vld [vmem:[#allocation9 + $0x80] sm:$0xff]  }
 0x249   : > { %4895 = vst [vmem:[#allocation3 + $0x60] sm:$0x1] %v4894_v52  ;;  %v9943_v20 = vcombine.low %v13973_v38, %v13977_v63  ;;  %v6006_v52 = vrot.slane %v6004_v17, 4  ;;  %v16696_v45 = vld [vmem:[#allocation50_spill] sm:$0xff] }
 0x24a   : > { %v10488_v31 = vpop.f32.mrf.mxu0  ;;  %v13999_v16 = vadd.f32 %v10487_v28, %v16695_v21  ;;  %v14004_v0 = vpop.f32.mrf.mxu1  ;;  %v5577_v19 = vsel %vm12037_vm14, %v5572_v26, %v5576_v57  ;;  %v4891_v21 = vsel %vm11978_vm3, 0, %v4890_v5  ;;  %v4947_v57 = vld [vmem:[#allocation3 + $0x68] sm:$0x1]  ;;  %10799 = vmatpush3.bf16.msra.mxu0 %v11464_v36 }
 0x24b   : > { %v9959_v28 = vcombine.low %v5567_v18, %v5577_v19  ;;  %4892 = vst [vmem:[#allocation3 + $0x54] sm:$0x1] %v4891_v21  ;;  %v14017_v38 = vsel %vm12031_vm13, %v6006_v52, %v6007_v24  ;;  %v4948_v18 = vsel %vm11983_vm4, 0, %v4947_v57  ;;  %v16698_v26 = vld [vmem:[#allocation52_spill] sm:$0xff]  ;;  %v4899_v24 = vld [vmem:[#allocation3 + $0x78] sm:$0x1] }
 0x24c   : > { %v10489_v56 = vpop.f32.mrf.mxu0  ;;  %16697 = vst [vmem:[#allocation29_spill] sm:$0xff] %v14017_v38  ;;  %v14019_v63 = vpop.f32.mrf.mxu1  ;;  %4949 = vst [vmem:[#allocation3 + $0x68] sm:$0x1] %v4948_v18  ;;  %v5938_v21 = vld [vmem:[#allocation3] sm:$0xe] }
 0x24d   : > { %v10490_v30 = vadd.f32 %v10489_v56, %v10488_v31  ;;  %8563 = vmatprep.mubr.bf16.mxu1 %v9959_v28 }
 0x24e   : > { %v10491_v2 = vpop.f32.mrf.mxu0  ;;  %8564 = vmatmul.mubr.bf16.vlgmr.msra.gmra.mxu1 %v9943_v20  ;;  %v14026_v19 = vpop.f32.mrf.mxu1 }
 0x24f   : > { %v14011_v25 = vadd.f32 %v10490_v30, %v16696_v45  ;;  %v4944_v30 = vld [vmem:[#allocation3 + $0x5c] sm:$0x1]  ;;  %v4896_v45 = vld [vmem:[#allocation3 + $0x6c] sm:$0x1] }
 0x250   : > { %v10492_v31 = vpop.f32.mrf.mxu0  ;;  %v4945_v5 = vsel %vm11983_vm4, 0, %v4944_v30  ;;  %v14032_v36 = vpop.f32.mrf.mxu1  ;;  %v4897_v57 = vsel %vm11978_vm3, 0, %v4896_v45 }
 0x251   : > { %v10493_v8 = vadd.f32 %v10492_v31, %v10491_v2  ;;  %4946 = vst [vmem:[#allocation3 + $0x5c] sm:$0x1] %v4945_v5  ;;  %v4900_v2 = vsel %vm11978_vm3, 0, %v4899_v24  ;;  %4898 = vst [vmem:[#allocation3 + $0x6c] sm:$0x1] %v4897_v57 }
 0x252   : > { %4901 = vst [vmem:[#allocation3 + $0x78] sm:$0x1] %v4900_v2  ;;  %v4953_v2 = vld [vmem:[#allocation3 + $0x80] sm:$0x1] }
 0x253   : > { %v14024_v56 = vadd.f32 %v10493_v8, %v16698_v26  ;;  %v9895_v8 = vrot.slane %v5938_v21, 9 }
 0x255   : > { %v14041_v30 = vsel %vm12031_vm13, %v9895_v8, %v6004_v17 }
 0x256   : > { %v10494_v50 = vpop.f32.mrf.mxu0  ;;  %16699 = vst [vmem:[#allocation31_spill] sm:$0xff] %v14041_v30 }
 0x258   : > { %v10495_v52 = vpop.f32.mrf.mxu0 }
 0x259   : > { %v10496_v28 = vadd.f32 %v10495_v52, %v10494_v50  ;;  %v14043_v50 = vpop.f32.mrf.mxu1 }
 0x25a   : > { %v10497_v20 = vpop.f32.mrf.mxu0 }
 0x25b   : > { %v14035_v31 = vadd.f32 %v10496_v28, %v13722_v13  ;;  %v14050_v24 = vpop.f32.mrf.mxu1 }
 0x25c   : > { %v10498_v18 = vpop.f32.mrf.mxu0 }
 0x25d   : > { %v10499_v26 = vadd.f32 %v10498_v18, %v10497_v20  ;;  %v4954_v20 = vsel %vm11983_vm4, 0, %v4953_v2  ;;  %v14054_v17 = vpop.f32.mrf.mxu1  ;;  %v11468_v2 = vld [vmem:[#allocation9 + $0x138] sm:$0xff]  }
 0x25e   : > { %4955 = vst [vmem:[#allocation3 + $0x80] sm:$0x1] %v4954_v20  ;;  %v4950_v20 = vld [vmem:[#allocation3 + $0x74] sm:$0x1] }
 0x25f   : > { %v14048_v52 = vadd.f32 %v10499_v26, %v13728_v62  ;;  %v14059_v62 = vpop.f32.mrf.mxu1 }
 0x261   : > { %v10500_v13 = vpop.f32.mrf.mxu0  ;;  %v14064_v27 = vpop.f32.mrf.mxu1 }
 0x263   : > { %v10501_v28 = vpop.f32.mrf.mxu0 }
 0x264   : > { %v10502_v45 = vadd.f32 %v10501_v28, %v10500_v13  ;;  %v11467_v28 = vld [vmem:[#allocation9 + $0x178] sm:$0xff]  }
 0x265   : > { %v10503_v21 = vpop.f32.mrf.mxu0  ;;  %10896 = vmatprep.subr.bf16.mxu1 %v11467_v28  ;;  %v4902_v28 = vld [vmem:[#allocation3 + $0x84] sm:$0x1] }
 0x266   : > { %v14057_v57 = vadd.f32 %v10502_v45, %v13740_v48  ;;  %v4951_v48 = vsel %vm11983_vm4, 0, %v4950_v20  ;;  %10897 = vmatpush3.bf16.msra.mxu1 %v11468_v2 }
 0x267   : > { %v10504_v8 = vpop.f32.mrf.mxu0  ;;  %4952 = vst [vmem:[#allocation3 + $0x74] sm:$0x1] %v4951_v48 }
 0x268   : > { %16700 = vst [vmem:[#allocation23_spill] sm:$0xff] %v14057_v57  ;;  %v10505_v18 = vadd.f32 %v10504_v8, %v10503_v21 }
 0x26a   : > { %v14062_v26 = vadd.f32 %v10505_v18, %v13742_v40  ;;  %v14071_v40 = vpop.f32.mrf.mxu1  ;;  %v4905_v18 = vld [vmem:[#allocation3 + $0x90] sm:$0x1] }
 0x26c   : > { %16701 = vst [vmem:[#allocation32_spill] sm:$0xff] %v14062_v26  ;;  %v10506_v5 = vpop.f32.mrf.mxu0  ;;  %v14078_v20 = vpop.f32.mrf.mxu1 }
 0x26e   : > { %v10507_v13 = vpop.f32.mrf.mxu0  ;;  %v14085_v26 = vpop.f32.mrf.mxu1 }
 0x26f   : > { %v10508_v29 = vadd.f32 %v10507_v13, %v10506_v5  ;;  %v4906_v5 = vsel %vm11978_vm3, 0, %v4905_v18 }
 0x270   : > { %v10509_v38 = vpop.f32.mrf.mxu0  ;;  %4907 = vst [vmem:[#allocation3 + $0x90] sm:$0x1] %v4906_v5 }
 0x271   : > { %v14069_v45 = vadd.f32 %v10508_v29, %v13763_v32  ;;  %v4903_v32 = vsel %vm11978_vm3, 0, %v4902_v28  ;;  %v14092_v28 = vpop.f32.mrf.mxu1 }
 0x272   : > { %v10510_v21 = vpop.f32.mrf.mxu0  ;;  %4904 = vst [vmem:[#allocation3 + $0x84] sm:$0x1] %v4903_v32 }
 0x273   : > { %16702 = vst [vmem:[#allocation30_spill] sm:$0xff] %v14069_v45  ;;  %v10511_v8 = vadd.f32 %v10510_v21, %v10509_v38  ;;  %v4959_v21 = vld [vmem:[#allocation3 + $0x98] sm:$0x1]  ;;  %v4956_v45 = vld [vmem:[#allocation3 + $0x8c] sm:$0x1] }
 0x274   : > { %v10512_v30 = vpop.f32.mrf.mxu0 }
 0x275   : > { %v14076_v13 = vadd.f32 %v10511_v8, %v13765_v34  ;;  %v4960_v34 = vsel %vm11983_vm4, 0, %v4959_v21 }
 0x276   : > { %v10513_v29 = vpop.f32.mrf.mxu0  ;;  %4961 = vst [vmem:[#allocation3 + $0x98] sm:$0x1] %v4960_v34 }
 0x277   : > { %16703 = vst [vmem:[#allocation21_spill] sm:$0xff] %v14076_v13  ;;  %v10514_v2 = vadd.f32 %v10513_v29, %v10512_v30 }
 0x278   : > { %v10515_v48 = vpop.f32.mrf.mxu0 }
 0x279   : > { %v14083_v38 = vadd.f32 %v10514_v2, %v13769_v33  ;;  %v14094_v33 = vpop.f32.mrf.mxu1 }
 0x27a   : > { %v10516_v18 = vpop.f32.mrf.mxu0 }
 0x27b   : > { %16704 = vst [vmem:[#allocation22_spill] sm:$0xff] %v14083_v38  ;;  %v10517_v8 = vadd.f32 %v10516_v18, %v10515_v48  ;;  %v4957_v48 = vsel %vm11983_vm4, 0, %v4956_v45  ;;  %v14101_v21 = vpop.f32.mrf.mxu1 }
 0x27c   : > { %v10518_v13 = vpop.f32.mrf.mxu0  ;;  %4958 = vst [vmem:[#allocation3 + $0x8c] sm:$0x1] %v4957_v48  ;;  %v4965_v48 = vld [vmem:[#allocation3 + $0xb0] sm:$0x1] }
 0x27d   : > { %v14090_v5 = vadd.f32 %v10517_v8, %v13776_v43  ;;  %v14106_v34 = vpop.f32.mrf.mxu1 }
 0x27e   : > { %v10519_v30 = vpop.f32.mrf.mxu0 }
 0x27f   : > { %v10520_v29 = vadd.f32 %v10519_v30, %v10518_v13 }
 0x280   : > { %v10521_v32 = vpop.f32.mrf.mxu0 }
 0x281   : > { %v14097_v2 = vadd.f32 %v10520_v29, %v13782_v60 }
 0x282   : > { %v10522_v38 = vpop.f32.mrf.mxu0 }
 0x283   : > { %16705 = vst [vmem:[#allocation48_spill] sm:$0xff] %v14097_v2  ;;  %v10523_v57 = vadd.f32 %v10522_v38, %v10521_v32  ;;  %v4911_v38 = vld [vmem:[#allocation3 + $0xa8] sm:$0x1]  ;;  %v4908_v32 = vld [vmem:[#allocation3 + $0x9c] sm:$0x1]  ;;  %v14113_v2 = vpop.f32.mrf.mxu1 }
 0x284   : > { %v4912_v45 = vsel %vm11978_vm3, 0, %v4911_v38 }
 0x285   : > { %v14104_v43 = vadd.f32 %v10523_v57, %v13784_v10  ;;  %4913 = vst [vmem:[#allocation3 + $0xa8] sm:$0x1] %v4912_v45  ;;  %v4909_v57 = vsel %vm11978_vm3, 0, %v4908_v32  ;;  %v10560_v45 = vadd.f32 %v13871_v41, %v13865_v51 }
 0x286   : > { %4910 = vst [vmem:[#allocation3 + $0x9c] sm:$0x1] %v4909_v57  ;;  %v4962_v57 = vld [vmem:[#allocation3 + $0xa4] sm:$0x1] }
 0x287   : > { %v10524_v18 = vpop.f32.mrf.mxu0 }
 0x289   : > { %v10525_v13 = vpop.f32.mrf.mxu0 }
 0x28a   : > { %v10526_v8 = vadd.f32 %v10525_v13, %v10524_v18  ;;  %v4966_v18 = vsel %vm11983_vm4, 0, %v4965_v48  ;;  %v14122_v13 = vpop.f32.mrf.mxu1  ;;  %v10563_v48 = vadd.f32 %v13878_v44, %v13876_v59  ;;  %v10578_v59 = vadd.f32 %v13918_v3, %v13916_v6  ;;  %v16713_v3 = vld [vmem:[#allocation35_spill] sm:$0xff] }
 0x28b   : > { %v10527_v30 = vpop.f32.mrf.mxu0  ;;  %4967 = vst [vmem:[#allocation3 + $0xb0] sm:$0x1] %v4966_v18  ;;  %v10566_v18 = vadd.f32 %v13885_v12, %v13883_v15  ;;  %v4473_v15 = vadd.f32 %v10560_v45, %v13874_v4  ;;  %v16714_v4 = vld [vmem:[#allocation55_spill] sm:$0xff] }
 0x28c   : > { %v14109_v60 = vadd.f32 %v10526_v8, %v13817_v14  ;;  %v11473_v8 = vld [vmem:[#allocation9 + $0x170] sm:$0xff]   ;;  %v14124_v38 = vpop.f32.mrf.mxu1  ;;  %v10593_v45 = vadd.f32 %v16714_v4, %v16713_v3 }
 0x28d   : > { %v10528_v29 = vpop.f32.mrf.mxu0  ;;  %10898 = vmatprep.subr.bf16.mxu1 %v11473_v8  ;;  %v16711_v8 = vld [vmem:[#allocation33_spill] sm:$0xff] }
 0x28e   : > { %v10529_v10 = vadd.f32 %v10528_v29, %v10527_v30  ;;  %v10554_v30 = vadd.f32 %v13845_v46, %v13837_v1  ;;  %v10557_v29 = vadd.f32 %v13857_v42, %v13851_v11  ;;  %v14132_v32 = vpop.f32.mrf.mxu1  ;;  %v4963_v1 = vsel %vm11983_vm4, 0, %v4962_v57 }
 0x28f   : > { %v10569_v46 = vadd.f32 %v13892_v58, %v13890_v49  ;;  %v10572_v11 = vadd.f32 %v13902_v9, %v13897_v22  ;;  %v10575_v42 = vadd.f32 %v13909_v54, %v13904_v39  ;;  %4964 = vst [vmem:[#allocation3 + $0xa4] sm:$0x1] %v4963_v1  ;;  %v10581_v49 = vadd.f32 %v13927_v35, %v13923_v61  ;;  %v16707_v58 = vld [vmem:[#allocation43_spill] sm:$0xff]  ;;  %v16710_v54 = vld [vmem:[#allocation28_spill] sm:$0xff] }
 0x290   : > { %v14120_v14 = vadd.f32 %v10529_v10, %v13827_v55  ;;  %v11474_v10 = vld [vmem:[#allocation9 + $0x130] sm:$0xff]   ;;  %v4465_v41 = vadd.f32 %v10554_v30, %v13854_v23  ;;  %v14151_v12 = vadd.f32 %v10557_v29, %v13863_v53  ;;  %v16708_v22 = vld [vmem:[#allocation39_spill] sm:$0xff]  ;;  %v16712_v30 = vld [vmem:[#allocation25_spill] sm:$0xff]  ;;  %v14161_v57 = vpop.f32.mrf.mxu1 }
 0x291   : > { %10899 = vmatpush3.bf16.msra.mxu1 %v11474_v10  ;;  %v10584_v9 = vadd.f32 %v16708_v22, %v16707_v58  ;;  %v16709_v39 = vld [vmem:[#allocation47_spill] sm:$0xff]  ;;  %v10590_v10 = vadd.f32 %v16712_v30, %v16711_v8  ;;  %v16715_v53 = vld [vmem:[#allocation53_spill] sm:$0xff]  ;;  %v16717_v35 = vld [vmem:[#allocation40_spill] sm:$0xff] }
 0x292   : > { %16706 = vst [vmem:[#allocation24_spill] sm:$0xff] %v14120_v14  ;;  %v10587_v23 = vadd.f32 %v16710_v54, %v16709_v39  ;;  %v14170_v1 = vadd.f32 %v10566_v18, %v16717_v35  ;;  %v16719_v39 = vld [vmem:[#allocation41_spill] sm:$0xff]  ;;  %v16720_v8 = vld [vmem:[#allocation44_spill] sm:$0xff]  ;;  %v16722_v18 = vld [vmem:[#allocation42_spill] sm:$0xff] }
 0x293   : > { %v14175_v54 = vadd.f32 %v10572_v11, %v16719_v39  ;;  %v14178_v30 = vadd.f32 %v10575_v42, %v16720_v8  ;;  %v16721_v14 = vld [vmem:[#allocation37_spill] sm:$0xff]  ;;  %v14193_v42 = vld [vmem:[%s16410_s2] ss:$0 sm:$0xff]  ;;  %v16724_v35 = vld [vmem:[#allocation46_spill] sm:$0xff] }
 0x294   : > { %v14181_v3 = vadd.f32 %v10569_v46, %v16721_v14  ;;  %v16723_v14 = vld [vmem:[#allocation38_spill] sm:$0xff]  ;;  %v16727_v39 = vld [vmem:[#allocation51_spill] sm:$0xff] }
 0x295   : > { %v14196_v46 = vadd.f32 %v10584_v9, %v16723_v14  ;;  %v4914_v14 = vld [vmem:[#allocation3 + $0xb4] sm:$0x1] }
 0x29a   : > { %v10530_v55 = vpop.f32.mrf.mxu0 }
 0x29c   : > { %v10531_v51 = vpop.f32.mrf.mxu0 }
 0x29d   : > { %v10532_v44 = vadd.f32 %v10531_v51, %v10530_v55  ;;  %v16716_v55 = vld [vmem:[#allocation26_spill] sm:$0xff]  ;;  %v16718_v51 = vld [vmem:[#allocation56_spill] sm:$0xff] }
 0x29e   : > { %v10533_v6 = vpop.f32.mrf.mxu0  ;;  %v4476_v61 = vadd.f32 %v10563_v48, %v16716_v55  ;;  %v10596_v58 = vadd.f32 %v13994_v37, %v16718_v51  ;;  %v10599_v48 = vadd.f32 %v14019_v63, %v14004_v0  ;;  %v10628_v55 = vpop.f32.mrf.mxu1  ;;  %v14199_v51 = vadd.f32 %v10587_v23, %v16724_v35  ;;  %v16725_v0 = vld [vmem:[#allocation45_spill] sm:$0xff] }
 0x29f   : > { %v14166_v29 = vadd.f32 %v10532_v44, %v16715_v53  ;;  %v4917_v44 = vld [vmem:[#allocation3 + $0xc0] sm:$0x1]  ;;  %v14186_v53 = vadd.f32 %v10578_v59, %v16722_v18  ;;  %v14202_v63 = vadd.f32 %v10581_v49, %v16725_v0  ;;  %v16726_v59 = vld [vmem:[#allocation20_spill] sm:$0xff]  ;;  %v16728_v18 = vld [vmem:[#allocation54_spill] sm:$0xff]  ;;  %v10605_v23 = vadd.f32 %v14050_v24, %v14043_v50 }
 0x2a0   : > { %v10534_v22 = vpop.f32.mrf.mxu0  ;;  %v4918_v37 = vsel %vm11978_vm3, 0, %v4917_v44  ;;  %v14213_v9 = vadd.f32 %v10593_v45, %v16728_v18  ;;  %v10608_v49 = vadd.f32 %v14059_v62, %v14054_v17  ;;  %v4971_v45 = vld [vmem:[#allocation3 + $0xc8] sm:$0x1]  ;;  %v14231_v50 = vadd.f32 %v10599_v48, %v13999_v16 }
 0x2a1   : > { %v10535_v4 = vadd.f32 %v10534_v22, %v10533_v6  ;;  %v14205_v6 = vadd.f32 %v10590_v10, %v16726_v59  ;;  %4919 = vst [vmem:[#allocation3 + $0xc0] sm:$0x1] %v4918_v37  ;;  %v10602_v22 = vadd.f32 %v14032_v36, %v14026_v19  ;;  %v14222_v10 = vld [vmem:[%s16411_s3] ss:$0 sm:$0xff]  ;;  %v16729_v36 = vld [vmem:[#allocation27_spill] sm:$0xff]  ;;  %v4972_v24 = vsel %vm11983_vm4, 0, %v4971_v45 }
 0x2a2   : > { %v11162_v11 = vpop.f32.mrf.mxu0  ;;  %v10611_v17 = vadd.f32 %v14071_v40, %v14064_v27  ;;  %v10614_v62 = vadd.f32 %v14085_v26, %v14078_v20  ;;  %v10620_v35 = vadd.f32 %v14106_v34, %v14101_v21  ;;  %4973 = vst [vmem:[#allocation3 + $0xc8] sm:$0x1] %v4972_v24  ;;  %v10623_v27 = vadd.f32 %v14122_v13, %v14113_v2  ;;  %v16730_v13 = vld [vmem:[#allocation30_spill] sm:$0xff] }
 0x2a3   : > { %v14210_v8 = vadd.f32 %v10535_v4, %v16727_v39  ;;  %v4634_v44 = vadd.f32 %v11162_v11, %v4473_v15  ;;  %v14225_v4 = vadd.f32 %v10596_v58, %v16729_v36  ;;  %v4915_v15 = vsel %vm11978_vm3, 0, %v4914_v14  ;;  %v16733_v36 = vld [vmem:[#allocation21_spill] sm:$0xff]  ;;  %v16734_v45 = vld [vmem:[#allocation22_spill] sm:$0xff] }
 0x2a4   : > { %v4625_v19 = vpop.f32.mrf.mxu0  ;;  %4916 = vst [vmem:[#allocation3 + $0xb4] sm:$0x1] %v4915_v15  ;;  %v10617_v58 = vadd.f32 %v14094_v33, %v14092_v28  ;;  %v14246_v39 = vadd.f32 %v10602_v22, %v14011_v25  ;;  %v10626_v26 = vadd.f32 %v14132_v32, %v14124_v38  ;;  %v14253_v20 = vadd.f32 %v10608_v49, %v14035_v31  ;;  %v16731_v31 = vld [vmem:[#allocation23_spill] sm:$0xff] }
 0x2a5   : > { %v4761_v37 = vmul.f32 %v14193_v42, %v4634_v44  ;;  %v4626_v11 = vadd.f32 %v4625_v19, %v4465_v41  ;;  %v10630_v41 = vpop.f32.mrf.mxu1  ;;  %v14256_v28 = vadd.f32 %v10605_v23, %v14024_v56  ;;  %v14262_v2 = vadd.f32 %v10611_v17, %v14048_v52  ;;  %v16732_v56 = vld [vmem:[#allocation32_spill] sm:$0xff] }
 0x2a6   : > { %v11163_v0 = vpop.f32.mrf.mxu0  ;;  %v14265_v38 = vadd.f32 %v10620_v35, %v16730_v13  ;;  %v14268_v32 = vadd.f32 %v10614_v62, %v16731_v31  ;;  %v14271_v44 = vadd.f32 %v10617_v58, %v16732_v56  ;;  %v14276_v49 = vadd.f32 %v10628_v55, %v14161_v57  ;;  %v5394_v13 = vld [vmem:[#allocation3 + $0xc] sm:$0xf] }
 0x2a7   : > { %v4800_v16 = vadd.f32 %v14222_v10, %v4761_v37  ;;  %v4759_v48 = vmul.f32 %v14193_v42, %v4626_v11  ;;  %v4637_v59 = vadd.f32 %v11163_v0, %v4476_v61  ;;  %v10631_v61 = vpop.f32.mrf.mxu1  ;;  %v14280_v15 = vadd.f32 %v10623_v27, %v16733_v36  ;;  %v5401_v27 = vld [vmem:[#allocation3 + $0x18] sm:$0xf] }
 0x2a8   : > { %v4628_v40 = vpop.f32.mrf.mxu0  ;;  %v14283_v37 = vadd.f32 %v10626_v26, %v16734_v45  ;;  %v14285_v11 = vadd.f32 %v10631_v61, %v10630_v41 }
 0x2a9   : > { %v4832_v33 = vmax.f32 %v4800_v16, 0.0  ;;  %v4798_v21 = vadd.f32 %v14222_v10, %v4759_v48  ;;  %v4762_v34 = vmul.f32 %v14193_v42, %v4637_v59  ;;  %v4629_v25 = vadd.f32 %v4628_v40, %v14151_v12 }
 0x2aa   : > { %v11166_v22 = vpop.f32.mrf.mxu0 }
 0x2ab   : > { %v10169_v18 = vpack.c.bf16 %v4832_v33, %v4832_v33  ;;  %v4830_v14 = vmax.f32 %v4798_v21, 0.0  ;;  %v4801_v23 = vadd.f32 %v14222_v10, %v4762_v34  ;;  %v4760_v12 = vmul.f32 %v14193_v42, %v4629_v25 }
 0x2ac   : > { %v4650_v52 = vadd.f32 %v11166_v22, %v14175_v54  ;;  %v4641_v19 = vpop.f32.mrf.mxu0 }
 0x2ad   : > { %v5091_v24 = vshrl.u32 %v10169_v18, 16  ;;  %v10167_v17 = vpack.c.bf16 %v4830_v14, %v4830_v14  ;;  %v4833_v62 = vmax.f32 %v4801_v23, 0.0  ;;  %v5094_v58 = vshll.u32 %v10169_v18, 16 }
 0x2ae   : > { %v4799_v35 = vadd.f32 %v14222_v10, %v4760_v12  ;;  %v4765_v57 = vmul.f32 %v14193_v42, %v4650_v52  ;;  %v4642_v55 = vadd.f32 %v4641_v19, %v14170_v1  ;;  %v11167_v54 = vpop.f32.mrf.mxu0 }
 0x2af   : > { %v5093_v0 = vrot.slane %v5091_v24, 7  ;;  %v5074_v16 = vshrl.u32 %v10167_v17, 16  ;;  %v5077_v48 = vshll.u32 %v10167_v17, 16  ;;  %v10170_v59 = vpack.c.bf16 %v4833_v62, %v4833_v62 }
 0x2b0   : > { %v4831_v26 = vmax.f32 %v4799_v35, 0.0  ;;  %v4804_v41 = vadd.f32 %v14222_v10, %v4765_v57  ;;  %v4763_v40 = vmul.f32 %v14193_v42, %v4642_v55  ;;  %v4653_v33 = vadd.f32 %v11167_v54, %v14178_v30  ;;  %v4644_v21 = vpop.f32.mrf.mxu0  ;;  %v5405_v30 = vld [vmem:[#allocation3 + $0x20] sm:$0x1] }
 0x2b1   : > { %v5096_v34 = vor.u32 %v5094_v58, %v5093_v0  ;;  %v5097_v25 = vrot.slane %v5093_v0, 4  ;;  %v5076_v61 = vrot.slane %v5074_v16, 7  ;;  %v5099_v22 = vshrl.u32 %v10170_v59, 16 }
 0x2b2   : > { %v5102_v1 = vshll.u32 %v10170_v59, 16  ;;  %v10168_v31 = vpack.c.bf16 %v4831_v26, %v4831_v26  ;;  %v4836_v56 = vmax.f32 %v4804_v41, 0.0  ;;  %v4802_v18 = vadd.f32 %v14222_v10, %v4763_v40  ;;  %v11170_v14 = vpop.f32.mrf.mxu0  ;;  %v14299_v26 = vpop.f32.mrf.mxu1 }
 0x2b3   : > { %v5402_v12 = vsel %vm12013_vm12, %v5096_v34, %v5401_v27  ;;  %v5079_v52 = vor.u32 %v5077_v48, %v5076_v61  ;;  %v5080_v19 = vrot.slane %v5076_v61, 4  ;;  %v5101_v36 = vrot.slane %v5099_v22, 7  ;;  %v5398_v61 = vld [vmem:[#allocation3 + $0x14] sm:$0x1] }
 0x2b4   : > { %5403 = vst [vmem:[#allocation3 + $0x18] sm:$0xf] %v5402_v12  ;;  %v5082_v45 = vshrl.u32 %v10168_v31, 16  ;;  %v5085_v24 = vshll.u32 %v10168_v31, 16  ;;  %v10173_v17 = vpack.c.bf16 %v4836_v56, %v4836_v56  ;;  %v4834_v62 = vmax.f32 %v4802_v18, 0.0  ;;  %v4657_v58 = vpop.f32.mrf.mxu0 }
 0x2b5   : > { %v5395_v35 = vsel %vm12013_vm12, %v5079_v52, %v5394_v13  ;;  %v5104_v57 = vor.u32 %v5102_v1, %v5101_v36  ;;  %v5106_v55 = vrot.slane %v5101_v36, 4  ;;  %v4766_v54 = vmul.f32 %v14193_v42, %v4653_v33  ;;  %v11479_v33 = vld [vmem:[#allocation9 + $0x168] sm:$0xff]   ;;  %v5415_v52 = vld [vmem:[#allocation3 + $0x30] sm:$0xf] }
 0x2b6   : > { %5396 = vst [vmem:[#allocation3 + $0xc] sm:$0xf] %v5395_v35  ;;  %v5084_v0 = vrot.slane %v5082_v45, 7  ;;  %v5125_v16 = vshrl.u32 %v10173_v17, 16  ;;  %v5128_v48 = vshll.u32 %v10173_v17, 16  ;;  %v10171_v59 = vpack.c.bf16 %v4834_v62, %v4834_v62  ;;  %v11171_v27 = vpop.f32.mrf.mxu0  ;;  %10900 = vmatprep.subr.bf16.mxu1 %v11479_v33  ;;  %v11480_v35 = vld [vmem:[#allocation9 + $0x128] sm:$0xff]  }
 0x2b7   : > { %v5105_v40 = vsel %vm12005_vm11, %v5097_v25, %v5104_v57  ;;  %v5406_v34 = vsel %vm11978_vm3, %v5106_v55, %v5405_v30  ;;  %v4805_v22 = vadd.f32 %v14222_v10, %v4766_v54  ;;  %v4645_v13 = vadd.f32 %v4644_v21, %v14181_v3  ;;  %v14313_v57 = vpop.f32.mrf.mxu1  ;;  %10901 = vmatpush3.bf16.msra.mxu1 %v11480_v35 }
 0x2b8   : > { %5404 = vst [vmem:[#allocation3 + $0x1c] sm:$0xf] %v5105_v40  ;;  %5407 = vst [vmem:[#allocation3 + $0x20] sm:$0x1] %v5406_v34  ;;  %v5087_v1 = vor.u32 %v5085_v24, %v5084_v0  ;;  %v5089_v31 = vrot.slane %v5084_v0, 4  ;;  %v5127_v56 = vrot.slane %v5125_v16, 7  ;;  %v4660_v12 = vpop.f32.mrf.mxu0  ;;  %v4666_v30 = vadd.f32 %v11170_v14, %v14196_v46 }
 0x2b9   : > { %v5108_v18 = vshrl.u32 %v10171_v59, 16  ;;  %v5111_v36 = vshll.u32 %v10171_v59, 16  ;;  %v4837_v45 = vmax.f32 %v4805_v22, 0.0  ;;  %v4764_v25 = vmul.f32 %v14193_v42, %v4645_v13  ;;  %v5408_v0 = vld [vmem:[#allocation3 + $0x24] sm:$0xf] }
 0x2ba   : > { %v5088_v17 = vsel %vm12005_vm11, %v5080_v19, %v5087_v1  ;;  %v5399_v3 = vsel %vm11978_vm3, %v5089_v31, %v5398_v61  ;;  %v5130_v21 = vor.u32 %v5128_v48, %v5127_v56  ;;  %v5131_v24 = vrot.slane %v5127_v56, 4  ;;  %v11174_v62 = vpop.f32.mrf.mxu0 }
 0x2bb   : > { %5397 = vst [vmem:[#allocation3 + $0x10] sm:$0xf] %v5088_v17  ;;  %5400 = vst [vmem:[#allocation3 + $0x14] sm:$0x1] %v5399_v3  ;;  %v14315_v55 = vrot.slane %v5108_v18, 7  ;;  %v10174_v54 = vpack.c.bf16 %v4837_v45, %v4837_v45  ;;  %v4803_v46 = vadd.f32 %v14222_v10, %v4764_v25  ;;  %v4769_v14 = vmul.f32 %v14193_v42, %v4666_v30 }
 0x2bc   : > { %v5416_v19 = vsel %vm12013_vm12, %v5130_v21, %v5415_v52  ;;  %v4658_v16 = vadd.f32 %v4657_v58, %v14186_v53  ;;  %v4669_v48 = vadd.f32 %v11171_v27, %v14199_v51  ;;  %v4661_v59 = vadd.f32 %v4660_v12, %v14202_v63  ;;  %v4673_v13 = vpop.f32.mrf.mxu0  ;;  %v14329_v58 = vpop.f32.mrf.mxu1  ;;  %v5419_v18 = vld [vmem:[#allocation3 + $0x38] sm:$0x1] }
 0x2bd   : > { %5417 = vst [vmem:[#allocation3 + $0x30] sm:$0xf] %v5416_v19  ;;  %v5113_v40 = vor.u32 %v5111_v36, %v14315_v55  ;;  %v5114_v34 = vrot.slane %v14315_v55, 4  ;;  %v5133_v61 = vshrl.u32 %v10174_v54, 16  ;;  %v5136_v22 = vshll.u32 %v10174_v54, 16 }
 0x2be   : > { %v4835_v33 = vmax.f32 %v4803_v46, 0.0  ;;  %v4808_v1 = vadd.f32 %v14222_v10, %v4769_v14  ;;  %v4767_v31 = vmul.f32 %v14193_v42, %v4658_v16  ;;  %v4770_v53 = vmul.f32 %v14193_v42, %v4669_v48  ;;  %v11175_v21 = vpop.f32.mrf.mxu0 }
 0x2bf   : > { %v5409_v51 = vsel %vm12013_vm12, %v5113_v40, %v5408_v0  ;;  %v5135_v63 = vrot.slane %v5133_v61, 7  ;;  %v4768_v27 = vmul.f32 %v14193_v42, %v4661_v59  ;;  %v4682_v56 = vadd.f32 %v11174_v62, %v14225_v4  ;;  %v14339_v4 = vpop.f32.mrf.mxu1  ;;  %v5412_v61 = vld [vmem:[#allocation3 + $0x2c] sm:$0x1] }
 0x2c0   : > { %5410 = vst [vmem:[#allocation3 + $0x24] sm:$0xf] %v5409_v51  ;;  %v10172_v12 = vpack.c.bf16 %v4835_v33, %v4835_v33  ;;  %v4840_v52 = vmax.f32 %v4808_v1, 0.0  ;;  %v4806_v36 = vadd.f32 %v14222_v10, %v4767_v31  ;;  %v4809_v45 = vadd.f32 %v14222_v10, %v4770_v53  ;;  %v4676_v53 = vpop.f32.mrf.mxu0 }
 0x2c1   : > { %v5138_v25 = vor.u32 %v5136_v22, %v5135_v63  ;;  %v5140_v30 = vrot.slane %v5135_v63, 4  ;;  %v4807_v17 = vadd.f32 %v14222_v10, %v4768_v27  ;;  %v4773_v3 = vmul.f32 %v14193_v42, %v4682_v56 }
 0x2c2   : > { %v5116_v35 = vshrl.u32 %v10172_v12, 16  ;;  %v5119_v55 = vshll.u32 %v10172_v12, 16  ;;  %v10177_v54 = vpack.c.bf16 %v4840_v52, %v4840_v52  ;;  %v4838_v46 = vmax.f32 %v4806_v36, 0.0  ;;  %v5429_v12 = vld [vmem:[#allocation3 + $0x48] sm:$0xf] }
 0x2c3   : > { %v5139_v62 = vsel %vm12005_vm11, %v5131_v24, %v5138_v25  ;;  %v5420_v14 = vsel %vm11978_vm3, %v5140_v30, %v5419_v18  ;;  %v4841_v19 = vmax.f32 %v4809_v45, 0.0  ;;  %v4839_v0 = vmax.f32 %v4807_v17, 0.0  ;;  %v11485_v24 = vld [vmem:[#allocation9 + $0x160] sm:$0xff]   ;;  %v14347_v18 = vpop.f32.mrf.mxu1 }
 0x2c4   : > { %5418 = vst [vmem:[#allocation3 + $0x34] sm:$0xf] %v5139_v62  ;;  %5421 = vst [vmem:[#allocation3 + $0x38] sm:$0x1] %v5420_v14  ;;  %v5118_v16 = vrot.slane %v5116_v35, 7  ;;  %v5159_v48 = vshrl.u32 %v10177_v54, 16  ;;  %v10175_v40 = vpack.c.bf16 %v4838_v46, %v4838_v46  ;;  %v4812_v1 = vadd.f32 %v14222_v10, %v4773_v3  ;;  %10902 = vmatprep.subr.bf16.mxu1 %v11485_v24  ;;  %v11178_v46 = vpop.f32.mrf.mxu0 }
 0x2c5   : > { %v5162_v59 = vshll.u32 %v10177_v54, 16  ;;  %v10178_v22 = vpack.c.bf16 %v4841_v19, %v4841_v19  ;;  %v10176_v33 = vpack.c.bf16 %v4839_v0, %v4839_v0  ;;  %v4674_v31 = vadd.f32 %v4673_v13, %v14205_v6  ;;  %v5422_v14 = vld [vmem:[#allocation3 + $0x3c] sm:$0xf]  ;;  %v5433_v19 = vld [vmem:[#allocation3 + $0x50] sm:$0x1] }
 0x2c6   : > { %v5121_v51 = vor.u32 %v5119_v55, %v5118_v16  ;;  %v5123_v63 = vrot.slane %v5118_v16, 4  ;;  %v5161_v27 = vrot.slane %v5159_v48, 7  ;;  %v5142_v56 = vshrl.u32 %v10175_v40, 16  ;;  %v10640_v48 = vpop.f32.mrf.mxu1  ;;  %v5426_v24 = vld [vmem:[#allocation3 + $0x44] sm:$0x1] }
 0x2c7   : > { %v5145_v52 = vshll.u32 %v10175_v40, 16  ;;  %v5167_v36 = vshrl.u32 %v10178_v22, 16  ;;  %v5170_v45 = vshll.u32 %v10178_v22, 16  ;;  %v5150_v25 = vshrl.u32 %v10176_v33, 16 }
 0x2c8   : > { %v5122_v30 = vsel %vm12005_vm11, %v5114_v34, %v5121_v51  ;;  %v5413_v6 = vsel %vm11978_vm3, %v5123_v63, %v5412_v61  ;;  %v5164_v13 = vor.u32 %v5162_v59, %v5161_v27  ;;  %v5165_v17 = vrot.slane %v5161_v27, 4 }
 0x2c9   : > { %5411 = vst [vmem:[#allocation3 + $0x28] sm:$0xf] %v5122_v30  ;;  %5414 = vst [vmem:[#allocation3 + $0x2c] sm:$0x1] %v5413_v6  ;;  %v5144_v3 = vrot.slane %v5142_v56, 7  ;;  %v5169_v35 = vrot.slane %v5167_v36, 7  ;;  %v4771_v34 = vmul.f32 %v14193_v42, %v4674_v31  ;;  %v4685_v16 = vadd.f32 %v11175_v21, %v14231_v50  ;;  %v4689_v31 = vpop.f32.mrf.mxu0  ;;  %v10642_v30 = vpop.f32.mrf.mxu1 }
 0x2ca   : > { %v5152_v55 = vrot.slane %v5150_v25, 7  ;;  %v5153_v54 = vshll.u32 %v10176_v33, 16  ;;  %v5430_v62 = vsel %vm12013_vm12, %v5164_v13, %v5429_v12  ;;  %v4844_v0 = vmax.f32 %v4812_v1, 0.0  ;;  %v11486_v12 = vld [vmem:[#allocation9 + $0x120] sm:$0xff]  }
 0x2cb   : > { %5431 = vst [vmem:[#allocation3 + $0x48] sm:$0xf] %v5430_v62  ;;  %v5147_v59 = vor.u32 %v5145_v52, %v5144_v3  ;;  %v5148_v40 = vrot.slane %v5144_v3, 4  ;;  %v5172_v61 = vor.u32 %v5170_v45, %v5169_v35  ;;  %v5174_v22 = vrot.slane %v5169_v35, 4  ;;  %10903 = vmatpush3.bf16.msra.mxu1 %v11486_v12  ;;  %v16737_v62 = vld [vmem:[#allocation48_spill] sm:$0xff] }
 0x2cc   : > { %v5155_v51 = vor.u32 %v5153_v54, %v5152_v55  ;;  %v5157_v33 = vrot.slane %v5152_v55, 4  ;;  %v10181_v63 = vpack.c.bf16 %v4844_v0, %v4844_v0  ;;  %v4810_v27 = vadd.f32 %v14222_v10, %v4771_v34 }
 0x2cd   : > { %v5423_v56 = vsel %vm12013_vm12, %v5147_v59, %v5422_v14  ;;  %v5173_v1 = vsel %vm12005_vm11, %v5165_v17, %v5172_v61  ;;  %v5434_v50 = vsel %vm11978_vm3, %v5174_v22, %v5433_v19  ;;  %v4774_v21 = vmul.f32 %v14193_v42, %v4685_v16  ;;  %v14383_v16 = vld [vmem:[#allocation3 + $0xc] sm:$0xf] }
 0x2ce   : > { %5424 = vst [vmem:[#allocation3 + $0x3c] sm:$0xf] %v5423_v56  ;;  %5432 = vst [vmem:[#allocation3 + $0x4c] sm:$0xf] %v5173_v1  ;;  %v5156_v52 = vsel %vm12005_vm11, %v5148_v40, %v5155_v51  ;;  %v5427_v36 = vsel %vm11978_vm3, %v5157_v33, %v5426_v24  ;;  %v5193_v45 = vshrl.u32 %v10181_v63, 16  ;;  %v14371_v25 = vadd.f32 %v14276_v49, %v14090_v5 }
 0x2cf   : > { %5435 = vst [vmem:[#allocation3 + $0x50] sm:$0x1] %v5434_v50  ;;  %5425 = vst [vmem:[#allocation3 + $0x40] sm:$0xf] %v5156_v52  ;;  %v4842_v6 = vmax.f32 %v4810_v27, 0.0  ;;  %v4813_v13 = vadd.f32 %v14222_v10, %v4774_v21  ;;  %v4677_v17 = vadd.f32 %v4676_v53, %v14213_v9  ;;  %v4698_v3 = vadd.f32 %v11178_v46, %v14253_v20  ;;  %v10643_v46 = vpop.f32.mrf.mxu1  ;;  %v11489_v50 = vld [vmem:[#allocation9 + $0x1f8] sm:$0xff]  }
 0x2d0   : > { %5428 = vst [vmem:[#allocation3 + $0x44] sm:$0x1] %v5427_v36  ;;  %v5195_v35 = vrot.slane %v5193_v45, 7  ;;  %v5196_v55 = vshll.u32 %v10181_v63, 16  ;;  %v4690_v54 = vadd.f32 %v4689_v31, %v14246_v39  ;;  %v14379_v14 = vadd.f32 %v14285_v11, %v16737_v62  ;;  %v5443_v5 = vld [vmem:[#allocation3 + $0x60] sm:$0xf]  ;;  %11008 = vmatprep.subr.bf16.mxu0 %v11489_v50 }
 0x2d1   : > { %v10179_v49 = vpack.c.bf16 %v4842_v6, %v4842_v6  ;;  %v4845_v19 = vmax.f32 %v4813_v13, 0.0  ;;  %v4772_v0 = vmul.f32 %v14193_v42, %v4677_v17  ;;  %v4777_v34 = vmul.f32 %v14193_v42, %v4698_v3  ;;  %v5436_v63 = vld [vmem:[#allocation3 + $0x54] sm:$0xf]  ;;  %v10645_v21 = vpop.f32.mrf.mxu1  ;;  %v5447_v6 = vld [vmem:[#allocation3 + $0x68] sm:$0x1] }
 0x2d2   : > { %v14387_v9 = vadd.f32 %v14313_v57, %v14299_v26  ;;  %v14391_v39 = vadd.f32 %v14339_v4, %v14329_v58  ;;  %v5198_v20 = vor.u32 %v5196_v55, %v5195_v35  ;;  %v4775_v11 = vmul.f32 %v14193_v42, %v4690_v54  ;;  %v11490_v50 = vld [vmem:[#allocation9 + $0x1b8] sm:$0xff]  }
 0x2d3   : > { %v14395_v53 = vadd.f32 %v10640_v48, %v14347_v18  ;;  %v5176_v59 = vshrl.u32 %v10179_v49, 16  ;;  %v10182_v40 = vpack.c.bf16 %v4845_v19, %v4845_v19  ;;  %v4811_v61 = vadd.f32 %v14222_v10, %v4772_v0  ;;  %v11179_v48 = vpop.f32.mrf.mxu0 }
 0x2d4   : > { %v5444_v22 = vsel %vm12013_vm12, %v5198_v20, %v5443_v5  ;;  %v4816_v26 = vadd.f32 %v14222_v10, %v4777_v34  ;;  %v4814_v57 = vadd.f32 %v14222_v10, %v4775_v11  ;;  %v6163_v58 = vshrl.u32 %v14383_v16, 16  ;;  %v14410_v34 = vld [vmem:[#allocation3 + $0x10] sm:$0xf]  ;;  %v10646_v20 = vpop.f32.mrf.mxu1 }
 0x2d5   : > { %5445 = vst [vmem:[#allocation3 + $0x60] sm:$0xf] %v5444_v22  ;;  %v5178_v4 = vrot.slane %v5176_v59, 7  ;;  %v5179_v24 = vshll.u32 %v10179_v49, 16  ;;  %v5201_v51 = vshrl.u32 %v10182_v40, 16  ;;  %v4843_v18 = vmax.f32 %v4811_v61, 0.0  ;;  %v4692_v5 = vpop.f32.mrf.mxu0 }
 0x2d6   : > { %v14403_v33 = vadd.f32 %v10643_v46, %v10642_v30  ;;  %v4848_v27 = vmax.f32 %v4816_v26, 0.0  ;;  %v4846_v56 = vmax.f32 %v4814_v57, 0.0  ;;  %v6166_v1 = vshll.u32 %v14383_v16, 16  ;;  %v11493_v61 = vld [vmem:[#allocation9 + $0x158] sm:$0xff]   ;;  %v5440_v22 = vld [vmem:[#allocation3 + $0x5c] sm:$0x1] }
 0x2d7   : > { %v5181_v31 = vor.u32 %v5179_v24, %v5178_v4  ;;  %v5203_v12 = vrot.slane %v5201_v51, 7  ;;  %v5204_v52 = vshll.u32 %v10182_v40, 16  ;;  %v10180_v36 = vpack.c.bf16 %v4843_v18, %v4843_v18  ;;  %v5457_v18 = vld [vmem:[#allocation3 + $0x78] sm:$0xf]  ;;  %10904 = vmatprep.subr.bf16.mxu1 %v11493_v61 }
 0x2d8   : > { %v5199_v45 = vrot.slane %v5195_v35, 4  ;;  %v10185_v13 = vpack.c.bf16 %v4848_v27, %v4848_v27  ;;  %v10183_v17 = vpack.c.bf16 %v4846_v56, %v4846_v56  ;;  %v14406_v3 = vrot.slane %v6163_v58, 4 }
 0x2d9   : > { %v5437_v30 = vsel %vm12013_vm12, %v5181_v31, %v5436_v63  ;;  %v5206_v55 = vor.u32 %v5204_v52, %v5203_v12  ;;  %v5208_v54 = vrot.slane %v5203_v12, 4  ;;  %v5184_v62 = vshrl.u32 %v10180_v36, 16  ;;  %v5450_v63 = vld [vmem:[#allocation3 + $0x6c] sm:$0xf] }
 0x2da   : > { %v5182_v49 = vrot.slane %v5178_v4, 4  ;;  %5438 = vst [vmem:[#allocation3 + $0x54] sm:$0xf] %v5437_v30  ;;  %v5227_v19 = vshrl.u32 %v10185_v13, 16  ;;  %v5210_v0 = vshrl.u32 %v10183_v17, 16  ;;  %v6168_v35 = vrot.slane %v6166_v1, 5  ;;  %v11182_v1 = vpop.f32.mrf.mxu0 }
 0x2db   : > { %v5207_v11 = vsel %vm12005_vm11, %v5199_v45, %v5206_v55  ;;  %v5448_v46 = vsel %vm11978_vm3, %v5208_v54, %v5447_v6  ;;  %v5186_v59 = vrot.slane %v5184_v62, 7  ;;  %v5187_v40 = vshll.u32 %v10180_v36, 16  ;;  %v16739_v30 = vld [vmem:[#allocation29_spill] sm:$0xff] }
 0x2dc   : > { %5446 = vst [vmem:[#allocation3 + $0x64] sm:$0xf] %v5207_v11  ;;  %5449 = vst [vmem:[#allocation3 + $0x68] sm:$0x1] %v5448_v46  ;;  %v14416_v26 = vrot.slane %v5227_v19, 7  ;;  %v5230_v57 = vshll.u32 %v10185_v13, 16  ;;  %v9991_v27 = vcombine.low %v14383_v16, %v14410_v34  ;;  %v4701_v56 = vadd.f32 %v11179_v48, %v14262_v2 }
 0x2dd   : > { %v14418_v58 = vrot.slane %v5210_v0, 7  ;;  %v5213_v4 = vshll.u32 %v10183_v17, 16  ;;  %v5189_v24 = vor.u32 %v5187_v40, %v5186_v59  ;;  %v5191_v51 = vrot.slane %v5186_v59, 4  ;;  %v14432_v48 = vld [vmem:[#allocation3 + $0x1c] sm:$0xf]  ;;  %v4705_v0 = vpop.f32.mrf.mxu0 }
 0x2de   : > { %v10647_v31 = vadd.f32 %v10646_v20, %v10645_v21  ;;  %v5232_v12 = vor.u32 %v5230_v57, %v14416_v26  ;;  %v6169_v36 = vor.u32 %v6168_v35, %v14406_v3  ;;  %v6172_v16 = vshll.u32 %v14410_v34, 16  ;;  %8724 = vmatprep.mubr.bf16.mxu0 %v9991_v27  ;;  %v11494_v21 = vld [vmem:[#allocation9 + $0x118] sm:$0xff]   ;;  %v16738_v3 = vld [vmem:[#allocation31_spill] sm:$0xff]  ;;  %v14450_v19 = vld [vmem:[#allocation3 + $0x18] sm:$0xf] }
 0x2df   : > { %v5215_v52 = vor.u32 %v5213_v4, %v14418_v58  ;;  %v5190_v45 = vsel %vm12005_vm11, %v5182_v49, %v5189_v24  ;;  %v5441_v6 = vsel %vm11978_vm3, %v5191_v51, %v5440_v22  ;;  %v4778_v2 = vmul.f32 %v14193_v42, %v4701_v56  ;;  %v16741_v20 = vld [vmem:[#allocation24_spill] sm:$0xff]  ;;  %10905 = vmatpush3.bf16.msra.mxu1 %v11494_v21  ;;  %v14466_v46 = vld [vmem:[#allocation3 + $0x10] sm:$0xf] }
 0x2e0   : > { %5439 = vst [vmem:[#allocation3 + $0x58] sm:$0xf] %v5190_v45  ;;  %5442 = vst [vmem:[#allocation3 + $0x5c] sm:$0x1] %v5441_v6  ;;  %v5458_v13 = vsel %vm12013_vm12, %v5232_v12, %v5457_v18  ;;  %v16740_v55 = vcombine.low %v16738_v3, %v16739_v30  ;;  %v14443_v54 = vadd.f32 %v14387_v9, %v14104_v43  ;;  %v6176_v43 = vshrl.u32 %v14410_v34, 16  ;;  %v11498_v30 = vld [vmem:[#allocation9 + $0x1b0] sm:$0xff]  }
 0x2e1   : > { %v5451_v17 = vsel %vm12013_vm12, %v5215_v52, %v5450_v63  ;;  %v14447_v62 = vadd.f32 %v14391_v39, %v14109_v60  ;;  %5459 = vst [vmem:[#allocation3 + $0x78] sm:$0xf] %v5458_v13  ;;  %v4817_v49 = vadd.f32 %v14222_v10, %v4778_v2  ;;  %v14454_v35 = vadd.f32 %v14403_v33, %v14166_v29  ;;  %v14464_v39 = vld [vmem:[#allocation3 + $0xc] sm:$0xf]  ;;  %v14491_v12 = vld [vmem:[#allocation3 + $0x14] sm:$0x1] }
 0x2e2   : > { %8725 = vmatmul.mubr.bf16.vlgmr.msra.gmra.mxu0 %v16740_v55  ;;  %5452 = vst [vmem:[#allocation3 + $0x6c] sm:$0xf] %v5451_v17  ;;  %v14458_v11 = vadd.f32 %v14395_v53, %v16741_v20  ;;  %v9992_v60 = vcombine.low %v14450_v19, %v14432_v48  ;;  %v4693_v9 = vadd.f32 %v4692_v5, %v14256_v28  ;;  %v5233_v33 = vrot.slane %v14416_v26, 4  ;;  %v5461_v2 = vld [vmem:[#allocation3 + $0x80] sm:$0x1] }
 0x2e3   : > { %11009 = vmatpush3.bf16.msra.mxu0 %v11490_v50  ;;  %v14469_v29 = vadd.f32 %v10647_v31, %v14210_v8  ;;  %v14472_v53 = vrot.slane %v6169_v36, 4  ;;  %v14474_v59 = vrot.slane %v6172_v16, 5  ;;  %v4849_v40 = vmax.f32 %v4817_v49, 0.0  ;;  %v11497_v16 = vld [vmem:[#allocation9 + $0x1f0] sm:$0xff]  }
 0x2e4   : > { %v5216_v34 = vrot.slane %v14418_v58, 4  ;;  %8732 = vmatprep.mubr.bf16.mxu0 %v9992_v60  ;;  %v4776_v61 = vmul.f32 %v14193_v42, %v4693_v9  ;;  %v4714_v28 = vadd.f32 %v11182_v1, %v14265_v38  ;;  %v4706_v5 = vadd.f32 %v4705_v0, %v14268_v32  ;;  %11010 = vmatprep.subr.bf16.mxu0 %v11497_v16  ;;  %v5471_v16 = vld [vmem:[#allocation3 + $0x90] sm:$0xf] }
 0x2e5   : > { %v10186_v22 = vpack.c.bf16 %v4849_v40, %v4849_v40  ;;  %v5579_v8 = vshrl.u32 %v14464_v39, 16  ;;  %v5582_v57 = vshll.u32 %v14464_v39, 16  ;;  %v5588_v26 = vshll.u32 %v14466_v46, 16 }
 0x2e6   : > { %v14483_v4 = vrot.slane %v6176_v43, 4  ;;  %v4815_v24 = vadd.f32 %v14222_v10, %v4776_v61  ;;  %v4781_v51 = vmul.f32 %v14193_v42, %v4714_v28  ;;  %v4779_v18 = vmul.f32 %v14193_v42, %v4706_v5  ;;  %v11501_v43 = vld [vmem:[#allocation9 + $0x150] sm:$0xff]   ;;  %v11183_v28 = vpop.f32.mrf.mxu0 }
 0x2e7   : > { %v5235_v63 = vshrl.u32 %v10186_v22, 16  ;;  %v6187_v38 = vshrl.u32 %v14450_v19, 16  ;;  %v5581_v27 = vrot.slane %v5579_v8, 4  ;;  %v5584_v32 = vrot.slane %v5582_v57, 5  ;;  %11011 = vmatpush3.bf16.msra.mxu0 %v11498_v30  ;;  %10906 = vmatprep.subr.bf16.mxu1 %v11501_v43  ;;  %v5464_v43 = vld [vmem:[#allocation3 + $0x84] sm:$0xf] }
 0x2e8   : > { %v5238_v56 = vshll.u32 %v10186_v22, 16  ;;  %v4847_v1 = vmax.f32 %v4815_v24, 0.0  ;;  %v4820_v50 = vadd.f32 %v14222_v10, %v4781_v51  ;;  %v4818_v31 = vadd.f32 %v14222_v10, %v4779_v18 }
 0x2e9   : > { %v5237_v52 = vrot.slane %v5235_v63, 7  ;;  %v5585_v36 = vor.u32 %v5584_v32, %v5581_v27  ;;  %v5590_v45 = vrot.slane %v5588_v26, 5  ;;  %v5592_v6 = vshrl.u32 %v14466_v46, 16  ;;  %v5454_v27 = vld [vmem:[#allocation3 + $0x74] sm:$0x1] }
 0x2ea   : > { %v6190_v21 = vshll.u32 %v14450_v19, 16  ;;  %v10184_v13 = vpack.c.bf16 %v4847_v1, %v4847_v1  ;;  %v4852_v17 = vmax.f32 %v4820_v50, 0.0  ;;  %v4850_v3 = vmax.f32 %v4818_v31, 0.0 }
 0x2eb   : > { %v5240_v55 = vor.u32 %v5238_v56, %v5237_v52  ;;  %v5242_v49 = vrot.slane %v5237_v52, 4  ;;  %v5594_v0 = vrot.slane %v5592_v6, 4  ;;  %v5598_v20 = vshll.u32 %v14491_v12, 16  ;;  %v14507_v6 = vpop.f32.mrf.mxu0 }
 0x2ec   : > { %v6179_v60 = vor.u32 %v14483_v4, %v14474_v59  ;;  %v5218_v9 = vshrl.u32 %v10184_v13, 16  ;;  %v10189_v40 = vpack.c.bf16 %v4852_v17, %v4852_v17  ;;  %v10187_v61 = vpack.c.bf16 %v4850_v3, %v4850_v3 }
 0x2ed   : > { %v5241_v5 = vsel %vm12005_vm11, %v5233_v33, %v5240_v55  ;;  %v5462_v22 = vsel %vm11978_vm3, %v5242_v49, %v5461_v2  ;;  %v5586_v8 = vrot.slane %v5585_v36, 4  ;;  %v5595_v57 = vor.u32 %v5594_v0, %v5590_v45  ;;  %v5939_v36 = vld [vmem:[#allocation3 + $0xc] sm:$0xe] }
 0x2ee   : > { %5460 = vst [vmem:[#allocation3 + $0x7c] sm:$0xf] %v5241_v5  ;;  %5463 = vst [vmem:[#allocation3 + $0x80] sm:$0x1] %v5462_v22  ;;  %v5220_v26 = vrot.slane %v5218_v9, 7  ;;  %v5221_v24 = vshll.u32 %v10184_v13, 16  ;;  %v4717_v30 = vadd.f32 %v11183_v28, %v14280_v15  ;;  %v9944_v22 = vcombine.low %v14464_v39, %v14466_v46 }
 0x2ef   : > { %v5261_v51 = vshrl.u32 %v10189_v40, 16  ;;  %v5244_v18 = vshrl.u32 %v10187_v61, 16  ;;  %v6196_v63 = vshll.u32 %v14432_v48, 16  ;;  %v5264_v32 = vshll.u32 %v10189_v40, 16  ;;  %v11502_v55 = vld [vmem:[#allocation9 + $0x110] sm:$0xff]  }
 0x2f0   : > { %v5596_v56 = vrot.slane %v5595_v57, 4  ;;  %v5600_v1 = vrot.slane %v5598_v20, 5  ;;  %v5223_v50 = vor.u32 %v5221_v24, %v5220_v26  ;;  %v5225_v33 = vrot.slane %v5220_v26, 4  ;;  %10907 = vmatpush3.bf16.msra.mxu1 %v11502_v55  ;;  %v14529_v57 = vld [vmem:[#allocation3 + $0x28] sm:$0xf] }
 0x2f1   : > { %v14503_v31 = vrot.slane %v5261_v51, 7  ;;  %v14505_v52 = vrot.slane %v5244_v18, 7  ;;  %v5247_v2 = vshll.u32 %v10187_v61, 16  ;;  %v6011_v3 = vrot.slane %v14466_v46, 5  ;;  %v14545_v46 = vld [vmem:[#allocation3 + $0x18] sm:$0xf] }
 0x2f2   : > { %v5601_v17 = vsel %vm12037_vm14, %v5596_v56, %v5600_v1  ;;  %v5224_v49 = vsel %vm12005_vm11, %v5216_v34, %v5223_v50  ;;  %v5455_v0 = vsel %vm11978_vm3, %v5225_v33, %v5454_v27  ;;  %v5591_v9 = vsel %vm12037_vm14, %v5586_v8, %v5590_v45  ;;  %v11186_v45 = vpop.f32.mrf.mxu0  ;;  %v14547_v24 = vld [vmem:[#allocation3 + $0x1c] sm:$0xf]  ;;  %v14555_v27 = vld [vmem:[#allocation3 + $0x24] sm:$0xf]  ;;  %v11617_v13 = vld [vmem:[#allocation3 + $0x58] sm:$0xf] }
 0x2f3   : > { %v5266_v20 = vor.u32 %v5264_v32, %v14503_v31  ;;  %5453 = vst [vmem:[#allocation3 + $0x70] sm:$0xf] %v5224_v49  ;;  %5456 = vst [vmem:[#allocation3 + $0x74] sm:$0x1] %v5455_v0  ;;  %v5249_v40 = vor.u32 %v5247_v2, %v14505_v52  ;;  %v6014_v15 = vrot.slane %v14491_v12, 5  ;;  %v9960_v61 = vcombine.low %v5591_v9, %v5601_v17 }
 0x2f4   : > { %v9896_v58 = vrot.slane %v5939_v36, 9  ;;  %v6013_v28 = vrot.slane %v6011_v3, 4  ;;  %v4782_v5 = vmul.f32 %v14193_v42, %v4717_v30  ;;  %v14537_v8 = vrot.slane %v6187_v38, 4  ;;  %v14557_v32 = vld [vmem:[#allocation3 + $0x20] sm:$0x1] }
 0x2f5   : > { %v5472_v34 = vsel %vm12013_vm12, %v5266_v20, %v5471_v16  ;;  %v14541_v26 = vrot.slane %v6190_v21, 5  ;;  %v5465_v39 = vsel %vm12013_vm12, %v5249_v40, %v5464_v43  ;;  %8571 = vmatprep.mubr.bf16.mxu1 %v9960_v61  ;;  %v6200_v51 = vshrl.u32 %v14432_v48, 16  ;;  %v11505_v43 = vld [vmem:[#allocation9 + $0x1e8] sm:$0xff]  }
 0x2f6   : > { %5473 = vst [vmem:[#allocation3 + $0x90] sm:$0xf] %v5472_v34  ;;  %5466 = vst [vmem:[#allocation3 + $0x84] sm:$0xf] %v5465_v39  ;;  %v6012_v38 = vsel %vm12031_vm13, %v9896_v58, %v6011_v3  ;;  %v6015_v19 = vsel %vm12031_vm13, %v6013_v28, %v6014_v15  ;;  %v4821_v21 = vadd.f32 %v14222_v10, %v4782_v5  ;;  %8572 = vmatmul.mubr.bf16.gmra.mxu1 %v9944_v22  ;;  %v4721_v3 = vpop.f32.mrf.mxu0  ;;  %v14651_v48 = vld [vmem:[#allocation3 + $0x24] sm:$0xf] }
 0x2f7   : > { %v14562_v56 = vrot.slane %v6179_v60, 4  ;;  %v14564_v1 = vrot.slane %v6196_v63, 5  ;;  %v9976_v50 = vcombine.low %v6012_v38, %v6015_v19  ;;  %v9993_v33 = vcombine.low %v14555_v27, %v14529_v57  ;;  %11012 = vmatprep.subr.bf16.mxu0 %v11505_v43 }
 0x2f8   : > { %v4853_v36 = vmax.f32 %v4821_v21, 0.0  ;;  %v5603_v16 = vshrl.u32 %v14545_v46, 16  ;;  %v5606_v2 = vshll.u32 %v14545_v46, 16  ;;  %v5612_v17 = vshll.u32 %v14547_v24, 16  ;;  %v11187_v22 = vpop.f32.mrf.mxu0 }
 0x2f9   : > { %v6193_v30 = vor.u32 %v14541_v26, %v14537_v8  ;;  %v5267_v4 = vrot.slane %v14503_v31, 4  ;;  %8733 = vmatmul.mubr.bf16.gmra.mxu0 %v9976_v50  ;;  %v5616_v60 = vshrl.u32 %v14547_v24, 16  ;;  %v5622_v63 = vshll.u32 %v14557_v32, 16  ;;  %v11506_v31 = vld [vmem:[#allocation9 + $0x1a8] sm:$0xff]   ;;  %v5940_v50 = vld [vmem:[#allocation3 + $0x18] sm:$0xe] }
 0x2fa   : > { %v10190_v55 = vpack.c.bf16 %v4853_v36, %v4853_v36  ;;  %8740 = vmatprep.mubr.bf16.mxu0 %v9993_v33  ;;  %v5605_v49 = vrot.slane %v5603_v16, 4  ;;  %v5608_v0 = vrot.slane %v5606_v2, 5  ;;  %v5614_v20 = vrot.slane %v5612_v17, 5  ;;  %11013 = vmatpush3.bf16.msra.mxu0 %v11506_v31 }
 0x2fb   : > { %v6211_v9 = vshrl.u32 %v14555_v27, 16  ;;  %v5618_v40 = vrot.slane %v5616_v60, 4  ;;  %v6021_v15 = vrot.slane %v14557_v32, 5  ;;  %v4709_v61 = vadd.f32 %v14507_v6, %v14271_v44  ;;  %v11509_v32 = vld [vmem:[#allocation9 + $0x148] sm:$0xff]   ;;  %v14586_v44 = vld [vmem:[%s16410_s2] ss:$0 sm:$0xff] }
 0x2fc   : > { %v5269_v58 = vshrl.u32 %v10190_v55, 16  ;;  %v5609_v34 = vor.u32 %v5608_v0, %v5605_v49  ;;  %v5624_v28 = vrot.slane %v5622_v63, 5  ;;  %v4730_v5 = vadd.f32 %v11186_v45, %v14379_v14  ;;  %v5475_v45 = vld [vmem:[#allocation3 + $0x98] sm:$0x1]  ;;  %10908 = vmatprep.subr.bf16.mxu1 %v11509_v32  ;;  %v14596_v60 = vld [vmem:[%s16411_s3] ss:$0 sm:$0xff] }
 0x2fd   : > { %v5272_v39 = vshll.u32 %v10190_v55, 16  ;;  %v5619_v38 = vor.u32 %v5618_v40, %v5614_v20  ;;  %v4780_v19 = vmul.f32 %v14193_v42, %v4709_v61  ;;  %v4722_v21 = vadd.f32 %v4721_v3, %v14283_v37 }
 0x2fe   : > { %v5271_v33 = vrot.slane %v5269_v58, 7  ;;  %v5610_v36 = vrot.slane %v5609_v34, 4  ;;  %v4785_v14 = vmul.f32 %v14586_v44, %v4730_v5  ;;  %v6018_v6 = vrot.slane %v14547_v24, 5 }
 0x2ff   : > { %v5620_v16 = vrot.slane %v5619_v38, 4  ;;  %v4819_v42 = vadd.f32 %v14222_v10, %v4780_v19  ;;  %v4783_v37 = vmul.f32 %v14586_v44, %v4722_v21  ;;  %v4733_v2 = vadd.f32 %v11187_v22, %v14443_v54  ;;  %v11510_v22 = vld [vmem:[#allocation9 + $0x108] sm:$0xff]  }
 0x300   : > { %v5274_v17 = vor.u32 %v5272_v39, %v5271_v33  ;;  %v5276_v3 = vrot.slane %v5271_v33, 4  ;;  %v4824_v63 = vadd.f32 %v14596_v60, %v4785_v14  ;;  %v9897_v55 = vrot.slane %v5940_v50, 9  ;;  %v14617_v33 = vpop.f32.mrf.mxu0  ;;  %10909 = vmatpush3.bf16.msra.mxu1 %v11510_v22 }
 0x301   : > { %v5615_v49 = vsel %vm12037_vm14, %v5610_v36, %v5614_v20  ;;  %v5625_v10 = vsel %vm12037_vm14, %v5620_v16, %v5624_v28  ;;  %v4851_v0 = vmax.f32 %v4819_v42, 0.0  ;;  %v4822_v54 = vadd.f32 %v14596_v60, %v4783_v37 }
 0x302   : > { %v5275_v43 = vsel %vm12005_vm11, %v5267_v4, %v5274_v17  ;;  %v5476_v40 = vsel %vm11978_vm3, %v5276_v3, %v5475_v45  ;;  %v9961_v61 = vcombine.low %v5615_v49, %v5625_v10  ;;  %v4856_v31 = vmax.f32 %v4824_v63, 0.0  ;;  %v5485_v17 = vld [vmem:[#allocation3 + $0xa8] sm:$0xf] }
 0x303   : > { %5474 = vst [vmem:[#allocation3 + $0x94] sm:$0xf] %v5275_v43  ;;  %5477 = vst [vmem:[#allocation3 + $0x98] sm:$0x1] %v5476_v40  ;;  %v10188_v58 = vpack.c.bf16 %v4851_v0, %v4851_v0  ;;  %v4854_v34 = vmax.f32 %v4822_v54, 0.0  ;;  %v6020_v5 = vrot.slane %v6018_v6, 4  ;;  %v4786_v20 = vmul.f32 %v14586_v44, %v4733_v2 }
 0x304   : > { %v5250_v28 = vrot.slane %v14505_v52, 4  ;;  %v6214_v39 = vshll.u32 %v14555_v27, 16  ;;  %8579 = vmatprep.mubr.bf16.mxu1 %v9961_v61  ;;  %v10193_v38 = vpack.c.bf16 %v4856_v31, %v4856_v31  ;;  %v9945_v4 = vcombine.low %v14545_v46, %v14547_v24  ;;  %v5478_v27 = vld [vmem:[#allocation3 + $0x9c] sm:$0xf]  ;;  %v14641_v61 = vld [vmem:[#allocation3 + $0x30] sm:$0xf] }
 0x305   : > { %v5252_v19 = vshrl.u32 %v10188_v58, 16  ;;  %v10191_v21 = vpack.c.bf16 %v4854_v34, %v4854_v34  ;;  %v6019_v50 = vsel %vm12031_vm13, %v9897_v55, %v6018_v6  ;;  %v6022_v32 = vsel %vm12031_vm13, %v6020_v5, %v6021_v15  ;;  %v5468_v6 = vld [vmem:[#allocation3 + $0x8c] sm:$0x1]  ;;  %v14643_v31 = vld [vmem:[#allocation3 + $0x34] sm:$0xf] }
 0x306   : > { %v6220_v52 = vshll.u32 %v14529_v57, 16  ;;  %v5295_v36 = vshrl.u32 %v10193_v38, 16  ;;  %v9977_v14 = vcombine.low %v6019_v50, %v6022_v32  ;;  %v4825_v45 = vadd.f32 %v14596_v60, %v4786_v20  ;;  %8580 = vmatmul.mubr.bf16.gmra.mxu1 %v9945_v4 }
 0x307   : > { %v14623_v46 = vrot.slane %v6211_v9, 4  ;;  %v5254_v24 = vrot.slane %v5252_v19, 7  ;;  %v5255_v16 = vshll.u32 %v10188_v58, 16  ;;  %v5278_v42 = vshrl.u32 %v10191_v21, 16  ;;  %v11190_v9 = vpop.f32.mrf.mxu0 }
 0x308   : > { %v14625_v37 = vrot.slane %v6214_v39, 5  ;;  %v14627_v15 = vrot.slane %v5295_v36, 7  ;;  %v5298_v2 = vshll.u32 %v10193_v38, 16  ;;  %8741 = vmatmul.mubr.bf16.gmra.mxu0 %v9977_v14  ;;  %v4857_v3 = vmax.f32 %v4825_v45, 0.0  ;;  %v11514_v39 = vld [vmem:[#allocation9 + $0x1a0] sm:$0xff]   ;;  %v11515_v38 = vld [vmem:[#allocation9 + $0x1d8] sm:$0xff]  }
 0x309   : > { %v5257_v63 = vor.u32 %v5255_v16, %v5254_v24  ;;  %v5259_v55 = vrot.slane %v5254_v24, 4  ;;  %v14629_v49 = vrot.slane %v5278_v42, 7  ;;  %v5281_v10 = vshll.u32 %v10191_v21, 16  ;;  %v4737_v32 = vpop.f32.mrf.mxu0  ;;  %v5541_v14 = vld [vmem:[#allocation3 + $0x2c] sm:$0x1] }
 0x30a   : > { %v14634_v0 = vrot.slane %v6193_v30, 4  ;;  %v14638_v54 = vrot.slane %v6200_v51, 4  ;;  %v5300_v43 = vor.u32 %v5298_v2, %v14627_v15  ;;  %v10194_v40 = vpack.c.bf16 %v4857_v3, %v4857_v3  ;;  %v14653_v51 = vld [vmem:[#allocation3 + $0x28] sm:$0xf]  ;;  %v5489_v42 = vld [vmem:[#allocation3 + $0xb0] sm:$0x1] }
 0x30b   : > { %v6224_v58 = vshrl.u32 %v14529_v57, 16  ;;  %v5258_v34 = vsel %vm12005_vm11, %v5250_v28, %v5257_v63  ;;  %v5469_v8 = vsel %vm11978_vm3, %v5259_v55, %v5468_v6  ;;  %v5283_v26 = vor.u32 %v5281_v10, %v14629_v49  ;;  %v11513_v28 = vld [vmem:[#allocation9 + $0x1e0] sm:$0xff]   ;;  %v11519_v63 = vld [vmem:[#allocation9 + $0x198] sm:$0xff]  }
 0x30c   : > { %v6217_v30 = vor.u32 %v14625_v37, %v14623_v46  ;;  %v14657_v5 = vrot.slane %v6220_v52, 5  ;;  %5467 = vst [vmem:[#allocation3 + $0x88] sm:$0xf] %v5258_v34  ;;  %5470 = vst [vmem:[#allocation3 + $0x8c] sm:$0x1] %v5469_v8  ;;  %v5486_v20 = vsel %vm12013_vm12, %v5300_v43, %v5485_v17  ;;  %v5303_v22 = vshrl.u32 %v10194_v40, 16  ;;  %11014 = vmatprep.subr.bf16.mxu0 %v11513_v28 }
 0x30d   : > { %5487 = vst [vmem:[#allocation3 + $0xa8] sm:$0xf] %v5486_v20  ;;  %v5479_v4 = vsel %vm12013_vm12, %v5283_v26, %v5478_v27  ;;  %v5306_v19 = vshll.u32 %v10194_v40, 16  ;;  %v6235_v21 = vshrl.u32 %v14641_v61, 16  ;;  %v9994_v50 = vcombine.low %v14641_v61, %v14643_v31  ;;  %v11518_v52 = vld [vmem:[#allocation9 + $0x140] sm:$0xff]   ;;  %11015 = vmatpush3.bf16.msra.mxu0 %v11514_v39  ;;  %v11191_v26 = vpop.f32.mrf.mxu0 }
 0x30e   : > { %5480 = vst [vmem:[#allocation3 + $0x9c] sm:$0xf] %v5479_v4  ;;  %v5305_v36 = vrot.slane %v5303_v22, 7  ;;  %v5627_v45 = vshrl.u32 %v14651_v48, 16  ;;  %v5630_v24 = vshll.u32 %v14651_v48, 16  ;;  %v5636_v16 = vshll.u32 %v14653_v51, 16  ;;  %11016 = vmatprep.subr.bf16.mxu0 %v11515_v38  ;;  %10910 = vmatprep.subr.bf16.mxu1 %v11518_v52 }
 0x30f   : > { %v5301_v6 = vrot.slane %v14627_v15, 4  ;;  %v6238_v2 = vshll.u32 %v14641_v61, 16  ;;  %8748 = vmatprep.mubr.bf16.mxu0 %v9994_v50  ;;  %v5640_v17 = vshrl.u32 %v14653_v51, 16  ;;  %v4725_v3 = vadd.f32 %v14617_v33, %v14371_v25  ;;  %v11527_v46 = vld [vmem:[#allocation9 + $0x1c0] sm:$0xff]  }
 0x310   : > { %v5308_v55 = vor.u32 %v5306_v19, %v5305_v36  ;;  %v5310_v10 = vrot.slane %v5305_v36, 4  ;;  %v5629_v27 = vrot.slane %v5627_v45, 4  ;;  %v5632_v43 = vrot.slane %v5630_v24, 5  ;;  %v5941_v19 = vld [vmem:[#allocation3 + $0x24] sm:$0xe] }
 0x311   : > { %v5638_v40 = vrot.slane %v5636_v16, 5  ;;  %v5642_v34 = vrot.slane %v5640_v17, 4  ;;  %v5646_v15 = vshll.u32 %v5541_v14, 16  ;;  %v4784_v8 = vmul.f32 %v14586_v44, %v4725_v3  ;;  %11017 = vmatpush3.bf16.msra.mxu0 %v11519_v63 }
 0x312   : > { %v5309_v20 = vsel %vm12005_vm11, %v5301_v6, %v5308_v55  ;;  %v5490_v25 = vsel %vm11978_vm3, %v5310_v10, %v5489_v42  ;;  %v5633_v33 = vor.u32 %v5632_v43, %v5629_v27  ;;  %v4746_v22 = vadd.f32 %v11190_v9, %v14454_v35  ;;  %v11520_v42 = vld [vmem:[#allocation9 + $0x100] sm:$0xff]   ;;  %v11521_v55 = vld [vmem:[#allocation9 + $0x1d0] sm:$0xff]  }
 0x313   : > { %5488 = vst [vmem:[#allocation3 + $0xac] sm:$0xf] %v5309_v20  ;;  %5491 = vst [vmem:[#allocation3 + $0xb0] sm:$0x1] %v5490_v25  ;;  %v5643_v28 = vor.u32 %v5642_v34, %v5638_v40  ;;  %v6028_v39 = vrot.slane %v5541_v14, 5  ;;  %v4823_v38 = vadd.f32 %v14596_v60, %v4784_v8  ;;  %v4738_v4 = vadd.f32 %v4737_v32, %v14447_v62  ;;  %v11522_v10 = vld [vmem:[#allocation9 + $0x190] sm:$0xff]  }
 0x314   : > { %v5634_v50 = vrot.slane %v5633_v33, 4  ;;  %v4789_v52 = vmul.f32 %v14586_v44, %v4746_v22  ;;  %v6025_v36 = vrot.slane %v14653_v51, 5  ;;  %v4749_v45 = vadd.f32 %v11191_v26, %v14469_v29  ;;  %10911 = vmatpush3.bf16.msra.mxu1 %v11520_v42  ;;  %11018 = vmatprep.subr.bf16.mxu0 %v11521_v55 }
 0x315   : > { %v5644_v24 = vrot.slane %v5643_v28, 4  ;;  %v5648_v16 = vrot.slane %v5646_v15, 5  ;;  %v4855_v35 = vmax.f32 %v4823_v38, 0.0  ;;  %v4787_v9 = vmul.f32 %v14586_v44, %v4738_v4  ;;  %v11523_v15 = vld [vmem:[#allocation9 + $0x1c8] sm:$0xff]   ;;  %11019 = vmatpush3.bf16.msra.mxu0 %v11522_v10 }
 0x316   : > { %v5639_v14 = vsel %vm12037_vm14, %v5634_v50, %v5638_v40  ;;  %v4828_v6 = vadd.f32 %v14596_v60, %v4789_v52  ;;  %v9898_v62 = vrot.slane %v5941_v19, 9  ;;  %v6027_v32 = vrot.slane %v6025_v36, 4  ;;  %v11525_v38 = vld [vmem:[#allocation9 + $0x188] sm:$0xff]   ;;  %11020 = vmatprep.subr.bf16.mxu0 %v11523_v15 }
 0x317   : > { %v5649_v17 = vsel %vm12037_vm14, %v5644_v24, %v5648_v16  ;;  %v10192_v3 = vpack.c.bf16 %v4855_v35, %v4855_v35  ;;  %v4826_v63 = vadd.f32 %v14596_v60, %v4787_v9  ;;  %v4790_v29 = vmul.f32 %v14586_v44, %v4749_v45  ;;  %v5499_v45 = vld [vmem:[#allocation3 + $0xc0] sm:$0xf]  ;;  %v14717_v16 = vld [vmem:[#allocation3 + $0x3c] sm:$0xf] }
 0x318   : > { %v9962_v27 = vcombine.low %v5639_v14, %v5649_v17  ;;  %v4860_v43 = vmax.f32 %v4828_v6, 0.0  ;;  %v6026_v40 = vsel %vm12031_vm13, %v9898_v62, %v6025_v36  ;;  %v6029_v34 = vsel %vm12031_vm13, %v6027_v32, %v6028_v39  ;;  %v11528_v6 = vld [vmem:[#allocation9 + $0x180] sm:$0xff]   ;;  %v5492_v17 = vld [vmem:[#allocation3 + $0xb4] sm:$0xf] }
 0x319   : > { %v5286_v8 = vshrl.u32 %v10192_v3, 16  ;;  %v4858_v26 = vmax.f32 %v4826_v63, 0.0  ;;  %v9978_v20 = vcombine.low %v6026_v40, %v6029_v34  ;;  %v9946_v25 = vcombine.low %v14651_v48, %v14653_v51  ;;  %11021 = vmatpush3.bf16.msra.mxu0 %v11525_v38  ;;  %v5503_v38 = vld [vmem:[#allocation3 + $0xc8] sm:$0x1] }
 0x31a   : > { %v14702_v33 = vrot.slane %v6217_v30, 4  ;;  %v14706_v22 = vrot.slane %v6224_v58, 4  ;;  %8587 = vmatprep.mubr.bf16.mxu1 %v9962_v27  ;;  %v10197_v28 = vpack.c.bf16 %v4860_v43, %v4860_v43  ;;  %v4829_v39 = vadd.f32 %v14596_v60, %v4790_v29  ;;  %v5482_v58 = vld [vmem:[#allocation3 + $0xa4] sm:$0x1]  ;;  %11022 = vmatprep.subr.bf16.mxu0 %v11527_v46  ;;  %v14732_v27 = vld [vmem:[#allocation3 + $0x34] sm:$0xf] }
 0x31b   : > { %v14711_v4 = vrot.slane %v6235_v21, 4  ;;  %v5288_v48 = vrot.slane %v5286_v8, 7  ;;  %v5289_v51 = vshll.u32 %v10192_v3, 16  ;;  %v10195_v19 = vpack.c.bf16 %v4858_v26, %v4858_v26  ;;  %8749 = vmatmul.mubr.bf16.gmra.mxu0 %v9978_v20  ;;  %8588 = vmatmul.mubr.bf16.gmra.mxu1 %v9946_v25  ;;  %v14728_v3 = vld [vmem:[#allocation3 + $0x30] sm:$0xf] }
 0x31c   : > { %v6240_v57 = vrot.slane %v6238_v2, 5  ;;  %v6244_v37 = vshll.u32 %v14643_v31, 16  ;;  %v5329_v30 = vshrl.u32 %v10197_v28, 16  ;;  %v4861_v50 = vmax.f32 %v4829_v39, 0.0  ;;  %v14720_v2 = vld [vmem:[#allocation3 + $0x40] sm:$0xf] }
 0x31d   : > { %v5284_v52 = vrot.slane %v14629_v49, 4  ;;  %v5291_v36 = vor.u32 %v5289_v51, %v5288_v48  ;;  %v5293_v21 = vrot.slane %v5288_v48, 4  ;;  %v5312_v24 = vshrl.u32 %v10195_v19, 16  ;;  %v5542_v43 = vld [vmem:[#allocation3 + $0x38] sm:$0x1]  ;;  %11023 = vmatpush3.bf16.msra.mxu0 %v11528_v6  ;;  %v11529_v46 = vld [vmem:[#allocation9 + $0x238] sm:$0xff]  }
 0x31e   : > { %v6248_v35 = vshrl.u32 %v14643_v31, 16  ;;  %v5331_v9 = vrot.slane %v5329_v30, 7  ;;  %v5332_v14 = vshll.u32 %v10197_v28, 16  ;;  %v10198_v61 = vpack.c.bf16 %v4861_v50, %v4861_v50  ;;  %11192 = vmatprep.subr.bf16.mxu1 %v11529_v46  ;;  %v5942_v6 = vld [vmem:[#allocation3 + $0x30] sm:$0xe] }
 0x31f   : > { %v5292_v62 = vsel %vm12005_vm11, %v5284_v52, %v5291_v36  ;;  %v5483_v49 = vsel %vm11978_vm3, %v5293_v21, %v5482_v58  ;;  %v14726_v32 = vrot.slane %v5312_v24, 7  ;;  %v5315_v42 = vshll.u32 %v10195_v19, 16  ;;  %v4740_v19 = vpop.f32.mrf.mxu0  ;;  %v4968_v52 = vld [vmem:[#allocation3 + $0xbc] sm:$0x1] }
 0x320   : > { %v6241_v63 = vor.u32 %v6240_v57, %v14711_v4  ;;  %5481 = vst [vmem:[#allocation3 + $0xa0] sm:$0xf] %v5292_v62  ;;  %5484 = vst [vmem:[#allocation3 + $0xa4] sm:$0x1] %v5483_v49  ;;  %v5334_v29 = vor.u32 %v5332_v14, %v5331_v9  ;;  %v5337_v55 = vshrl.u32 %v10198_v61, 16  ;;  %v6259_v10 = vshrl.u32 %v14717_v16, 16 }
 0x321   : > { %v5335_v40 = vrot.slane %v5331_v9, 4  ;;  %v5317_v34 = vor.u32 %v5315_v42, %v14726_v32  ;;  %v5340_v15 = vshll.u32 %v10198_v61, 16  ;;  %v9995_v8 = vcombine.low %v14717_v16, %v14720_v2 }
 0x322   : > { %v5500_v26 = vsel %vm12013_vm12, %v5334_v29, %v5499_v45  ;;  %v5339_v20 = vrot.slane %v5337_v55, 7  ;;  %v5651_v25 = vshrl.u32 %v14728_v3, 16  ;;  %v5654_v28 = vshll.u32 %v14728_v3, 16 }
 0x323   : > { %5501 = vst [vmem:[#allocation3 + $0xc0] sm:$0xf] %v5500_v26  ;;  %v5493_v39 = vsel %vm12013_vm12, %v5317_v34, %v5492_v17  ;;  %8756 = vmatprep.mubr.bf16.mxu0 %v9995_v8  ;;  %v5660_v4 = vshll.u32 %v14732_v27, 16  ;;  %v5664_v48 = vshrl.u32 %v14732_v27, 16  ;;  %v5670_v51 = vshll.u32 %v5542_v43, 16 }
 0x324   : > { %5494 = vst [vmem:[#allocation3 + $0xb4] sm:$0xf] %v5493_v39  ;;  %v5342_v57 = vor.u32 %v5340_v15, %v5339_v20  ;;  %v5344_v58 = vrot.slane %v5339_v20, 4  ;;  %v5653_v30 = vrot.slane %v5651_v25, 4  ;;  %v5656_v50 = vrot.slane %v5654_v28, 5 }
 0x325   : > { %v14745_v36 = vrot.slane %v6241_v63, 4  ;;  %v6262_v23 = vshll.u32 %v14717_v16, 16  ;;  %v5662_v21 = vrot.slane %v5660_v4, 5  ;;  %v5666_v45 = vrot.slane %v5664_v48, 4  ;;  %v14765_v8 = vld [vmem:[#allocation3 + $0x4c] sm:$0xf] }
 0x326   : > { %v5343_v24 = vsel %vm12005_vm11, %v5335_v40, %v5342_v57  ;;  %v5504_v9 = vsel %vm11978_vm3, %v5344_v58, %v5503_v38  ;;  %v5657_v14 = vor.u32 %v5656_v50, %v5653_v30  ;;  %v4741_v61 = vadd.f32 %v4740_v19, %v14458_v11  ;;  %v14763_v11 = vld [vmem:[#allocation3 + $0x48] sm:$0xf]  ;;  %v14772_v28 = vld [vmem:[#allocation3 + $0x3c] sm:$0xf]  ;;  %v14782_v4 = vld [vmem:[#allocation3 + $0x40] sm:$0xf] }
 0x327   : > { %v14755_v62 = vrot.slane %v6244_v37, 5  ;;  %5502 = vst [vmem:[#allocation3 + $0xc4] sm:$0xf] %v5343_v24  ;;  %5505 = vst [vmem:[#allocation3 + $0xc8] sm:$0x1] %v5504_v9  ;;  %v5667_v16 = vor.u32 %v5666_v45, %v5662_v21  ;;  %v4969_v49 = vsel %vm11983_vm4, 0, %v4968_v52  ;;  %v9947_v19 = vcombine.low %v14728_v3, %v14732_v27 }
 0x328   : > { %v6032_v42 = vrot.slane %v14732_v27, 5  ;;  %v14760_v17 = vrot.slane %v6259_v10, 4  ;;  %v5658_v63 = vrot.slane %v5657_v14, 4  ;;  %v5672_v29 = vrot.slane %v5670_v51, 5  ;;  %4970 = vst [vmem:[#allocation3 + $0xbc] sm:$0x1] %v4969_v49 }
 0x329   : > { %v4788_v55 = vmul.f32 %v14586_v44, %v4741_v61  ;;  %v5668_v40 = vrot.slane %v5667_v16, 4  ;;  %v6035_v37 = vrot.slane %v5542_v43, 5  ;;  %v9899_v34 = vrot.slane %v5942_v6, 9  ;;  %v5543_v58 = vld [vmem:[#allocation3 + $0x44] sm:$0x1] }
 0x32a   : > { %v6034_v15 = vrot.slane %v6032_v42, 4  ;;  %v14767_v26 = vrot.slane %v6262_v23, 5  ;;  %v6268_v20 = vshll.u32 %v14720_v2, 16  ;;  %v6272_v10 = vshrl.u32 %v14720_v2, 16  ;;  %v5943_v61 = vld [vmem:[#allocation3 + $0x3c] sm:$0xe] }
 0x32b   : > { %v4827_v25 = vadd.f32 %v14596_v60, %v4788_v55  ;;  %v5663_v44 = vsel %vm12037_vm14, %v5658_v63, %v5662_v21  ;;  %v5673_v43 = vsel %vm12037_vm14, %v5668_v40, %v5672_v29  ;;  %v6033_v39 = vsel %vm12031_vm13, %v9899_v34, %v6032_v42 }
 0x32c   : > { %v6036_v38 = vsel %vm12031_vm13, %v6034_v15, %v6035_v37  ;;  %v14786_v2 = vrot.slane %v6248_v35, 4  ;;  %v9963_v60 = vcombine.low %v5663_v44, %v5673_v43  ;;  %v6283_v46 = vshrl.u32 %v14763_v11, 16  ;;  %v6126_v37 = vld [vmem:[#allocation3 + $0x54] sm:$0xf] }
 0x32d   : > { %v4859_v48 = vmax.f32 %v4827_v25, 0.0  ;;  %v9979_v51 = vcombine.low %v6033_v39, %v6036_v38  ;;  %v9996_v57 = vcombine.low %v14763_v11, %v14765_v8  ;;  %v5675_v30 = vshrl.u32 %v14772_v28, 16 }
 0x32e   : > { %8595 = vmatprep.mubr.bf16.mxu1 %v9963_v60  ;;  %v5678_v31 = vshll.u32 %v14772_v28, 16  ;;  %v5684_v35 = vshll.u32 %v14782_v4, 16  ;;  %v5688_v52 = vshrl.u32 %v14782_v4, 16  ;;  %v6265_v3 = vor.u32 %v14767_v26, %v14760_v17  ;;  %v14849_v26 = vld [vmem:[#allocation3 + $0x54] sm:$0xf] }
 0x32f   : > { %v10196_v50 = vpack.c.bf16 %v4859_v48, %v4859_v48  ;;  %8757 = vmatmul.mubr.bf16.gmra.mxu0 %v9979_v51  ;;  %v14799_v27 = vrot.slane %v6268_v20, 5  ;;  %v14801_v23 = vrot.slane %v6272_v10, 4  ;;  %8596 = vmatmul.mubr.bf16.gmra.mxu1 %v9947_v19  ;;  %v5677_v21 = vrot.slane %v5675_v30, 4  ;;  %v5496_v34 = vld [vmem:[#allocation3 + $0xbc] sm:$0x1] }
 0x330   : > { %8764 = vmatprep.mubr.bf16.mxu0 %v9996_v57  ;;  %v5680_v24 = vrot.slane %v5678_v31, 5  ;;  %v5686_v9 = vrot.slane %v5684_v35, 5  ;;  %v5694_v14 = vshll.u32 %v5543_v58, 16  ;;  %v5318_v6 = vrot.slane %v14726_v32, 4  ;;  %v14812_v48 = vld [vmem:[#allocation3 + $0x58] sm:$0xf] }
 0x331   : > { %v5320_v45 = vshrl.u32 %v10196_v50, 16  ;;  %v6286_v16 = vshll.u32 %v14763_v11, 16  ;;  %v5690_v49 = vrot.slane %v5688_v52, 4  ;;  %v6039_v42 = vrot.slane %v14782_v4, 5  ;;  %v14814_v19 = vld [vmem:[#allocation3 + $0x48] sm:$0xf] }
 0x332   : > { %v5323_v29 = vshll.u32 %v10196_v50, 16  ;;  %v14806_v55 = vrot.slane %v6283_v46, 4  ;;  %v5681_v40 = vor.u32 %v5680_v24, %v5677_v21  ;;  %v6042_v20 = vrot.slane %v5543_v58, 5  ;;  %v14820_v50 = vld [vmem:[#allocation3 + $0x4c] sm:$0xf] }
 0x333   : > { %v5322_v63 = vrot.slane %v5320_v45, 7  ;;  %v5691_v15 = vor.u32 %v5690_v49, %v5686_v9  ;;  %v9900_v10 = vrot.slane %v5943_v61, 9  ;;  %v6041_v25 = vrot.slane %v6039_v42, 4  ;;  %v5544_v24 = vld [vmem:[#allocation3 + $0x50] sm:$0x1] }
 0x334   : > { %v5682_v39 = vrot.slane %v5681_v40, 4  ;;  %v5696_v32 = vrot.slane %v5694_v14, 5  ;;  %v6307_v51 = vshrl.u32 %v6126_v37, 16  ;;  %v6310_v30 = vshll.u32 %v6126_v37, 16 }
 0x335   : > { %v5325_v44 = vor.u32 %v5323_v29, %v5322_v63  ;;  %v5327_v43 = vrot.slane %v5322_v63, 4  ;;  %v5692_v38 = vrot.slane %v5691_v15, 4  ;;  %v6040_v11 = vsel %vm12031_vm13, %v9900_v10, %v6039_v42 }
 0x336   : > { %v6043_v60 = vsel %vm12031_vm13, %v6041_v25, %v6042_v20  ;;  %v6288_v31 = vrot.slane %v6286_v16, 5  ;;  %v6292_v35 = vshll.u32 %v14765_v8, 16  ;;  %v5687_v52 = vsel %vm12037_vm14, %v5682_v39, %v5686_v9 }
 0x337   : > { %v5326_v46 = vsel %vm12005_vm11, %v5318_v6, %v5325_v44  ;;  %v5497_v57 = vsel %vm11978_vm3, %v5327_v43, %v5496_v34  ;;  %v9980_v58 = vcombine.low %v6040_v11, %v6043_v60  ;;  %v5697_v21 = vsel %vm12037_vm14, %v5692_v38, %v5696_v32  ;;  %v6128_v44 = vld [vmem:[#allocation3 + $0x60] sm:$0xf]  ;;  %v14844_v11 = vld [vmem:[#allocation3 + $0x64] sm:$0xf] }
 0x338   : > { %5495 = vst [vmem:[#allocation3 + $0xb8] sm:$0xf] %v5326_v46  ;;  %5498 = vst [vmem:[#allocation3 + $0xbc] sm:$0x1] %v5497_v57  ;;  %v9964_v41 = vcombine.low %v5687_v52, %v5697_v21  ;;  %v9997_v45 = vcombine.low %v6126_v37, %v14812_v48  ;;  %v5699_v14 = vshrl.u32 %v14814_v19, 16  ;;  %v5702_v61 = vshll.u32 %v14814_v19, 16 }
 0x339   : > { %8765 = vmatmul.mubr.bf16.gmra.mxu0 %v9980_v58  ;;  %v6296_v6 = vshrl.u32 %v14765_v8, 16  ;;  %v9948_v16 = vcombine.low %v14772_v28, %v14782_v4  ;;  %v5708_v49 = vshll.u32 %v14820_v50, 16  ;;  %v5712_v9 = vshrl.u32 %v14820_v50, 16  ;;  %v5944_v37 = vld [vmem:[#allocation3 + $0x48] sm:$0xe] }
 0x33a   : > { %8603 = vmatprep.mubr.bf16.mxu1 %v9964_v41  ;;  %v6309_v42 = vrot.slane %v6307_v51, 4  ;;  %v6312_v63 = vrot.slane %v6310_v30, 5  ;;  %8772 = vmatprep.mubr.bf16.mxu0 %v9997_v45  ;;  %v5701_v29 = vrot.slane %v5699_v14, 4  ;;  %v5704_v40 = vrot.slane %v5702_v61, 5  ;;  %v14855_v30 = vld [vmem:[#allocation3 + $0x58] sm:$0xf] }
 0x33b   : > { %8604 = vmatmul.mubr.bf16.gmra.mxu1 %v9948_v16  ;;  %v5710_v34 = vrot.slane %v5708_v49, 5  ;;  %v5714_v15 = vrot.slane %v5712_v9, 4  ;;  %v5718_v20 = vshll.u32 %v5544_v24, 16  ;;  %v6046_v8 = vrot.slane %v14820_v50, 5 }
 0x33c   : > { %v14839_v28 = vrot.slane %v6265_v3, 4  ;;  %v6289_v4 = vor.u32 %v6288_v31, %v14806_v55  ;;  %v14842_v10 = vrot.slane %v6292_v35, 5  ;;  %v5705_v25 = vor.u32 %v5704_v40, %v5701_v29 }
 0x33d   : > { %v5715_v43 = vor.u32 %v5714_v15, %v5710_v34  ;;  %v6049_v39 = vrot.slane %v5544_v24, 5  ;;  %v9901_v32 = vrot.slane %v5944_v37, 9  ;;  %v6048_v38 = vrot.slane %v6046_v8, 4  ;;  %v5545_v24 = vld [vmem:[#allocation3 + $0x5c] sm:$0x1] }
 0x33e   : > { %v14846_v60 = vrot.slane %v6296_v6, 4  ;;  %v6313_v51 = vor.u32 %v6312_v63, %v6309_v42  ;;  %v6316_v46 = vshll.u32 %v14812_v48, 16  ;;  %v5706_v17 = vrot.slane %v5705_v25, 4 }
 0x33f   : > { %v5716_v3 = vrot.slane %v5715_v43, 4  ;;  %v5720_v55 = vrot.slane %v5718_v20, 5  ;;  %v6047_v57 = vsel %vm12031_vm13, %v9901_v32, %v6046_v8  ;;  %v6050_v58 = vsel %vm12031_vm13, %v6048_v38, %v6049_v39  ;;  %v5945_v20 = vld [vmem:[#allocation3 + $0x54] sm:$0xe]  ;;  %v6130_v43 = vld [vmem:[#allocation3 + $0x6c] sm:$0xf] }
 0x340   : > { %v6320_v31 = vshrl.u32 %v14812_v48, 16  ;;  %v9981_v35 = vcombine.low %v6047_v57, %v6050_v58  ;;  %v6331_v52 = vshrl.u32 %v6128_v44, 16  ;;  %v9998_v21 = vcombine.low %v6128_v44, %v14844_v11  ;;  %v14879_v38 = vld [vmem:[#allocation3 + $0x60] sm:$0xf] }
 0x341   : > { %v5711_v41 = vsel %vm12037_vm14, %v5706_v17, %v5710_v34  ;;  %v5721_v45 = vsel %vm12037_vm14, %v5716_v3, %v5720_v55  ;;  %v5723_v14 = vshrl.u32 %v14849_v26, 16  ;;  %v5726_v61 = vshll.u32 %v14849_v26, 16 }
 0x342   : > { %v9965_v6 = vcombine.low %v5711_v41, %v5721_v45  ;;  %8773 = vmatmul.mubr.bf16.gmra.mxu0 %v9981_v35  ;;  %v6334_v16 = vshll.u32 %v6128_v44, 16  ;;  %v5732_v48 = vshll.u32 %v14855_v30, 16  ;;  %v5736_v49 = vshrl.u32 %v14855_v30, 16 }
 0x343   : > { %v14867_v9 = vrot.slane %v6289_v4, 4  ;;  %v9949_v42 = vcombine.low %v14814_v19, %v14820_v50  ;;  %8780 = vmatprep.mubr.bf16.mxu0 %v9998_v21  ;;  %v5725_v63 = vrot.slane %v5723_v14, 4  ;;  %v5728_v29 = vrot.slane %v5726_v61, 5  ;;  %v14883_v21 = vld [vmem:[#allocation3 + $0x64] sm:$0xf] }
 0x344   : > { %v14871_v40 = vrot.slane %v6316_v46, 5  ;;  %8611 = vmatprep.mubr.bf16.mxu1 %v9965_v6  ;;  %v5734_v37 = vrot.slane %v5732_v48, 5  ;;  %v5738_v34 = vrot.slane %v5736_v49, 4  ;;  %v5742_v15 = vshll.u32 %v5545_v24, 16 }
 0x345   : > { %v14873_v8 = vrot.slane %v6313_v51, 4  ;;  %v14875_v25 = vrot.slane %v6320_v31, 4  ;;  %8612 = vmatmul.mubr.bf16.gmra.mxu1 %v9949_v42  ;;  %v5729_v4 = vor.u32 %v5728_v29, %v5725_v63  ;;  %v6053_v44 = vrot.slane %v14855_v30, 5  ;;  %v14881_v51 = vld [vmem:[#allocation3 + $0x70] sm:$0xf] }
 0x346   : > { %v6333_v19 = vrot.slane %v6331_v52, 4  ;;  %v6336_v50 = vrot.slane %v6334_v16, 5  ;;  %v6340_v39 = vshll.u32 %v14844_v11, 16  ;;  %v5739_v32 = vor.u32 %v5738_v34, %v5734_v37  ;;  %v5546_v16 = vld [vmem:[#allocation3 + $0x68] sm:$0x1] }
 0x347   : > { %v5730_v46 = vrot.slane %v5729_v4, 4  ;;  %v6056_v17 = vrot.slane %v5545_v24, 5  ;;  %v9902_v3 = vrot.slane %v5945_v20, 9  ;;  %v6055_v55 = vrot.slane %v6053_v44, 4  ;;  %v5946_v4 = vld [vmem:[#allocation3 + $0x60] sm:$0xe] }
 0x348   : > { %v5740_v57 = vrot.slane %v5739_v32, 4  ;;  %v5744_v58 = vrot.slane %v5742_v15, 5  ;;  %v6355_v31 = vshrl.u32 %v6130_v43, 16  ;;  %v6358_v35 = vshll.u32 %v6130_v43, 16 }
 0x349   : > { %v5735_v52 = vsel %vm12037_vm14, %v5730_v46, %v5734_v37  ;;  %v6054_v41 = vsel %vm12031_vm13, %v9902_v3, %v6053_v44  ;;  %v6057_v45 = vsel %vm12031_vm13, %v6055_v55, %v6056_v17  ;;  %v5747_v24 = vshrl.u32 %v14879_v38, 16 }
 0x34a   : > { %v5745_v14 = vsel %vm12037_vm14, %v5740_v57, %v5744_v58  ;;  %v9982_v61 = vcombine.low %v6054_v41, %v6057_v45  ;;  %v9999_v6 = vcombine.low %v6130_v43, %v14881_v51  ;;  %v5750_v48 = vshll.u32 %v14879_v38, 16 }
 0x34b   : > { %v9966_v49 = vcombine.low %v5735_v52, %v5745_v14  ;;  %v5749_v42 = vrot.slane %v5747_v24, 4  ;;  %v5756_v63 = vshll.u32 %v14883_v21, 16  ;;  %v5760_v29 = vshrl.u32 %v14883_v21, 16  ;;  %v14911_v24 = vld [vmem:[#allocation3 + $0x6c] sm:$0xf] }
 0x34c   : > { %v6337_v37 = vor.u32 %v6336_v50, %v6333_v19  ;;  %v6344_v34 = vshrl.u32 %v14844_v11, 16  ;;  %8781 = vmatmul.mubr.bf16.gmra.mxu0 %v9982_v61  ;;  %v9950_v15 = vcombine.low %v14849_v26, %v14855_v30  ;;  %v5752_v20 = vrot.slane %v5750_v48, 5  ;;  %v14904_v26 = vld [vmem:[#allocation3 + $0x7c] sm:$0xf]  ;;  %v6132_v61 = vld [vmem:[#allocation3 + $0x78] sm:$0xf] }
 0x34d   : > { %8619 = vmatprep.mubr.bf16.mxu1 %v9966_v49  ;;  %8788 = vmatprep.mubr.bf16.mxu0 %v9999_v6  ;;  %v5758_v44 = vrot.slane %v5756_v63, 5  ;;  %v5762_v43 = vrot.slane %v5760_v29, 4  ;;  %v5766_v32 = vshll.u32 %v5546_v16, 16  ;;  %v6060_v46 = vrot.slane %v14883_v21, 5  ;;  %v14917_v6 = vld [vmem:[#allocation3 + $0x70] sm:$0xf] }
 0x34e   : > { %v14902_v17 = vrot.slane %v6340_v39, 5  ;;  %8620 = vmatmul.mubr.bf16.gmra.mxu1 %v9950_v15  ;;  %v6357_v3 = vrot.slane %v6355_v31, 4  ;;  %v6360_v19 = vrot.slane %v6358_v35, 5  ;;  %v5753_v50 = vor.u32 %v5752_v20, %v5749_v42 }
 0x34f   : > { %v5763_v11 = vor.u32 %v5762_v43, %v5758_v44  ;;  %v6063_v55 = vrot.slane %v5546_v16, 5  ;;  %v9903_v57 = vrot.slane %v5946_v4, 9  ;;  %v6062_v58 = vrot.slane %v6060_v46, 4 }
 0x350   : > { %v14906_v30 = vrot.slane %v6337_v37, 4  ;;  %v14908_v52 = vrot.slane %v6344_v34, 4  ;;  %v6364_v41 = vshll.u32 %v14881_v51, 16  ;;  %v5754_v45 = vrot.slane %v5753_v50, 4  ;;  %v5547_v37 = vld [vmem:[#allocation3 + $0x74] sm:$0x1] }
 0x351   : > { %v5764_v39 = vrot.slane %v5763_v11, 4  ;;  %v5768_v14 = vrot.slane %v5766_v32, 5  ;;  %v6061_v31 = vsel %vm12031_vm13, %v9903_v57, %v6060_v46  ;;  %v6064_v35 = vsel %vm12031_vm13, %v6062_v58, %v6063_v55  ;;  %v5947_v57 = vld [vmem:[#allocation3 + $0x6c] sm:$0xe] }
 0x352   : > { %v6361_v16 = vor.u32 %v6360_v19, %v6357_v3  ;;  %v6368_v48 = vshrl.u32 %v14881_v51, 16  ;;  %v9983_v49 = vcombine.low %v6061_v31, %v6064_v35  ;;  %v10000_v42 = vcombine.low %v6132_v61, %v14904_v26 }
 0x353   : > { %v5759_v63 = vsel %vm12037_vm14, %v5754_v45, %v5758_v44  ;;  %v5769_v29 = vsel %vm12037_vm14, %v5764_v39, %v5768_v14  ;;  %v5771_v34 = vshrl.u32 %v14911_v24, 16  ;;  %v5774_v15 = vshll.u32 %v14911_v24, 16  ;;  %v6134_v14 = vld [vmem:[#allocation3 + $0x84] sm:$0xf] }
 0x354   : > { %v9967_v20 = vcombine.low %v5759_v63, %v5769_v29  ;;  %8789 = vmatmul.mubr.bf16.gmra.mxu0 %v9983_v49  ;;  %v6379_v4 = vshrl.u32 %v6132_v61, 16  ;;  %v5780_v43 = vshll.u32 %v14917_v6, 16  ;;  %v5784_v51 = vshrl.u32 %v14917_v6, 16  ;;  %v14944_v29 = vld [vmem:[#allocation3 + $0x88] sm:$0xf] }
 0x355   : > { %v14929_v32 = vrot.slane %v6364_v41, 5  ;;  %v9951_v44 = vcombine.low %v14879_v38, %v14883_v21  ;;  %8796 = vmatprep.mubr.bf16.mxu0 %v10000_v42  ;;  %v5773_v46 = vrot.slane %v5771_v34, 4  ;;  %v5776_v3 = vrot.slane %v5774_v15, 5 }
 0x356   : > { %v14933_v19 = vrot.slane %v6368_v48, 4  ;;  %8627 = vmatprep.mubr.bf16.mxu1 %v9967_v20  ;;  %v5782_v50 = vrot.slane %v5780_v43, 5  ;;  %v5786_v11 = vrot.slane %v5784_v51, 4  ;;  %v5790_v55 = vshll.u32 %v5547_v37, 16  ;;  %v14942_v48 = vld [vmem:[#allocation3 + $0x78] sm:$0xf] }
 0x357   : > { %v14935_v58 = vrot.slane %v6361_v16, 4  ;;  %8628 = vmatmul.mubr.bf16.gmra.mxu1 %v9951_v44  ;;  %v6382_v45 = vshll.u32 %v6132_v61, 16  ;;  %v5777_v39 = vor.u32 %v5776_v3, %v5773_v46  ;;  %v6067_v41 = vrot.slane %v14917_v6, 5  ;;  %v14946_v43 = vld [vmem:[#allocation3 + $0x7c] sm:$0xf] }
 0x358   : > { %v14938_v31 = vrot.slane %v6379_v4, 4  ;;  %v6388_v38 = vshll.u32 %v14904_v26, 16  ;;  %v6392_v21 = vshrl.u32 %v14904_v26, 16  ;;  %v5787_v35 = vor.u32 %v5786_v11, %v5782_v50  ;;  %v5548_v11 = vld [vmem:[#allocation3 + $0x80] sm:$0x1] }
 0x359   : > { %v5778_v49 = vrot.slane %v5777_v39, 4  ;;  %v6070_v42 = vrot.slane %v5547_v37, 5  ;;  %v9904_v63 = vrot.slane %v5947_v57, 9  ;;  %v6069_v16 = vrot.slane %v6067_v41, 4 }
 0x35a   : > { %v5788_v61 = vrot.slane %v5787_v35, 4  ;;  %v5792_v34 = vrot.slane %v5790_v55, 5  ;;  %v6403_v15 = vshrl.u32 %v6134_v14, 16  ;;  %v6406_v20 = vshll.u32 %v6134_v14, 16 }
 0x35b   : > { %v5783_v4 = vsel %vm12037_vm14, %v5778_v49, %v5782_v50  ;;  %v6068_v26 = vsel %vm12031_vm13, %v9904_v63, %v6067_v41  ;;  %v6071_v51 = vsel %vm12031_vm13, %v6069_v16, %v6070_v42  ;;  %v5795_v37 = vshrl.u32 %v14942_v48, 16  ;;  %v5948_v16 = vld [vmem:[#allocation3 + $0x78] sm:$0xe] }
 0x35c   : > { %v5793_v44 = vsel %vm12037_vm14, %v5788_v61, %v5792_v34  ;;  %v9984_v46 = vcombine.low %v6068_v26, %v6071_v51  ;;  %v10001_v3 = vcombine.low %v6134_v14, %v14944_v29  ;;  %v5798_v55 = vshll.u32 %v14942_v48, 16 }
 0x35d   : > { %v9968_v57 = vcombine.low %v5783_v4, %v5793_v44  ;;  %v5797_v39 = vrot.slane %v5795_v37, 4  ;;  %v5804_v50 = vshll.u32 %v14946_v43, 16  ;;  %v5808_v41 = vshrl.u32 %v14946_v43, 16  ;;  %v6136_v37 = vld [vmem:[#allocation3 + $0x90] sm:$0xf] }
 0x35e   : > { %v6384_v35 = vrot.slane %v6382_v45, 5  ;;  %v14961_v49 = vrot.slane %v6388_v38, 5  ;;  %8797 = vmatmul.mubr.bf16.gmra.mxu0 %v9984_v46  ;;  %v9952_v42 = vcombine.low %v14911_v24, %v14917_v6  ;;  %v5800_v63 = vrot.slane %v5798_v55, 5  ;;  %v14968_v6 = vld [vmem:[#allocation3 + $0x94] sm:$0xf] }
 0x35f   : > { %8635 = vmatprep.mubr.bf16.mxu1 %v9968_v57  ;;  %8804 = vmatprep.mubr.bf16.mxu0 %v10001_v3  ;;  %v5806_v14 = vrot.slane %v5804_v50, 5  ;;  %v5810_v61 = vrot.slane %v5808_v41, 4  ;;  %v5814_v34 = vshll.u32 %v5548_v11, 16  ;;  %v6074_v4 = vrot.slane %v14946_v43, 5 }
 0x360   : > { %16744 = vst [vmem:[#allocation49_spill] sm:$0xff] %v14961_v49  ;;  %v14966_v26 = vrot.slane %v6392_v21, 4  ;;  %8636 = vmatmul.mubr.bf16.gmra.mxu1 %v9952_v42  ;;  %v6405_v51 = vrot.slane %v6403_v15, 4  ;;  %v6408_v45 = vrot.slane %v6406_v20, 5  ;;  %v5801_v38 = vor.u32 %v5800_v63, %v5797_v39  ;;  %v14973_v21 = vld [vmem:[#allocation3 + $0x84] sm:$0xf] }
 0x361   : > { %v5811_v44 = vor.u32 %v5810_v61, %v5806_v14  ;;  %v6077_v46 = vrot.slane %v5548_v11, 5  ;;  %v9905_v12 = vrot.slane %v5948_v16, 9  ;;  %v6076_v24 = vrot.slane %v6074_v4, 4  ;;  %v14979_v39 = vld [vmem:[#allocation3 + $0x88] sm:$0xf] }
 0x362   : > { %16745 = vst [vmem:[#allocation34_spill] sm:$0xff] %v14966_v26  ;;  %v6385_v3 = vor.u32 %v6384_v35, %v14938_v31  ;;  %v6412_v55 = vshll.u32 %v14944_v29, 16  ;;  %v6416_v57 = vshrl.u32 %v14944_v29, 16  ;;  %v5802_v50 = vrot.slane %v5801_v38, 4  ;;  %v5549_v61 = vld [vmem:[#allocation3 + $0x8c] sm:$0x1] }
 0x363   : > { %v5812_v41 = vrot.slane %v5811_v44, 4  ;;  %v5816_v15 = vrot.slane %v5814_v34, 5  ;;  %v6075_v20 = vsel %vm12031_vm13, %v9905_v12, %v6074_v4  ;;  %v6078_v11 = vsel %vm12031_vm13, %v6076_v24, %v6077_v46  ;;  %v6546_v26 = vld [vmem:[#allocation3 + $0xc] sm:$0xe] }
 0x364   : > { %v6409_v42 = vor.u32 %v6408_v45, %v6405_v51  ;;  %v9985_v63 = vcombine.low %v6075_v20, %v6078_v11  ;;  %v6427_v31 = vshrl.u32 %v6136_v37, 16  ;;  %v10002_v35 = vcombine.low %v6136_v37, %v14968_v6  ;;  %v5949_v11 = vld [vmem:[#allocation3 + $0x84] sm:$0xe] }
 0x365   : > { %v5807_v29 = vsel %vm12037_vm14, %v5802_v50, %v5806_v14  ;;  %v5817_v16 = vsel %vm12037_vm14, %v5812_v41, %v5816_v15  ;;  %v5819_v34 = vshrl.u32 %v14973_v21, 16  ;;  %v5822_v12 = vshll.u32 %v14973_v21, 16 }
 0x366   : > { %v9969_v4 = vcombine.low %v5807_v29, %v5817_v16  ;;  %8805 = vmatmul.mubr.bf16.gmra.mxu0 %v9985_v63  ;;  %v6430_v38 = vshll.u32 %v6136_v37, 16  ;;  %v5828_v51 = vshll.u32 %v14979_v39, 16  ;;  %v5832_v45 = vshrl.u32 %v14979_v39, 16  ;;  %v6138_v16 = vld [vmem:[#allocation3 + $0x9c] sm:$0xf] }
 0x367   : > { %v14990_v44 = vrot.slane %v6385_v3, 4  ;;  %v9953_v14 = vcombine.low %v14942_v48, %v14946_v43  ;;  %8812 = vmatprep.mubr.bf16.mxu0 %v10002_v35  ;;  %v5821_v46 = vrot.slane %v5819_v34, 4  ;;  %v5824_v24 = vrot.slane %v5822_v12, 5  ;;  %v15002_v34 = vld [vmem:[#allocation3 + $0x90] sm:$0xf] }
 0x368   : > { %v14994_v50 = vrot.slane %v6412_v55, 5  ;;  %8643 = vmatprep.mubr.bf16.mxu1 %v9969_v4  ;;  %v5830_v41 = vrot.slane %v5828_v51, 5  ;;  %v5834_v15 = vrot.slane %v5832_v45, 4  ;;  %v5838_v20 = vshll.u32 %v5549_v61, 16 }
 0x369   : > { %16746 = vst [vmem:[#allocation36_spill] sm:$0xff] %v14990_v44  ;;  %v14996_v37 = vrot.slane %v6409_v42, 4  ;;  %v14998_v63 = vrot.slane %v6416_v57, 4  ;;  %8644 = vmatmul.mubr.bf16.gmra.mxu1 %v9953_v14  ;;  %v5825_v3 = vor.u32 %v5824_v24, %v5821_v46  ;;  %v6081_v29 = vrot.slane %v14979_v39, 5  ;;  %v15004_v42 = vld [vmem:[#allocation3 + $0xa0] sm:$0xf] }
 0x36a   : > { %16747 = vst [vmem:[#allocation50_spill] sm:$0xff] %v14994_v50  ;;  %v6429_v48 = vrot.slane %v6427_v31, 4  ;;  %v6432_v43 = vrot.slane %v6430_v38, 5  ;;  %v6436_v35 = vshll.u32 %v14968_v6, 16  ;;  %v5835_v55 = vor.u32 %v5834_v15, %v5830_v41  ;;  %v15006_v24 = vld [vmem:[#allocation3 + $0x94] sm:$0xf] }
 0x36b   : > { %16748 = vst [vmem:[#allocation52_spill] sm:$0xff] %v14996_v37  ;;  %16749 = vst [vmem:[#allocation43_spill] sm:$0xff] %v14998_v63  ;;  %v5826_v12 = vrot.slane %v5825_v3, 4  ;;  %v6084_v4 = vrot.slane %v5549_v61, 5  ;;  %v9906_v51 = vrot.slane %v5949_v11, 9  ;;  %v6083_v45 = vrot.slane %v6081_v29, 4 }
 0x36c   : > { %v5836_v57 = vrot.slane %v5835_v55, 4  ;;  %v5840_v47 = vrot.slane %v5838_v20, 5  ;;  %v6451_v14 = vshrl.u32 %v6138_v16, 16  ;;  %v6454_v46 = vshll.u32 %v6138_v16, 16  ;;  %v5550_v55 = vld [vmem:[#allocation3 + $0x98] sm:$0x1] }
 0x36d   : > { %v5831_v31 = vsel %vm12037_vm14, %v5826_v12, %v5830_v41  ;;  %v6082_v38 = vsel %vm12031_vm13, %v9906_v51, %v6081_v29  ;;  %v6085_v15 = vsel %vm12031_vm13, %v6083_v45, %v6084_v4  ;;  %v5843_v61 = vshrl.u32 %v15002_v34, 16  ;;  %v5950_v45 = vld [vmem:[#allocation3 + $0x90] sm:$0xe] }
 0x36e   : > { %v5841_v11 = vsel %vm12037_vm14, %v5836_v57, %v5840_v47  ;;  %v9986_v3 = vcombine.low %v6082_v38, %v6085_v15  ;;  %v10003_v20 = vcombine.low %v6138_v16, %v15004_v42  ;;  %v5846_v7 = vshll.u32 %v15002_v34, 16 }
 0x36f   : > { %v9970_v37 = vcombine.low %v5831_v31, %v5841_v11  ;;  %v5845_v63 = vrot.slane %v5843_v61, 4  ;;  %v5852_v41 = vshll.u32 %v15006_v24, 16  ;;  %v5856_v29 = vshrl.u32 %v15006_v24, 16 }
 0x370   : > { %v6433_v12 = vor.u32 %v6432_v43, %v6429_v48  ;;  %v6440_v4 = vshrl.u32 %v14968_v6, 16  ;;  %8813 = vmatmul.mubr.bf16.gmra.mxu0 %v9986_v3  ;;  %v9954_v51 = vcombine.low %v14973_v21, %v14979_v39  ;;  %v5848_v47 = vrot.slane %v5846_v7, 5  ;;  %v15027_v21 = vld [vmem:[#allocation3 + $0xac] sm:$0xf] }
 0x371   : > { %8651 = vmatprep.mubr.bf16.mxu1 %v9970_v37  ;;  %8820 = vmatprep.mubr.bf16.mxu0 %v10003_v20  ;;  %v5854_v16 = vrot.slane %v5852_v41, 5  ;;  %v5858_v57 = vrot.slane %v5856_v29, 4  ;;  %v5862_v38 = vshll.u32 %v5550_v55, 16  ;;  %v6088_v31 = vrot.slane %v15006_v24, 5  ;;  %v15034_v41 = vld [vmem:[#allocation3 + $0x9c] sm:$0xf] }
 0x372   : > { %v15025_v15 = vrot.slane %v6436_v35, 5  ;;  %8652 = vmatmul.mubr.bf16.gmra.mxu1 %v9954_v51  ;;  %v6453_v61 = vrot.slane %v6451_v14, 4  ;;  %v6456_v48 = vrot.slane %v6454_v46, 5  ;;  %v5849_v43 = vor.u32 %v5848_v47, %v5845_v63  ;;  %v6140_v46 = vld [vmem:[#allocation3 + $0xa8] sm:$0xf] }
 0x373   : > { %v5859_v6 = vor.u32 %v5858_v57, %v5854_v16  ;;  %v6091_v11 = vrot.slane %v5550_v55, 5  ;;  %v9907_v3 = vrot.slane %v5950_v45, 9  ;;  %v6090_v50 = vrot.slane %v6088_v31, 4  ;;  %v15040_v55 = vld [vmem:[#allocation3 + $0xa0] sm:$0xf] }
 0x374   : > { %16750 = vst [vmem:[#allocation39_spill] sm:$0xff] %v15025_v15  ;;  %v15029_v7 = vrot.slane %v6433_v12, 4  ;;  %v15031_v39 = vrot.slane %v6440_v4, 4  ;;  %v6460_v37 = vshll.u32 %v15004_v42, 16  ;;  %v5850_v20 = vrot.slane %v5849_v43, 4 }
 0x375   : > { %v5860_v35 = vrot.slane %v5859_v6, 4  ;;  %v5864_v29 = vrot.slane %v5862_v38, 5  ;;  %v6089_v63 = vsel %vm12031_vm13, %v9907_v3, %v6088_v31  ;;  %v6092_v14 = vsel %vm12031_vm13, %v6090_v50, %v6091_v11  ;;  %v5551_v38 = vld [vmem:[#allocation3 + $0xa4] sm:$0x1] }
 0x376   : > { %16751 = vst [vmem:[#allocation47_spill] sm:$0xff] %v15029_v7  ;;  %16752 = vst [vmem:[#allocation28_spill] sm:$0xff] %v15031_v39  ;;  %v6457_v12 = vor.u32 %v6456_v48, %v6453_v61  ;;  %v6464_v4 = vshrl.u32 %v15004_v42, 16  ;;  %v9987_v51 = vcombine.low %v6089_v63, %v6092_v14  ;;  %v10004_v47 = vcombine.low %v6140_v46, %v15027_v21  ;;  %v5951_v14 = vld [vmem:[#allocation3 + $0x9c] sm:$0xe] }
 0x377   : > { %v5855_v45 = vsel %vm12037_vm14, %v5850_v20, %v5854_v16  ;;  %v5865_v57 = vsel %vm12037_vm14, %v5860_v35, %v5864_v29  ;;  %v5867_v31 = vshrl.u32 %v15034_v41, 16  ;;  %v5870_v50 = vshll.u32 %v15034_v41, 16 }
 0x378   : > { %v9971_v43 = vcombine.low %v5855_v45, %v5865_v57  ;;  %8821 = vmatmul.mubr.bf16.gmra.mxu0 %v9987_v51  ;;  %v6475_v6 = vshrl.u32 %v6140_v46, 16  ;;  %v5876_v61 = vshll.u32 %v15040_v55, 16  ;;  %v5880_v42 = vshrl.u32 %v15040_v55, 16 }
 0x379   : > { %v9955_v48 = vcombine.low %v15002_v34, %v15006_v24  ;;  %v6478_v11 = vshll.u32 %v6140_v46, 16  ;;  %8828 = vmatprep.mubr.bf16.mxu0 %v10004_v47  ;;  %v5869_v16 = vrot.slane %v5867_v31, 4  ;;  %v5872_v3 = vrot.slane %v5870_v50, 5  ;;  %v15063_v31 = vld [vmem:[#allocation3 + $0xa8] sm:$0xf] }
 0x37a   : > { %8659 = vmatprep.mubr.bf16.mxu1 %v9971_v43  ;;  %v6484_v20 = vshll.u32 %v15027_v21, 16  ;;  %v5878_v35 = vrot.slane %v5876_v61, 5  ;;  %v5882_v29 = vrot.slane %v5880_v42, 4  ;;  %v5886_v63 = vshll.u32 %v5551_v38, 16 }
 0x37b   : > { %v15055_v51 = vrot.slane %v6460_v37, 5  ;;  %v15057_v45 = vrot.slane %v6464_v4, 4  ;;  %8660 = vmatmul.mubr.bf16.gmra.mxu1 %v9955_v48  ;;  %v5873_v57 = vor.u32 %v5872_v3, %v5869_v16  ;;  %v6095_v7 = vrot.slane %v15040_v55, 5  ;;  %v15065_v37 = vld [vmem:[#allocation3 + $0xb8] sm:$0xf] }
 0x37c   : > { %v15060_v34 = vrot.slane %v6457_v12, 4  ;;  %v6477_v24 = vrot.slane %v6475_v6, 4  ;;  %v6488_v46 = vshrl.u32 %v15027_v21, 16  ;;  %v5883_v47 = vor.u32 %v5882_v29, %v5878_v35  ;;  %v15069_v3 = vld [vmem:[#allocation3 + $0xac] sm:$0xf] }
 0x37d   : > { %16753 = vst [vmem:[#allocation33_spill] sm:$0xff] %v15055_v51  ;;  %16754 = vst [vmem:[#allocation25_spill] sm:$0xff] %v15057_v45  ;;  %v5874_v50 = vrot.slane %v5873_v57, 4  ;;  %v6098_v43 = vrot.slane %v5551_v38, 5  ;;  %v9908_v61 = vrot.slane %v5951_v14, 9  ;;  %v6097_v42 = vrot.slane %v6095_v7, 4 }
 0x37e   : > { %16755 = vst [vmem:[#allocation35_spill] sm:$0xff] %v15060_v34  ;;  %v6480_v4 = vrot.slane %v6478_v11, 5  ;;  %v15067_v45 = vrot.slane %v6484_v20, 5  ;;  %v5884_v48 = vrot.slane %v5883_v47, 4  ;;  %v5888_v16 = vrot.slane %v5886_v63, 5 }
 0x37f   : > { %v5879_v12 = vsel %vm12037_vm14, %v5874_v50, %v5878_v35  ;;  %v6096_v21 = vsel %vm12031_vm13, %v9908_v61, %v6095_v7  ;;  %v6099_v38 = vsel %vm12031_vm13, %v6097_v42, %v6098_v43  ;;  %v6142_v6 = vld [vmem:[#allocation3 + $0xb4] sm:$0xf]  ;;  %v5891_v29 = vshrl.u32 %v15063_v31, 16  ;;  %v5552_v14 = vld [vmem:[#allocation3 + $0xb0] sm:$0x1] }
 0x380   : > { %16756 = vst [vmem:[#allocation55_spill] sm:$0xff] %v15067_v45  ;;  %v5889_v11 = vsel %vm12037_vm14, %v5884_v48, %v5888_v16  ;;  %v9988_v20 = vcombine.low %v6096_v21, %v6099_v38  ;;  %v10005_v63 = vcombine.low %v6142_v6, %v15065_v37  ;;  %v5894_v57 = vshll.u32 %v15063_v31, 16  ;;  %v5952_v48 = vld [vmem:[#allocation3 + $0xa8] sm:$0xe] }
 0x381   : > { %v9972_v47 = vcombine.low %v5879_v12, %v5889_v11  ;;  %v5893_v35 = vrot.slane %v5891_v29, 4  ;;  %v5900_v50 = vshll.u32 %v15069_v3, 16  ;;  %v5904_v7 = vshrl.u32 %v15069_v3, 16 }
 0x382   : > { %v6481_v61 = vor.u32 %v6480_v4, %v6477_v24  ;;  %8829 = vmatmul.mubr.bf16.gmra.mxu0 %v9988_v20  ;;  %v9956_v43 = vcombine.low %v15034_v41, %v15040_v55  ;;  %v6499_v42 = vshrl.u32 %v6142_v6, 16  ;;  %v5896_v45 = vrot.slane %v5894_v57, 5  ;;  %v15090_v57 = vld [vmem:[#allocation3 + $0xc0] sm:$0xf] }
 0x383   : > { %8667 = vmatprep.mubr.bf16.mxu1 %v9972_v47  ;;  %8836 = vmatprep.mubr.bf16.mxu0 %v10005_v63  ;;  %v5902_v16 = vrot.slane %v5900_v50, 5  ;;  %v5906_v21 = vrot.slane %v5904_v7, 4  ;;  %v5910_v38 = vshll.u32 %v5552_v14, 16  ;;  %v6102_v12 = vrot.slane %v15069_v3, 5  ;;  %v15092_v47 = vld [vmem:[#allocation3 + $0xc4] sm:$0xf] }
 0x384   : > { %v15087_v29 = vrot.slane %v6488_v46, 4  ;;  %8668 = vmatmul.mubr.bf16.gmra.mxu1 %v9956_v43  ;;  %v6502_v11 = vshll.u32 %v6142_v6, 16  ;;  %v6508_v24 = vshll.u32 %v15065_v37, 16  ;;  %v5897_v4 = vor.u32 %v5896_v45, %v5893_v35  ;;  %v15099_v43 = vld [vmem:[#allocation3 + $0xb4] sm:$0xf] }
 0x385   : > { %v5907_v20 = vor.u32 %v5906_v21, %v5902_v16  ;;  %v6105_v34 = vrot.slane %v5552_v14, 5  ;;  %v9909_v41 = vrot.slane %v5952_v48, 9  ;;  %v6104_v55 = vrot.slane %v6102_v12, 4  ;;  %v15105_v35 = vld [vmem:[#allocation3 + $0xb8] sm:$0xf] }
 0x386   : > { %16757 = vst [vmem:[#allocation53_spill] sm:$0xff] %v15087_v29  ;;  %v15094_v63 = vrot.slane %v6481_v61, 4  ;;  %v15096_v50 = vrot.slane %v6499_v42, 4  ;;  %v6512_v46 = vshrl.u32 %v15065_v37, 16  ;;  %v5898_v7 = vrot.slane %v5897_v4, 4 }
 0x387   : > { %v5908_v6 = vrot.slane %v5907_v20, 4  ;;  %v5912_v29 = vrot.slane %v5910_v38, 5  ;;  %v6103_v45 = vsel %vm12031_vm13, %v9909_v41, %v6102_v12  ;;  %v6106_v14 = vsel %vm12031_vm13, %v6104_v55, %v6105_v34  ;;  %v5553_v48 = vld [vmem:[#allocation3 + $0xbc] sm:$0x1]  ;;  %v15121_v55 = vld [vmem:[#allocation3 + $0x18] sm:$0xf] }
 0x388   : > { %16758 = vst [vmem:[#allocation26_spill] sm:$0xff] %v15094_v63  ;;  %v15107_v61 = vrot.slane %v6502_v11, 5  ;;  %v15109_v42 = vrot.slane %v6508_v24, 5  ;;  %v9989_v21 = vcombine.low %v6103_v45, %v6106_v14  ;;  %v10006_v37 = vcombine.low %v15090_v57, %v15092_v47 }
 0x389   : > { %v5903_v38 = vsel %vm12037_vm14, %v5898_v7, %v5902_v16  ;;  %v5913_v12 = vsel %vm12037_vm14, %v5908_v6, %v5912_v29  ;;  %v5915_v4 = vshrl.u32 %v15099_v43, 16  ;;  %v5918_v34 = vshll.u32 %v15099_v43, 16  ;;  %v15127_v6 = vld [vmem:[#allocation3 + $0x1c] sm:$0xf] }
 0x38a   : > { %16759 = vst [vmem:[#allocation40_spill] sm:$0xff] %v15109_v42  ;;  %v9973_v20 = vcombine.low %v5903_v38, %v5913_v12  ;;  %8837 = vmatmul.mubr.bf16.gmra.mxu0 %v9989_v21  ;;  %v5924_v11 = vshll.u32 %v15105_v35, 16  ;;  %v5928_v24 = vshrl.u32 %v15105_v35, 16  ;;  %v5934_v41 = vshll.u32 %v5553_v48, 16  ;;  %v5953_v42 = vld [vmem:[#allocation3 + $0xb4] sm:$0xe] }
 0x38b   : > { %v15123_v45 = vrot.slane %v6512_v46, 4  ;;  %v9957_v16 = vcombine.low %v15063_v31, %v15069_v3  ;;  %8844 = vmatprep.mubr.bf16.mxu0 %v10006_v37  ;;  %v5917_v29 = vrot.slane %v5915_v4, 4  ;;  %v5920_v7 = vrot.slane %v5918_v34, 5  ;;  %v6755_v37 = vld [vmem:[#allocation3 + $0x20] sm:$0x1] }
 0x38c   : > { %8675 = vmatprep.mubr.bf16.mxu1 %v9973_v20  ;;  %v5926_v21 = vrot.slane %v5924_v11, 5  ;;  %v5930_v38 = vrot.slane %v5928_v24, 4  ;;  %v6112_v12 = vrot.slane %v5553_v48, 5  ;;  %v5936_v46 = vrot.slane %v5934_v41, 5 }
 0x38d   : > { %16760 = vst [vmem:[#allocation56_spill] sm:$0xff] %v15123_v45  ;;  %8676 = vmatmul.mubr.bf16.gmra.mxu1 %v9957_v16  ;;  %v5921_v63 = vor.u32 %v5920_v7, %v5917_v29  ;;  %v6109_v45 = vrot.slane %v15105_v35, 5  ;;  %v6772_v31 = vshrl.u32 %v15121_v55, 16  ;;  %v6775_v4 = vshll.u32 %v15121_v55, 16  ;;  %v6146_v7 = vld [vmem:[#allocation3 + $0x14] sm:$0x1] }
 0x38e   : > { %v5931_v3 = vor.u32 %v5930_v38, %v5926_v21  ;;  %v6781_v34 = vshll.u32 %v15127_v6, 16  ;;  %v6785_v14 = vshrl.u32 %v15127_v6, 16  ;;  %v9910_v11 = vrot.slane %v5953_v42, 9 }
 0x38f   : > { %v5922_v20 = vrot.slane %v5921_v63, 4  ;;  %v6111_v24 = vrot.slane %v6109_v45, 4  ;;  %v6774_v48 = vrot.slane %v6772_v31, 4  ;;  %v6777_v16 = vrot.slane %v6775_v4, 5  ;;  %v15144_v4 = vld [vmem:[#allocation3 + $0x24] sm:$0xf] }
 0x390   : > { %v5932_v51 = vrot.slane %v5931_v3, 4  ;;  %v6783_v29 = vrot.slane %v6781_v34, 5  ;;  %v6787_v41 = vrot.slane %v6785_v14, 4  ;;  %v6110_v38 = vsel %vm12031_vm13, %v9910_v11, %v6109_v45  ;;  %v15146_v14 = vld [vmem:[#allocation3 + $0x28] sm:$0xf] }
 0x391   : > { %v5927_v39 = vsel %vm12037_vm14, %v5922_v20, %v5926_v21  ;;  %v6113_v15 = vsel %vm12031_vm13, %v6111_v24, %v6112_v12  ;;  %v6791_v44 = vshll.u32 %v6755_v37, 16  ;;  %v6778_v31 = vor.u32 %v6777_v16, %v6774_v48  ;;  %v11592_v24 = vld [vmem:[#allocation3 + $0x10] sm:$0xf] }
 0x392   : > { %v5937_v63 = vsel %vm12037_vm14, %v5932_v51, %v5936_v46  ;;  %v9990_v42 = vcombine.low %v6110_v38, %v6113_v15  ;;  %v6788_v3 = vor.u32 %v6787_v41, %v6783_v29  ;;  %v9958_v21 = vcombine.low %v15099_v43, %v15105_v35 }
 0x393   : > { %v9974_v34 = vcombine.low %v5927_v39, %v5937_v63  ;;  %v6793_v45 = vrot.slane %v6791_v44, 5  ;;  %v6182_v20 = vshll.u32 %v6146_v7, 16  ;;  %v6779_v12 = vrot.slane %v6778_v31, 4 }
 0x394   : > { %8845 = vmatmul.mubr.bf16.gmra.mxu0 %v9990_v42  ;;  %v6789_v37 = vrot.slane %v6788_v3, 4  ;;  %v9911_v11 = vrot.slane %v6546_v26, 9  ;;  %v6612_v49 = vrot.slane %v11592_v24, 5  ;;  %v6796_v51 = vshrl.u32 %v15144_v4, 16  ;;  %v6756_v26 = vld [vmem:[#allocation3 + $0x2c] sm:$0x1] }
 0x395   : > { %8683 = vmatprep.mubr.bf16.mxu1 %v9974_v34  ;;  %v6184_v15 = vrot.slane %v6182_v20, 5  ;;  %v6799_v46 = vshll.u32 %v15144_v4, 16  ;;  %v6805_v48 = vshll.u32 %v15146_v14, 16  ;;  %v6784_v39 = vsel %vm12037_vm14, %v6779_v12, %v6783_v29  ;;  %v6147_v42 = vld [vmem:[#allocation3 + $0x20] sm:$0x1] }
 0x396   : > { %8684 = vmatmul.mubr.bf16.gmra.mxu1 %v9958_v21  ;;  %v6794_v44 = vsel %vm12037_vm14, %v6789_v37, %v6793_v45  ;;  %v6614_v43 = vrot.slane %v6612_v49, 4  ;;  %v6615_v35 = vrot.slane %v6146_v7, 5  ;;  %v6798_v38 = vrot.slane %v6796_v51, 4  ;;  %v6547_v12 = vld [vmem:[#allocation3 + $0x18] sm:$0xe] }
 0x397   : > { %v10055_v16 = vcombine.low %v6784_v39, %v6794_v44  ;;  %v6185_v41 = vsel %vm12037_vm14, %v14562_v56, %v6184_v15  ;;  %v6801_v63 = vrot.slane %v6799_v46, 5  ;;  %v6613_v31 = vsel %vm12031_vm13, %v9911_v11, %v6612_v49  ;;  %v15175_v44 = vld [vmem:[#allocation3 + $0x30] sm:$0xf] }
 0x398   : > { %v6616_v29 = vsel %vm12031_vm13, %v6614_v43, %v6615_v35  ;;  %v6807_v3 = vrot.slane %v6805_v48, 5  ;;  %v6809_v34 = vshrl.u32 %v15146_v14, 16  ;;  %v6815_v45 = vshll.u32 %v6756_v26, 16  ;;  %v11593_v48 = vld [vmem:[#allocation3 + $0x1c] sm:$0xf] }
 0x399   : > { %9046 = vmatprep.mubr.bf16.mxu0 %v10055_v16  ;;  %v10023_v7 = vcombine.low %v6613_v31, %v6616_v29  ;;  %v6802_v21 = vor.u32 %v6801_v63, %v6798_v38  ;;  %v16470_v20 = vrot.slane %v15146_v14, 5  ;;  %v10039_v56 = vcombine.low %v15121_v55, %v15127_v6  ;;  %v15177_v16 = vld [vmem:[#allocation3 + $0x34] sm:$0xf] }
 0x39a   : > { %v16761_v49 = vsel %vm12037_vm14, %v14472_v53, %v14474_v59  ;;  %v6811_v11 = vrot.slane %v6809_v34, 4  ;;  %v6206_v24 = vshll.u32 %v6147_v42, 16  ;;  %v7231_v46 = vrot.slane %v6756_v26, 5  ;;  %v11532_v53 = vld [vmem:[#allocation9 + $0x230] sm:$0xff]   ;;  %v6757_v34 = vld [vmem:[#allocation3 + $0x38] sm:$0x1] }
 0x39b   : > { %v10007_v37 = vcombine.low %v16761_v49, %v6185_v41  ;;  %8885 = vmatprep.mubr.bf16.mxu1 %v10023_v7  ;;  %v6803_v15 = vrot.slane %v6802_v21, 4  ;;  %v7230_v51 = vrot.slane %v16470_v20, 4  ;;  %v6619_v39 = vrot.slane %v11593_v48, 5  ;;  %v11594_v21 = vld [vmem:[#allocation9 + $0x238] sm:$0xff]  }
 0x39c   : > { %9047 = vmatmul.mubr.bf16.vlgmr.msra.gmra.mxu0 %v10039_v56  ;;  %v6812_v55 = vor.u32 %v6811_v11, %v6807_v3  ;;  %v6817_v6 = vrot.slane %v6815_v45, 5  ;;  %v6208_v43 = vrot.slane %v6206_v24, 5  ;;  %v9912_v35 = vrot.slane %v6547_v12, 9  ;;  %v6148_v56 = vld [vmem:[#allocation3 + $0x2c] sm:$0x1]  ;;  %v11535_v24 = vld [vmem:[#allocation9 + $0x228] sm:$0xff]  }
 0x39d   : > { %v6808_v59 = vsel %vm12037_vm14, %v6803_v15, %v6807_v3  ;;  %v15183_v41 = vsel %vm12031_vm13, %v7230_v51, %v7231_v46  ;;  %v6621_v26 = vrot.slane %v6619_v39, 4  ;;  %v6622_v38 = vrot.slane %v6147_v42, 5 }
 0x39e   : > { %8886 = vmatmul.mubr.bf16.vlgmr.msra.gmra.mxu1 %v10007_v37  ;;  %v6813_v63 = vrot.slane %v6812_v55, 4  ;;  %v6620_v31 = vsel %vm12031_vm13, %v9912_v35, %v6619_v39  ;;  %v6203_v29 = vor.u32 %v14638_v54, %v14564_v1  ;;  %v6820_v7 = vshrl.u32 %v15175_v44, 16  ;;  %v6548_v39 = vld [vmem:[#allocation3 + $0x24] sm:$0xe] }
 0x39f   : > { %v6623_v3 = vsel %vm12031_vm13, %v6621_v26, %v6622_v38  ;;  %11193 = vmatpush3.bf16.msra.mxu1 %v11594_v21  ;;  %v6823_v45 = vshll.u32 %v15175_v44, 16  ;;  %v6829_v42 = vshll.u32 %v15177_v16, 16  ;;  %v6833_v12 = vshrl.u32 %v15177_v16, 16 }
 0x3a0   : > { %v6818_v49 = vsel %vm12037_vm14, %v6813_v63, %v6817_v6  ;;  %v10024_v37 = vcombine.low %v6620_v31, %v6623_v3  ;;  %v6204_v54 = vrot.slane %v6203_v29, 4  ;;  %v6822_v11 = vrot.slane %v6820_v7, 4  ;;  %11194 = vmatprep.subr.bf16.mxu1 %v11532_v53  ;;  %v11595_v31 = vld [vmem:[#allocation3 + $0x28] sm:$0xf]  ;;  %v15205_v7 = vld [vmem:[#allocation3 + $0x3c] sm:$0xf] }
 0x3a1   : > { %v10056_v15 = vcombine.low %v6808_v59, %v6818_v49  ;;  %v6825_v51 = vrot.slane %v6823_v45, 5  ;;  %v6831_v46 = vrot.slane %v6829_v42, 5  ;;  %v6835_v48 = vrot.slane %v6833_v12, 4  ;;  %v11538_v45 = vld [vmem:[#allocation9 + $0x220] sm:$0xff]  }
 0x3a2   : > { %8893 = vmatprep.mubr.bf16.mxu1 %v10024_v37  ;;  %v10040_v55 = vcombine.low %v15144_v4, %v15146_v14  ;;  %v6209_v35 = vsel %vm12037_vm14, %v6204_v54, %v6208_v43  ;;  %v6839_v26 = vshll.u32 %v6757_v34, 16  ;;  %v6230_v38 = vshll.u32 %v6148_v56, 16  ;;  %v15207_v34 = vld [vmem:[#allocation3 + $0x40] sm:$0xf]  ;;  %v6758_v37 = vld [vmem:[#allocation3 + $0x44] sm:$0x1] }
 0x3a3   : > { %9054 = vmatprep.mubr.bf16.mxu0 %v10056_v15  ;;  %v6199_v6 = vsel %vm12037_vm14, %v14634_v0, %v14564_v1  ;;  %v6826_v59 = vor.u32 %v6825_v51, %v6822_v11  ;;  %v6836_v63 = vor.u32 %v6835_v48, %v6831_v46  ;;  %v6626_v29 = vrot.slane %v11595_v31, 5  ;;  %11195 = vmatpush3.bf16.msra.mxu1 %v11532_v53 }
 0x3a4   : > { %9055 = vmatmul.mubr.bf16.gmra.mxu0 %v10040_v55  ;;  %v10008_v4 = vcombine.low %v6199_v6, %v6209_v35  ;;  %v6841_v3 = vrot.slane %v6839_v26, 5  ;;  %v6232_v21 = vrot.slane %v6230_v38, 5  ;;  %v9913_v43 = vrot.slane %v6548_v39, 9  ;;  %11196 = vmatprep.subr.bf16.mxu1 %v11535_v24  ;;  %v6149_v39 = vld [vmem:[#allocation3 + $0x38] sm:$0x1]  ;;  %v11541_v6 = vld [vmem:[#allocation9 + $0x218] sm:$0xff]  }
 0x3a5   : > { %v6827_v42 = vrot.slane %v6826_v59, 4  ;;  %v6837_v12 = vrot.slane %v6836_v63, 4  ;;  %v6628_v49 = vrot.slane %v6626_v29, 4  ;;  %v6629_v1 = vrot.slane %v6148_v56, 5  ;;  %v6549_v38 = vld [vmem:[#allocation3 + $0x30] sm:$0xe] }
 0x3a6   : > { %8894 = vmatmul.mubr.bf16.gmra.mxu1 %v10008_v4  ;;  %v6627_v0 = vsel %vm12031_vm13, %v9913_v43, %v6626_v29  ;;  %v6227_v53 = vor.u32 %v14706_v22, %v14657_v5  ;;  %v6844_v54 = vshrl.u32 %v15205_v7, 16  ;;  %v6847_v11 = vshll.u32 %v15205_v7, 16 }
 0x3a7   : > { %v6832_v15 = vsel %vm12037_vm14, %v6827_v42, %v6831_v46  ;;  %v6842_v51 = vsel %vm12037_vm14, %v6837_v12, %v6841_v3  ;;  %v6630_v56 = vsel %vm12031_vm13, %v6628_v49, %v6629_v1  ;;  %v6853_v48 = vshll.u32 %v15207_v34, 16  ;;  %11197 = vmatpush3.bf16.msra.mxu1 %v11535_v24 }
 0x3a8   : > { %v10057_v55 = vcombine.low %v6832_v15, %v6842_v51  ;;  %v10025_v22 = vcombine.low %v6627_v0, %v6630_v56  ;;  %v6228_v35 = vrot.slane %v6227_v53, 4  ;;  %v6846_v26 = vrot.slane %v6844_v54, 4  ;;  %11198 = vmatprep.subr.bf16.mxu1 %v11538_v45 }
 0x3a9   : > { %v6849_v59 = vrot.slane %v6847_v11, 5  ;;  %v6855_v63 = vrot.slane %v6853_v48, 5  ;;  %v6857_v46 = vshrl.u32 %v15207_v34, 16  ;;  %v6863_v31 = vshll.u32 %v6758_v37, 16  ;;  %v15238_v37 = vld [vmem:[#allocation3 + $0x4c] sm:$0xf]  ;;  %v15246_v48 = vpop.f32.mrf.mxu0 }
 0x3aa   : > { %v16762_v29 = vor.u32 %v15107_v61, %v15096_v50  ;;  %9062 = vmatprep.mubr.bf16.mxu0 %v10057_v55  ;;  %8901 = vmatprep.mubr.bf16.mxu1 %v10025_v22  ;;  %v10041_v24 = vcombine.low %v15175_v44, %v15177_v16  ;;  %v6233_v3 = vsel %vm12037_vm14, %v6228_v35, %v6232_v21  ;;  %v6254_v43 = vshll.u32 %v6149_v39, 16  ;;  %v15236_v50 = vld [vmem:[#allocation3 + $0x48] sm:$0xf]  ;;  %v11596_v44 = vld [vmem:[#allocation3 + $0x34] sm:$0xf] }
 0x3ab   : > { %v6223_v42 = vsel %vm12037_vm14, %v14702_v33, %v14657_v5  ;;  %v6850_v12 = vor.u32 %v6849_v59, %v6846_v26  ;;  %v6859_v49 = vrot.slane %v6857_v46, 4  ;;  %v9914_v1 = vrot.slane %v6549_v38, 9  ;;  %11199 = vmatpush3.bf16.msra.mxu1 %v11538_v45  ;;  %v11544_v21 = vld [vmem:[#allocation9 + $0x210] sm:$0xff]  }
 0x3ac   : > { %v15226_v4 = vrot.slane %v16762_v29, 4  ;;  %9063 = vmatmul.mubr.bf16.gmra.mxu0 %v10041_v24  ;;  %v10009_v61 = vcombine.low %v6223_v42, %v6233_v3  ;;  %v6865_v0 = vrot.slane %v6863_v31, 5  ;;  %v6256_v53 = vrot.slane %v6254_v43, 5  ;;  %11200 = vmatprep.subr.bf16.mxu1 %v11541_v6  ;;  %v6150_v31 = vld [vmem:[#allocation3 + $0x44] sm:$0x1] }
 0x3ad   : > { %v6633_v16 = vrot.slane %v11596_v44, 5  ;;  %v6851_v54 = vrot.slane %v6850_v12, 4  ;;  %v6860_v11 = vor.u32 %v6859_v49, %v6855_v63  ;;  %v6636_v15 = vrot.slane %v6149_v39, 5  ;;  %v6759_v39 = vld [vmem:[#allocation3 + $0x50] sm:$0x1]  ;;  %v11547_v29 = vld [vmem:[#allocation9 + $0x208] sm:$0xff]   ;;  %v15262_v44 = vpop.f32.mrf.mxu0 }
 0x3ae   : > { %v6251_v5 = vor.u32 %v14786_v2, %v14755_v62  ;;  %8902 = vmatmul.mubr.bf16.gmra.mxu1 %v10009_v61  ;;  %v6868_v51 = vshrl.u32 %v15236_v50, 16  ;;  %v6871_v56 = vshll.u32 %v15236_v50, 16  ;;  %v6877_v26 = vshll.u32 %v15238_v37, 16  ;;  %v6550_v42 = vld [vmem:[#allocation3 + $0x3c] sm:$0xe] }
 0x3af   : > { %v6634_v33 = vsel %vm12031_vm13, %v9914_v1, %v6633_v16  ;;  %v6635_v45 = vrot.slane %v6633_v16, 4  ;;  %v6856_v55 = vsel %vm12037_vm14, %v6851_v54, %v6855_v63  ;;  %v6861_v22 = vrot.slane %v6860_v11, 4  ;;  %11201 = vmatpush3.bf16.msra.mxu1 %v11541_v6  ;;  %v15258_v6 = vpop.f32.mrf.mxu1  ;;  %v11597_v54 = vld [vmem:[#allocation3 + $0x40] sm:$0xf] }
 0x3b0   : > { %v6252_v35 = vrot.slane %v6251_v5, 4  ;;  %v6870_v38 = vrot.slane %v6868_v51, 4  ;;  %v6873_v59 = vrot.slane %v6871_v56, 5  ;;  %v6881_v46 = vshrl.u32 %v15238_v37, 16  ;;  %11202 = vmatprep.subr.bf16.mxu1 %v11544_v21  ;;  %v11550_v51 = vld [vmem:[#allocation9 + $0x200] sm:$0xff]  }
 0x3b1   : > { %v6637_v2 = vsel %vm12031_vm13, %v6635_v45, %v6636_v15  ;;  %v6866_v24 = vsel %vm12037_vm14, %v6861_v22, %v6865_v0  ;;  %v6879_v43 = vrot.slane %v6877_v26, 5  ;;  %v10042_v49 = vcombine.low %v15205_v7, %v15207_v34  ;;  %v15268_v15 = vld [vmem:[#allocation3 + $0x54] sm:$0xf]  ;;  %v15270_v45 = vld [vmem:[#allocation3 + $0x58] sm:$0xf]  ;;  %v15272_v22 = vpop.f32.mrf.mxu1 }
 0x3b2   : > { %v10026_v63 = vcombine.low %v6634_v33, %v6637_v2  ;;  %v6257_v3 = vsel %vm12037_vm14, %v6252_v35, %v6256_v53  ;;  %v10058_v12 = vcombine.low %v6856_v55, %v6866_v24  ;;  %v6874_v1 = vor.u32 %v6873_v59, %v6870_v38  ;;  %v15280_v2 = vpop.f32.mrf.mxu0  ;;  %v6760_v59 = vld [vmem:[#allocation3 + $0x5c] sm:$0x1] }
 0x3b3   : > { %v6883_v61 = vrot.slane %v6881_v46, 4  ;;  %v6247_v0 = vsel %vm12037_vm14, %v14745_v36, %v14755_v62  ;;  %v6887_v16 = vshll.u32 %v6759_v39, 16  ;;  %v6278_v53 = vshll.u32 %v6150_v31, 16  ;;  %11203 = vmatpush3.bf16.msra.mxu1 %v11544_v21 }
 0x3b4   : > { %8909 = vmatprep.mubr.bf16.mxu1 %v10026_v63  ;;  %v6640_v11 = vrot.slane %v11597_v54, 5  ;;  %9070 = vmatprep.mubr.bf16.mxu0 %v10058_v12  ;;  %v10010_v5 = vcombine.low %v6247_v0, %v6257_v3  ;;  %v6875_v7 = vrot.slane %v6874_v1, 4  ;;  %v9915_v33 = vrot.slane %v6550_v42, 9  ;;  %v6151_v42 = vld [vmem:[#allocation3 + $0x50] sm:$0x1] }
 0x3b5   : > { %v6884_v34 = vor.u32 %v6883_v61, %v6879_v43  ;;  %11204 = vmatprep.subr.bf16.mxu1 %v11547_v29  ;;  %9071 = vmatmul.mubr.bf16.gmra.mxu0 %v10042_v49  ;;  %v6889_v56 = vrot.slane %v6887_v16, 5  ;;  %v6280_v55 = vrot.slane %v6278_v53, 5  ;;  %v6643_v62 = vrot.slane %v6150_v31, 5  ;;  %v6551_v0 = vld [vmem:[#allocation3 + $0x48] sm:$0xe]  ;;  %v15290_v16 = vpop.f32.mrf.mxu1 }
 0x3b6   : > { %v6642_v36 = vrot.slane %v6640_v11, 4  ;;  %8910 = vmatmul.mubr.bf16.gmra.mxu1 %v10010_v5  ;;  %v6880_v21 = vsel %vm12037_vm14, %v6875_v7, %v6879_v43  ;;  %v6641_v39 = vsel %vm12031_vm13, %v9915_v33, %v6640_v11  ;;  %v6275_v26 = vor.u32 %v14801_v23, %v14799_v27  ;;  %v15295_v5 = vpop.f32.mrf.mxu0 }
 0x3b7   : > { %v6885_v35 = vrot.slane %v6884_v34, 4  ;;  %v6892_v46 = vshrl.u32 %v15268_v15, 16  ;;  %v6895_v31 = vshll.u32 %v15268_v15, 16  ;;  %v6901_v24 = vshll.u32 %v15270_v45, 16  ;;  %11205 = vmatpush3.bf16.msra.mxu1 %v11547_v29 }
 0x3b8   : > { %v6644_v38 = vsel %vm12031_vm13, %v6642_v36, %v6643_v62  ;;  %v6276_v43 = vrot.slane %v6275_v26, 4  ;;  %v6905_v23 = vshrl.u32 %v15270_v45, 16  ;;  %11206 = vmatprep.subr.bf16.mxu1 %v11550_v51  ;;  %v6523_v53 = vshrl.u32 %v15090_v57, 16  ;;  %v15305_v26 = vld [vmem:[#allocation3 + $0x64] sm:$0xf] }
 0x3b9   : > { %v6890_v63 = vsel %vm12037_vm14, %v6885_v35, %v6889_v56  ;;  %v10027_v3 = vcombine.low %v6641_v39, %v6644_v38  ;;  %v6894_v49 = vrot.slane %v6892_v46, 4  ;;  %v6897_v1 = vrot.slane %v6895_v31, 5  ;;  %v15303_v39 = vld [vmem:[#allocation3 + $0x60] sm:$0xf]  ;;  %v15307_v46 = vpop.f32.mrf.mxu1 }
 0x3ba   : > { %v10059_v12 = vcombine.low %v6880_v21, %v6890_v63  ;;  %v6903_v61 = vrot.slane %v6901_v24, 5  ;;  %v6281_v29 = vsel %vm12037_vm14, %v6276_v43, %v6280_v55  ;;  %v6907_v54 = vrot.slane %v6905_v23, 4  ;;  %v11598_v55 = vld [vmem:[#allocation3 + $0x4c] sm:$0xf]  ;;  %16763 = vst [vmem:[#allocation41_spill] sm:$0xff] %v15307_v46  ;;  %v15313_v24 = vpop.f32.mrf.mxu0 }
 0x3bb   : > { %8917 = vmatprep.mubr.bf16.mxu1 %v10027_v3  ;;  %v6911_v11 = vshll.u32 %v6760_v59, 16  ;;  %v10043_v7 = vcombine.low %v15236_v50, %v15238_v37  ;;  %v6271_v34 = vsel %vm12037_vm14, %v14839_v28, %v14799_v27  ;;  %v6898_v33 = vor.u32 %v6897_v1, %v6894_v49  ;;  %11207 = vmatpush3.bf16.msra.mxu1 %v11550_v51  ;;  %v6761_v3 = vld [vmem:[#allocation3 + $0x68] sm:$0x1] }
 0x3bc   : > { %9078 = vmatprep.mubr.bf16.mxu0 %v10059_v12  ;;  %v6302_v56 = vshll.u32 %v6151_v42, 16  ;;  %v10011_v36 = vcombine.low %v6271_v34, %v6281_v29  ;;  %v6908_v62 = vor.u32 %v6907_v54, %v6903_v61  ;;  %v9916_v21 = vrot.slane %v6551_v0, 9  ;;  %v15320_v12 = vpop.f32.mrf.mxu1  ;;  %v6152_v29 = vld [vmem:[#allocation3 + $0x5c] sm:$0x1]  ;;  %v6552_v34 = vld [vmem:[#allocation3 + $0x54] sm:$0xe] }
 0x3bd   : > { %v6647_v35 = vrot.slane %v11598_v55, 5  ;;  %9079 = vmatmul.mubr.bf16.gmra.mxu0 %v10043_v7  ;;  %v6899_v38 = vrot.slane %v6898_v33, 4  ;;  %v6913_v50 = vrot.slane %v6911_v11, 5  ;;  %v6650_v59 = vrot.slane %v6151_v42, 5 }
 0x3be   : > { %v6304_v37 = vrot.slane %v6302_v56, 5  ;;  %8918 = vmatmul.mubr.bf16.gmra.mxu1 %v10011_v36  ;;  %v6909_v27 = vrot.slane %v6908_v62, 4  ;;  %v6299_v31 = vor.u32 %v14846_v60, %v14842_v10  ;;  %v6916_v43 = vshrl.u32 %v15303_v39, 16 }
 0x3bf   : > { %v6648_v28 = vsel %vm12031_vm13, %v9916_v21, %v6647_v35  ;;  %v6649_v51 = vrot.slane %v6647_v35, 4  ;;  %v6904_v63 = vsel %vm12037_vm14, %v6899_v38, %v6903_v61  ;;  %v6919_v23 = vshll.u32 %v15303_v39, 16  ;;  %v15329_v21 = vpop.f32.mrf.mxu0 }
 0x3c0   : > { %v6925_v42 = vshll.u32 %v15305_v26, 16  ;;  %v6914_v49 = vsel %vm12037_vm14, %v6909_v27, %v6913_v50  ;;  %v6300_v1 = vrot.slane %v6299_v31, 4  ;;  %v6929_v0 = vshrl.u32 %v15305_v26, 16 }
 0x3c1   : > { %v6651_v60 = vsel %vm12031_vm13, %v6649_v51, %v6650_v59  ;;  %v10060_v61 = vcombine.low %v6904_v63, %v6914_v49  ;;  %v6918_v11 = vrot.slane %v6916_v43, 4  ;;  %v6921_v7 = vrot.slane %v6919_v23, 5  ;;  %v15337_v59 = vpop.f32.mrf.mxu1  ;;  %v11599_v51 = vld [vmem:[#allocation3 + $0x58] sm:$0xf]  ;;  %v15339_v63 = vld [vmem:[#allocation3 + $0x6c] sm:$0xf] }
 0x3c2   : > { %v10028_v54 = vcombine.low %v6648_v28, %v6651_v60  ;;  %v6305_v33 = vsel %vm12037_vm14, %v6300_v1, %v6304_v37  ;;  %v6927_v56 = vrot.slane %v6925_v42, 5  ;;  %v6931_v36 = vrot.slane %v6929_v0, 4  ;;  %v15347_v60 = vpop.f32.mrf.mxu0  ;;  %v6762_v0 = vld [vmem:[#allocation3 + $0x74] sm:$0x1] }
 0x3c3   : > { %v6935_v62 = vshll.u32 %v6761_v3, 16  ;;  %9086 = vmatprep.mubr.bf16.mxu0 %v10060_v61  ;;  %v10044_v55 = vcombine.low %v15268_v15, %v15270_v45  ;;  %v6295_v35 = vsel %vm12037_vm14, %v14867_v9, %v14842_v10  ;;  %v6922_v38 = vor.u32 %v6921_v7, %v6918_v11  ;;  %v15341_v3 = vld [vmem:[#allocation3 + $0x70] sm:$0xf]  ;;  %v15354_v11 = vpop.f32.mrf.mxu1 }
 0x3c4   : > { %8925 = vmatprep.mubr.bf16.mxu1 %v10028_v54  ;;  %v6326_v50 = vshll.u32 %v6152_v29, 16  ;;  %v10012_v37 = vcombine.low %v6295_v35, %v6305_v33  ;;  %v6932_v27 = vor.u32 %v6931_v36, %v6927_v56  ;;  %v9917_v28 = vrot.slane %v6552_v34, 9  ;;  %v6153_v36 = vld [vmem:[#allocation3 + $0x68] sm:$0x1] }
 0x3c5   : > { %v6654_v31 = vrot.slane %v11599_v51, 5  ;;  %9087 = vmatmul.mubr.bf16.gmra.mxu0 %v10044_v55  ;;  %v6923_v15 = vrot.slane %v6922_v38, 4  ;;  %v6937_v45 = vrot.slane %v6935_v62, 5  ;;  %v6657_v23 = vrot.slane %v6152_v29, 5  ;;  %v6553_v38 = vld [vmem:[#allocation3 + $0x60] sm:$0xe]  ;;  %v15363_v51 = vpop.f32.mrf.mxu0 }
 0x3c6   : > { %v6328_v43 = vrot.slane %v6326_v50, 5  ;;  %8926 = vmatmul.mubr.bf16.gmra.mxu1 %v10012_v37  ;;  %v6933_v10 = vrot.slane %v6932_v27, 4  ;;  %v6323_v49 = vor.u32 %v14875_v25, %v14871_v40  ;;  %v6940_v61 = vshrl.u32 %v15339_v63, 16 }
 0x3c7   : > { %v6655_v9 = vsel %vm12031_vm13, %v9917_v28, %v6654_v31  ;;  %v6656_v42 = vrot.slane %v6654_v31, 4  ;;  %v6928_v1 = vsel %vm12037_vm14, %v6923_v15, %v6927_v56  ;;  %v6943_v54 = vshll.u32 %v15339_v63, 16 }
 0x3c8   : > { %v6949_v29 = vshll.u32 %v15341_v3, 16  ;;  %v6938_v7 = vsel %vm12037_vm14, %v6933_v10, %v6937_v45  ;;  %v6324_v34 = vrot.slane %v6323_v49, 4  ;;  %v6953_v33 = vshrl.u32 %v15341_v3, 16  ;;  %v15371_v10 = vpop.f32.mrf.mxu1  ;;  %v11600_v49 = vld [vmem:[#allocation3 + $0x64] sm:$0xf] }
 0x3c9   : > { %v6658_v25 = vsel %vm12031_vm13, %v6656_v42, %v6657_v23  ;;  %v10061_v56 = vcombine.low %v6928_v1, %v6938_v7  ;;  %v6942_v55 = vrot.slane %v6940_v61, 4  ;;  %v6945_v35 = vrot.slane %v6943_v54, 5 }
 0x3ca   : > { %v10029_v62 = vcombine.low %v6655_v9, %v6658_v25  ;;  %v6329_v50 = vsel %vm12037_vm14, %v6324_v34, %v6328_v43  ;;  %v6951_v37 = vrot.slane %v6949_v29, 5  ;;  %v6955_v27 = vrot.slane %v6953_v33, 4  ;;  %v15375_v29 = vld [vmem:[#allocation3 + $0x7c] sm:$0xf]  ;;  %v15381_v34 = vpop.f32.mrf.mxu0 }
 0x3cb   : > { %v6959_v28 = vshll.u32 %v6762_v0, 16  ;;  %9094 = vmatprep.mubr.bf16.mxu0 %v10061_v56  ;;  %v10045_v31 = vcombine.low %v15303_v39, %v15305_v26  ;;  %v6319_v15 = vsel %vm12037_vm14, %v14873_v8, %v14871_v40  ;;  %v6946_v45 = vor.u32 %v6945_v35, %v6942_v55  ;;  %v15373_v0 = vld [vmem:[#allocation3 + $0x78] sm:$0xf]  ;;  %v15389_v35 = vpop.f32.mrf.mxu1 }
 0x3cc   : > { %8933 = vmatprep.mubr.bf16.mxu1 %v10029_v62  ;;  %v6350_v23 = vshll.u32 %v6153_v36, 16  ;;  %v10013_v43 = vcombine.low %v6319_v15, %v6329_v50  ;;  %v6956_v9 = vor.u32 %v6955_v27, %v6951_v37  ;;  %v9918_v42 = vrot.slane %v6553_v38, 9 }
 0x3cd   : > { %v6661_v1 = vrot.slane %v11600_v49, 5  ;;  %9095 = vmatmul.mubr.bf16.gmra.mxu0 %v10045_v31  ;;  %v6947_v61 = vrot.slane %v6946_v45, 4  ;;  %v6961_v54 = vrot.slane %v6959_v28, 5  ;;  %v6664_v26 = vrot.slane %v6153_v36, 5  ;;  %v6763_v36 = vld [vmem:[#allocation3 + $0x80] sm:$0x1] }
 0x3ce   : > { %v6352_v39 = vrot.slane %v6350_v23, 5  ;;  %8934 = vmatmul.mubr.bf16.gmra.mxu1 %v10013_v43  ;;  %v6957_v40 = vrot.slane %v6956_v9, 4  ;;  %v10046_v25 = vcombine.low %v15339_v63, %v15341_v3  ;;  %v6347_v56 = vor.u32 %v14908_v52, %v14902_v17  ;;  %v6554_v9 = vld [vmem:[#allocation3 + $0x6c] sm:$0xe] }
 0x3cf   : > { %v6662_v8 = vsel %vm12031_vm13, %v9918_v42, %v6661_v1  ;;  %v6663_v7 = vrot.slane %v6661_v1, 4  ;;  %v6952_v33 = vsel %vm12037_vm14, %v6947_v61, %v6951_v37  ;;  %v6964_v62 = vshrl.u32 %v15373_v0, 16  ;;  %v6154_v37 = vld [vmem:[#allocation3 + $0x74] sm:$0x1]  ;;  %v15397_v42 = vpop.f32.mrf.mxu0 }
 0x3d0   : > { %v6967_v55 = vshll.u32 %v15373_v0, 16  ;;  %v6962_v38 = vsel %vm12037_vm14, %v6957_v40, %v6961_v54  ;;  %v6973_v3 = vshll.u32 %v15375_v29, 16  ;;  %v6977_v50 = vshrl.u32 %v15375_v29, 16  ;;  %v11601_v54 = vld [vmem:[#allocation3 + $0x70] sm:$0xf]  ;;  %v15405_v40 = vpop.f32.mrf.mxu1 }
 0x3d1   : > { %v6665_v63 = vsel %vm12031_vm13, %v6663_v7, %v6664_v26  ;;  %v10062_v27 = vcombine.low %v6952_v33, %v6962_v38  ;;  %v6348_v28 = vrot.slane %v6347_v56, 4  ;;  %v6966_v31 = vrot.slane %v6964_v62, 4 }
 0x3d2   : > { %v10030_v52 = vcombine.low %v6662_v8, %v6665_v63  ;;  %v6969_v15 = vrot.slane %v6967_v55, 5  ;;  %v6975_v45 = vrot.slane %v6973_v3, 5  ;;  %v6979_v23 = vrot.slane %v6977_v50, 4  ;;  %v15411_v50 = vld [vmem:[#allocation3 + $0x88] sm:$0xf] }
 0x3d3   : > { %v6983_v43 = vshll.u32 %v6763_v36, 16  ;;  %9102 = vmatprep.mubr.bf16.mxu0 %v10062_v27  ;;  %v6343_v49 = vsel %vm12037_vm14, %v14906_v30, %v14902_v17  ;;  %v6353_v1 = vsel %vm12037_vm14, %v6348_v28, %v6352_v39  ;;  %v6374_v61 = vshll.u32 %v6154_v37, 16  ;;  %v15408_v36 = vld [vmem:[#allocation3 + $0x84] sm:$0xf]  ;;  %v15413_v27 = vpop.f32.mrf.mxu0 }
 0x3d4   : > { %8941 = vmatprep.mubr.bf16.mxu1 %v10030_v52  ;;  %v6668_v26 = vrot.slane %v11601_v54, 5  ;;  %v6526_v8 = vshll.u32 %v15090_v57, 16  ;;  %v10014_v7 = vcombine.low %v6343_v49, %v6353_v1  ;;  %v6970_v33 = vor.u32 %v6969_v15, %v6966_v31  ;;  %v15422_v31 = vpop.f32.mrf.mxu1  ;;  %v15456_v57 = vld [vmem:[#allocation3 + $0x90] sm:$0xf] }
 0x3d5   : > { %v6980_v56 = vor.u32 %v6979_v23, %v6975_v45  ;;  %v6532_v62 = vshll.u32 %v15092_v47, 16  ;;  %9103 = vmatmul.mubr.bf16.gmra.mxu0 %v10046_v25  ;;  %v9919_v55 = vrot.slane %v6554_v9, 9  ;;  %v6671_v30 = vrot.slane %v6154_v37, 5  ;;  %v6764_v9 = vld [vmem:[#allocation3 + $0x8c] sm:$0x1] }
 0x3d6   : > { %v6670_v17 = vrot.slane %v6668_v26, 4  ;;  %8942 = vmatmul.mubr.bf16.gmra.mxu1 %v10014_v7  ;;  %v6971_v39 = vrot.slane %v6970_v33, 4  ;;  %v6985_v63 = vrot.slane %v6983_v43, 5  ;;  %v6376_v3 = vrot.slane %v6374_v61, 5 }
 0x3d7   : > { %v6981_v38 = vrot.slane %v6980_v56, 4  ;;  %v6669_v52 = vsel %vm12031_vm13, %v9919_v55, %v6668_v26  ;;  %v6371_v25 = vor.u32 %v14933_v19, %v14929_v32  ;;  %v6988_v37 = vshrl.u32 %v15408_v36, 16  ;;  %v6155_v56 = vld [vmem:[#allocation3 + $0x80] sm:$0x1]  ;;  %v15437_v55 = vpop.f32.mrf.mxu0 }
 0x3d8   : > { %v6672_v28 = vsel %vm12031_vm13, %v6670_v17, %v6671_v30  ;;  %v6976_v15 = vsel %vm12037_vm14, %v6971_v39, %v6975_v45  ;;  %v6991_v49 = vshll.u32 %v15408_v36, 16  ;;  %v6997_v26 = vshll.u32 %v15411_v50, 16 }
 0x3d9   : > { %v6986_v23 = vsel %vm12037_vm14, %v6981_v38, %v6985_v63  ;;  %v10031_v43 = vcombine.low %v6669_v52, %v6672_v28  ;;  %v6372_v61 = vrot.slane %v6371_v25, 4  ;;  %v6990_v54 = vrot.slane %v6988_v37, 4  ;;  %v15445_v38 = vpop.f32.mrf.mxu1  ;;  %v11602_v37 = vld [vmem:[#allocation3 + $0x7c] sm:$0xf] }
 0x3da   : > { %v10063_v1 = vcombine.low %v6976_v15, %v6986_v23  ;;  %v10047_v19 = vcombine.low %v15373_v0, %v15375_v29  ;;  %v6367_v45 = vsel %vm12037_vm14, %v14935_v58, %v14929_v32  ;;  %v6993_v7 = vrot.slane %v6991_v49, 5  ;;  %v6555_v29 = vld [vmem:[#allocation3 + $0x78] sm:$0xe] }
 0x3db   : > { %8949 = vmatprep.mubr.bf16.mxu1 %v10031_v43  ;;  %v7001_v33 = vshrl.u32 %v15411_v50, 16  ;;  %v6377_v17 = vsel %vm12037_vm14, %v6372_v61, %v6376_v3  ;;  %v6999_v30 = vrot.slane %v6997_v26, 5  ;;  %v7007_v39 = vshll.u32 %v6764_v9, 16  ;;  %v15460_v61 = vld [vmem:[#allocation3 + $0x94] sm:$0xf] }
 0x3dc   : > { %9110 = vmatprep.mubr.bf16.mxu0 %v10063_v1  ;;  %v15443_v0 = vadd.f32 %v15262_v44, %v15246_v48  ;;  %v15449_v32 = vrot.slane %v6523_v53, 4  ;;  %v10015_v58 = vcombine.low %v6367_v45, %v6377_v17  ;;  %v6994_v63 = vor.u32 %v6993_v7, %v6990_v54  ;;  %v15458_v53 = vpop.f32.mrf.mxu0  ;;  %v15462_v54 = vpop.f32.mrf.mxu1  ;;  %v16765_v17 = vld [vmem:[#allocation34_spill] sm:$0xff] }
 0x3dd   : > { %v7003_v52 = vrot.slane %v7001_v33, 4  ;;  %v15451_v28 = vrot.slane %v6526_v8, 5  ;;  %9111 = vmatmul.mubr.bf16.gmra.mxu0 %v10047_v19  ;;  %v6398_v25 = vshll.u32 %v6155_v56, 16  ;;  %v6675_v15 = vrot.slane %v11602_v37, 5  ;;  %v16764_v33 = vld [vmem:[#allocation49_spill] sm:$0xff] }
 0x3de   : > { %v15454_v48 = vrot.slane %v6532_v62, 5  ;;  %8950 = vmatmul.mubr.bf16.gmra.mxu1 %v10015_v58  ;;  %v6995_v44 = vrot.slane %v6994_v63, 4  ;;  %v9920_v43 = vrot.slane %v6555_v29, 9  ;;  %v7009_v9 = vrot.slane %v7007_v39, 5  ;;  %v6765_v39 = vld [vmem:[#allocation3 + $0x98] sm:$0x1] }
 0x3df   : > { %v7004_v23 = vor.u32 %v7003_v52, %v6999_v30  ;;  %v6400_v49 = vrot.slane %v6398_v25, 5  ;;  %v6677_v8 = vrot.slane %v6675_v15, 4  ;;  %v6678_v1 = vrot.slane %v6155_v56, 5 }
 0x3e0   : > { %v7000_v62 = vsel %vm12037_vm14, %v6995_v44, %v6999_v30  ;;  %v6676_v19 = vsel %vm12031_vm13, %v9920_v43, %v6675_v15  ;;  %v10048_v45 = vcombine.low %v15408_v36, %v15411_v50  ;;  %v6395_v56 = vor.u32 %v16765_v17, %v16764_v33  ;;  %v6156_v36 = vld [vmem:[#allocation3 + $0x8c] sm:$0x1]  ;;  %v15480_v50 = vpop.f32.mrf.mxu0  ;;  %v6556_v43 = vld [vmem:[#allocation3 + $0x84] sm:$0xe] }
 0x3e1   : > { %v7005_v26 = vrot.slane %v7004_v23, 4  ;;  %v6679_v7 = vsel %vm12031_vm13, %v6677_v8, %v6678_v1  ;;  %v7012_v29 = vshrl.u32 %v15456_v57, 16  ;;  %v7015_v58 = vshll.u32 %v15456_v57, 16  ;;  %v15482_v8 = vpop.f32.mrf.mxu1 }
 0x3e2   : > { %v10032_v63 = vcombine.low %v6676_v19, %v6679_v7  ;;  %v7021_v52 = vshll.u32 %v15460_v61, 16  ;;  %v7025_v25 = vshrl.u32 %v15460_v61, 16  ;;  %v6396_v15 = vrot.slane %v6395_v56, 4 }
 0x3e3   : > { %v7010_v30 = vsel %vm12037_vm14, %v7005_v26, %v7009_v9  ;;  %v7014_v44 = vrot.slane %v7012_v29, 4  ;;  %v7017_v23 = vrot.slane %v7015_v58, 5  ;;  %v7031_v20 = vshll.u32 %v6765_v39, 16  ;;  %v16766_v26 = vld [vmem:[#allocation36_spill] sm:$0xff] }
 0x3e4   : > { %v10064_v37 = vcombine.low %v7000_v62, %v7010_v30  ;;  %8957 = vmatprep.mubr.bf16.mxu1 %v10032_v63  ;;  %v7023_v1 = vrot.slane %v7021_v52, 5  ;;  %v7027_v17 = vrot.slane %v7025_v25, 4  ;;  %v10808_v9 = vadd.f32 %v15329_v21, %v15313_v24  ;;  %v11603_v63 = vld [vmem:[#allocation3 + $0x88] sm:$0xf]  ;;  %v15492_v52 = vpop.f32.mrf.mxu0 }
 0x3e5   : > { %v6391_v19 = vsel %vm12037_vm14, %v16766_v26, %v16764_v33  ;;  %v6401_v62 = vsel %vm12037_vm14, %v6396_v15, %v6400_v49  ;;  %v7018_v7 = vor.u32 %v7017_v23, %v7014_v44  ;;  %v6422_v56 = vshll.u32 %v6156_v36, 16  ;;  %v15496_v33 = vpop.f32.mrf.mxu1  ;;  %v15500_v23 = vld [vmem:[#allocation3 + $0x9c] sm:$0xf]  ;;  %v16769_v26 = vld [vmem:[#allocation43_spill] sm:$0xff] }
 0x3e6   : > { %9118 = vmatprep.mubr.bf16.mxu0 %v10064_v37  ;;  %v10016_v29 = vcombine.low %v6391_v19, %v6401_v62  ;;  %v7028_v58 = vor.u32 %v7027_v17, %v7023_v1  ;;  %v9921_v30 = vrot.slane %v6556_v43, 9  ;;  %v6682_v39 = vrot.slane %v11603_v63, 5  ;;  %v15520_v62 = vld [vmem:[#allocation3 + $0xa4] sm:$0x1] }
 0x3e7   : > { %9119 = vmatmul.mubr.bf16.gmra.mxu0 %v10048_v45  ;;  %v7019_v24 = vrot.slane %v7018_v7, 4  ;;  %v7033_v21 = vrot.slane %v7031_v20, 5  ;;  %v6424_v25 = vrot.slane %v6422_v56, 5  ;;  %v10696_v37 = vadd.f32 %v15337_v59, %v15320_v12  ;;  %v15510_v59 = vld [vmem:[#allocation3 + $0xa0] sm:$0xf] }
 0x3e8   : > { %8958 = vmatmul.mubr.bf16.gmra.mxu1 %v10016_v29  ;;  %v7029_v49 = vrot.slane %v7028_v58, 4  ;;  %v6684_v15 = vrot.slane %v6682_v39, 4  ;;  %v6685_v44 = vrot.slane %v6156_v36, 5  ;;  %v10811_v45 = vadd.f32 %v15363_v51, %v15347_v60  ;;  %v15527_v29 = vpop.f32.mrf.mxu1 }
 0x3e9   : > { %v7024_v43 = vsel %vm12037_vm14, %v7019_v24, %v7023_v1  ;;  %v6683_v20 = vsel %vm12031_vm13, %v9921_v30, %v6682_v39  ;;  %v15506_v17 = vadd.f32 %v10808_v9, %v10696_v37  ;;  %v10699_v12 = vadd.f32 %v15371_v10, %v15354_v11  ;;  %v16768_v1 = vld [vmem:[#allocation50_spill] sm:$0xff]  ;;  %v15522_v9 = vpop.f32.mrf.mxu0  ;;  %v16771_v24 = vld [vmem:[#allocation52_spill] sm:$0xff] }
 0x3ea   : > { %v7034_v36 = vsel %vm12037_vm14, %v7029_v49, %v7033_v21  ;;  %v6686_v60 = vsel %vm12031_vm13, %v6684_v15, %v6685_v44  ;;  %v10049_v51 = vcombine.low %v15456_v57, %v15460_v61  ;;  %v6419_v19 = vor.u32 %v16769_v26, %v16768_v1  ;;  %v6157_v39 = vld [vmem:[#allocation3 + $0x98] sm:$0x1]  ;;  %v6557_v44 = vld [vmem:[#allocation3 + $0x90] sm:$0xe] }
 0x3eb   : > { %16767 = vst [vmem:[#allocation44_spill] sm:$0xff] %v15506_v17  ;;  %v10065_v7 = vcombine.low %v7024_v43, %v7034_v36  ;;  %v10033_v11 = vcombine.low %v6683_v20, %v6686_v60  ;;  %v15524_v10 = vadd.f32 %v10811_v45, %v10699_v12  ;;  %v7036_v56 = vshrl.u32 %v15500_v23, 16 }
 0x3ec   : > { %v6420_v58 = vrot.slane %v6419_v19, 4  ;;  %v7039_v30 = vshll.u32 %v15500_v23, 16  ;;  %v7045_v57 = vshll.u32 %v15510_v59, 16  ;;  %v7049_v63 = vshrl.u32 %v15510_v59, 16 }
 0x3ed   : > { %16770 = vst [vmem:[#allocation37_spill] sm:$0xff] %v15524_v10  ;;  %9126 = vmatprep.mubr.bf16.mxu0 %v10065_v7  ;;  %8965 = vmatprep.mubr.bf16.mxu1 %v10033_v11  ;;  %v6415_v21 = vsel %vm12037_vm14, %v16771_v24, %v16768_v1  ;;  %v7038_v37 = vrot.slane %v7036_v56, 4  ;;  %v7055_v49 = vshll.u32 %v15520_v62, 16  ;;  %v10814_v15 = vadd.f32 %v15397_v42, %v15381_v34 }
 0x3ee   : > { %v6425_v45 = vsel %vm12037_vm14, %v6420_v58, %v6424_v25  ;;  %v7041_v43 = vrot.slane %v7039_v30, 5  ;;  %v7047_v20 = vrot.slane %v7045_v57, 5  ;;  %v7051_v12 = vrot.slane %v7049_v63, 4 }
 0x3ef   : > { %9127 = vmatmul.mubr.bf16.gmra.mxu0 %v10049_v51  ;;  %v15541_v36 = vpop.f32.mrf.mxu0  ;;  %v10017_v1 = vcombine.low %v6415_v21, %v6425_v45  ;;  %v7057_v26 = vrot.slane %v7055_v49, 5  ;;  %v6446_v19 = vshll.u32 %v6157_v39, 16  ;;  %v15545_v7 = vpop.f32.mrf.mxu1  ;;  %v9922_v42 = vrot.slane %v6557_v44, 9  ;;  %v11604_v51 = vld [vmem:[#allocation3 + $0x94] sm:$0xf] }
 0x3f0   : > { %v7042_v11 = vor.u32 %v7041_v43, %v7038_v37  ;;  %v7052_v34 = vor.u32 %v7051_v12, %v7047_v20  ;;  %v6689_v56 = vrot.slane %v11604_v51, 5  ;;  %v6692_v25 = vrot.slane %v6157_v39, 5  ;;  %v15557_v45 = vld [vmem:[#allocation3 + $0xa8] sm:$0xf] }
 0x3f1   : > { %v15547_v24 = vpop.f32.mrf.mxu0  ;;  %8966 = vmatmul.mubr.bf16.gmra.mxu1 %v10017_v1  ;;  %v10702_v58 = vadd.f32 %v15405_v40, %v15389_v35  ;;  %v10817_v30 = vadd.f32 %v15437_v55, %v15413_v27  ;;  %v10705_v57 = vadd.f32 %v15445_v38, %v15422_v31  ;;  %v15555_v63 = vpop.f32.mrf.mxu1  ;;  %v6448_v49 = vrot.slane %v6446_v19, 5  ;;  %v15569_v31 = vld [vmem:[#allocation3 + $0xac] sm:$0xf]  ;;  %v15571_v55 = vld [vmem:[#allocation3 + $0xb0] sm:$0x1]  ;;  %v16774_v19 = vld [vmem:[#allocation39_spill] sm:$0xff] }
 0x3f2   : > { %v7043_v21 = vrot.slane %v7042_v11, 4  ;;  %v7053_v37 = vrot.slane %v7052_v34, 4  ;;  %v6691_v44 = vrot.slane %v6689_v56, 4  ;;  %v6690_v39 = vsel %vm12031_vm13, %v9922_v42, %v6689_v56  ;;  %v16775_v11 = vld [vmem:[#allocation28_spill] sm:$0xff]  ;;  %v6158_v42 = vld [vmem:[#allocation3 + $0xa4] sm:$0x1] }
 0x3f3   : > { %v15559_v43 = vpop.f32.mrf.mxu0  ;;  %v15563_v35 = vadd.f32 %v10814_v15, %v10702_v58  ;;  %v15565_v40 = vadd.f32 %v10817_v30, %v10705_v57  ;;  %v10050_v27 = vcombine.low %v15500_v23, %v15510_v59  ;;  %v15573_v38 = vpop.f32.mrf.mxu1  ;;  %v6443_v34 = vor.u32 %v16775_v11, %v16774_v19 }
 0x3f4   : > { %v7048_v12 = vsel %vm12037_vm14, %v7043_v21, %v7047_v20  ;;  %v7058_v1 = vsel %vm12037_vm14, %v7053_v37, %v7057_v26  ;;  %v6693_v15 = vsel %vm12031_vm13, %v6691_v44, %v6692_v25  ;;  %v7060_v58 = vshrl.u32 %v15557_v45, 16 }
 0x3f5   : > { %16772 = vst [vmem:[#allocation42_spill] sm:$0xff] %v15563_v35  ;;  %16773 = vst [vmem:[#allocation38_spill] sm:$0xff] %v15565_v40  ;;  %v15583_v23 = vpop.f32.mrf.mxu0  ;;  %v10066_v51 = vcombine.low %v7048_v12, %v7058_v1  ;;  %v10034_v56 = vcombine.low %v6690_v39, %v6693_v15  ;;  %v7063_v30 = vshll.u32 %v15557_v45, 16  ;;  %v6444_v57 = vrot.slane %v6443_v34, 4  ;;  %v6558_v39 = vld [vmem:[#allocation3 + $0x9c] sm:$0xe]  ;;  %v15592_v1 = vpop.f32.mrf.mxu1 }
 0x3f6   : > { %v7069_v20 = vshll.u32 %v15569_v31, 16  ;;  %v7073_v26 = vshrl.u32 %v15569_v31, 16  ;;  %v7079_v21 = vshll.u32 %v15571_v55, 16  ;;  %v7062_v25 = vrot.slane %v7060_v58, 4  ;;  %v16776_v15 = vld [vmem:[#allocation47_spill] sm:$0xff] }
 0x3f7   : > { %9134 = vmatprep.mubr.bf16.mxu0 %v10066_v51  ;;  %8973 = vmatprep.mubr.bf16.mxu1 %v10034_v56  ;;  %v7065_v37 = vrot.slane %v7063_v30, 5  ;;  %v10820_v44 = vadd.f32 %v15480_v50, %v15458_v53  ;;  %v6470_v12 = vshll.u32 %v6158_v42, 16  ;;  %v6439_v11 = vsel %vm12037_vm14, %v16776_v15, %v16774_v19  ;;  %v11605_v35 = vld [vmem:[#allocation3 + $0xa0] sm:$0xf] }
 0x3f8   : > { %9135 = vmatmul.mubr.bf16.gmra.mxu0 %v10050_v27  ;;  %v6449_v34 = vsel %vm12037_vm14, %v6444_v57, %v6448_v49  ;;  %v7071_v51 = vrot.slane %v7069_v20, 5  ;;  %v7075_v56 = vrot.slane %v7073_v26, 4  ;;  %v7081_v53 = vrot.slane %v7079_v21, 5  ;;  %v15610_v26 = vld [vmem:[#allocation3 + $0xb4] sm:$0xf] }
 0x3f9   : > { %v15600_v58 = vpop.f32.mrf.mxu0  ;;  %v10018_v30 = vcombine.low %v6439_v11, %v6449_v34  ;;  %v7066_v3 = vor.u32 %v7065_v37, %v7062_v25  ;;  %v6472_v50 = vrot.slane %v6470_v12, 5  ;;  %v9923_v40 = vrot.slane %v6558_v39, 9 }
 0x3fa   : > { %v7076_v60 = vor.u32 %v7075_v56, %v7071_v51  ;;  %v6696_v27 = vrot.slane %v11605_v35, 5  ;;  %v10708_v10 = vadd.f32 %v15482_v8, %v15462_v54  ;;  %v6699_v49 = vrot.slane %v6158_v42, 5  ;;  %v15618_v8 = vld [vmem:[#allocation3 + $0xb8] sm:$0xf] }
 0x3fb   : > { %v15604_v17 = vpop.f32.mrf.mxu0  ;;  %8974 = vmatmul.mubr.bf16.gmra.mxu1 %v10018_v30  ;;  %v7067_v19 = vrot.slane %v7066_v3, 4  ;;  %v10823_v57 = vadd.f32 %v15522_v9, %v15492_v52  ;;  %v10711_v20 = vadd.f32 %v15527_v29, %v15496_v33  ;;  %v15612_v21 = vpop.f32.mrf.mxu1  ;;  %v10051_v54 = vcombine.low %v15557_v45, %v15569_v31  ;;  %v16779_v29 = vld [vmem:[#allocation33_spill] sm:$0xff] }
 0x3fc   : > { %v7077_v25 = vrot.slane %v7076_v60, 4  ;;  %v6698_v35 = vrot.slane %v6696_v27, 4  ;;  %v15614_v37 = vadd.f32 %v10820_v44, %v10708_v10  ;;  %v6697_v33 = vsel %vm12031_vm13, %v9923_v40, %v6696_v27  ;;  %v16780_v60 = vld [vmem:[#allocation25_spill] sm:$0xff]  ;;  %v15630_v10 = vld [vmem:[#allocation3 + $0xbc] sm:$0x1] }
 0x3fd   : > { %v15620_v3 = vpop.f32.mrf.mxu0  ;;  %v7072_v52 = vsel %vm12037_vm14, %v7067_v19, %v7071_v51  ;;  %v15626_v9 = vadd.f32 %v10823_v57, %v10711_v20  ;;  %v6467_v42 = vor.u32 %v16780_v60, %v16779_v29  ;;  %v15632_v44 = vpop.f32.mrf.mxu1  ;;  %v7084_v39 = vshrl.u32 %v15610_v26, 16  ;;  %v6159_v30 = vld [vmem:[#allocation3 + $0xb0] sm:$0x1]  ;;  %v6559_v20 = vld [vmem:[#allocation3 + $0xa8] sm:$0xe] }
 0x3fe   : > { %16777 = vst [vmem:[#allocation46_spill] sm:$0xff] %v15614_v37  ;;  %v7082_v45 = vsel %vm12037_vm14, %v7077_v25, %v7081_v53  ;;  %v6700_v12 = vsel %vm12031_vm13, %v6698_v35, %v6699_v49  ;;  %v7087_v15 = vshll.u32 %v15610_v26, 16  ;;  %v7093_v56 = vshll.u32 %v15618_v8, 16  ;;  %v16781_v25 = vld [vmem:[#allocation35_spill] sm:$0xff]  ;;  %v11606_v37 = vld [vmem:[#allocation3 + $0xac] sm:$0xf] }
 0x3ff   : > { %16778 = vst [vmem:[#allocation45_spill] sm:$0xff] %v15626_v9  ;;  %v15640_v40 = vpop.f32.mrf.mxu0  ;;  %v10067_v11 = vcombine.low %v7072_v52, %v7082_v45  ;;  %v10035_v34 = vcombine.low %v6697_v33, %v6700_v12  ;;  %v6468_v51 = vrot.slane %v6467_v42, 4  ;;  %v15643_v27 = vpop.f32.mrf.mxu1  ;;  %v7086_v19 = vrot.slane %v7084_v39, 4 }
 0x400   : > { %v7089_v57 = vrot.slane %v7087_v15, 5  ;;  %v7097_v53 = vshrl.u32 %v15618_v8, 16  ;;  %v7103_v49 = vshll.u32 %v15630_v10, 16  ;;  %v6463_v35 = vsel %vm12037_vm14, %v16781_v25, %v16779_v29 }
 0x401   : > { %9142 = vmatprep.mubr.bf16.mxu0 %v10067_v11  ;;  %8981 = vmatprep.mubr.bf16.mxu1 %v10035_v34  ;;  %v6473_v52 = vsel %vm12037_vm14, %v6468_v51, %v6472_v50  ;;  %v7095_v33 = vrot.slane %v7093_v56, 5  ;;  %v10826_v60 = vadd.f32 %v15547_v24, %v15541_v36  ;;  %v15655_v42 = vpop.f32.mrf.mxu1  ;;  %v6494_v34 = vshll.u32 %v6159_v30, 16 }
 0x402   : > { %9143 = vmatmul.mubr.bf16.gmra.mxu0 %v10051_v54  ;;  %v10019_v45 = vcombine.low %v6463_v35, %v6473_v52  ;;  %v7090_v12 = vor.u32 %v7089_v57, %v7086_v19  ;;  %v7099_v39 = vrot.slane %v7097_v53, 4  ;;  %v7105_v15 = vrot.slane %v7103_v49, 5  ;;  %v15657_v11 = vpop.f32.mrf.mxu0  ;;  %v16785_v35 = vld [vmem:[#allocation26_spill] sm:$0xff] }
 0x403   : > { %v9924_v9 = vrot.slane %v6559_v20, 9  ;;  %v6703_v29 = vrot.slane %v11606_v37, 5  ;;  %v6706_v25 = vrot.slane %v6159_v30, 5  ;;  %v10714_v36 = vadd.f32 %v15555_v63, %v15545_v7  ;;  %v15669_v30 = vld [vmem:[#allocation3 + $0xc0] sm:$0xf] }
 0x404   : > { %8982 = vmatmul.mubr.bf16.gmra.mxu1 %v10019_v45  ;;  %v7091_v50 = vrot.slane %v7090_v12, 4  ;;  %v7100_v51 = vor.u32 %v7099_v39, %v7095_v33  ;;  %v10829_v24 = vadd.f32 %v15583_v23, %v15559_v43  ;;  %v15663_v54 = vpop.f32.mrf.mxu0  ;;  %v6496_v56 = vrot.slane %v6494_v34, 5  ;;  %v15679_v23 = vld [vmem:[#allocation3 + $0xc4] sm:$0xf]  ;;  %v15693_v45 = vld [vmem:[#allocation3 + $0xc8] sm:$0x1] }
 0x405   : > { %v6704_v19 = vsel %vm12031_vm13, %v9924_v9, %v6703_v29  ;;  %v6705_v57 = vrot.slane %v6703_v29, 4  ;;  %v10717_v37 = vadd.f32 %v15592_v1, %v15573_v38  ;;  %v15671_v53 = vpop.f32.mrf.mxu1  ;;  %v15675_v49 = vadd.f32 %v10826_v60, %v10714_v36  ;;  %v16784_v20 = vld [vmem:[#allocation55_spill] sm:$0xff] }
 0x406   : > { %v7096_v7 = vsel %vm12037_vm14, %v7091_v50, %v7095_v33  ;;  %v7101_v63 = vrot.slane %v7100_v51, 4  ;;  %v10052_v43 = vcombine.low %v15610_v26, %v15618_v8  ;;  %v15681_v9 = vpop.f32.mrf.mxu0  ;;  %v6487_v52 = vsel %vm12037_vm14, %v16785_v35, %v16784_v20  ;;  %v16786_v33 = vld [vmem:[#allocation53_spill] sm:$0xff] }
 0x407   : > { %16782 = vst [vmem:[#allocation20_spill] sm:$0xff] %v15675_v49  ;;  %v6707_v38 = vsel %vm12031_vm13, %v6705_v57, %v6706_v25  ;;  %v15685_v1 = vadd.f32 %v10829_v24, %v10717_v37  ;;  %v6491_v60 = vor.u32 %v16786_v33, %v16784_v20  ;;  %v15695_v26 = vpop.f32.mrf.mxu1  ;;  %v7108_v34 = vshrl.u32 %v15669_v30, 16  ;;  %v6160_v25 = vld [vmem:[#allocation3 + $0xbc] sm:$0x1] }
 0x408   : > { %v7106_v12 = vsel %vm12037_vm14, %v7101_v63, %v7105_v15  ;;  %v10036_v39 = vcombine.low %v6704_v19, %v6707_v38  ;;  %v7111_v29 = vshll.u32 %v15669_v30, 16  ;;  %v15701_v50 = vpop.f32.mrf.mxu0  ;;  %v7117_v24 = vshll.u32 %v15679_v23, 16  ;;  %v6560_v63 = vld [vmem:[#allocation3 + $0xb4] sm:$0xe] }
 0x409   : > { %16783 = vst [vmem:[#allocation51_spill] sm:$0xff] %v15685_v1  ;;  %v10068_v51 = vcombine.low %v7096_v7, %v7106_v12  ;;  %v6492_v36 = vrot.slane %v6491_v60, 4  ;;  %v7121_v57 = vshrl.u32 %v15679_v23, 16  ;;  %v15705_v37 = vpop.f32.mrf.mxu1  ;;  %v7110_v20 = vrot.slane %v7108_v34, 4 }
 0x40a   : > { %8989 = vmatprep.mubr.bf16.mxu1 %v10036_v39  ;;  %v7113_v35 = vrot.slane %v7111_v29, 5  ;;  %v7127_v15 = vshll.u32 %v15693_v45, 16  ;;  %v10832_v19 = vadd.f32 %v15604_v17, %v15600_v58  ;;  %v7119_v38 = vrot.slane %v7117_v24, 5 }
 0x40b   : > { %9150 = vmatprep.mubr.bf16.mxu0 %v10068_v51  ;;  %v6497_v7 = vsel %vm12037_vm14, %v6492_v36, %v6496_v56  ;;  %v7123_v33 = vrot.slane %v7121_v57, 4  ;;  %v6518_v60 = vshll.u32 %v6160_v25, 16  ;;  %v10728_v12 = vpop.f32.mrf.mxu1  ;;  %v16787_v1 = vor.u32 %v15451_v28, %v15449_v32  ;;  %v11607_v36 = vld [vmem:[#allocation3 + $0xb8] sm:$0xf] }
 0x40c   : > { %v16788_v34 = vshrl.u32 %v15092_v47, 16  ;;  %9151 = vmatmul.mubr.bf16.gmra.mxu0 %v10052_v43  ;;  %v10020_v17 = vcombine.low %v6487_v52, %v6497_v7  ;;  %v7114_v58 = vor.u32 %v7113_v35, %v7110_v20  ;;  %v10842_v51 = vpop.f32.mrf.mxu0  ;;  %v7129_v46 = vrot.slane %v7127_v15, 5 }
 0x40d   : > { %v15715_v39 = vrot.slane %v16787_v1, 4  ;;  %v7124_v49 = vor.u32 %v7123_v33, %v7119_v38  ;;  %v9925_v56 = vrot.slane %v6560_v63, 9  ;;  %v6710_v24 = vrot.slane %v11607_v36, 5  ;;  %v16790_v33 = vld [vmem:[#allocation56_spill] sm:$0xff] }
 0x40e   : > { %v15719_v29 = vrot.slane %v16788_v34, 4  ;;  %8990 = vmatmul.mubr.bf16.gmra.mxu1 %v10020_v17  ;;  %v7115_v57 = vrot.slane %v7114_v58, 4  ;;  %v10720_v32 = vadd.f32 %v15632_v44, %v15612_v21  ;;  %v10835_v28 = vadd.f32 %v15640_v40, %v15620_v3  ;;  %v15727_v43 = vpop.f32.mrf.mxu1  ;;  %v10843_v1 = vpop.f32.mrf.mxu0  ;;  %v6561_v3 = vld [vmem:[#allocation3 + $0xc0] sm:$0xe]  ;;  %v6161_v34 = vld [vmem:[#allocation3 + $0xc8] sm:$0x1] }
 0x40f   : > { %v10723_v47 = vadd.f32 %v15655_v42, %v15643_v27  ;;  %v7125_v52 = vrot.slane %v7124_v49, 4  ;;  %v6520_v20 = vrot.slane %v6518_v60, 5  ;;  %v6712_v35 = vrot.slane %v6710_v24, 4 }
 0x410   : > { %v6713_v15 = vrot.slane %v6160_v25, 5  ;;  %v7120_v63 = vsel %vm12037_vm14, %v7115_v57, %v7119_v38  ;;  %v6711_v7 = vsel %vm12031_vm13, %v9925_v56, %v6710_v24  ;;  %v15733_v21 = vadd.f32 %v10832_v19, %v10720_v32  ;;  %v10731_v40 = vpop.f32.mrf.mxu1  ;;  %v10845_v27 = vpop.f32.mrf.mxu0  ;;  %v16789_v25 = vld [vmem:[#allocation40_spill] sm:$0xff]  ;;  %v11608_v32 = vld [vmem:[#allocation3 + $0xc4] sm:$0xf] }
 0x411   : > { %v15735_v44 = vadd.f32 %v10835_v28, %v10723_v47  ;;  %v7130_v42 = vsel %vm12037_vm14, %v7125_v52, %v7129_v46  ;;  %v6515_v60 = vor.u32 %v16790_v33, %v16789_v25  ;;  %v10838_v38 = vadd.f32 %v15663_v54, %v15657_v11  ;;  %v4920_v54 = vld [vmem:[#allocation3 + $0xcc] sm:$0x1] }
 0x412   : > { %v6714_v49 = vsel %vm12031_vm13, %v6712_v35, %v6713_v15  ;;  %v10069_v19 = vcombine.low %v7120_v63, %v7130_v42  ;;  %v10053_v58 = vcombine.low %v15669_v30, %v15679_v23  ;;  %v6511_v46 = vsel %vm12037_vm14, %v15226_v4, %v16789_v25  ;;  %v10733_v56 = vpop.f32.mrf.mxu1  ;;  %v10846_v36 = vpop.f32.mrf.mxu0  ;;  %v4974_v4 = vld [vmem:[#allocation3 + $0xd4] sm:$0x1]  ;;  %v15756_v15 = vld [vmem:[#allocation3 + $0xd0] sm:$0xf] }
 0x413   : > { %v10037_v17 = vcombine.low %v6711_v7, %v6714_v49  ;;  %v6516_v24 = vrot.slane %v6515_v60, 4  ;;  %v9926_v57 = vrot.slane %v6561_v3, 9  ;;  %v6717_v28 = vrot.slane %v11608_v32, 5 }
 0x414   : > { %v10726_v11 = vadd.f32 %v15695_v26, %v15671_v53  ;;  %9158 = vmatprep.mubr.bf16.mxu0 %v10069_v19  ;;  %v6542_v47 = vshll.u32 %v6161_v34, 16  ;;  %v6720_v52 = vrot.slane %v6161_v34, 5  ;;  %v10841_v30 = vadd.f32 %v15701_v50, %v15681_v9  ;;  %v10734_v63 = vpop.f32.mrf.mxu1  ;;  %v10848_v7 = vpop.f32.mrf.mxu0 }
 0x415   : > { %8997 = vmatprep.mubr.bf16.mxu1 %v10037_v17  ;;  %v10729_v35 = vadd.f32 %v10728_v12, %v15705_v37  ;;  %9159 = vmatmul.mubr.bf16.gmra.mxu0 %v10053_v58  ;;  %v6521_v3 = vsel %vm12037_vm14, %v6516_v24, %v6520_v20  ;;  %v6718_v53 = vsel %vm12031_vm13, %v9926_v57, %v6717_v28  ;;  %v6719_v26 = vrot.slane %v6717_v28, 4  ;;  %v7155_v24 = vld [vmem:[#allocation3 + $0x18] sm:$0xe]  ;;  %v11609_v57 = vld [vmem:[#allocation3 + $0x1c] sm:$0xf] }
 0x416   : > { %v15762_v42 = vadd.f32 %v10838_v38, %v10726_v11  ;;  %v10021_v49 = vcombine.low %v6511_v46, %v6521_v3  ;;  %v6539_v9 = vor.u32 %v15719_v29, %v15454_v48  ;;  %v10844_v50 = vadd.f32 %v10843_v1, %v10842_v51  ;;  %v10849_v37 = vpop.f32.mrf.mxu0  ;;  %v7156_v11 = vld [vmem:[#allocation3 + $0x24] sm:$0xe] }
 0x417   : > { %v15764_v25 = vadd.f32 %v10841_v30, %v10729_v35  ;;  %v6721_v12 = vsel %vm12031_vm13, %v6719_v26, %v6720_v52  ;;  %v4921_v20 = vsel %vm11978_vm3, 0, %v4920_v54  ;;  %v4975_v34 = vsel %vm11983_vm4, 0, %v4974_v4  ;;  %v10736_v19 = vpop.f32.mrf.mxu1  ;;  %v11610_v26 = vld [vmem:[#allocation3 + $0x20] sm:$0x1] }
 0x418   : > { %v7141_v38 = vshll.u32 %v15756_v15, 16  ;;  %8998 = vmatmul.mubr.bf16.gmra.mxu1 %v10021_v49  ;;  %v6544_v17 = vrot.slane %v6542_v47, 5  ;;  %v10038_v58 = vcombine.low %v6718_v53, %v6721_v12  ;;  %v6540_v46 = vrot.slane %v6539_v9, 4  ;;  %4922 = vst [vmem:[#allocation3 + $0xcc] sm:$0x1] %v4921_v20  ;;  %v10851_v51 = vpop.f32.mrf.mxu0 }
 0x419   : > { %4976 = vst [vmem:[#allocation3 + $0xd4] sm:$0x1] %v4975_v34  ;;  %v7145_v29 = vshrl.u32 %v15756_v15, 16  ;;  %v7221_v32 = vrot.slane %v11609_v57, 5  ;;  %v10732_v28 = vadd.f32 %v10731_v40, %v15727_v43  ;;  %v10737_v54 = vpop.f32.mrf.mxu1  ;;  %v10847_v30 = vadd.f32 %v10846_v36, %v10845_v27 }
 0x41a   : > { %v15776_v1 = vrot.slane %v7141_v38, 5  ;;  %9005 = vmatprep.mubr.bf16.mxu1 %v10038_v58  ;;  %v6545_v47 = vsel %vm12037_vm14, %v6540_v46, %v6544_v17  ;;  %v10735_v35 = vadd.f32 %v10734_v63, %v10733_v56  ;;  %v10852_v4 = vpop.f32.mrf.mxu0  ;;  %v6535_v3 = vsel %vm12037_vm14, %v15715_v39, %v15454_v48  ;;  %v11611_v56 = vld [vmem:[#allocation3 + $0x34] sm:$0xf] }
 0x41b   : > { %v7147_v52 = vrot.slane %v7145_v29, 4  ;;  %v7223_v53 = vrot.slane %v7221_v32, 4  ;;  %v7224_v49 = vrot.slane %v11610_v26, 5  ;;  %v15785_v9 = vadd.f32 %v10844_v50, %v10732_v28  ;;  %v10739_v43 = vpop.f32.mrf.mxu1 }
 0x41c   : > { %v9927_v40 = vrot.slane %v7155_v24, 9  ;;  %v15787_v12 = vadd.f32 %v10847_v30, %v10735_v35  ;;  %v9928_v33 = vrot.slane %v7156_v11, 9  ;;  %v10850_v20 = vadd.f32 %v10849_v37, %v10848_v7 }
 0x41d   : > { %v10022_v60 = vcombine.low %v6535_v3, %v6545_v47  ;;  %v7225_v27 = vsel %vm12031_vm13, %v7223_v53, %v7224_v49  ;;  %v7235_v36 = vrot.slane %v11611_v56, 5  ;;  %v10740_v63 = vpop.f32.mrf.mxu1  ;;  %v7148_v48 = vor.u32 %v7147_v52, %v15776_v1  ;;  %v11613_v49 = vld [vmem:[#allocation3 + $0x40] sm:$0xf] }
 0x41e   : > { %v7222_v39 = vsel %vm12031_vm13, %v9927_v40, %v7221_v32  ;;  %v16793_v50 = vrot.slane %v15146_v14, 5  ;;  %v10738_v38 = vadd.f32 %v10737_v54, %v10736_v19  ;;  %v10854_v17 = vpop.f32.mrf.mxu0  ;;  %v10853_v29 = vadd.f32 %v10852_v4, %v10851_v51  ;;  %v7157_v19 = vld [vmem:[#allocation3 + $0x30] sm:$0xe]  ;;  %v11612_v54 = vld [vmem:[#allocation3 + $0x38] sm:$0x1] }
 0x41f   : > { %v15798_v7 = vld [vmem:[#allocation3 + $0xcc] sm:$0xf]  ;;  %v10071_v58 = vcombine.low %v7222_v39, %v7225_v27  ;;  %v7237_v32 = vrot.slane %v7235_v36, 4  ;;  %v7238_v47 = vrot.slane %v11612_v54, 5  ;;  %v10741_v30 = vadd.f32 %v10740_v63, %v10739_v43  ;;  %v7159_v54 = vld [vmem:[#allocation3 + $0x48] sm:$0xe] }
 0x420   : > { %v7229_v34 = vsel %vm12031_vm13, %v9928_v33, %v16793_v50  ;;  %v15800_v37 = vld [vmem:[#allocation3 + $0xd4] sm:$0x1]  ;;  %9006 = vmatmul.mubr.bf16.gmra.mxu1 %v10022_v60  ;;  %v7132_v24 = vshrl.u32 %v15798_v7, 16  ;;  %v7135_v57 = vshll.u32 %v15798_v7, 16  ;;  %v10742_v28 = vpop.f32.mrf.mxu1  ;;  %v10855_v11 = vpop.f32.mrf.mxu0  ;;  %v15806_v52 = vadd.f32 %v10850_v20, %v10738_v38  ;;  %v11614_v39 = vld [vmem:[#allocation3 + $0x4c] sm:$0xf] }
 0x421   : > { %v10072_v46 = vcombine.low %v7229_v34, %v15183_v41  ;;  %v7151_v14 = vshll.u32 %v15800_v37, 16  ;;  %11208 = vmatprep.mubr.bf16.mxu1 %v10071_v58  ;;  %v7149_v51 = vrot.slane %v7148_v48, 4  ;;  %v15808_v26 = vadd.f32 %v10853_v29, %v10741_v30  ;;  %v11615_v30 = vld [vmem:[#allocation3 + $0x44] sm:$0x1] }
 0x422   : > { %v7134_v35 = vrot.slane %v7132_v24, 4  ;;  %v7137_v41 = vrot.slane %v7135_v57, 5  ;;  %v10743_v3 = vpop.f32.mrf.mxu1  ;;  %v10857_v53 = vpop.f32.mrf.mxu0  ;;  %v7242_v40 = vrot.slane %v11613_v49, 5  ;;  %v10856_v33 = vadd.f32 %v10855_v11, %v10854_v17 }
 0x423   : > { %v7153_v4 = vrot.slane %v7151_v14, 5  ;;  %v9929_v27 = vrot.slane %v7157_v19, 9  ;;  %v7239_v56 = vsel %vm12031_vm13, %v7237_v32, %v7238_v47  ;;  %v7249_v20 = vrot.slane %v11614_v39, 5  ;;  %v7158_v19 = vld [vmem:[#allocation3 + $0x3c] sm:$0xe] }
 0x424   : > { %v7138_v60 = vor.u32 %v7137_v41, %v7134_v35  ;;  %v10745_v50 = vpop.f32.mrf.mxu1  ;;  %v10858_v43 = vpop.f32.mrf.mxu0  ;;  %v10744_v63 = vadd.f32 %v10743_v3, %v10742_v28  ;;  %v7244_v57 = vrot.slane %v7242_v40, 4  ;;  %v10054_v28 = vcombine.low %v15798_v7, %v15756_v15 }
 0x425   : > { %v7154_v48 = vsel %vm12037_vm14, %v7149_v51, %v7153_v4  ;;  %v7236_v38 = vsel %vm12031_vm13, %v9929_v27, %v7235_v36  ;;  %v10859_v58 = vadd.f32 %v10858_v43, %v10857_v53  ;;  %v7251_v47 = vrot.slane %v7249_v20, 4  ;;  %v11616_v53 = vld [vmem:[#allocation3 + $0x50] sm:$0x1]  ;;  %v11618_v27 = vld [vmem:[#allocation3 + $0x64] sm:$0xf] }
 0x426   : > { %v7139_v34 = vrot.slane %v7138_v60, 4  ;;  %v10746_v29 = vpop.f32.mrf.mxu1  ;;  %v10860_v17 = vpop.f32.mrf.mxu0  ;;  %v10073_v24 = vcombine.low %v7236_v38, %v7239_v56  ;;  %v15816_v14 = vadd.f32 %v10856_v33, %v10744_v63  ;;  %v7245_v35 = vrot.slane %v11615_v30, 5 }
 0x427   : > { %v10747_v32 = vadd.f32 %v10746_v29, %v10745_v50  ;;  %v7252_v49 = vrot.slane %v11616_v53, 5  ;;  %v9930_v7 = vrot.slane %v7158_v19, 9  ;;  %v9931_v60 = vrot.slane %v7159_v54, 9  ;;  %v7161_v19 = vld [vmem:[#allocation3 + $0x60] sm:$0xe] }
 0x428   : > { %v7144_v11 = vsel %vm12037_vm14, %v7139_v34, %v15776_v1  ;;  %11209 = vmatmul.mubr.bf16.vlgmr.msra.gmra.mxu1 %v10072_v46  ;;  %v10861_v36 = vpop.f32.mrf.mxu0  ;;  %v7256_v1 = vrot.slane %v11617_v13, 5  ;;  %v7246_v46 = vsel %vm12031_vm13, %v7244_v57, %v7245_v35  ;;  %v7263_v56 = vrot.slane %v11618_v27, 5 }
 0x429   : > { %v10070_v41 = vcombine.low %v7144_v11, %v7154_v48  ;;  %11212 = vmatprep.mubr.bf16.mxu1 %v10073_v24  ;;  %v15823_v51 = vadd.f32 %v10859_v58, %v10747_v32  ;;  %v10748_v4 = vpop.f32.mrf.mxu1  ;;  %v10862_v3 = vadd.f32 %v10861_v36, %v10860_v17  ;;  %v7253_v50 = vsel %vm12031_vm13, %v7251_v47, %v7252_v49  ;;  %v7160_v17 = vld [vmem:[#allocation3 + $0x54] sm:$0xe]  ;;  %v11619_v32 = vld [vmem:[#allocation3 + $0x70] sm:$0xf]  ;;  %v11620_v36 = vld [vmem:[#allocation3 + $0x5c] sm:$0x1] }
 0x42a   : > { %v10863_v33 = vpop.f32.mrf.mxu0  ;;  %v7243_v34 = vsel %vm12031_vm13, %v9930_v7, %v7242_v40  ;;  %v7250_v48 = vsel %vm12031_vm13, %v9931_v60, %v7249_v20  ;;  %v7258_v24 = vrot.slane %v7256_v1, 4  ;;  %v7270_v11 = vrot.slane %v11619_v32, 5  ;;  %v11621_v20 = vld [vmem:[#allocation3 + $0x74] sm:$0x1]  ;;  %v11622_v49 = vld [vmem:[#allocation3 + $0x68] sm:$0x1] }
 0x42b   : > { %9166 = vmatprep.mubr.bf16.mxu0 %v10070_v41  ;;  %v10749_v39 = vpop.f32.mrf.mxu1  ;;  %v10074_v29 = vcombine.low %v7243_v34, %v7246_v46  ;;  %v7265_v54 = vrot.slane %v7263_v56, 4  ;;  %v7259_v30 = vrot.slane %v11620_v36, 5  ;;  %v7162_v41 = vld [vmem:[#allocation3 + $0x6c] sm:$0xe]  ;;  %v9932_v53 = vrot.slane %v7160_v17, 9 }
 0x42c   : > { %9167 = vmatmul.mubr.bf16.gmra.mxu0 %v10054_v28  ;;  %v10750_v43 = vadd.f32 %v10749_v39, %v10748_v4  ;;  %v10864_v63 = vpop.f32.mrf.mxu0  ;;  %v10075_v28 = vcombine.low %v7250_v48, %v7253_v50  ;;  %v7273_v4 = vrot.slane %v11621_v20, 5  ;;  %v7266_v13 = vrot.slane %v11622_v49, 5  ;;  %v11623_v34 = vld [vmem:[#allocation3 + $0x7c] sm:$0xf] }
 0x42d   : > { %v10751_v38 = vpop.f32.mrf.mxu1  ;;  %v10865_v58 = vadd.f32 %v10864_v63, %v10863_v33  ;;  %v7260_v33 = vsel %vm12031_vm13, %v7258_v24, %v7259_v30  ;;  %v9933_v7 = vrot.slane %v7161_v19, 9  ;;  %v7272_v27 = vrot.slane %v7270_v11, 4  ;;  %v7168_v30 = vld [vmem:[#allocation3 + $0xb4] sm:$0xe] }
 0x42e   : > { %v15833_v57 = vadd.f32 %v10862_v3, %v10750_v43  ;;  %v15835_v3 = vld [vmem:[#allocation3 + $0x78] sm:$0xe]  ;;  %v7267_v50 = vsel %vm12031_vm13, %v7265_v54, %v7266_v13  ;;  %v9934_v43 = vrot.slane %v7162_v41, 9  ;;  %v7277_v48 = vrot.slane %v11623_v34, 5 }
 0x42f   : > { %v10752_v47 = vpop.f32.mrf.mxu1  ;;  %v7264_v17 = vsel %vm12031_vm13, %v9933_v7, %v7263_v56  ;;  %v7305_v36 = vrot.slane %v15569_v31, 5  ;;  %v7312_v20 = vrot.slane %v15618_v8, 5  ;;  %v7308_v7 = vrot.slane %v15571_v55, 5  ;;  %v7169_v8 = vld [vmem:[#allocation3 + $0xc0] sm:$0xe] }
 0x430   : > { %11213 = vmatmul.mubr.bf16.gmra.mxu1 %v10074_v29  ;;  %v10753_v40 = vadd.f32 %v10752_v47, %v10751_v38  ;;  %v10866_v35 = vpop.f32.mrf.mxu0  ;;  %v7315_v38 = vrot.slane %v15630_v10, 5  ;;  %v7257_v29 = vsel %vm12031_vm13, %v9932_v53, %v7256_v1  ;;  %v7271_v54 = vsel %vm12031_vm13, %v9934_v43, %v7270_v11 }
 0x431   : > { %11216 = vmatprep.mubr.bf16.mxu1 %v10075_v28  ;;  %v7167_v28 = vld [vmem:[#allocation3 + $0xa8] sm:$0xe]  ;;  %v10076_v19 = vcombine.low %v7257_v29, %v7260_v33  ;;  %v10077_v10 = vcombine.low %v7264_v17, %v7267_v50  ;;  %v7274_v1 = vsel %vm12031_vm13, %v7272_v27, %v7273_v4  ;;  %v7279_v53 = vrot.slane %v7277_v48, 4 }
 0x432   : > { %v15839_v46 = vadd.f32 %v10865_v58, %v10753_v40  ;;  %v10754_v60 = vpop.f32.mrf.mxu1  ;;  %v10867_v39 = vpop.f32.mrf.mxu0  ;;  %v9935_v58 = vrot.slane %v15835_v3, 9  ;;  %v11624_v40 = vld [vmem:[#allocation3 + $0x80] sm:$0x1]  ;;  %v9939_v3 = vrot.slane %v7167_v28, 9  ;;  %v7307_v31 = vrot.slane %v7305_v36, 4 }
 0x433   : > { %v10868_v63 = vadd.f32 %v10867_v39, %v10866_v35  ;;  %v7280_v35 = vrot.slane %v11624_v40, 5  ;;  %v7314_v39 = vrot.slane %v7312_v20, 4  ;;  %v11625_v27 = vld [vmem:[#allocation3 + $0x88] sm:$0xf]  ;;  %v7291_v43 = vrot.slane %v15460_v61, 5 }
 0x434   : > { %v10755_v24 = vpop.f32.mrf.mxu1  ;;  %v10869_v32 = vpop.f32.mrf.mxu0  ;;  %v7284_v50 = vrot.slane %v11625_v27, 5  ;;  %v15862_v29 = vsel %vm12031_vm13, %v9939_v3, %v7305_v36  ;;  %v15866_v17 = vsel %vm12031_vm13, %v7307_v31, %v7308_v7  ;;  %v7322_v40 = vrot.slane %v15693_v45, 5 }
 0x435   : > { %v10756_v47 = vadd.f32 %v10755_v24, %v10754_v60  ;;  %v9940_v60 = vrot.slane %v7168_v30, 9  ;;  %v15874_v24 = vsel %vm12031_vm13, %v7314_v39, %v7315_v38  ;;  %v10083_v28 = vcombine.low %v15862_v29, %v15866_v17 }
 0x436   : > { %v10757_v56 = vpop.f32.mrf.mxu1  ;;  %v10870_v41 = vpop.f32.mrf.mxu0  ;;  %v9941_v30 = vrot.slane %v7169_v8, 9  ;;  %v10078_v38 = vcombine.low %v7271_v54, %v7274_v1  ;;  %v7164_v54 = vld [vmem:[#allocation3 + $0x84] sm:$0xe]  ;;  %v11626_v1 = vld [vmem:[#allocation3 + $0x8c] sm:$0x1] }
 0x437   : > { %v15855_v49 = vadd.f32 %v10868_v63, %v10756_v47  ;;  %v10871_v13 = vadd.f32 %v10870_v41, %v10869_v32  ;;  %v7319_v63 = vrot.slane %v15679_v23, 5  ;;  %v15870_v55 = vsel %vm12031_vm13, %v9940_v60, %v7312_v20  ;;  %v7165_v60 = vld [vmem:[#allocation3 + $0x90] sm:$0xe] }
 0x438   : > { %11217 = vmatmul.mubr.bf16.gmra.mxu1 %v10076_v19  ;;  %v10758_v11 = vpop.f32.mrf.mxu1  ;;  %v10872_v33 = vpop.f32.mrf.mxu0  ;;  %v10084_v19 = vcombine.low %v15870_v55, %v15874_v24  ;;  %v7281_v47 = vsel %vm12031_vm13, %v7279_v53, %v7280_v35  ;;  %v7278_v41 = vsel %vm12031_vm13, %v9935_v58, %v7277_v48  ;;  %v7286_v53 = vrot.slane %v7284_v50, 4 }
 0x439   : > { %11220 = vmatprep.mubr.bf16.mxu1 %v10077_v10  ;;  %v10759_v4 = vadd.f32 %v10758_v11, %v10757_v56  ;;  %v7321_v10 = vrot.slane %v7319_v63, 4  ;;  %v15889_v3 = vsel %vm12031_vm13, %v9941_v30, %v7319_v63  ;;  %v10079_v35 = vcombine.low %v7278_v41, %v7281_v47 }
 0x43a   : > { %v10873_v34 = vpop.f32.mrf.mxu0  ;;  %v7293_v48 = vrot.slane %v7291_v43, 4  ;;  %v7287_v7 = vrot.slane %v11626_v1, 5  ;;  %v7298_v47 = vrot.slane %v15510_v59, 5  ;;  %v7301_v1 = vrot.slane %v15520_v62, 5 }
 0x43b   : > { %v15876_v61 = vadd.f32 %v10871_v13, %v10759_v4  ;;  %v10760_v23 = vpop.f32.mrf.mxu1  ;;  %v10874_v32 = vadd.f32 %v10873_v34, %v10872_v33  ;;  %v15893_v11 = vsel %vm12031_vm13, %v7321_v10, %v7322_v40  ;;  %v11627_v4 = vld [vmem:[#allocation3 + $0x98] sm:$0x1]  ;;  %v9936_v34 = vrot.slane %v7164_v54, 9  ;;  %v7166_v54 = vld [vmem:[#allocation3 + $0x9c] sm:$0xe] }
 0x43c   : > { %v10875_v36 = vpop.f32.mrf.mxu0  ;;  %v10085_v45 = vcombine.low %v15889_v3, %v15893_v11  ;;  %v7294_v27 = vrot.slane %v11627_v4, 5  ;;  %v7300_v59 = vrot.slane %v7298_v47, 4  ;;  %v9938_v4 = vrot.slane %v7166_v54, 9 }
 0x43d   : > { %v10761_v56 = vpop.f32.mrf.mxu1 }
 0x43e   : > { %v10762_v20 = vadd.f32 %v10761_v56, %v10760_v23  ;;  %v10876_v13 = vpop.f32.mrf.mxu0  ;;  %v7288_v23 = vsel %vm12031_vm13, %v7286_v53, %v7287_v7 }
 0x43f   : > { %v10763_v33 = vpop.f32.mrf.mxu1  ;;  %v10877_v31 = vadd.f32 %v10876_v13, %v10875_v36  ;;  %v9937_v36 = vrot.slane %v7165_v60, 9 }
 0x440   : > { %11221 = vmatmul.mubr.bf16.gmra.mxu1 %v10078_v38  ;;  %v15897_v58 = vadd.f32 %v10874_v32, %v10762_v20  ;;  %v7295_v32 = vsel %vm12031_vm13, %v7293_v48, %v7294_v27  ;;  %v7285_v38 = vsel %vm12031_vm13, %v9936_v34, %v7284_v50 }
 0x441   : > { %11224 = vmatprep.mubr.bf16.mxu1 %v10079_v35  ;;  %v10764_v39 = vpop.f32.mrf.mxu1  ;;  %v10080_v41 = vcombine.low %v7285_v38, %v7288_v23  ;;  %v7292_v20 = vsel %vm12031_vm13, %v9937_v36, %v7291_v43  ;;  %v7302_v43 = vsel %vm12031_vm13, %v7300_v59, %v7301_v1 }
 0x442   : > { %v10765_v8 = vadd.f32 %v10764_v39, %v10763_v33  ;;  %v10878_v63 = vpop.f32.mrf.mxu0  ;;  %v10081_v53 = vcombine.low %v7292_v20, %v7295_v32  ;;  %v7326_v20 = vrot.slane %v15756_v15, 5 }
 0x444   : > { %v15904_v30 = vadd.f32 %v10877_v31, %v10765_v8  ;;  %v10766_v10 = vpop.f32.mrf.mxu1  ;;  %v10879_v40 = vpop.f32.mrf.mxu0 }
 0x445   : > { %v10880_v56 = vadd.f32 %v10879_v40, %v10878_v63  ;;  %v7299_v63 = vsel %vm12031_vm13, %v9938_v4, %v7298_v47  ;;  %v7170_v47 = vld [vmem:[#allocation3 + $0xcc] sm:$0xe] }
 0x446   : > { %v10767_v13 = vpop.f32.mrf.mxu1  ;;  %v10881_v35 = vpop.f32.mrf.mxu0  ;;  %v10082_v62 = vcombine.low %v7299_v63, %v7302_v43  ;;  %v9942_v54 = vrot.slane %v7170_v47, 9 }
 0x447   : > { %v10768_v33 = vadd.f32 %v10767_v13, %v10766_v10 }
 0x448   : > { %11225 = vmatmul.mubr.bf16.gmra.mxu1 %v10080_v41  ;;  %v10769_v48 = vpop.f32.mrf.mxu1  ;;  %v10882_v31 = vpop.f32.mrf.mxu0 }
 0x449   : > { %11228 = vmatprep.mubr.bf16.mxu1 %v10081_v53  ;;  %v15911_v7 = vadd.f32 %v10880_v56, %v10768_v33  ;;  %v10883_v50 = vadd.f32 %v10882_v31, %v10881_v35  ;;  %v7329_v33 = vrot.slane %v15800_v37, 5  ;;  %v7327_v37 = vsel %vm12031_vm13, %v9942_v54, %v7326_v20 }
 0x44a   : > { %v10770_v60 = vpop.f32.mrf.mxu1  ;;  %v10884_v39 = vpop.f32.mrf.mxu0 }
 0x44b   : > { %v10771_v27 = vadd.f32 %v10770_v60, %v10769_v48  ;;  %v7328_v48 = vrot.slane %v7326_v20, 4 }
 0x44c   : > { %v10885_v8 = vpop.f32.mrf.mxu0 }
 0x44d   : > { %v15917_v34 = vadd.f32 %v10883_v50, %v10771_v27  ;;  %v10772_v23 = vpop.f32.mrf.mxu1  ;;  %v10886_v36 = vadd.f32 %v10885_v8, %v10884_v39  ;;  %v10690_v8 = vadd.f32 %v15272_v22, %v15258_v6 }
 0x44e   : > { %v10887_v32 = vpop.f32.mrf.mxu0 }
 0x44f   : > { %v10773_v10 = vpop.f32.mrf.mxu1 }
 0x450   : > { %11229 = vmatmul.mubr.bf16.gmra.mxu1 %v10082_v62  ;;  %v10774_v40 = vadd.f32 %v10773_v10, %v10772_v23  ;;  %v10888_v38 = vpop.f32.mrf.mxu0  ;;  %v8727_v62 = vadd.f32 %v15443_v0, %v10690_v8  ;;  %v16799_v8 = vld [vmem:[#allocation42_spill] sm:$0xff] }
 0x451   : > { %11232 = vmatprep.mubr.bf16.mxu1 %v10083_v28  ;;  %v10775_v56 = vpop.f32.mrf.mxu1  ;;  %v10889_v41 = vadd.f32 %v10888_v38, %v10887_v32  ;;  %v7330_v28 = vsel %vm12031_vm13, %v7328_v48, %v7329_v33  ;;  %v10805_v32 = vadd.f32 %v15295_v5, %v15280_v2 }
 0x452   : > { %v15923_v13 = vadd.f32 %v10886_v36, %v10774_v40  ;;  %v10086_v55 = vcombine.low %v7327_v37, %v7330_v28 }
 0x453   : > { %v10776_v35 = vpop.f32.mrf.mxu1 }
 0x454   : > { %v10777_v53 = vadd.f32 %v10776_v35, %v10775_v56  ;;  %v10890_v59 = vpop.f32.mrf.mxu0  ;;  %v16796_v56 = vld [vmem:[#allocation41_spill] sm:$0xff] }
 0x455   : > { %v10693_v6 = vadd.f32 %v16796_v56, %v15290_v16 }
 0x456   : > { %v15926_v31 = vadd.f32 %v10889_v41, %v10777_v53  ;;  %v10778_v1 = vpop.f32.mrf.mxu1  ;;  %v10891_v50 = vpop.f32.mrf.mxu0 }
 0x457   : > { %v10892_v29 = vadd.f32 %v10891_v50, %v10890_v59  ;;  %v8730_v35 = vadd.f32 %v10805_v32, %v10693_v6  ;;  %v16797_v50 = vld [vmem:[#allocation44_spill] sm:$0xff] }
 0x458   : > { %11233 = vmatmul.mubr.bf16.gmra.mxu1 %v10084_v19  ;;  %v10779_v15 = vpop.f32.mrf.mxu1  ;;  %v10893_v17 = vpop.f32.mrf.mxu0 }
 0x459   : > { %11236 = vmatprep.mubr.bf16.mxu1 %v10085_v45  ;;  %v10780_v60 = vadd.f32 %v10779_v15, %v10778_v1 }
 0x45a   : > { %v10781_v39 = vpop.f32.mrf.mxu1  ;;  %v10894_v4 = vpop.f32.mrf.mxu0 }
 0x45b   : > { %v15938_v43 = vadd.f32 %v10892_v29, %v10780_v60  ;;  %v10895_v27 = vadd.f32 %v10894_v4, %v10893_v17  ;;  %v16798_v60 = vld [vmem:[#allocation37_spill] sm:$0xff] }
 0x45c   : > { %v10782_v24 = vpop.f32.mrf.mxu1  ;;  %v11024_v19 = vpop.f32.mrf.mxu0 }
 0x45d   : > { %16794 = vst [vmem:[#allocation54_spill] sm:$0xff] %v15938_v43  ;;  %v10783_v3 = vadd.f32 %v10782_v24, %v10781_v39 }
 0x45e   : > { %v10912_v11 = vpop.f32.mrf.mxu1  ;;  %v11025_v45 = vpop.f32.mrf.mxu0 }
 0x45f   : > { %v15942_v63 = vadd.f32 %v10895_v27, %v10783_v3  ;;  %v11026_v23 = vadd.f32 %v11025_v45, %v11024_v19 }
 0x460   : > { %11237 = vmatmul.mubr.bf16.gmra.mxu1 %v10086_v55  ;;  %v10913_v18 = vpop.f32.mrf.mxu1  ;;  %v11027_v36 = vpop.f32.mrf.mxu0 }
 0x461   : > { %16795 = vst [vmem:[#allocation27_spill] sm:$0xff] %v15942_v63  ;;  %v10914_v10 = vadd.f32 %v10913_v18, %v10912_v11 }
 0x462   : > { %v10915_v40 = vpop.f32.mrf.mxu1  ;;  %v11028_v38 = vpop.f32.mrf.mxu0 }
 0x463   : > { %v8888_v22 = vadd.f32 %v10914_v10, %v8727_v62  ;;  %v11029_v41 = vadd.f32 %v11028_v38, %v11027_v36  ;;  %v16800_v10 = vld [vmem:[#allocation38_spill] sm:$0xff] }
 0x464   : > { %v10916_v20 = vpop.f32.mrf.mxu1  ;;  %v15949_v47 = vpop.f32.mrf.mxu0 }
 0x465   : > { %v10917_v53 = vadd.f32 %v10916_v20, %v10915_v40  ;;  %v15974_v11 = vadd.f32 %v11026_v23, %v8888_v22 }
 0x466   : > { %v10918_v59 = vpop.f32.mrf.mxu1  ;;  %v15951_v33 = vpop.f32.mrf.mxu0 }
 0x467   : > { %v8891_v0 = vadd.f32 %v10917_v53, %v8730_v35  ;;  %v16801_v53 = vld [vmem:[#allocation46_spill] sm:$0xff] }
 0x468   : > { %v10919_v54 = vpop.f32.mrf.mxu1  ;;  %v15953_v48 = vpop.f32.mrf.mxu0 }
 0x469   : > { %v10920_v2 = vadd.f32 %v10919_v54, %v10918_v59  ;;  %v15978_v62 = vadd.f32 %v11029_v41, %v8891_v0 }
 0x46a   : > { %v10921_v5 = vpop.f32.mrf.mxu1  ;;  %v15955_v1 = vpop.f32.mrf.mxu0 }
 0x46b   : > { %v15958_v16 = vadd.f32 %v10920_v2, %v16797_v50  ;;  %v16802_v2 = vld [vmem:[#allocation45_spill] sm:$0xff] }
 0x46c   : > { %v10922_v29 = vpop.f32.mrf.mxu1  ;;  %v15960_v15 = vpop.f32.mrf.mxu0 }
 0x46d   : > { %v10923_v17 = vadd.f32 %v10922_v29, %v10921_v5 }
 0x46e   : > { %v10924_v37 = vpop.f32.mrf.mxu1  ;;  %v15962_v28 = vpop.f32.mrf.mxu0 }
 0x46f   : > { %v15965_v39 = vadd.f32 %v10923_v17, %v16798_v60 }
 0x470   : > { %v10925_v4 = vpop.f32.mrf.mxu1  ;;  %v15967_v27 = vpop.f32.mrf.mxu0 }
 0x471   : > { %v10926_v55 = vadd.f32 %v10925_v4, %v10924_v37  ;;  %v16803_v4 = vld [vmem:[#allocation20_spill] sm:$0xff] }
 0x472   : > { %v10927_v24 = vpop.f32.mrf.mxu1  ;;  %v15969_v19 = vpop.f32.mrf.mxu0 }
 0x473   : > { %v15972_v3 = vadd.f32 %v10926_v55, %v16799_v8 }
 0x474   : > { %v10928_v45 = vpop.f32.mrf.mxu1 }
 0x475   : > { %v10929_v18 = vadd.f32 %v10928_v45, %v10927_v24  ;;  %v15976_v36 = vpop.f32.mrf.mxu0 }
 0x476   : > { %v10930_v32 = vpop.f32.mrf.mxu1 }
 0x477   : > { %v15981_v40 = vadd.f32 %v10929_v18, %v16800_v10  ;;  %v15983_v38 = vpop.f32.mrf.mxu0  ;;  %v16804_v10 = vld [vmem:[#allocation51_spill] sm:$0xff] }
 0x478   : > { %v10931_v56 = vpop.f32.mrf.mxu1 }
 0x479   : > { %v10932_v6 = vadd.f32 %v10931_v56, %v10930_v32  ;;  %v15985_v20 = vpop.f32.mrf.mxu0 }
 0x47a   : > { %v10933_v35 = vpop.f32.mrf.mxu1 }
 0x47b   : > { %v15988_v23 = vadd.f32 %v10932_v6, %v16801_v53  ;;  %v15990_v22 = vpop.f32.mrf.mxu0 }
 0x47c   : > { %v10934_v59 = vpop.f32.mrf.mxu1 }
 0x47d   : > { %v10935_v54 = vadd.f32 %v10934_v59, %v10933_v35  ;;  %v15992_v41 = vpop.f32.mrf.mxu0 }
 0x47e   : > { %v10936_v0 = vpop.f32.mrf.mxu1 }
 0x47f   : > { %v15995_v5 = vadd.f32 %v10935_v54, %v16802_v2  ;;  %v15997_v50 = vpop.f32.mrf.mxu0 }
 0x480   : > { %v10937_v29 = vpop.f32.mrf.mxu1 }
 0x481   : > { %v10938_v17 = vadd.f32 %v10937_v29, %v10936_v0  ;;  %v15999_v37 = vpop.f32.mrf.mxu0 }
 0x482   : > { %v10939_v60 = vpop.f32.mrf.mxu1 }
 0x483   : > { %v16002_v55 = vadd.f32 %v10938_v17, %v16803_v4  ;;  %v16004_v24 = vpop.f32.mrf.mxu0 }
 0x484   : > { %v10940_v8 = vpop.f32.mrf.mxu1 }
 0x485   : > { %v10941_v45 = vadd.f32 %v10940_v8, %v10939_v60  ;;  %v16006_v18 = vpop.f32.mrf.mxu0 }
 0x486   : > { %v10942_v32 = vpop.f32.mrf.mxu1 }
 0x487   : > { %v16009_v56 = vadd.f32 %v10941_v45, %v16804_v10  ;;  %v16011_v6 = vpop.f32.mrf.mxu0 }
 0x488   : > { %v10943_v35 = vpop.f32.mrf.mxu1 }
 0x489   : > { %16805 = vst [vmem:[#allocation30_spill] sm:$0xff] %v16009_v56  ;;  %v10944_v53 = vadd.f32 %v10943_v35, %v10942_v32  ;;  %v16013_v59 = vpop.f32.mrf.mxu0 }
 0x48a   : > { %v10945_v54 = vpop.f32.mrf.mxu1 }
 0x48b   : > { %v16016_v0 = vadd.f32 %v10944_v53, %v15733_v21  ;;  %v16018_v2 = vpop.f32.mrf.mxu0 }
 0x48c   : > { %v10946_v29 = vpop.f32.mrf.mxu1 }
 0x48d   : > { %v10947_v17 = vadd.f32 %v10946_v29, %v10945_v54  ;;  %v16020_v60 = vpop.f32.mrf.mxu0 }
 0x48e   : > { %16806 = vst [vmem:[#allocation23_spill] sm:$0xff] %v16020_v60  ;;  %v10948_v4 = vpop.f32.mrf.mxu1 }
 0x48f   : > { %v16023_v8 = vadd.f32 %v10947_v17, %v15735_v44  ;;  %v16025_v45 = vpop.f32.mrf.mxu0 }
 0x490   : > { %16807 = vst [vmem:[#allocation32_spill] sm:$0xff] %v16025_v45  ;;  %v10949_v10 = vpop.f32.mrf.mxu1 }
 0x491   : > { %v10950_v32 = vadd.f32 %v10949_v10, %v10948_v4  ;;  %v16027_v35 = vpop.f32.mrf.mxu0 }
 0x492   : > { %16808 = vst [vmem:[#allocation21_spill] sm:$0xff] %v16027_v35  ;;  %v10951_v63 = vpop.f32.mrf.mxu1 }
 0x493   : > { %v16030_v21 = vadd.f32 %v10950_v32, %v15762_v42  ;;  %v16032_v53 = vpop.f32.mrf.mxu0 }
 0x494   : > { %16810 = vst [vmem:[#allocation17_spill] sm:$0xff] %v16032_v53  ;;  %v10952_v43 = vpop.f32.mrf.mxu1 }
 0x495   : > { %16809 = vst [vmem:[#allocation22_spill] sm:$0xff] %v16030_v21  ;;  %v10953_v54 = vadd.f32 %v10952_v43, %v10951_v63  ;;  %v16034_v29 = vpop.f32.mrf.mxu0 }
 0x496   : > { %v10954_v60 = vpop.f32.mrf.mxu1 }
 0x497   : > { %v16037_v44 = vadd.f32 %v10953_v54, %v15764_v25  ;;  %v16039_v17 = vpop.f32.mrf.mxu0 }
 0x498   : > { %v10955_v45 = vpop.f32.mrf.mxu1 }
 0x499   : > { %16811 = vst [vmem:[#allocation16_spill] sm:$0xff] %v16037_v44  ;;  %v10956_v4 = vadd.f32 %v10955_v45, %v10954_v60  ;;  %v16041_v10 = vpop.f32.mrf.mxu0 }
 0x49a   : > { %16812 = vst [vmem:[#allocation48_spill] sm:$0xff] %v16041_v10  ;;  %v10957_v35 = vpop.f32.mrf.mxu1 }
 0x49b   : > { %v16044_v42 = vadd.f32 %v10956_v4, %v15785_v9  ;;  %v16046_v53 = vpop.f32.mrf.mxu0 }
 0x49c   : > { %v10958_v32 = vpop.f32.mrf.mxu1  ;;  %16813 = vst [vmem:[#allocation31_spill] sm:$0xff] %v16046_v53 }
 0x49d   : > { %v10959_v43 = vadd.f32 %v10958_v32, %v10957_v35  ;;  %v16051_v54 = vpop.f32.mrf.mxu0 }
 0x49e   : > { %v10960_v63 = vpop.f32.mrf.mxu1 }
 0x49f   : > { %v16049_v21 = vadd.f32 %v10959_v43, %v15787_v12  ;;  %v16056_v10 = vpop.f32.mrf.mxu0 }
 0x4a0   : > { %v10961_v25 = vpop.f32.mrf.mxu1 }
 0x4a1   : > { %16814 = vst [vmem:[#allocation29_spill] sm:$0xff] %v16049_v21  ;;  %v10962_v44 = vadd.f32 %v10961_v25, %v10960_v63  ;;  %v16061_v32 = vpop.f32.mrf.mxu0 }
 0x4a2   : > { %v10963_v56 = vpop.f32.mrf.mxu1  ;;  %16817 = vst [vmem:[#allocation18_spill] sm:$0xff] %v16061_v32 }
 0x4a3   : > { %v16054_v60 = vadd.f32 %v10962_v44, %v15806_v52  ;;  %v16063_v53 = vpop.f32.mrf.mxu0 }
 0x4a4   : > { %v10964_v45 = vpop.f32.mrf.mxu1  ;;  %16818 = vst [vmem:[#allocation49_spill] sm:$0xff] %v16063_v53 }
 0x4a5   : > { %16815 = vst [vmem:[#allocation24_spill] sm:$0xff] %v16054_v60  ;;  %v10965_v9 = vadd.f32 %v10964_v45, %v10963_v56 }
 0x4a7   : > { %v16059_v4 = vadd.f32 %v10965_v9, %v15808_v26  ;;  %v16068_v25 = vpop.f32.mrf.mxu0 }
 0x4a8   : > { %v10966_v35 = vpop.f32.mrf.mxu1 }
 0x4a9   : > { %16816 = vst [vmem:[#allocation19_spill] sm:$0xff] %v16059_v4  ;;  %v16073_v4 = vpop.f32.mrf.mxu0 }
 0x4aa   : > { %v10967_v12 = vpop.f32.mrf.mxu1 }
 0x4ab   : > { %v10968_v43 = vadd.f32 %v10967_v12, %v10966_v35 }
 0x4ac   : > { %v10969_v21 = vpop.f32.mrf.mxu1 }
 0x4ad   : > { %v16066_v63 = vadd.f32 %v10968_v43, %v15816_v14  ;;  %v16078_v14 = vpop.f32.mrf.mxu0 }
 0x4ae   : > { %v10970_v52 = vpop.f32.mrf.mxu1 }
 0x4af   : > { %v10971_v44 = vadd.f32 %v10970_v52, %v10969_v21  ;;  %v16083_v52 = vpop.f32.mrf.mxu0 }
 0x4b1   : > { %v16071_v56 = vadd.f32 %v10971_v44, %v15823_v51  ;;  %v10972_v26 = vpop.f32.mrf.mxu1 }
 0x4b3   : > { %16819 = vst [vmem:[#allocation34_spill] sm:$0xff] %v16071_v56  ;;  %v10973_v45 = vpop.f32.mrf.mxu1 }
 0x4b4   : > { %v10974_v9 = vadd.f32 %v10973_v45, %v10972_v26  ;;  %v16088_v45 = vpop.f32.mrf.mxu0 }
 0x4b5   : > { %v10975_v32 = vpop.f32.mrf.mxu1 }
 0x4b6   : > { %v16076_v35 = vadd.f32 %v10974_v9, %v15833_v57 }
 0x4b7   : > { %v10976_v12 = vpop.f32.mrf.mxu1 }
 0x4b8   : > { %16820 = vst [vmem:[#allocation36_spill] sm:$0xff] %v16076_v35  ;;  %v10977_v53 = vadd.f32 %v10976_v12, %v10975_v32  ;;  %v16093_v35 = vpop.f32.mrf.mxu0 }
 0x4ba   : > { %v16081_v21 = vadd.f32 %v10977_v53, %v15839_v46  ;;  %v16095_v60 = vpop.f32.mrf.mxu0 }
 0x4bb   : > { %v10978_v43 = vpop.f32.mrf.mxu1  ;;  %16824 = vst [vmem:[#allocation39_spill] sm:$0xff] %v16095_v60 }
 0x4bc   : > { %16821 = vst [vmem:[#allocation50_spill] sm:$0xff] %v16081_v21 }
 0x4bd   : > { %v10979_v51 = vpop.f32.mrf.mxu1 }
 0x4be   : > { %v10980_v44 = vadd.f32 %v10979_v51, %v10978_v43 }
 0x4bf   : > { %v10981_v56 = vpop.f32.mrf.mxu1 }
 0x4c0   : > { %v16086_v26 = vadd.f32 %v10980_v44, %v15855_v49  ;;  %v16100_v44 = vpop.f32.mrf.mxu0 }
 0x4c1   : > { %v10982_v57 = vpop.f32.mrf.mxu1 }
 0x4c2   : > { %16822 = vst [vmem:[#allocation43_spill] sm:$0xff] %v16086_v26  ;;  %v10983_v9 = vadd.f32 %v10982_v57, %v10981_v56 }
 0x4c4   : > { %v16091_v32 = vadd.f32 %v10983_v9, %v15876_v61  ;;  %v10984_v12 = vpop.f32.mrf.mxu1  ;;  %v16105_v9 = vpop.f32.mrf.mxu0 }
 0x4c6   : > { %16823 = vst [vmem:[#allocation52_spill] sm:$0xff] %v16091_v32  ;;  %v10985_v46 = vpop.f32.mrf.mxu1  ;;  %v16110_v60 = vpop.f32.mrf.mxu0 }
 0x4c7   : > { %v10986_v53 = vadd.f32 %v10985_v46, %v10984_v12 }
 0x4c8   : > { %v10987_v21 = vpop.f32.mrf.mxu1 }
 0x4c9   : > { %v16098_v43 = vadd.f32 %v10986_v53, %v15897_v58 }
 0x4ca   : > { %v10988_v49 = vpop.f32.mrf.mxu1 }
 0x4cb   : > { %16825 = vst [vmem:[#allocation28_spill] sm:$0xff] %v16098_v43  ;;  %v10989_v51 = vadd.f32 %v10988_v49, %v10987_v21  ;;  %v16115_v49 = vpop.f32.mrf.mxu0 }
 0x4cd   : > { %v16103_v56 = vadd.f32 %v10989_v51, %v15904_v30  ;;  %v16117_v43 = vpop.f32.mrf.mxu0 }
 0x4ce   : > { %v10990_v61 = vpop.f32.mrf.mxu1 }
 0x4cf   : > { %16826 = vst [vmem:[#allocation47_spill] sm:$0xff] %v16103_v56 }
 0x4d0   : > { %v10991_v57 = vpop.f32.mrf.mxu1 }
 0x4d1   : > { %v10992_v32 = vadd.f32 %v10991_v57, %v10990_v61 }
 0x4d2   : > { %v10993_v26 = vpop.f32.mrf.mxu1 }
 0x4d3   : > { %v16108_v12 = vadd.f32 %v10992_v32, %v15911_v7 }
 0x4d4   : > { %v10994_v46 = vpop.f32.mrf.mxu1 }
 0x4d5   : > { %v10995_v58 = vadd.f32 %v10994_v46, %v10993_v26  ;;  %v16124_v26 = vpop.f32.mrf.mxu0 }
 0x4d7   : > { %v16113_v21 = vadd.f32 %v10995_v58, %v15917_v34 }
 0x4d8   : > { %v10996_v53 = vpop.f32.mrf.mxu1 }
 0x4d9   : > { %16827 = vst [vmem:[#allocation33_spill] sm:$0xff] %v16113_v21 }
 0x4da   : > { %v10997_v30 = vpop.f32.mrf.mxu1 }
 0x4db   : > { %v10998_v51 = vadd.f32 %v10997_v30, %v10996_v53  ;;  %v11032_v53 = vadd.f32 %v15951_v33, %v15949_v47  ;;  %v16135_v30 = vpop.f32.mrf.mxu0  ;;  %v16152_v47 = vld [vmem:[%s16414_s6] ss:$0 sm:$0xff] }
 0x4dc   : > { %v10999_v56 = vpop.f32.mrf.mxu1 }
 0x4dd   : > { %v16120_v61 = vadd.f32 %v10998_v51, %v15923_v13 }
 0x4de   : > { %v11000_v7 = vpop.f32.mrf.mxu1 }
 0x4df   : > { %16828 = vst [vmem:[#allocation25_spill] sm:$0xff] %v16120_v61  ;;  %v11001_v32 = vadd.f32 %v11000_v7, %v10999_v56  ;;  %v9057_v56 = vadd.f32 %v11032_v53, %v15958_v16  ;;  %v16143_v7 = vld [vmem:[%s16413_s5] ss:$0 sm:$0xff] }
 0x4e0   : > { %v16122_v57 = vpop.f32.mrf.mxu1 }
 0x4e1   : > { %v16127_v34 = vadd.f32 %v11001_v32, %v15926_v31  ;;  %v11035_v31 = vadd.f32 %v15955_v1, %v15953_v48  ;;  %v16147_v32 = vpop.f32.mrf.mxu0  ;;  %v11044_v48 = vadd.f32 %v15983_v38, %v15976_v36 }
 0x4e2   : > { %v16129_v46 = vpop.f32.mrf.mxu1  ;;  %16832 = vst [vmem:[#allocation53_spill] sm:$0xff] %v16147_v32 }
 0x4e3   : > { %16829 = vst [vmem:[#allocation35_spill] sm:$0xff] %v16127_v34  ;;  %v9060_v61 = vadd.f32 %v11035_v31, %v15965_v39  ;;  %v16160_v1 = vpop.f32.mrf.mxu0  ;;  %v9073_v31 = vadd.f32 %v11044_v48, %v15988_v23 }
 0x4e4   : > { %v16131_v58 = vpop.f32.mrf.mxu1 }
 0x4e5   : > { %16830 = vst [vmem:[#allocation55_spill] sm:$0xff] %v16131_v58  ;;  %v11038_v58 = vadd.f32 %v15962_v28, %v15960_v15 }
 0x4e6   : > { %v16137_v13 = vpop.f32.mrf.mxu1 }
 0x4e7   : > { %16831 = vst [vmem:[#allocation26_spill] sm:$0xff] %v16137_v13 }
 0x4e8   : > { %v11210_v51 = vpop.f32.mrf.mxu1 }
 0x4e9   : > { %v9218_v34 = vadd.f32 %v11210_v51, %v9057_v56 }
 0x4ea   : > { %v9209_v33 = vpop.f32.mrf.mxu1 }
 0x4eb   : > { %v9345_v16 = vmul.f32 %v16143_v7, %v9218_v34  ;;  %v9210_v53 = vadd.f32 %v9209_v33, %v15974_v11  ;;  %v9065_v33 = vadd.f32 %v11038_v58, %v15972_v3 }
 0x4ec   : > { %v11211_v21 = vpop.f32.mrf.mxu1 }
 0x4ed   : > { %v9384_v56 = vadd.f32 %v16152_v47, %v9345_v16  ;;  %v9343_v51 = vmul.f32 %v16143_v7, %v9210_v53  ;;  %v9221_v13 = vadd.f32 %v11211_v21, %v9060_v61  ;;  %v11047_v16 = vadd.f32 %v15990_v22, %v15985_v20  ;;  %v16173_v21 = vpop.f32.mrf.mxu0 }
 0x4ee   : > { %v9212_v32 = vpop.f32.mrf.mxu1 }
 0x4ef   : > { %v9416_v34 = vmax.f32 %v9384_v56, 0.0  ;;  %v9382_v11 = vadd.f32 %v16152_v47, %v9343_v51  ;;  %v9346_v39 = vmul.f32 %v16143_v7, %v9221_v13  ;;  %v9213_v36 = vadd.f32 %v9212_v32, %v15978_v62  ;;  %v16188_v56 = vpop.f32.mrf.mxu0 }
 0x4f0   : > { %v11214_v38 = vpop.f32.mrf.mxu1  ;;  %v11041_v62 = vadd.f32 %v15969_v19, %v15967_v27  ;;  %v9076_v13 = vadd.f32 %v11047_v16, %v15995_v5  ;;  %v11056_v32 = vadd.f32 %v16011_v6, %v16006_v18  ;;  %v11050_v5 = vadd.f32 %v15997_v50, %v15992_v41 }
 0x4f1   : > { %9448 = vst [vmem:[%s16175_s19 + $0x10] sm:$0xff] %v9416_v34  ;;  %v9414_v15 = vmax.f32 %v9382_v11, 0.0  ;;  %v9385_v28 = vadd.f32 %v16152_v47, %v9346_v39  ;;  %v9234_v23 = vadd.f32 %v11214_v38, %v9073_v31  ;;  %v9344_v3 = vmul.f32 %v16143_v7, %v9213_v36 }
 0x4f2   : > { %v9225_v61 = vpop.f32.mrf.mxu1  ;;  %v9068_v34 = vadd.f32 %v11041_v62, %v15981_v40  ;;  %v9089_v6 = vadd.f32 %v11056_v32, %v16016_v0  ;;  %v9081_v40 = vadd.f32 %v11050_v5, %v16002_v55 }
 0x4f3   : > { %9446 = vst [vmem:[%s16175_s19] sm:$0xff] %v9414_v15  ;;  %v9417_v20 = vmax.f32 %v9385_v28, 0.0  ;;  %v9349_v22 = vmul.f32 %v16143_v7, %v9234_v23  ;;  %v9226_v58 = vadd.f32 %v9225_v61, %v9065_v33  ;;  %v9383_v53 = vadd.f32 %v16152_v47, %v9344_v3  ;;  %v16203_v15 = vpop.f32.mrf.mxu0 }
 0x4f4   : > { %v11215_v48 = vpop.f32.mrf.mxu1  ;;  %v11059_v33 = vadd.f32 %v16018_v2, %v16013_v59  ;;  %v11053_v23 = vadd.f32 %v16004_v24, %v15999_v37 }
 0x4f5   : > { %9449 = vst [vmem:[%s16175_s19 + $0x18] sm:$0xff] %v9417_v20  ;;  %v9388_v27 = vadd.f32 %v16152_v47, %v9349_v22  ;;  %v9347_v19 = vmul.f32 %v16143_v7, %v9226_v58  ;;  %v9237_v51 = vadd.f32 %v11215_v48, %v9076_v13  ;;  %v9415_v11 = vmax.f32 %v9383_v53, 0.0  ;;  %v16833_v58 = vld [vmem:[#allocation30_spill] sm:$0xff]  ;;  %v16217_v32 = vpop.f32.mrf.mxu0  ;;  %v16834_v48 = vld [vmem:[#allocation23_spill] sm:$0xff] }
 0x4f6   : > { %v9228_v18 = vpop.f32.mrf.mxu1  ;;  %v9092_v59 = vadd.f32 %v11059_v33, %v16023_v8  ;;  %v11068_v20 = vadd.f32 %v16039_v17, %v16034_v29  ;;  %v9084_v13 = vadd.f32 %v11053_v23, %v16833_v58  ;;  %v16842_v58 = vld [vmem:[#allocation16_spill] sm:$0xff] }
 0x4f7   : > { %v9420_v39 = vmax.f32 %v9388_v27, 0.0  ;;  %v9386_v31 = vadd.f32 %v16152_v47, %v9347_v19  ;;  %v9350_v36 = vmul.f32 %v16143_v7, %v9237_v51  ;;  %v9229_v38 = vadd.f32 %v9228_v18, %v9068_v34  ;;  %9447 = vst [vmem:[%s16175_s19 + $0x8] sm:$0xff] %v9415_v11  ;;  %v16835_v27 = vld [vmem:[#allocation32_spill] sm:$0xff]  ;;  %v16231_v33 = vpop.f32.mrf.mxu0 }
 0x4f8   : > { %v11218_v16 = vpop.f32.mrf.mxu1  ;;  %v11062_v19 = vadd.f32 %v16835_v27, %v16834_v48  ;;  %v9105_v34 = vadd.f32 %v11068_v20, %v16044_v42  ;;  %v16836_v18 = vld [vmem:[#allocation48_spill] sm:$0xff]  ;;  %v11080_v20 = vadd.f32 %v16073_v4, %v16068_v25  ;;  %v11074_v27 = vadd.f32 %v16056_v10, %v16051_v54 }
 0x4f9   : > { %9452 = vst [vmem:[%s16175_s19 + $0x30] sm:$0xff] %v9420_v39  ;;  %v9418_v41 = vmax.f32 %v9386_v31, 0.0  ;;  %v9389_v50 = vadd.f32 %v16152_v47, %v9350_v36  ;;  %v9348_v0 = vmul.f32 %v16143_v7, %v9229_v38  ;;  %v9250_v28 = vadd.f32 %v11218_v16, %v9089_v6  ;;  %v16837_v6 = vld [vmem:[#allocation31_spill] sm:$0xff]  ;;  %v16838_v36 = vld [vmem:[#allocation22_spill] sm:$0xff] }
 0x4fa   : > { %v9241_v62 = vpop.f32.mrf.mxu1  ;;  %v11071_v39 = vadd.f32 %v16837_v6, %v16836_v18  ;;  %v9097_v38 = vadd.f32 %v11062_v19, %v16838_v36  ;;  %v16845_v36 = vld [vmem:[#allocation49_spill] sm:$0xff] }
 0x4fb   : > { %9450 = vst [vmem:[%s16175_s19 + $0x20] sm:$0xff] %v9418_v41  ;;  %v9421_v2 = vmax.f32 %v9389_v50, 0.0  ;;  %v9387_v55 = vadd.f32 %v16152_v47, %v9348_v0  ;;  %v9353_v3 = vmul.f32 %v16143_v7, %v9250_v28  ;;  %v9242_v61 = vadd.f32 %v9241_v62, %v9081_v40  ;;  %v16839_v50 = vld [vmem:[#allocation21_spill] sm:$0xff] }
 0x4fc   : > { %v11219_v22 = vpop.f32.mrf.mxu1  ;;  %v16840_v0 = vld [vmem:[#allocation17_spill] sm:$0xff] }
 0x4fd   : > { %9453 = vst [vmem:[%s16175_s19 + $0x38] sm:$0xff] %v9421_v2  ;;  %v9419_v37 = vmax.f32 %v9387_v55, 0.0  ;;  %v9392_v24 = vadd.f32 %v16152_v47, %v9353_v3  ;;  %v9351_v8 = vmul.f32 %v16143_v7, %v9242_v61  ;;  %v9253_v53 = vadd.f32 %v11219_v22, %v9092_v59  ;;  %v16841_v62 = vld [vmem:[#allocation29_spill] sm:$0xff] }
 0x4fe   : > { %v9244_v51 = vpop.f32.mrf.mxu1  ;;  %v11065_v28 = vadd.f32 %v16840_v0, %v16839_v50  ;;  %v9108_v59 = vadd.f32 %v11071_v39, %v16841_v62  ;;  %v11092_v0 = vadd.f32 %v16110_v60, %v16105_v9 }
 0x4ff   : > { %9451 = vst [vmem:[%s16175_s19 + $0x28] sm:$0xff] %v9419_v37  ;;  %v9424_v29 = vmax.f32 %v9392_v24, 0.0  ;;  %v9390_v17 = vadd.f32 %v16152_v47, %v9351_v8  ;;  %v9354_v5 = vmul.f32 %v16143_v7, %v9253_v53  ;;  %v9245_v11 = vadd.f32 %v9244_v51, %v9084_v13  ;;  %v16245_v37 = vpop.f32.mrf.mxu0 }
 0x500   : > { %v11222_v31 = vpop.f32.mrf.mxu1  ;;  %v9100_v13 = vadd.f32 %v11065_v28, %v16842_v58  ;;  %v9121_v51 = vadd.f32 %v11080_v20, %v16066_v63  ;;  %v11086_v20 = vadd.f32 %v16093_v35, %v16088_v45  ;;  %v16848_v58 = vld [vmem:[#allocation43_spill] sm:$0xff] }
 0x501   : > { %9456 = vst [vmem:[%s16175_s19 + $0x50] sm:$0xff] %v9424_v29  ;;  %v9422_v16 = vmax.f32 %v9390_v17, 0.0  ;;  %v9393_v42 = vadd.f32 %v16152_v47, %v9354_v5  ;;  %v9352_v40 = vmul.f32 %v16143_v7, %v9245_v11  ;;  %v9266_v41 = vadd.f32 %v11222_v31, %v9105_v34  ;;  %v16843_v11 = vld [vmem:[#allocation24_spill] sm:$0xff]  ;;  %v16259_v6 = vpop.f32.mrf.mxu0  ;;  %v16844_v31 = vld [vmem:[#allocation18_spill] sm:$0xff] }
 0x502   : > { %v9257_v23 = vpop.f32.mrf.mxu1  ;;  %v11083_v17 = vadd.f32 %v16083_v52, %v16078_v14  ;;  %v9113_v18 = vadd.f32 %v11074_v27, %v16843_v11 }
 0x503   : > { %9454 = vst [vmem:[%s16175_s19 + $0x40] sm:$0xff] %v9422_v16  ;;  %v9425_v2 = vmax.f32 %v9393_v42, 0.0  ;;  %v9391_v55 = vadd.f32 %v16152_v47, %v9352_v40  ;;  %v9357_v3 = vmul.f32 %v16143_v7, %v9266_v41  ;;  %v9258_v61 = vadd.f32 %v9257_v23, %v9097_v38  ;;  %v16846_v42 = vld [vmem:[#allocation34_spill] sm:$0xff]  ;;  %v16847_v23 = vld [vmem:[#allocation19_spill] sm:$0xff] }
 0x504   : > { %v11223_v22 = vpop.f32.mrf.mxu1  ;;  %v11077_v38 = vadd.f32 %v16845_v36, %v16844_v31  ;;  %v9124_v40 = vadd.f32 %v11083_v17, %v16846_v42  ;;  %v16852_v31 = vld [vmem:[#allocation50_spill] sm:$0xff] }
 0x505   : > { %9457 = vst [vmem:[%s16175_s19 + $0x58] sm:$0xff] %v9425_v2  ;;  %v9423_v24 = vmax.f32 %v9391_v55, 0.0  ;;  %v9396_v8 = vadd.f32 %v16152_v47, %v9357_v3  ;;  %v9355_v53 = vmul.f32 %v16143_v7, %v9258_v61  ;;  %v9269_v48 = vadd.f32 %v11223_v22, %v9108_v59  ;;  %v16273_v59 = vpop.f32.mrf.mxu0 }
 0x506   : > { %v9260_v19 = vpop.f32.mrf.mxu1  ;;  %v9116_v62 = vadd.f32 %v11077_v38, %v16847_v23  ;;  %v16853_v23 = vld [vmem:[#allocation53_spill] sm:$0xff] }
 0x507   : > { %9455 = vst [vmem:[%s16175_s19 + $0x48] sm:$0xff] %v9423_v24  ;;  %v9428_v4 = vmax.f32 %v9396_v8, 0.0  ;;  %v9394_v25 = vadd.f32 %v16152_v47, %v9355_v53  ;;  %v9358_v34 = vmul.f32 %v16143_v7, %v9269_v48  ;;  %v9261_v29 = vadd.f32 %v9260_v19, %v9100_v13  ;;  %v11114_v60 = vpop.f32.mrf.mxu0  ;;  %v16849_v19 = vld [vmem:[#allocation36_spill] sm:$0xff] }
 0x508   : > { %v11226_v5 = vpop.f32.mrf.mxu1  ;;  %v9137_v13 = vadd.f32 %v11092_v0, %v16848_v58  ;;  %v11095_v48 = vadd.f32 %v16117_v43, %v16115_v49  ;;  %v16856_v58 = vld [vmem:[#allocation55_spill] sm:$0xff] }
 0x509   : > { %9460 = vst [vmem:[%s16175_s19 + $0x70] sm:$0xff] %v9428_v4  ;;  %v9426_v10 = vmax.f32 %v9394_v25, 0.0  ;;  %v9397_v54 = vadd.f32 %v16152_v47, %v9358_v34  ;;  %v9356_v63 = vmul.f32 %v16143_v7, %v9261_v29  ;;  %v9282_v39 = vadd.f32 %v11226_v5, %v9121_v51  ;;  %v16850_v34 = vld [vmem:[#allocation39_spill] sm:$0xff]  ;;  %v16851_v5 = vld [vmem:[#allocation52_spill] sm:$0xff] }
 0x50a   : > { %v9273_v16 = vpop.f32.mrf.mxu1  ;;  %v9129_v51 = vadd.f32 %v11086_v20, %v16849_v19  ;;  %v11089_v29 = vadd.f32 %v16100_v44, %v16850_v34  ;;  %v9140_v11 = vadd.f32 %v11095_v48, %v16851_v5  ;;  %v11110_v34 = vadd.f32 %v16245_v37, %v16231_v33 }
 0x50b   : > { %9458 = vst [vmem:[%s16175_s19 + $0x60] sm:$0xff] %v9426_v10  ;;  %v9429_v14 = vmax.f32 %v9397_v54, 0.0  ;;  %v9395_v52 = vadd.f32 %v16152_v47, %v9356_v63  ;;  %v9361_v41 = vmul.f32 %v16143_v7, %v9282_v39  ;;  %v9274_v50 = vadd.f32 %v9273_v16, %v9113_v18  ;;  %v11115_v18 = vpop.f32.mrf.mxu0 }
 0x50c   : > { %v11227_v28 = vpop.f32.mrf.mxu1  ;;  %v11104_v63 = vadd.f32 %v16188_v56, %v16173_v21  ;;  %v9132_v36 = vadd.f32 %v11089_v29, %v16852_v31  ;;  %v16860_v29 = vld [vmem:[#allocation27_spill] sm:$0xff] }
 0x50d   : > { %9461 = vst [vmem:[%s16175_s19 + $0x78] sm:$0xff] %v9429_v14  ;;  %v9427_v2 = vmax.f32 %v9395_v52, 0.0  ;;  %v9400_v55 = vadd.f32 %v16152_v47, %v9361_v41  ;;  %v9359_v3 = vmul.f32 %v16143_v7, %v9274_v50  ;;  %v9285_v61 = vadd.f32 %v11227_v28, %v9124_v40  ;;  %v11117_v56 = vpop.f32.mrf.mxu0 }
 0x50e   : > { %v9276_v22 = vpop.f32.mrf.mxu1  ;;  %v11098_v40 = vadd.f32 %v16135_v30, %v16124_v26  ;;  %v11004_v14 = vadd.f32 %v16129_v46, %v16122_v57  ;;  %v9153_v21 = vadd.f32 %v11104_v63, %v16108_v12  ;;  %v11107_v26 = vadd.f32 %v16217_v32, %v16203_v15  ;;  %v16854_v57 = vld [vmem:[#allocation28_spill] sm:$0xff] }
 0x50f   : > { %9459 = vst [vmem:[%s16175_s19 + $0x68] sm:$0xff] %v9427_v2  ;;  %v9432_v9 = vmax.f32 %v9400_v55, 0.0  ;;  %v9398_v24 = vadd.f32 %v16152_v47, %v9359_v3  ;;  %v9362_v8 = vmul.f32 %v16143_v7, %v9285_v61  ;;  %v9277_v53 = vadd.f32 %v9276_v22, %v9116_v62  ;;  %v16855_v61 = vld [vmem:[#allocation54_spill] sm:$0xff]  ;;  %v11118_v32 = vpop.f32.mrf.mxu0 }
 0x510   : > { %v11230_v27 = vpop.f32.mrf.mxu1  ;;  %v11101_v62 = vadd.f32 %v16160_v1, %v16853_v23  ;;  %v9145_v46 = vadd.f32 %v11098_v40, %v16854_v57  ;;  %v9008_v20 = vadd.f32 %v11004_v14, %v16855_v61  ;;  %v11116_v22 = vadd.f32 %v11115_v18, %v11114_v60 }
 0x511   : > { %9464 = vst [vmem:[%s16175_s19 + $0x90] sm:$0xff] %v9432_v9  ;;  %v9430_v35 = vmax.f32 %v9398_v24, 0.0  ;;  %v9401_v45 = vadd.f32 %v16152_v47, %v9362_v8  ;;  %v9360_v4 = vmul.f32 %v16143_v7, %v9277_v53  ;;  %v9298_v25 = vadd.f32 %v11230_v27, %v9137_v13  ;;  %v16857_v13 = vld [vmem:[#allocation26_spill] sm:$0xff]  ;;  %v16858_v24 = vld [vmem:[#allocation33_spill] sm:$0xff] }
 0x512   : > { %v9289_v17 = vpop.f32.mrf.mxu1  ;;  %v11007_v1 = vadd.f32 %v16857_v13, %v16856_v58  ;;  %v9156_v15 = vadd.f32 %v11107_v26, %v16858_v24  ;;  %v11119_v5 = vadd.f32 %v11118_v32, %v11117_v56  ;;  %v9169_v18 = vadd.f32 %v11116_v22, %v9008_v20 }
 0x513   : > { %9462 = vst [vmem:[%s16175_s19 + $0x80] sm:$0xff] %v9430_v35  ;;  %v9433_v43 = vmax.f32 %v9401_v45, 0.0  ;;  %v9399_v49 = vadd.f32 %v16152_v47, %v9360_v4  ;;  %v9365_v10 = vmul.f32 %v16143_v7, %v9298_v25  ;;  %v9290_v54 = vadd.f32 %v9289_v17, %v9129_v51  ;;  %v16859_v51 = vld [vmem:[#allocation47_spill] sm:$0xff] }
 0x514   : > { %v11231_v39 = vpop.f32.mrf.mxu1  ;;  %v9148_v35 = vadd.f32 %v11101_v62, %v16859_v51  ;;  %v9011_v17 = vadd.f32 %v11007_v1, %v16860_v29 }
 0x515   : > { %9465 = vst [vmem:[%s16175_s19 + $0x98] sm:$0xff] %v9433_v43  ;;  %v9431_v44 = vmax.f32 %v9399_v49, 0.0  ;;  %v9404_v38 = vadd.f32 %v16152_v47, %v9365_v10  ;;  %v9363_v16 = vmul.f32 %v16143_v7, %v9290_v54  ;;  %v9301_v42 = vadd.f32 %v11231_v39, %v9140_v11  ;;  %v16861_v39 = vld [vmem:[#allocation25_spill] sm:$0xff] }
 0x516   : > { %v9292_v52 = vpop.f32.mrf.mxu1  ;;  %v9161_v31 = vadd.f32 %v11110_v34, %v16861_v39 }
 0x517   : > { %9463 = vst [vmem:[%s16175_s19 + $0x88] sm:$0xff] %v9431_v44  ;;  %v9436_v41 = vmax.f32 %v9404_v38, 0.0  ;;  %v9402_v50 = vadd.f32 %v16152_v47, %v9363_v16  ;;  %v9366_v0 = vmul.f32 %v16143_v7, %v9301_v42  ;;  %v9293_v28 = vadd.f32 %v9292_v52, %v9132_v36 }
 0x518   : > { %v11234_v30 = vpop.f32.mrf.mxu1  ;;  %v11113_v38 = vadd.f32 %v16273_v59, %v16259_v6  ;;  %v9172_v42 = vadd.f32 %v11119_v5, %v9011_v17 }
 0x519   : > { %9468 = vst [vmem:[%s16175_s19 + $0xb0] sm:$0xff] %v9436_v41  ;;  %v9434_v12 = vmax.f32 %v9402_v50, 0.0  ;;  %v9405_v2 = vadd.f32 %v16152_v47, %v9366_v0  ;;  %v9364_v55 = vmul.f32 %v16143_v7, %v9293_v28  ;;  %v9314_v3 = vadd.f32 %v11234_v30, %v9153_v21  ;;  %v16862_v41 = vld [vmem:[#allocation35_spill] sm:$0xff] }
 0x51a   : > { %v9305_v9 = vpop.f32.mrf.mxu1  ;;  %v9164_v50 = vadd.f32 %v11113_v38, %v16862_v41 }
 0x51b   : > { %9466 = vst [vmem:[%s16175_s19 + $0xa0] sm:$0xff] %v9434_v12  ;;  %v9437_v8 = vmax.f32 %v9405_v2, 0.0  ;;  %v9403_v53 = vadd.f32 %v16152_v47, %v9364_v55  ;;  %v9369_v48 = vmul.f32 %v16143_v7, %v9314_v3  ;;  %v9306_v27 = vadd.f32 %v9305_v9, %v9145_v46 }
 0x51c   : > { %v11235_v19 = vpop.f32.mrf.mxu1 }
 0x51d   : > { %9469 = vst [vmem:[%s16175_s19 + $0xb8] sm:$0xff] %v9437_v8  ;;  %v9435_v60 = vmax.f32 %v9403_v53, 0.0  ;;  %v9408_v45 = vadd.f32 %v16152_v47, %v9369_v48  ;;  %v9367_v4 = vmul.f32 %v16143_v7, %v9306_v27  ;;  %v9317_v25 = vadd.f32 %v11235_v19, %v9156_v15 }
 0x51e   : > { %v9308_v11 = vpop.f32.mrf.mxu1 }
 0x51f   : > { %9467 = vst [vmem:[%s16175_s19 + $0xa8] sm:$0xff] %v9435_v60  ;;  %v9440_v43 = vmax.f32 %v9408_v45, 0.0  ;;  %v9406_v49 = vadd.f32 %v16152_v47, %v9367_v4  ;;  %v9370_v10 = vmul.f32 %v16143_v7, %v9317_v25  ;;  %v9309_v54 = vadd.f32 %v9308_v11, %v9148_v35 }
 0x520   : > { %v11238_v63 = vpop.f32.mrf.mxu1 }
 0x521   : > { %9472 = vst [vmem:[%s16175_s19 + $0xd0] sm:$0xff] %v9440_v43  ;;  %v9438_v36 = vmax.f32 %v9406_v49, 0.0  ;;  %v9409_v33 = vadd.f32 %v16152_v47, %v9370_v10  ;;  %v9368_v37 = vmul.f32 %v16143_v7, %v9309_v54  ;;  %v9330_v44 = vadd.f32 %v11238_v63, %v9169_v18 }
 0x522   : > { %v9321_v16 = vpop.f32.mrf.mxu1 }
 0x523   : > { %9470 = vst [vmem:[%s16175_s19 + $0xc0] sm:$0xff] %v9438_v36  ;;  %v9441_v40 = vmax.f32 %v9409_v33, 0.0  ;;  %v9407_v14 = vadd.f32 %v16152_v47, %v9368_v37  ;;  %v9373_v52 = vmul.f32 %v16143_v7, %v9330_v44  ;;  %v9322_v21 = vadd.f32 %v9321_v16, %v9161_v31 }
 0x524   : > { %v11239_v56 = vpop.f32.mrf.mxu1 }
 0x525   : > { %9473 = vst [vmem:[%s16175_s19 + $0xd8] sm:$0xff] %v9441_v40  ;;  %v9439_v0 = vmax.f32 %v9407_v14, 0.0  ;;  %v9412_v6 = vadd.f32 %v16152_v47, %v9373_v52  ;;  %v9371_v59 = vmul.f32 %v16143_v7, %v9322_v21  ;;  %v9333_v28 = vadd.f32 %v11239_v56, %v9172_v42 }
 0x526   : > { %v9324_v23 = vpop.f32.mrf.mxu1 }
 0x527   : > { %9471 = vst [vmem:[%s16175_s19 + $0xc8] sm:$0xff] %v9439_v0  ;;  %v9444_v62 = vmax.f32 %v9412_v6, 0.0  ;;  %v9410_v26 = vadd.f32 %v16152_v47, %v9371_v59  ;;  %v9374_v30 = vmul.f32 %v16143_v7, %v9333_v28  ;;  %v9325_v57 = vadd.f32 %v9324_v23, %v9164_v50 }
 0x529   : > { %9476 = vst [vmem:[%s16175_s19 + $0xf0] sm:$0xff] %v9444_v62  ;;  %v9442_v46 = vmax.f32 %v9410_v26, 0.0  ;;  %v9413_v12 = vadd.f32 %v16152_v47, %v9374_v30  ;;  %v9372_v2 = vmul.f32 %v16143_v7, %v9325_v57 }
 0x52b   : > { %9474 = vst [vmem:[%s16175_s19 + $0xe0] sm:$0xff] %v9442_v46  ;;  %v9445_v55 = vmax.f32 %v9413_v12, 0.0  ;;  %v9411_v3 = vadd.f32 %v16152_v47, %v9372_v2 }
 0x52d   : > { %9477 = vst [vmem:[%s16175_s19 + $0xf8] sm:$0xff] %v9445_v55  ;;  %v9443_v61 = vmax.f32 %v9411_v3, 0.0 }
 0x52f   : > { %9475 = vst [vmem:[%s16175_s19 + $0xe8] sm:$0xff] %v9443_v61 }
 0x530   : > { %11721 = shalt.err (!%p11718_p3)
}
 0x531   : > { %s11722_s16 = scalar_lea.hbm %s16361_s10, 4096  ;;  %s11726_s15 = scalar_lea.hbm %s16415_s7, 8192 }
 0x532   : > { %p11723_p11 = scmp.ne.s32.totalorder %s16361_s10, %s11722_s16  ;;  %p11727_p4 = scmp.lt.s32.totalorder %s16361_s10, %s16415_s7 }
 0x533   : > { %p11728_p6 = scmp.lt.s32.totalorder %s11726_s15, %s11722_s16 }
 0x534   : > { %p11724_p9 = pnand %p11723_p11, %p16863_p2 }
 0x535   : > { %p11729_p8 = por %p11728_p6, %p11727_p4 }
 0x536   : > { %p11725_p1 = pneg %p11724_p9 }
 0x538   : > { %p11730_p5 = pnand %p11729_p8, %p11725_p1 }
 0x53a   : > { %11733 = shalt.err (!%p11730_p5)
}
 0x53b   : > { %s11785_s20 = smov 128   ;;  %s11786_s22 = smov 8  }
 0x53c   : > { %11250 = dma.vmem_to_hbm [thread:$0]  (%p16863_p2), %s16363_s9, 4096, %s16361_s10, %s9479_s29, %s11785_s20, %s11785_s20, %s11786_s22  }
 0x53d PF: > { %s9507_s28 = sand.u32 1, %s11764_s24   ;;  %p16864_p7 = scmp.ne.s32.totalorder %s16473_s8, 0 }
 0x53e   : > { %p16865_p12 = scmp.ge.s32.totalorder %s11776_s27, 2  ;;  %s9508_s21 = scalar_lea.sflag [#allocation6], %s9507_s28 }
 0x540   : > { %p11264_p13 = pnand %p16865_p12, %p16864_p7 }
 0x542   : > { %p11265_p0 = pneg %p11264_p13 }
 0x544   : > { %11759 = dma.done.wait (%p11265_p0), %s9508_s21, 4096  }
 0x545   : > { %11761 = vsyncadd (%p11265_p0), %s9508_s21, 4294963200  ;;  %p21_p10 = scmp.ge.s32.totalorder %s11905_s23, 4   ;;  %s16866_s24 = smov %s11768_s25 }
 0x546   : > { %s16867_s25 = smov %s11772_s26  ;;  %s16868_s26 = smov %s11921_s12 }
 0x547   : > { %s16869_s27 = smov %s11905_s23  ;;  %23 = sbr.rel (!%p21_p10) target bundleno = 8 (0x8), region = 107 }
 0x54c   :  { %9513 = vsyncpa [#allocation5], 1 }
 0x54d   :  { %9515 = vsyncpa [#allocation5 + $0x1], 1 }
 0x54e   :  { %9516 = vsyncpa [#allocation8], 1 }
 0x54f   :  { %9517 = vsyncpa [#allocation6], 1 }
 0x550   :  { %9519 = vsyncpa [#allocation6 + $0x1], 1 }

</bundles_post_ra>
